<compile_context>
chip_gen: v5e
topology: v5e:2x2
jax: 0.10.0
libtpu: 0.0.40
codegen_flags: <defaults>
</compile_context>

<pallas_src>
import numpy as np
import jax
import jax.numpy as jnp
from jax import lax
from jax.experimental import pallas as pl
from jax.experimental.pallas import tpu as pltpu

BATCH_TILE = 8                      # batch rows per grid step (tunable, multiple of 8)
VMEM_LIMIT = 64 * 1024 * 1024       # explicit scoped-VMEM cap (defaults: 16/32 MiB)


# --------------------- Kernel A: fused bidirectional LSTM layer ---------------------

def _bilstm_layer_kernel(x_ref, wih_t_ref, bcat_ref, whh_cat_ref,
                         h0f_ref, c0f_ref, h0b_ref, c0b_ref,
                         out_ref, xp_scr, hcat, cf, cb):
    # x_ref:       (T, BT, E)   time-major input tile (BT = batch tile)
    # wih_t_ref:   (E, 8H) bf16 [W_ih_fwd^T | W_ih_bwd^T]
    # bcat_ref:    (1, 8H) f32  [b_ih_f + b_hh_f | b_ih_b + b_hh_b]
    # whh_cat_ref: (H, 8H) bf16 [W_hh_fwd^T | W_hh_bwd^T]   (fused-direction weight)
    # h0*/c0*:     (BT, H)
    # out_ref:     (T, BT, 2H)  combined hidden output: [:, :, :H]=fwd, [:, :, H:]=bwd
    T, BT, E = x_ref.shape
    H = whh_cat_ref.shape[0]
    G = 4 * H
    unroll = True if T <= 64 else 4

    # Input-gate precompute for all timesteps and both directions in one MXU call (bf16).
    x2d = x_ref[...].reshape(T * BT, E).astype(jnp.bfloat16)
    xp = jnp.dot(x2d, wih_t_ref[...], preferred_element_type=jnp.float32) + bcat_ref[...]
    xp_scr[...] = xp.reshape(T, BT, 2 * G)

    # Stacked hidden state: rows [0:BT] = fwd chain, rows [BT:2BT] = bwd chain.
    hcat[0:BT] = h0f_ref[...]
    hcat[BT:2 * BT] = h0b_ref[...]
    cf[...] = c0f_ref[...]
    cb[...] = c0b_ref[...]

    def gates_to_hc(g, c_prev):
        # PyTorch LSTM gate order: i, f, g, o  (elementwise math kept in f32)
        i_g = jax.nn.sigmoid(g[:, 0:H])
        f_g = jax.nn.sigmoid(g[:, H:2 * H])
        g_g = jnp.tanh(g[:, 2 * H:3 * H])
        o_g = jax.nn.sigmoid(g[:, 3 * H:4 * H])
        c = f_g * c_prev + i_g * g_g
        h = o_g * jnp.tanh(c)
        return h, c

    def body(t, carry):
        tb = T - 1 - t                          # backward chain walks time in reverse
        # ONE fused MXU call for both directions: (2BT, H) @ (H, 8H).
        rec = jnp.dot(hcat[...].astype(jnp.bfloat16), whh_cat_ref[...],
                      preferred_element_type=jnp.float32)
        gf = xp_scr[t, :, 0:G] + rec[0:BT, 0:G]               # fwd gates (BT, 4H)
        gb = xp_scr[tb, :, G:2 * G] + rec[BT:2 * BT, G:2 * G]  # bwd gates (BT, 4H)
        h_f, c_f = gates_to_hc(gf, cf[...])
        h_b, c_b = gates_to_hc(gb, cb[...])
        hcat[0:BT] = h_f
        hcat[BT:2 * BT] = h_b
        cf[...] = c_f
        cb[...] = c_b
        out_ref[t, :, 0:H] = h_f                # combined output, original time order
        out_ref[tb, :, H:2 * H] = h_b
        return carry

    lax.fori_loop(0, T, body, 0, unroll=unroll)


def _bilstm_layer(x_tm, lp, h0f, c0f, h0b, c0b):
    T, BP, E = x_tm.shape
    H = lp['whh_cat'].shape[0]
    bt = BATCH_TILE
    assert BP % bt == 0
    nb = BP // bt

    flops = (2 * T * BP * E * 8 * H            # input-gate precompute (both dirs)
             + 2 * T * 2 * BP * H * 8 * H      # fused recurrent matmul
             + 32 * T * BP * H)                # gate elementwise math
    transcendentals = 10 * T * BP * H
    bytes_accessed = (4 * T * BP * (E + 2 * H) + 2 * (E + H) * 8 * H
                      + 4 * 8 * H + 4 * 4 * BP * H)

    return pl.pallas_call(
        _bilstm_layer_kernel,
        out_shape=jax.ShapeDtypeStruct((T, BP, 2 * H), jnp.float32),
        grid_spec=pltpu.PrefetchScalarGridSpec(
            num_scalar_prefetch=0,
            grid=(nb,),
            in_specs=[
                pl.BlockSpec((T, bt, E), lambda b: (0, b, 0)),
                pl.BlockSpec((E, 8 * H), lambda b: (0, 0)),
                pl.BlockSpec((1, 8 * H), lambda b: (0, 0)),
                pl.BlockSpec((H, 8 * H), lambda b: (0, 0)),
                pl.BlockSpec((bt, H), lambda b: (b, 0)),
                pl.BlockSpec((bt, H), lambda b: (b, 0)),
                pl.BlockSpec((bt, H), lambda b: (b, 0)),
                pl.BlockSpec((bt, H), lambda b: (b, 0)),
            ],
            out_specs=pl.BlockSpec((T, bt, 2 * H), lambda b: (0, b, 0)),
            scratch_shapes=[
                pltpu.VMEM((T, bt, 8 * H), jnp.float32),   # xp (both directions)
                pltpu.VMEM((2 * bt, H), jnp.float32),      # stacked h [fwd; bwd]
                pltpu.VMEM((bt, H), jnp.float32),          # c fwd
                pltpu.VMEM((bt, H), jnp.float32),          # c bwd
            ]),
        compiler_params=pltpu.CompilerParams(
            dimension_semantics=("parallel",),
            vmem_limit_bytes=VMEM_LIMIT),
        cost_estimate=pl.CostEstimate(flops=flops, transcendentals=transcendentals,
                                      bytes_accessed=bytes_accessed),
    )(x_tm, lp['wih_t'], lp['bcat'], lp['whh_cat'], h0f, c0f, h0b, c0b)


# --------- Kernel B: hidden2tag + CRF Viterbi forward + on-device backtracking ---------

def _crf_decode_kernel(h_ref, wtag_t_ref, btag_ref, trans_t_ref,
                       start_ref, end_ref, seqend_ref, tags_ref,
                       emis_scr, score_scr, hist_scr, ptr_scr, path_scr):
    # h_ref: (T, BT, 2H); wtag_t: (2H, K) bf16; btag/start/end: (1, K)
    # trans_t_ref: (K, K) = transitions^T; seqend_ref: (BT, 1) int32 (= length - 1)
    # tags_ref: (1, BT, T) int32 — one bulk store per batch tile, time on the lane axis.
    # NOTE: mask is assumed left-contiguous (standard padded-sequence mask), so
    #       mask[t, b] == (t <= seq_end[b]); this replaces the dense (T, BP, 1) mask.
    T, BT, H2 = h_ref.shape
    K = trans_t_ref.shape[0]
    unroll = True if T <= 64 else 4

    # --- fused hidden2tag projection (single combined matmul) ---
    h2d = h_ref[...].reshape(T * BT, H2).astype(jnp.bfloat16)
    emis = (jnp.dot(h2d, wtag_t_ref[...], preferred_element_type=jnp.float32)
            + btag_ref[...])
    emis_scr[...] = emis.reshape(T, BT, K)

    # --- hoisted loop invariants (broadcast_in_dim is not CSE'd by JAX) ---
    trans_b = trans_t_ref[...][None, :, :]                       # (1, Kcur, Kprev)
    iota_prev = lax.broadcasted_iota(jnp.int32, (BT, K, K), 2)
    lane_iota = lax.broadcasted_iota(jnp.int32, (BT, K), 1)
    t_lanes = lax.broadcasted_iota(jnp.int32, (BT, T), 1)
    seq_end = seqend_ref[...]                                    # (BT, 1)

    # --- Viterbi forward recursion (torchcrf semantics) ---
    score_scr[...] = start_ref[...] + emis_scr[0]

    def fwd(t, carry):
        prev = score_scr[...]                                    # (BT, Kprev)
        ns = prev[:, None, :] + trans_b + emis_scr[t][:, :, None]  # (BT, Kcur, Kprev)
        best = jnp.max(ns, axis=-1)                              # (BT, Kcur)
        # first-argmax over prev (matches torch tie-breaking)
        bp = jnp.min(jnp.where(ns == best[:, :, None], iota_prev, K),
                     axis=-1).astype(jnp.int32)
        active = t <= seq_end                                    # (BT, 1) bool
        score_scr[...] = jnp.where(active, best, prev)           # freeze past seq end
        hist_scr[t] = bp                                         # never read for t>seq_end
        return carry

    lax.fori_loop(1, T, fwd, 0, unroll=unroll)

    # --- on-device vectorized backtracking; path accumulated lane-dense in VMEM ---
    final = score_scr[...] + end_ref[...]                        # (BT, K)
    fbest = jnp.max(final, axis=-1, keepdims=True)
    ptr_scr[...] = jnp.min(jnp.where(final == fbest, lane_iota, K),
                           axis=-1, keepdims=True).astype(jnp.int32)
    path_scr[...] = jnp.zeros_like(path_scr)

    def bwd(j, carry):
        t = T - 1 - j
        tt = jnp.minimum(t + 1, T - 1)                           # safe clamp
        ptr = ptr_scr[...]                                       # tag at time t+1 (or seq_end)
        hrow = hist_scr[tt]                                      # (BT, K)
        onehot = lane_iota == ptr
        stepped = jnp.sum(jnp.where(onehot, hrow, 0), axis=-1, keepdims=True)
        active = t < seq_end                                     # rows still back-stepping
        new_ptr = jnp.where(active, stepped, ptr).astype(jnp.int32)
        ptr_scr[...] = new_ptr
        # select-write column t of the (BT, T) path (no masked stores, no relayout)
        path_scr[...] = jnp.where(t_lanes == t, new_ptr, path_scr[...])
        return carry

    lax.fori_loop(0, T, bwd, 0, unroll=unroll)

    tags_ref[0] = path_scr[...]                                  # one bulk store per tile


def _crf_decode(hidden, dp, seq_end):
    T, BP, H2 = hidden.shape
    K = dp['trans_t'].shape[0]
    bt = BATCH_TILE
    assert BP % bt == 0
    nb = BP // bt

    flops = 2 * T * BP * H2 * K + 8 * T * BP * K * K
    bytes_accessed = 4 * T * BP * H2 + 2 * H2 * K + 4 * (K * K + 3 * K + BP) + 4 * BP * T

    return pl.pallas_call(
        _crf_decode_kernel,
        out_shape=jax.ShapeDtypeStruct((nb, bt, T), jnp.int32),
        grid_spec=pltpu.PrefetchScalarGridSpec(
            num_scalar_prefetch=0,
            grid=(nb,),
            in_specs=[
                pl.BlockSpec((T, bt, H2), lambda b: (0, b, 0)),
                pl.BlockSpec((H2, K), lambda b: (0, 0)),
                pl.BlockSpec((1, K), lambda b: (0, 0)),
                pl.BlockSpec((K, K), lambda b: (0, 0)),
                pl.BlockSpec((1, K), lambda b: (0, 0)),
                pl.BlockSpec((1, K), lambda b: (0, 0)),
                pl.BlockSpec((bt, 1), lambda b: (b, 0)),
            ],
            out_specs=pl.BlockSpec((1, bt, T), lambda b: (b, 0, 0)),
            scratch_shapes=[
                pltpu.VMEM((T, bt, K), jnp.float32),      # emissions
                pltpu.VMEM((bt, K), jnp.float32),          # running score
                pltpu.VMEM((T, bt, K), jnp.int32),         # back-pointers
                pltpu.VMEM((bt, 1), jnp.int32),            # current pointer
                pltpu.VMEM((bt, T), jnp.int32),            # decoded path (time on lanes)
            ]),
        compiler_params=pltpu.CompilerParams(
            dimension_semantics=("parallel",),
            vmem_limit_bytes=VMEM_LIMIT),
        cost_estimate=pl.CostEstimate(flops=flops, transcendentals=0,
                                      bytes_accessed=bytes_accessed),
    )(hidden, dp['wtag_t'], dp['btag'], dp['trans_t'], dp['start'], dp['end'], seq_end)


# ------------------------------ jitted device forward ------------------------------

@jax.jit
def _forward_device(ids, mask_bool, h0, c0, dp):
    B, T = ids.shape
    BP = ((B + 7) // 8) * 8                   # sublane-pad batch to a multiple of 8
    pad = BP - B
    ids_p = jnp.pad(ids, ((0, pad), (0, 0)))
    mask_p = jnp.pad(mask_bool, ((0, pad), (0, 0)))
    h0_p = jnp.pad(h0, ((0, 0), (0, pad), (0, 0)))
    c0_p = jnp.pad(c0, ((0, 0), (0, pad), (0, 0)))

    # embedding gather + time-major transpose stay as fused XLA ops inside this jit
    x_tm = dp['embedding'][ids_p].astype(jnp.float32).transpose(1, 0, 2)   # (T, BP, E)

    hidden = None
    for li, lp in enumerate(dp['layers']):
        x_in = x_tm if li == 0 else hidden
        hidden = _bilstm_layer(x_in, lp,
                               h0_p[2 * li], c0_p[2 * li],
                               h0_p[2 * li + 1], c0_p[2 * li + 1])         # (T, BP, 2H)

    # seq_end = length - 1 (assumes standard left-contiguous mask)
    seq_end = jnp.maximum(jnp.sum(mask_p.astype(jnp.int32), axis=1) - 1,
                          0)[:, None].astype(jnp.int32)                     # (BP, 1)
    tags_tiles = _crf_decode(hidden, dp, seq_end)                           # (nb, bt, T)
    tags_bt = tags_tiles.reshape(BP, T)                                     # (BP, T)
    return tags_bt[:B]                                                      # (B, T) int32


def prepare_device_params(emb, lstm_layers, w_tag, b_tag, trans, start_trans, end_trans):
    """Pre-transpose / pre-cast all weights once (outside the per-call path).
    Matmul weights are stored bf16 (f32 accumulation at the dot sites)."""
    layers = []
    for lp in lstm_layers:
        w_ihf, w_hhf, b_ihf, b_hhf = lp['fwd']
        w_ihb, w_hhb, b_ihb, b_hhb = lp['bwd']
        layers.append(dict(
            wih_t=jnp.concatenate([w_ihf.T, w_ihb.T], axis=1).astype(jnp.bfloat16),
            bcat=jnp.concatenate([b_ihf + b_hhf, b_ihb + b_hhb])[None, :].astype(jnp.float32),
            whh_cat=jnp.concatenate([w_hhf.T, w_hhb.T], axis=1).astype(jnp.bfloat16)))
    return dict(
        embedding=emb.astype(jnp.float32),
        layers=tuple(layers),
        wtag_t=w_tag.T.astype(jnp.bfloat16),          # (2H, K), fwd rows first then bwd
        btag=b_tag[None, :].astype(jnp.float32),
        trans_t=trans.T.astype(jnp.float32),
        start=start_trans[None, :].astype(jnp.float32),
        end=end_trans[None, :].astype(jnp.float32))


def bilstm_crf_forward(ids, mask_bool, dparams, h0, c0):
    """Returns torchcrf-style Python lists of tags, one list per sequence."""
    tags_bt = _forward_device(ids, mask_bool, h0, c0, dparams)
    tags_bt = jax.block_until_ready(tags_bt)          # single small (B, T) D2H transfer
    tags_np = np.asarray(tags_bt)
    lengths = np.asarray(mask_bool).sum(axis=1)
    return [tags_np[b, :int(lengths[b])].tolist() for b in range(tags_np.shape[0])]


# ----------------------------------------- Main -----------------------------------------

if __name__ == "__main__":
    # configs: vocab_len=20, embedding_dim=16, hidden_size=32, num_layers=1,
    #          bidirectional=True, tagset_size=5, PAD idx = 0
    B, T = 2, 8
    V, E, H, K = 20, 16, 32, 5
    NUM_LAYERS = 1
    PAD_IDX = 0

    key = jax.random.PRNGKey(0)
    ks = jax.random.split(key, 24)
    s = 0.1
    kidx = 0

    emb = jax.random.normal(ks[kidx], (V, E), jnp.float32) * s; kidx += 1
    emb = emb.at[PAD_IDX].set(0.0)                     # padding_idx row zeroed

    lstm_layers = []
    in_size = E
    for layer in range(NUM_LAYERS):
        layer_p = {}
        for d in ('fwd', 'bwd'):
            w_ih = jax.random.normal(ks[kidx], (4 * H, in_size), jnp.float32) * s; kidx += 1
            w_hh = jax.random.normal(ks[kidx], (4 * H, H), jnp.float32) * s; kidx += 1
            b_ih = jax.random.normal(ks[kidx], (4 * H,), jnp.float32) * s; kidx += 1
            b_hh = jax.random.normal(ks[kidx], (4 * H,), jnp.float32) * s; kidx += 1
            layer_p[d] = (w_ih, w_hh, b_ih, b_hh)
        lstm_layers.append(layer_p)
        in_size = 2 * H

    w_tag = jax.random.normal(ks[kidx], (K, 2 * H), jnp.float32) * s; kidx += 1
    b_tag = jax.random.normal(ks[kidx], (K,), jnp.float32) * s; kidx += 1
    start_trans = jax.random.normal(ks[kidx], (K,), jnp.float32) * s; kidx += 1
    end_trans = jax.random.normal(ks[kidx], (K,), jnp.float32) * s; kidx += 1
    trans = jax.random.normal(ks[kidx], (K, K), jnp.float32) * s; kidx += 1

    dparams = prepare_device_params(emb, lstm_layers, w_tag, b_tag,
                                    trans, start_trans, end_trans)

    # example inputs: two sequences of lengths 8 and 5 (mask[:, 0] must be all True)
    lengths = jnp.array([T, 5])
    mask_bool = jnp.arange(T)[None, :] < lengths[:, None]          # (B, T) bool
    ids = jax.random.randint(ks[kidx], (B, T), 1, V); kidx += 1
    ids = jnp.where(mask_bool, ids, PAD_IDX).astype(jnp.int32)

    # torch's _init_hidden uses torch.randn each forward; deterministic equivalent here
    h0 = jax.random.normal(ks[kidx], (NUM_LAYERS * 2, B, H), jnp.float32); kidx += 1
    c0 = jax.random.normal(ks[kidx], (NUM_LAYERS * 2, B, H), jnp.float32); kidx += 1

    best_tags = bilstm_crf_forward(ids, mask_bool, dparams, h0, c0)
    assert len(best_tags) == B
    assert [len(t) for t in best_tags] == [int(l) for l in np.asarray(lengths)]
    assert all(0 <= tag < K for seq in best_tags for tag in seq)
    print("KERNEL_OK")
</pallas_src>

<mosaic_0001>
module attributes {stable_mosaic.version = 11 : i64} {
  func.func @_bilstm_layer_kernel(%arg0: i32, %arg1: memref<8x8x16xf32, #tpu.memory_space<vmem>>, %arg2: memref<16x256xbf16, #tpu.memory_space<vmem>>, %arg3: memref<1x256xf32, #tpu.memory_space<vmem>>, %arg4: memref<32x256xbf16, #tpu.memory_space<vmem>>, %arg5: memref<8x32xf32, #tpu.memory_space<vmem>>, %arg6: memref<8x32xf32, #tpu.memory_space<vmem>>, %arg7: memref<8x32xf32, #tpu.memory_space<vmem>>, %arg8: memref<8x32xf32, #tpu.memory_space<vmem>>, %arg9: memref<8x8x64xf32, #tpu.memory_space<vmem>>, %arg10: memref<8x8x256xf32, #tpu.memory_space<vmem>>, %arg11: memref<16x32xf32, #tpu.memory_space<vmem>>, %arg12: memref<8x32xf32, #tpu.memory_space<vmem>>, %arg13: memref<8x32xf32, #tpu.memory_space<vmem>>) attributes {dimension_semantics = [#tpu.dimension_semantics<parallel>], iteration_bounds = array<i64: 1>, scalar_prefetch = 0 : i64, scratch_operands = 4 : i64, tpu.core_type = #tpu.core_type<tc>, window_params = [{transform_indices = @transform_0, window_bounds = array<i64: 8, 8, 16>}, {pipeline_mode = #tpu.pipeline_mode<synchronous>, transform_indices = @transform_1, window_bounds = array<i64: 16, 256>}, {pipeline_mode = #tpu.pipeline_mode<synchronous>, transform_indices = @transform_2, window_bounds = array<i64: 1, 256>}, {pipeline_mode = #tpu.pipeline_mode<synchronous>, transform_indices = @transform_3, window_bounds = array<i64: 32, 256>}, {transform_indices = @transform_4, window_bounds = array<i64: 8, 32>}, {transform_indices = @transform_5, window_bounds = array<i64: 8, 32>}, {transform_indices = @transform_6, window_bounds = array<i64: 8, 32>}, {transform_indices = @transform_7, window_bounds = array<i64: 8, 32>}, {transform_indices = @transform_8, window_bounds = array<i64: 8, 8, 64>}]} {
    %c0 = arith.constant 0 : index
    %c0_0 = arith.constant 0 : index
    %c0_1 = arith.constant 0 : index
    %0 = vector.load %arg1[%c0, %c0_0, %c0_1] : memref<8x8x16xf32, #tpu.memory_space<vmem>>, vector<8x8x16xf32>
    %1 = vector.shape_cast %0 : vector<8x8x16xf32> to vector<64x16xf32>
    %2 = arith.truncf %1 : vector<64x16xf32> to vector<64x16xbf16>
    %c0_2 = arith.constant 0 : index
    %c0_3 = arith.constant 0 : index
    %3 = vector.load %arg2[%c0_2, %c0_3] : memref<16x256xbf16, #tpu.memory_space<vmem>>, vector<16x256xbf16>
    %cst = arith.constant dense<0.000000e+00> : vector<64x256xf32>
    %4 = tpu.matmul %2, %3, %cst {dimension_numbers = #tpu.dot_dimension_numbers<[1], [0], [0], [1], [0, 0, 1, 1], [], []>} : vector<64x16xbf16>, vector<16x256xbf16>, vector<64x256xf32> -> vector<64x256xf32>
    %c0_4 = arith.constant 0 : index
    %c0_5 = arith.constant 0 : index
    %5 = vector.load %arg3[%c0_4, %c0_5] : memref<1x256xf32, #tpu.memory_space<vmem>>, vector<1x256xf32>
    %6 = vector.broadcast %5 : vector<1x256xf32> to vector<64x256xf32>
    %7 = arith.addf %4, %6 : vector<64x256xf32>
    %8 = vector.shape_cast %7 : vector<64x256xf32> to vector<8x8x256xf32>
    %c0_6 = arith.constant 0 : index
    %c0_7 = arith.constant 0 : index
    %c0_8 = arith.constant 0 : index
    %9 = vector.load %arg10[%c0_6, %c0_7, %c0_8] : memref<8x8x256xf32, #tpu.memory_space<vmem>>, vector<8x8x256xf32>
    tpu.vector_store %arg10[%c0_6, %c0_7, %c0_8], %8 {strides = array<i32>} : memref<8x8x256xf32, #tpu.memory_space<vmem>>, vector<8x8x256xf32>,
    %c0_9 = arith.constant 0 : index
    %c0_10 = arith.constant 0 : index
    %10 = vector.load %arg5[%c0_9, %c0_10] : memref<8x32xf32, #tpu.memory_space<vmem>>, vector<8x32xf32>
    %c0_11 = arith.constant 0 : index
    %c0_12 = arith.constant 0 : index
    %11 = vector.load %arg11[%c0_11, %c0_12] : memref<16x32xf32, #tpu.memory_space<vmem>>, vector<8x32xf32>
    tpu.vector_store %arg11[%c0_11, %c0_12], %10 {strides = array<i32>} : memref<16x32xf32, #tpu.memory_space<vmem>>, vector<8x32xf32>,
    %c0_13 = arith.constant 0 : index
    %c0_14 = arith.constant 0 : index
    %12 = vector.load %arg7[%c0_13, %c0_14] : memref<8x32xf32, #tpu.memory_space<vmem>>, vector<8x32xf32>
    %c8 = arith.constant 8 : index
    %c0_15 = arith.constant 0 : index
    %13 = vector.load %arg11[%c8, %c0_15] : memref<16x32xf32, #tpu.memory_space<vmem>>, vector<8x32xf32>
    tpu.vector_store %arg11[%c8, %c0_15], %12 {strides = array<i32>} : memref<16x32xf32, #tpu.memory_space<vmem>>, vector<8x32xf32>,
    %c0_16 = arith.constant 0 : index
    %c0_17 = arith.constant 0 : index
    %14 = vector.load %arg6[%c0_16, %c0_17] : memref<8x32xf32, #tpu.memory_space<vmem>>, vector<8x32xf32>
    %c0_18 = arith.constant 0 : index
    %c0_19 = arith.constant 0 : index
    %15 = vector.load %arg12[%c0_18, %c0_19] : memref<8x32xf32, #tpu.memory_space<vmem>>, vector<8x32xf32>
    tpu.vector_store %arg12[%c0_18, %c0_19], %14 {strides = array<i32>} : memref<8x32xf32, #tpu.memory_space<vmem>>, vector<8x32xf32>,
    %c0_20 = arith.constant 0 : index
    %c0_21 = arith.constant 0 : index
    %16 = vector.load %arg8[%c0_20, %c0_21] : memref<8x32xf32, #tpu.memory_space<vmem>>, vector<8x32xf32>
    %c0_22 = arith.constant 0 : index
    %c0_23 = arith.constant 0 : index
    %17 = vector.load %arg13[%c0_22, %c0_23] : memref<8x32xf32, #tpu.memory_space<vmem>>, vector<8x32xf32>
    tpu.vector_store %arg13[%c0_22, %c0_23], %16 {strides = array<i32>} : memref<8x32xf32, #tpu.memory_space<vmem>>, vector<8x32xf32>,
    %c0_i32 = arith.constant 0 : i32
    %c7_i32 = arith.constant 7 : i32
    %18 = arith.subi %c7_i32, %c0_i32 : i32
    %c0_24 = arith.constant 0 : index
    %c0_25 = arith.constant 0 : index
    %19 = vector.load %arg11[%c0_24, %c0_25] : memref<16x32xf32, #tpu.memory_space<vmem>>, vector<16x32xf32>
    %20 = arith.truncf %19 : vector<16x32xf32> to vector<16x32xbf16>
    %c0_26 = arith.constant 0 : index
    %c0_27 = arith.constant 0 : index
    %21 = vector.load %arg4[%c0_26, %c0_27] : memref<32x256xbf16, #tpu.memory_space<vmem>>, vector<32x256xbf16>
    %cst_28 = arith.constant dense<0.000000e+00> : vector<16x256xf32>
    %22 = tpu.matmul %20, %21, %cst_28 {dimension_numbers = #tpu.dot_dimension_numbers<[1], [0], [0], [1], [0, 0, 1, 1], [], []>} : vector<16x32xbf16>, vector<32x256xbf16>, vector<16x256xf32> -> vector<16x256xf32>
    %23 = arith.index_cast %c0_i32 : i32 to index
    %c0_29 = arith.constant 0 : index
    %c0_30 = arith.constant 0 : index
    %24 = vector.load %arg10[%23, %c0_29, %c0_30] : memref<8x8x256xf32, #tpu.memory_space<vmem>>, vector<1x8x128xf32>
    %25 = vector.shape_cast %24 : vector<1x8x128xf32> to vector<8x128xf32>
    %26 = vector.extract_strided_slice %22 {offsets = [0, 0], sizes = [8, 128], strides = [1, 1]} : vector<16x256xf32> to vector<8x128xf32>
    %27 = arith.addf %25, %26 : vector<8x128xf32>
    %28 = arith.index_cast %18 : i32 to index
    %c0_31 = arith.constant 0 : index
    %c128 = arith.constant 128 : index
    %29 = vector.load %arg10[%28, %c0_31, %c128] : memref<8x8x256xf32, #tpu.memory_space<vmem>>, vector<1x8x128xf32>
    %30 = vector.shape_cast %29 : vector<1x8x128xf32> to vector<8x128xf32>
    %31 = vector.extract_strided_slice %22 {offsets = [8, 128], sizes = [8, 128], strides = [1, 1]} : vector<16x256xf32> to vector<8x128xf32>
    %32 = arith.addf %30, %31 : vector<8x128xf32>
    %c0_32 = arith.constant 0 : index
    %c0_33 = arith.constant 0 : index
    %33 = vector.load %arg12[%c0_32, %c0_33] : memref<8x32xf32, #tpu.memory_space<vmem>>, vector<8x32xf32>
    %34 = vector.extract_strided_slice %27 {offsets = [0, 0], sizes = [8, 32], strides = [1, 1]} : vector<8x128xf32> to vector<8x32xf32>
    %35 = arith.negf %34 : vector<8x32xf32>
    %36 = math.exp %35 : vector<8x32xf32>
    %cst_34 = arith.constant 1.000000e+00 : f32
    %37 = vector.broadcast %cst_34 : f32 to vector<8x32xf32>
    %38 = arith.addf %37, %36 : vector<8x32xf32>
    %39 = arith.divf %37, %38 : vector<8x32xf32>
    %40 = vector.extract_strided_slice %27 {offsets = [0, 32], sizes = [8, 32], strides = [1, 1]} : vector<8x128xf32> to vector<8x32xf32>
    %41 = arith.negf %40 : vector<8x32xf32>
    %42 = math.exp %41 : vector<8x32xf32>
    %cst_35 = arith.constant 1.000000e+00 : f32
    %43 = vector.broadcast %cst_35 : f32 to vector<8x32xf32>
    %44 = arith.addf %43, %42 : vector<8x32xf32>
    %45 = arith.divf %43, %44 : vector<8x32xf32>
    %46 = vector.extract_strided_slice %27 {offsets = [0, 64], sizes = [8, 32], strides = [1, 1]} : vector<8x128xf32> to vector<8x32xf32>
    %47 = math.tanh %46 : vector<8x32xf32>
    %48 = vector.extract_strided_slice %27 {offsets = [0, 96], sizes = [8, 32], strides = [1, 1]} : vector<8x128xf32> to vector<8x32xf32>
    %49 = arith.negf %48 : vector<8x32xf32>
    %50 = math.exp %49 : vector<8x32xf32>
    %cst_36 = arith.constant 1.000000e+00 : f32
    %51 = vector.broadcast %cst_36 : f32 to vector<8x32xf32>
    %52 = arith.addf %51, %50 : vector<8x32xf32>
    %53 = arith.divf %51, %52 : vector<8x32xf32>
    %54 = arith.mulf %45, %33 : vector<8x32xf32>
    %55 = arith.mulf %39, %47 : vector<8x32xf32>
    %56 = arith.addf %54, %55 : vector<8x32xf32>
    %57 = math.tanh %56 : vector<8x32xf32>
    %58 = arith.mulf %53, %57 : vector<8x32xf32>
    %c0_37 = arith.constant 0 : index
    %c0_38 = arith.constant 0 : index
    %59 = vector.load %arg13[%c0_37, %c0_38] : memref<8x32xf32, #tpu.memory_space<vmem>>, vector<8x32xf32>
    %60 = vector.extract_strided_slice %32 {offsets = [0, 0], sizes = [8, 32], strides = [1, 1]} : vector<8x128xf32> to vector<8x32xf32>
    %61 = arith.negf %60 : vector<8x32xf32>
    %62 = math.exp %61 : vector<8x32xf32>
    %cst_39 = arith.constant 1.000000e+00 : f32
    %63 = vector.broadcast %cst_39 : f32 to vector<8x32xf32>
    %64 = arith.addf %63, %62 : vector<8x32xf32>
    %65 = arith.divf %63, %64 : vector<8x32xf32>
    %66 = vector.extract_strided_slice %32 {offsets = [0, 32], sizes = [8, 32], strides = [1, 1]} : vector<8x128xf32> to vector<8x32xf32>
    %67 = arith.negf %66 : vector<8x32xf32>
    %68 = math.exp %67 : vector<8x32xf32>
    %cst_40 = arith.constant 1.000000e+00 : f32
    %69 = vector.broadcast %cst_40 : f32 to vector<8x32xf32>
    %70 = arith.addf %69, %68 : vector<8x32xf32>
    %71 = arith.divf %69, %70 : vector<8x32xf32>
    %72 = vector.extract_strided_slice %32 {offsets = [0, 64], sizes = [8, 32], strides = [1, 1]} : vector<8x128xf32> to vector<8x32xf32>
    %73 = math.tanh %72 : vector<8x32xf32>
    %74 = vector.extract_strided_slice %32 {offsets = [0, 96], sizes = [8, 32], strides = [1, 1]} : vector<8x128xf32> to vector<8x32xf32>
    %75 = arith.negf %74 : vector<8x32xf32>
    %76 = math.exp %75 : vector<8x32xf32>
    %cst_41 = arith.constant 1.000000e+00 : f32
    %77 = vector.broadcast %cst_41 : f32 to vector<8x32xf32>
    %78 = arith.addf %77, %76 : vector<8x32xf32>
    %79 = arith.divf %77, %78 : vector<8x32xf32>
    %80 = arith.mulf %71, %59 : vector<8x32xf32>
    %81 = arith.mulf %65, %73 : vector<8x32xf32>
    %82 = arith.addf %80, %81 : vector<8x32xf32>
    %83 = math.tanh %82 : vector<8x32xf32>
    %84 = arith.mulf %79, %83 : vector<8x32xf32>
    %c0_42 = arith.constant 0 : index
    %c0_43 = arith.constant 0 : index
    %85 = vector.load %arg11[%c0_42, %c0_43] : memref<16x32xf32, #tpu.memory_space<vmem>>, vector<8x32xf32>
    tpu.vector_store %arg11[%c0_42, %c0_43], %58 {strides = array<i32>} : memref<16x32xf32, #tpu.memory_space<vmem>>, vector<8x32xf32>,
    %c8_44 = arith.constant 8 : index
    %c0_45 = arith.constant 0 : index
    %86 = vector.load %arg11[%c8_44, %c0_45] : memref<16x32xf32, #tpu.memory_space<vmem>>, vector<8x32xf32>
    tpu.vector_store %arg11[%c8_44, %c0_45], %84 {strides = array<i32>} : memref<16x32xf32, #tpu.memory_space<vmem>>, vector<8x32xf32>,
    %c0_46 = arith.constant 0 : index
    %c0_47 = arith.constant 0 : index
    %87 = vector.load %arg12[%c0_46, %c0_47] : memref<8x32xf32, #tpu.memory_space<vmem>>, vector<8x32xf32>
    tpu.vector_store %arg12[%c0_46, %c0_47], %56 {strides = array<i32>} : memref<8x32xf32, #tpu.memory_space<vmem>>, vector<8x32xf32>,
    %c0_48 = arith.constant 0 : index
    %c0_49 = arith.constant 0 : index
    %88 = vector.load %arg13[%c0_48, %c0_49] : memref<8x32xf32, #tpu.memory_space<vmem>>, vector<8x32xf32>
    tpu.vector_store %arg13[%c0_48, %c0_49], %82 {strides = array<i32>} : memref<8x32xf32, #tpu.memory_space<vmem>>, vector<8x32xf32>,
    %89 = arith.index_cast %c0_i32 : i32 to index
    %c0_50 = arith.constant 0 : index
    %c0_51 = arith.constant 0 : index
    %90 = vector.load %arg9[%89, %c0_50, %c0_51] : memref<8x8x64xf32, #tpu.memory_space<vmem>>, vector<1x8x32xf32>
    %91 = vector.shape_cast %90 : vector<1x8x32xf32> to vector<8x32xf32>
    %92 = vector.shape_cast %58 : vector<8x32xf32> to vector<1x8x32xf32>
    tpu.vector_store %arg9[%89, %c0_50, %c0_51], %92 {strides = array<i32>} : memref<8x8x64xf32, #tpu.memory_space<vmem>>, vector<1x8x32xf32>,
    %93 = arith.index_cast %18 : i32 to index
    %c0_52 = arith.constant 0 : index
    %c32 = arith.constant 32 : index
    %94 = vector.load %arg9[%93, %c0_52, %c32] : memref<8x8x64xf32, #tpu.memory_space<vmem>>, vector<1x8x32xf32>
    %95 = vector.shape_cast %94 : vector<1x8x32xf32> to vector<8x32xf32>
    %96 = vector.shape_cast %84 : vector<8x32xf32> to vector<1x8x32xf32>
    tpu.vector_store %arg9[%93, %c0_52, %c32], %96 {strides = array<i32>} : memref<8x8x64xf32, #tpu.memory_space<vmem>>, vector<1x8x32xf32>,
    %c1_i32 = arith.constant 1 : i32
    %c7_i32_53 = arith.constant 7 : i32
    %97 = arith.subi %c7_i32_53, %c1_i32 : i32
    %c0_54 = arith.constant 0 : index
    %c0_55 = arith.constant 0 : index
    %98 = vector.load %arg11[%c0_54, %c0_55] : memref<16x32xf32, #tpu.memory_space<vmem>>, vector<16x32xf32>
    %99 = arith.truncf %98 : vector<16x32xf32> to vector<16x32xbf16>
    %c0_56 = arith.constant 0 : index
    %c0_57 = arith.constant 0 : index
    %100 = vector.load %arg4[%c0_56, %c0_57] : memref<32x256xbf16, #tpu.memory_space<vmem>>, vector<32x256xbf16>
    %cst_58 = arith.constant dense<0.000000e+00> : vector<16x256xf32>
    %101 = tpu.matmul %99, %100, %cst_58 {dimension_numbers = #tpu.dot_dimension_numbers<[1], [0], [0], [1], [0, 0, 1, 1], [], []>} : vector<16x32xbf16>, vector<32x256xbf16>, vector<16x256xf32> -> vector<16x256xf32>
    %102 = arith.index_cast %c1_i32 : i32 to index
    %c0_59 = arith.constant 0 : index
    %c0_60 = arith.constant 0 : index
    %103 = vector.load %arg10[%102, %c0_59, %c0_60] : memref<8x8x256xf32, #tpu.memory_space<vmem>>, vector<1x8x128xf32>
    %104 = vector.shape_cast %103 : vector<1x8x128xf32> to vector<8x128xf32>
    %105 = vector.extract_strided_slice %101 {offsets = [0, 0], sizes = [8, 128], strides = [1, 1]} : vector<16x256xf32> to vector<8x128xf32>
    %106 = arith.addf %104, %105 : vector<8x128xf32>
    %107 = arith.index_cast %97 : i32 to index
    %c0_61 = arith.constant 0 : index
    %c128_62 = arith.constant 128 : index
    %108 = vector.load %arg10[%107, %c0_61, %c128_62] : memref<8x8x256xf32, #tpu.memory_space<vmem>>, vector<1x8x128xf32>
    %109 = vector.shape_cast %108 : vector<1x8x128xf32> to vector<8x128xf32>
    %110 = vector.extract_strided_slice %101 {offsets = [8, 128], sizes = [8, 128], strides = [1, 1]} : vector<16x256xf32> to vector<8x128xf32>
    %111 = arith.addf %109, %110 : vector<8x128xf32>
    %c0_63 = arith.constant 0 : index
    %c0_64 = arith.constant 0 : index
    %112 = vector.load %arg12[%c0_63, %c0_64] : memref<8x32xf32, #tpu.memory_space<vmem>>, vector<8x32xf32>
    %113 = vector.extract_strided_slice %106 {offsets = [0, 0], sizes = [8, 32], strides = [1, 1]} : vector<8x128xf32> to vector<8x32xf32>
    %114 = arith.negf %113 : vector<8x32xf32>
    %115 = math.exp %114 : vector<8x32xf32>
    %cst_65 = arith.constant 1.000000e+00 : f32
    %116 = vector.broadcast %cst_65 : f32 to vector<8x32xf32>
    %117 = arith.addf %116, %115 : vector<8x32xf32>
    %118 = arith.divf %116, %117 : vector<8x32xf32>
    %119 = vector.extract_strided_slice %106 {offsets = [0, 32], sizes = [8, 32], strides = [1, 1]} : vector<8x128xf32> to vector<8x32xf32>
    %120 = arith.negf %119 : vector<8x32xf32>
    %121 = math.exp %120 : vector<8x32xf32>
    %cst_66 = arith.constant 1.000000e+00 : f32
    %122 = vector.broadcast %cst_66 : f32 to vector<8x32xf32>
    %123 = arith.addf %122, %121 : vector<8x32xf32>
    %124 = arith.divf %122, %123 : vector<8x32xf32>
    %125 = vector.extract_strided_slice %106 {offsets = [0, 64], sizes = [8, 32], strides = [1, 1]} : vector<8x128xf32> to vector<8x32xf32>
    %126 = math.tanh %125 : vector<8x32xf32>
    %127 = vector.extract_strided_slice %106 {offsets = [0, 96], sizes = [8, 32], strides = [1, 1]} : vector<8x128xf32> to vector<8x32xf32>
    %128 = arith.negf %127 : vector<8x32xf32>
    %129 = math.exp %128 : vector<8x32xf32>
    %cst_67 = arith.constant 1.000000e+00 : f32
    %130 = vector.broadcast %cst_67 : f32 to vector<8x32xf32>
    %131 = arith.addf %130, %129 : vector<8x32xf32>
    %132 = arith.divf %130, %131 : vector<8x32xf32>
    %133 = arith.mulf %124, %112 : vector<8x32xf32>
    %134 = arith.mulf %118, %126 : vector<8x32xf32>
    %135 = arith.addf %133, %134 : vector<8x32xf32>
    %136 = math.tanh %135 : vector<8x32xf32>
    %137 = arith.mulf %132, %136 : vector<8x32xf32>
    %c0_68 = arith.constant 0 : index
    %c0_69 = arith.constant 0 : index
    %138 = vector.load %arg13[%c0_68, %c0_69] : memref<8x32xf32, #tpu.memory_space<vmem>>, vector<8x32xf32>
    %139 = vector.extract_strided_slice %111 {offsets = [0, 0], sizes = [8, 32], strides = [1, 1]} : vector<8x128xf32> to vector<8x32xf32>
    %140 = arith.negf %139 : vector<8x32xf32>
    %141 = math.exp %140 : vector<8x32xf32>
    %cst_70 = arith.constant 1.000000e+00 : f32
    %142 = vector.broadcast %cst_70 : f32 to vector<8x32xf32>
    %143 = arith.addf %142, %141 : vector<8x32xf32>
    %144 = arith.divf %142, %143 : vector<8x32xf32>
    %145 = vector.extract_strided_slice %111 {offsets = [0, 32], sizes = [8, 32], strides = [1, 1]} : vector<8x128xf32> to vector<8x32xf32>
    %146 = arith.negf %145 : vector<8x32xf32>
    %147 = math.exp %146 : vector<8x32xf32>
    %cst_71 = arith.constant 1.000000e+00 : f32
    %148 = vector.broadcast %cst_71 : f32 to vector<8x32xf32>
    %149 = arith.addf %148, %147 : vector<8x32xf32>
    %150 = arith.divf %148, %149 : vector<8x32xf32>
    %151 = vector.extract_strided_slice %111 {offsets = [0, 64], sizes = [8, 32], strides = [1, 1]} : vector<8x128xf32> to vector<8x32xf32>
    %152 = math.tanh %151 : vector<8x32xf32>
    %153 = vector.extract_strided_slice %111 {offsets = [0, 96], sizes = [8, 32], strides = [1, 1]} : vector<8x128xf32> to vector<8x32xf32>
    %154 = arith.negf %153 : vector<8x32xf32>
    %155 = math.exp %154 : vector<8x32xf32>
    %cst_72 = arith.constant 1.000000e+00 : f32
    %156 = vector.broadcast %cst_72 : f32 to vector<8x32xf32>
    %157 = arith.addf %156, %155 : vector<8x32xf32>
    %158 = arith.divf %156, %157 : vector<8x32xf32>
    %159 = arith.mulf %150, %138 : vector<8x32xf32>
    %160 = arith.mulf %144, %152 : vector<8x32xf32>
    %161 = arith.addf %159, %160 : vector<8x32xf32>
    %162 = math.tanh %161 : vector<8x32xf32>
    %163 = arith.mulf %158, %162 : vector<8x32xf32>
    %c0_73 = arith.constant 0 : index
    %c0_74 = arith.constant 0 : index
    %164 = vector.load %arg11[%c0_73, %c0_74] : memref<16x32xf32, #tpu.memory_space<vmem>>, vector<8x32xf32>
    tpu.vector_store %arg11[%c0_73, %c0_74], %137 {strides = array<i32>} : memref<16x32xf32, #tpu.memory_space<vmem>>, vector<8x32xf32>,
    %c8_75 = arith.constant 8 : index
    %c0_76 = arith.constant 0 : index
    %165 = vector.load %arg11[%c8_75, %c0_76] : memref<16x32xf32, #tpu.memory_space<vmem>>, vector<8x32xf32>
    tpu.vector_store %arg11[%c8_75, %c0_76], %163 {strides = array<i32>} : memref<16x32xf32, #tpu.memory_space<vmem>>, vector<8x32xf32>,
    %c0_77 = arith.constant 0 : index
    %c0_78 = arith.constant 0 : index
    %166 = vector.load %arg12[%c0_77, %c0_78] : memref<8x32xf32, #tpu.memory_space<vmem>>, vector<8x32xf32>
    tpu.vector_store %arg12[%c0_77, %c0_78], %135 {strides = array<i32>} : memref<8x32xf32, #tpu.memory_space<vmem>>, vector<8x32xf32>,
    %c0_79 = arith.constant 0 : index
    %c0_80 = arith.constant 0 : index
    %167 = vector.load %arg13[%c0_79, %c0_80] : memref<8x32xf32, #tpu.memory_space<vmem>>, vector<8x32xf32>
    tpu.vector_store %arg13[%c0_79, %c0_80], %161 {strides = array<i32>} : memref<8x32xf32, #tpu.memory_space<vmem>>, vector<8x32xf32>,
    %168 = arith.index_cast %c1_i32 : i32 to index
    %c0_81 = arith.constant 0 : index
    %c0_82 = arith.constant 0 : index
    %169 = vector.load %arg9[%168, %c0_81, %c0_82] : memref<8x8x64xf32, #tpu.memory_space<vmem>>, vector<1x8x32xf32>
    %170 = vector.shape_cast %169 : vector<1x8x32xf32> to vector<8x32xf32>
    %171 = vector.shape_cast %137 : vector<8x32xf32> to vector<1x8x32xf32>
    tpu.vector_store %arg9[%168, %c0_81, %c0_82], %171 {strides = array<i32>} : memref<8x8x64xf32, #tpu.memory_space<vmem>>, vector<1x8x32xf32>,
    %172 = arith.index_cast %97 : i32 to index
    %c0_83 = arith.constant 0 : index
    %c32_84 = arith.constant 32 : index
    %173 = vector.load %arg9[%172, %c0_83, %c32_84] : memref<8x8x64xf32, #tpu.memory_space<vmem>>, vector<1x8x32xf32>
    %174 = vector.shape_cast %173 : vector<1x8x32xf32> to vector<8x32xf32>
    %175 = vector.shape_cast %163 : vector<8x32xf32> to vector<1x8x32xf32>
    tpu.vector_store %arg9[%172, %c0_83, %c32_84], %175 {strides = array<i32>} : memref<8x8x64xf32, #tpu.memory_space<vmem>>, vector<1x8x32xf32>,
    %c2_i32 = arith.constant 2 : i32
    %c7_i32_85 = arith.constant 7 : i32
    %176 = arith.subi %c7_i32_85, %c2_i32 : i32
    %c0_86 = arith.constant 0 : index
    %c0_87 = arith.constant 0 : index
    %177 = vector.load %arg11[%c0_86, %c0_87] : memref<16x32xf32, #tpu.memory_space<vmem>>, vector<16x32xf32>
    %178 = arith.truncf %177 : vector<16x32xf32> to vector<16x32xbf16>
    %c0_88 = arith.constant 0 : index
    %c0_89 = arith.constant 0 : index
    %179 = vector.load %arg4[%c0_88, %c0_89] : memref<32x256xbf16, #tpu.memory_space<vmem>>, vector<32x256xbf16>
    %cst_90 = arith.constant dense<0.000000e+00> : vector<16x256xf32>
    %180 = tpu.matmul %178, %179, %cst_90 {dimension_numbers = #tpu.dot_dimension_numbers<[1], [0], [0], [1], [0, 0, 1, 1], [], []>} : vector<16x32xbf16>, vector<32x256xbf16>, vector<16x256xf32> -> vector<16x256xf32>
    %181 = arith.index_cast %c2_i32 : i32 to index
    %c0_91 = arith.constant 0 : index
    %c0_92 = arith.constant 0 : index
    %182 = vector.load %arg10[%181, %c0_91, %c0_92] : memref<8x8x256xf32, #tpu.memory_space<vmem>>, vector<1x8x128xf32>
    %183 = vector.shape_cast %182 : vector<1x8x128xf32> to vector<8x128xf32>
    %184 = vector.extract_strided_slice %180 {offsets = [0, 0], sizes = [8, 128], strides = [1, 1]} : vector<16x256xf32> to vector<8x128xf32>
    %185 = arith.addf %183, %184 : vector<8x128xf32>
    %186 = arith.index_cast %176 : i32 to index
    %c0_93 = arith.constant 0 : index
    %c128_94 = arith.constant 128 : index
    %187 = vector.load %arg10[%186, %c0_93, %c128_94] : memref<8x8x256xf32, #tpu.memory_space<vmem>>, vector<1x8x128xf32>
    %188 = vector.shape_cast %187 : vector<1x8x128xf32> to vector<8x128xf32>
    %189 = vector.extract_strided_slice %180 {offsets = [8, 128], sizes = [8, 128], strides = [1, 1]} : vector<16x256xf32> to vector<8x128xf32>
    %190 = arith.addf %188, %189 : vector<8x128xf32>
    %c0_95 = arith.constant 0 : index
    %c0_96 = arith.constant 0 : index
    %191 = vector.load %arg12[%c0_95, %c0_96] : memref<8x32xf32, #tpu.memory_space<vmem>>, vector<8x32xf32>
    %192 = vector.extract_strided_slice %185 {offsets = [0, 0], sizes = [8, 32], strides = [1, 1]} : vector<8x128xf32> to vector<8x32xf32>
    %193 = arith.negf %192 : vector<8x32xf32>
    %194 = math.exp %193 : vector<8x32xf32>
    %cst_97 = arith.constant 1.000000e+00 : f32
    %195 = vector.broadcast %cst_97 : f32 to vector<8x32xf32>
    %196 = arith.addf %195, %194 : vector<8x32xf32>
    %197 = arith.divf %195, %196 : vector<8x32xf32>
    %198 = vector.extract_strided_slice %185 {offsets = [0, 32], sizes = [8, 32], strides = [1, 1]} : vector<8x128xf32> to vector<8x32xf32>
    %199 = arith.negf %198 : vector<8x32xf32>
    %200 = math.exp %199 : vector<8x32xf32>
    %cst_98 = arith.constant 1.000000e+00 : f32
    %201 = vector.broadcast %cst_98 : f32 to vector<8x32xf32>
    %202 = arith.addf %201, %200 : vector<8x32xf32>
    %203 = arith.divf %201, %202 : vector<8x32xf32>
    %204 = vector.extract_strided_slice %185 {offsets = [0, 64], sizes = [8, 32], strides = [1, 1]} : vector<8x128xf32> to vector<8x32xf32>
    %205 = math.tanh %204 : vector<8x32xf32>
    %206 = vector.extract_strided_slice %185 {offsets = [0, 96], sizes = [8, 32], strides = [1, 1]} : vector<8x128xf32> to vector<8x32xf32>
    %207 = arith.negf %206 : vector<8x32xf32>
    %208 = math.exp %207 : vector<8x32xf32>
    %cst_99 = arith.constant 1.000000e+00 : f32
    %209 = vector.broadcast %cst_99 : f32 to vector<8x32xf32>
    %210 = arith.addf %209, %208 : vector<8x32xf32>
    %211 = arith.divf %209, %210 : vector<8x32xf32>
    %212 = arith.mulf %203, %191 : vector<8x32xf32>
    %213 = arith.mulf %197, %205 : vector<8x32xf32>
    %214 = arith.addf %212, %213 : vector<8x32xf32>
    %215 = math.tanh %214 : vector<8x32xf32>
    %216 = arith.mulf %211, %215 : vector<8x32xf32>
    %c0_100 = arith.constant 0 : index
    %c0_101 = arith.constant 0 : index
    %217 = vector.load %arg13[%c0_100, %c0_101] : memref<8x32xf32, #tpu.memory_space<vmem>>, vector<8x32xf32>
    %218 = vector.extract_strided_slice %190 {offsets = [0, 0], sizes = [8, 32], strides = [1, 1]} : vector<8x128xf32> to vector<8x32xf32>
    %219 = arith.negf %218 : vector<8x32xf32>
    %220 = math.exp %219 : vector<8x32xf32>
    %cst_102 = arith.constant 1.000000e+00 : f32
    %221 = vector.broadcast %cst_102 : f32 to vector<8x32xf32>
    %222 = arith.addf %221, %220 : vector<8x32xf32>
    %223 = arith.divf %221, %222 : vector<8x32xf32>
    %224 = vector.extract_strided_slice %190 {offsets = [0, 32], sizes = [8, 32], strides = [1, 1]} : vector<8x128xf32> to vector<8x32xf32>
    %225 = arith.negf %224 : vector<8x32xf32>
    %226 = math.exp %225 : vector<8x32xf32>
    %cst_103 = arith.constant 1.000000e+00 : f32
    %227 = vector.broadcast %cst_103 : f32 to vector<8x32xf32>
    %228 = arith.addf %227, %226 : vector<8x32xf32>
    %229 = arith.divf %227, %228 : vector<8x32xf32>
    %230 = vector.extract_strided_slice %190 {offsets = [0, 64], sizes = [8, 32], strides = [1, 1]} : vector<8x128xf32> to vector<8x32xf32>
    %231 = math.tanh %230 : vector<8x32xf32>
    %232 = vector.extract_strided_slice %190 {offsets = [0, 96], sizes = [8, 32], strides = [1, 1]} : vector<8x128xf32> to vector<8x32xf32>
    %233 = arith.negf %232 : vector<8x32xf32>
    %234 = math.exp %233 : vector<8x32xf32>
    %cst_104 = arith.constant 1.000000e+00 : f32
    %235 = vector.broadcast %cst_104 : f32 to vector<8x32xf32>
    %236 = arith.addf %235, %234 : vector<8x32xf32>
    %237 = arith.divf %235, %236 : vector<8x32xf32>
    %238 = arith.mulf %229, %217 : vector<8x32xf32>
    %239 = arith.mulf %223, %231 : vector<8x32xf32>
    %240 = arith.addf %238, %239 : vector<8x32xf32>
    %241 = math.tanh %240 : vector<8x32xf32>
    %242 = arith.mulf %237, %241 : vector<8x32xf32>
    %c0_105 = arith.constant 0 : index
    %c0_106 = arith.constant 0 : index
    %243 = vector.load %arg11[%c0_105, %c0_106] : memref<16x32xf32, #tpu.memory_space<vmem>>, vector<8x32xf32>
    tpu.vector_store %arg11[%c0_105, %c0_106], %216 {strides = array<i32>} : memref<16x32xf32, #tpu.memory_space<vmem>>, vector<8x32xf32>,
    %c8_107 = arith.constant 8 : index
    %c0_108 = arith.constant 0 : index
    %244 = vector.load %arg11[%c8_107, %c0_108] : memref<16x32xf32, #tpu.memory_space<vmem>>, vector<8x32xf32>
    tpu.vector_store %arg11[%c8_107, %c0_108], %242 {strides = array<i32>} : memref<16x32xf32, #tpu.memory_space<vmem>>, vector<8x32xf32>,
    %c0_109 = arith.constant 0 : index
    %c0_110 = arith.constant 0 : index
    %245 = vector.load %arg12[%c0_109, %c0_110] : memref<8x32xf32, #tpu.memory_space<vmem>>, vector<8x32xf32>
    tpu.vector_store %arg12[%c0_109, %c0_110], %214 {strides = array<i32>} : memref<8x32xf32, #tpu.memory_space<vmem>>, vector<8x32xf32>,
    %c0_111 = arith.constant 0 : index
    %c0_112 = arith.constant 0 : index
    %246 = vector.load %arg13[%c0_111, %c0_112] : memref<8x32xf32, #tpu.memory_space<vmem>>, vector<8x32xf32>
    tpu.vector_store %arg13[%c0_111, %c0_112], %240 {strides = array<i32>} : memref<8x32xf32, #tpu.memory_space<vmem>>, vector<8x32xf32>,
    %247 = arith.index_cast %c2_i32 : i32 to index
    %c0_113 = arith.constant 0 : index
    %c0_114 = arith.constant 0 : index
    %248 = vector.load %arg9[%247, %c0_113, %c0_114] : memref<8x8x64xf32, #tpu.memory_space<vmem>>, vector<1x8x32xf32>
    %249 = vector.shape_cast %248 : vector<1x8x32xf32> to vector<8x32xf32>
    %250 = vector.shape_cast %216 : vector<8x32xf32> to vector<1x8x32xf32>
    tpu.vector_store %arg9[%247, %c0_113, %c0_114], %250 {strides = array<i32>} : memref<8x8x64xf32, #tpu.memory_space<vmem>>, vector<1x8x32xf32>,
    %251 = arith.index_cast %176 : i32 to index
    %c0_115 = arith.constant 0 : index
    %c32_116 = arith.constant 32 : index
    %252 = vector.load %arg9[%251, %c0_115, %c32_116] : memref<8x8x64xf32, #tpu.memory_space<vmem>>, vector<1x8x32xf32>
    %253 = vector.shape_cast %252 : vector<1x8x32xf32> to vector<8x32xf32>
    %254 = vector.shape_cast %242 : vector<8x32xf32> to vector<1x8x32xf32>
    tpu.vector_store %arg9[%251, %c0_115, %c32_116], %254 {strides = array<i32>} : memref<8x8x64xf32, #tpu.memory_space<vmem>>, vector<1x8x32xf32>,
    %c3_i32 = arith.constant 3 : i32
    %c7_i32_117 = arith.constant 7 : i32
    %255 = arith.subi %c7_i32_117, %c3_i32 : i32
    %c0_118 = arith.constant 0 : index
    %c0_119 = arith.constant 0 : index
    %256 = vector.load %arg11[%c0_118, %c0_119] : memref<16x32xf32, #tpu.memory_space<vmem>>, vector<16x32xf32>
    %257 = arith.truncf %256 : vector<16x32xf32> to vector<16x32xbf16>
    %c0_120 = arith.constant 0 : index
    %c0_121 = arith.constant 0 : index
    %258 = vector.load %arg4[%c0_120, %c0_121] : memref<32x256xbf16, #tpu.memory_space<vmem>>, vector<32x256xbf16>
    %cst_122 = arith.constant dense<0.000000e+00> : vector<16x256xf32>
    %259 = tpu.matmul %257, %258, %cst_122 {dimension_numbers = #tpu.dot_dimension_numbers<[1], [0], [0], [1], [0, 0, 1, 1], [], []>} : vector<16x32xbf16>, vector<32x256xbf16>, vector<16x256xf32> -> vector<16x256xf32>
    %260 = arith.index_cast %c3_i32 : i32 to index
    %c0_123 = arith.constant 0 : index
    %c0_124 = arith.constant 0 : index
    %261 = vector.load %arg10[%260, %c0_123, %c0_124] : memref<8x8x256xf32, #tpu.memory_space<vmem>>, vector<1x8x128xf32>
    %262 = vector.shape_cast %261 : vector<1x8x128xf32> to vector<8x128xf32>
    %263 = vector.extract_strided_slice %259 {offsets = [0, 0], sizes = [8, 128], strides = [1, 1]} : vector<16x256xf32> to vector<8x128xf32>
    %264 = arith.addf %262, %263 : vector<8x128xf32>
    %265 = arith.index_cast %255 : i32 to index
    %c0_125 = arith.constant 0 : index
    %c128_126 = arith.constant 128 : index
    %266 = vector.load %arg10[%265, %c0_125, %c128_126] : memref<8x8x256xf32, #tpu.memory_space<vmem>>, vector<1x8x128xf32>
    %267 = vector.shape_cast %266 : vector<1x8x128xf32> to vector<8x128xf32>
    %268 = vector.extract_strided_slice %259 {offsets = [8, 128], sizes = [8, 128], strides = [1, 1]} : vector<16x256xf32> to vector<8x128xf32>
    %269 = arith.addf %267, %268 : vector<8x128xf32>
    %c0_127 = arith.constant 0 : index
    %c0_128 = arith.constant 0 : index
    %270 = vector.load %arg12[%c0_127, %c0_128] : memref<8x32xf32, #tpu.memory_space<vmem>>, vector<8x32xf32>
    %271 = vector.extract_strided_slice %264 {offsets = [0, 0], sizes = [8, 32], strides = [1, 1]} : vector<8x128xf32> to vector<8x32xf32>
    %272 = arith.negf %271 : vector<8x32xf32>
    %273 = math.exp %272 : vector<8x32xf32>
    %cst_129 = arith.constant 1.000000e+00 : f32
    %274 = vector.broadcast %cst_129 : f32 to vector<8x32xf32>
    %275 = arith.addf %274, %273 : vector<8x32xf32>
    %276 = arith.divf %274, %275 : vector<8x32xf32>
    %277 = vector.extract_strided_slice %264 {offsets = [0, 32], sizes = [8, 32], strides = [1, 1]} : vector<8x128xf32> to vector<8x32xf32>
    %278 = arith.negf %277 : vector<8x32xf32>
    %279 = math.exp %278 : vector<8x32xf32>
    %cst_130 = arith.constant 1.000000e+00 : f32
    %280 = vector.broadcast %cst_130 : f32 to vector<8x32xf32>
    %281 = arith.addf %280, %279 : vector<8x32xf32>
    %282 = arith.divf %280, %281 : vector<8x32xf32>
    %283 = vector.extract_strided_slice %264 {offsets = [0, 64], sizes = [8, 32], strides = [1, 1]} : vector<8x128xf32> to vector<8x32xf32>
    %284 = math.tanh %283 : vector<8x32xf32>
    %285 = vector.extract_strided_slice %264 {offsets = [0, 96], sizes = [8, 32], strides = [1, 1]} : vector<8x128xf32> to vector<8x32xf32>
    %286 = arith.negf %285 : vector<8x32xf32>
    %287 = math.exp %286 : vector<8x32xf32>
    %cst_131 = arith.constant 1.000000e+00 : f32
    %288 = vector.broadcast %cst_131 : f32 to vector<8x32xf32>
    %289 = arith.addf %288, %287 : vector<8x32xf32>
    %290 = arith.divf %288, %289 : vector<8x32xf32>
    %291 = arith.mulf %282, %270 : vector<8x32xf32>
    %292 = arith.mulf %276, %284 : vector<8x32xf32>
    %293 = arith.addf %291, %292 : vector<8x32xf32>
    %294 = math.tanh %293 : vector<8x32xf32>
    %295 = arith.mulf %290, %294 : vector<8x32xf32>
    %c0_132 = arith.constant 0 : index
    %c0_133 = arith.constant 0 : index
    %296 = vector.load %arg13[%c0_132, %c0_133] : memref<8x32xf32, #tpu.memory_space<vmem>>, vector<8x32xf32>
    %297 = vector.extract_strided_slice %269 {offsets = [0, 0], sizes = [8, 32], strides = [1, 1]} : vector<8x128xf32> to vector<8x32xf32>
    %298 = arith.negf %297 : vector<8x32xf32>
    %299 = math.exp %298 : vector<8x32xf32>
    %cst_134 = arith.constant 1.000000e+00 : f32
    %300 = vector.broadcast %cst_134 : f32 to vector<8x32xf32>
    %301 = arith.addf %300, %299 : vector<8x32xf32>
    %302 = arith.divf %300, %301 : vector<8x32xf32>
    %303 = vector.extract_strided_slice %269 {offsets = [0, 32], sizes = [8, 32], strides = [1, 1]} : vector<8x128xf32> to vector<8x32xf32>
    %304 = arith.negf %303 : vector<8x32xf32>
    %305 = math.exp %304 : vector<8x32xf32>
    %cst_135 = arith.constant 1.000000e+00 : f32
    %306 = vector.broadcast %cst_135 : f32 to vector<8x32xf32>
    %307 = arith.addf %306, %305 : vector<8x32xf32>
    %308 = arith.divf %306, %307 : vector<8x32xf32>
    %309 = vector.extract_strided_slice %269 {offsets = [0, 64], sizes = [8, 32], strides = [1, 1]} : vector<8x128xf32> to vector<8x32xf32>
    %310 = math.tanh %309 : vector<8x32xf32>
    %311 = vector.extract_strided_slice %269 {offsets = [0, 96], sizes = [8, 32], strides = [1, 1]} : vector<8x128xf32> to vector<8x32xf32>
    %312 = arith.negf %311 : vector<8x32xf32>
    %313 = math.exp %312 : vector<8x32xf32>
    %cst_136 = arith.constant 1.000000e+00 : f32
    %314 = vector.broadcast %cst_136 : f32 to vector<8x32xf32>
    %315 = arith.addf %314, %313 : vector<8x32xf32>
    %316 = arith.divf %314, %315 : vector<8x32xf32>
    %317 = arith.mulf %308, %296 : vector<8x32xf32>
    %318 = arith.mulf %302, %310 : vector<8x32xf32>
    %319 = arith.addf %317, %318 : vector<8x32xf32>
    %320 = math.tanh %319 : vector<8x32xf32>
    %321 = arith.mulf %316, %320 : vector<8x32xf32>
    %c0_137 = arith.constant 0 : index
    %c0_138 = arith.constant 0 : index
    %322 = vector.load %arg11[%c0_137, %c0_138] : memref<16x32xf32, #tpu.memory_space<vmem>>, vector<8x32xf32>
    tpu.vector_store %arg11[%c0_137, %c0_138], %295 {strides = array<i32>} : memref<16x32xf32, #tpu.memory_space<vmem>>, vector<8x32xf32>,
    %c8_139 = arith.constant 8 : index
    %c0_140 = arith.constant 0 : index
    %323 = vector.load %arg11[%c8_139, %c0_140] : memref<16x32xf32, #tpu.memory_space<vmem>>, vector<8x32xf32>
    tpu.vector_store %arg11[%c8_139, %c0_140], %321 {strides = array<i32>} : memref<16x32xf32, #tpu.memory_space<vmem>>, vector<8x32xf32>,
    %c0_141 = arith.constant 0 : index
    %c0_142 = arith.constant 0 : index
    %324 = vector.load %arg12[%c0_141, %c0_142] : memref<8x32xf32, #tpu.memory_space<vmem>>, vector<8x32xf32>
    tpu.vector_store %arg12[%c0_141, %c0_142], %293 {strides = array<i32>} : memref<8x32xf32, #tpu.memory_space<vmem>>, vector<8x32xf32>,
    %c0_143 = arith.constant 0 : index
    %c0_144 = arith.constant 0 : index
    %325 = vector.load %arg13[%c0_143, %c0_144] : memref<8x32xf32, #tpu.memory_space<vmem>>, vector<8x32xf32>
    tpu.vector_store %arg13[%c0_143, %c0_144], %319 {strides = array<i32>} : memref<8x32xf32, #tpu.memory_space<vmem>>, vector<8x32xf32>,
    %326 = arith.index_cast %c3_i32 : i32 to index
    %c0_145 = arith.constant 0 : index
    %c0_146 = arith.constant 0 : index
    %327 = vector.load %arg9[%326, %c0_145, %c0_146] : memref<8x8x64xf32, #tpu.memory_space<vmem>>, vector<1x8x32xf32>
    %328 = vector.shape_cast %327 : vector<1x8x32xf32> to vector<8x32xf32>
    %329 = vector.shape_cast %295 : vector<8x32xf32> to vector<1x8x32xf32>
    tpu.vector_store %arg9[%326, %c0_145, %c0_146], %329 {strides = array<i32>} : memref<8x8x64xf32, #tpu.memory_space<vmem>>, vector<1x8x32xf32>,
    %330 = arith.index_cast %255 : i32 to index
    %c0_147 = arith.constant 0 : index
    %c32_148 = arith.constant 32 : index
    %331 = vector.load %arg9[%330, %c0_147, %c32_148] : memref<8x8x64xf32, #tpu.memory_space<vmem>>, vector<1x8x32xf32>
    %332 = vector.shape_cast %331 : vector<1x8x32xf32> to vector<8x32xf32>
    %333 = vector.shape_cast %321 : vector<8x32xf32> to vector<1x8x32xf32>
    tpu.vector_store %arg9[%330, %c0_147, %c32_148], %333 {strides = array<i32>} : memref<8x8x64xf32, #tpu.memory_space<vmem>>, vector<1x8x32xf32>,
    %c4_i32 = arith.constant 4 : i32
    %c7_i32_149 = arith.constant 7 : i32
    %334 = arith.subi %c7_i32_149, %c4_i32 : i32
    %c0_150 = arith.constant 0 : index
    %c0_151 = arith.constant 0 : index
    %335 = vector.load %arg11[%c0_150, %c0_151] : memref<16x32xf32, #tpu.memory_space<vmem>>, vector<16x32xf32>
    %336 = arith.truncf %335 : vector<16x32xf32> to vector<16x32xbf16>
    %c0_152 = arith.constant 0 : index
    %c0_153 = arith.constant 0 : index
    %337 = vector.load %arg4[%c0_152, %c0_153] : memref<32x256xbf16, #tpu.memory_space<vmem>>, vector<32x256xbf16>
    %cst_154 = arith.constant dense<0.000000e+00> : vector<16x256xf32>
    %338 = tpu.matmul %336, %337, %cst_154 {dimension_numbers = #tpu.dot_dimension_numbers<[1], [0], [0], [1], [0, 0, 1, 1], [], []>} : vector<16x32xbf16>, vector<32x256xbf16>, vector<16x256xf32> -> vector<16x256xf32>
    %339 = arith.index_cast %c4_i32 : i32 to index
    %c0_155 = arith.constant 0 : index
    %c0_156 = arith.constant 0 : index
    %340 = vector.load %arg10[%339, %c0_155, %c0_156] : memref<8x8x256xf32, #tpu.memory_space<vmem>>, vector<1x8x128xf32>
    %341 = vector.shape_cast %340 : vector<1x8x128xf32> to vector<8x128xf32>
    %342 = vector.extract_strided_slice %338 {offsets = [0, 0], sizes = [8, 128], strides = [1, 1]} : vector<16x256xf32> to vector<8x128xf32>
    %343 = arith.addf %341, %342 : vector<8x128xf32>
    %344 = arith.index_cast %334 : i32 to index
    %c0_157 = arith.constant 0 : index
    %c128_158 = arith.constant 128 : index
    %345 = vector.load %arg10[%344, %c0_157, %c128_158] : memref<8x8x256xf32, #tpu.memory_space<vmem>>, vector<1x8x128xf32>
    %346 = vector.shape_cast %345 : vector<1x8x128xf32> to vector<8x128xf32>
    %347 = vector.extract_strided_slice %338 {offsets = [8, 128], sizes = [8, 128], strides = [1, 1]} : vector<16x256xf32> to vector<8x128xf32>
    %348 = arith.addf %346, %347 : vector<8x128xf32>
    %c0_159 = arith.constant 0 : index
    %c0_160 = arith.constant 0 : index
    %349 = vector.load %arg12[%c0_159, %c0_160] : memref<8x32xf32, #tpu.memory_space<vmem>>, vector<8x32xf32>
    %350 = vector.extract_strided_slice %343 {offsets = [0, 0], sizes = [8, 32], strides = [1, 1]} : vector<8x128xf32> to vector<8x32xf32>
    %351 = arith.negf %350 : vector<8x32xf32>
    %352 = math.exp %351 : vector<8x32xf32>
    %cst_161 = arith.constant 1.000000e+00 : f32
    %353 = vector.broadcast %cst_161 : f32 to vector<8x32xf32>
    %354 = arith.addf %353, %352 : vector<8x32xf32>
    %355 = arith.divf %353, %354 : vector<8x32xf32>
    %356 = vector.extract_strided_slice %343 {offsets = [0, 32], sizes = [8, 32], strides = [1, 1]} : vector<8x128xf32> to vector<8x32xf32>
    %357 = arith.negf %356 : vector<8x32xf32>
    %358 = math.exp %357 : vector<8x32xf32>
    %cst_162 = arith.constant 1.000000e+00 : f32
    %359 = vector.broadcast %cst_162 : f32 to vector<8x32xf32>
    %360 = arith.addf %359, %358 : vector<8x32xf32>
    %361 = arith.divf %359, %360 : vector<8x32xf32>
    %362 = vector.extract_strided_slice %343 {offsets = [0, 64], sizes = [8, 32], strides = [1, 1]} : vector<8x128xf32> to vector<8x32xf32>
    %363 = math.tanh %362 : vector<8x32xf32>
    %364 = vector.extract_strided_slice %343 {offsets = [0, 96], sizes = [8, 32], strides = [1, 1]} : vector<8x128xf32> to vector<8x32xf32>
    %365 = arith.negf %364 : vector<8x32xf32>
    %366 = math.exp %365 : vector<8x32xf32>
    %cst_163 = arith.constant 1.000000e+00 : f32
    %367 = vector.broadcast %cst_163 : f32 to vector<8x32xf32>
    %368 = arith.addf %367, %366 : vector<8x32xf32>
    %369 = arith.divf %367, %368 : vector<8x32xf32>
    %370 = arith.mulf %361, %349 : vector<8x32xf32>
    %371 = arith.mulf %355, %363 : vector<8x32xf32>
    %372 = arith.addf %370, %371 : vector<8x32xf32>
    %373 = math.tanh %372 : vector<8x32xf32>
    %374 = arith.mulf %369, %373 : vector<8x32xf32>
    %c0_164 = arith.constant 0 : index
    %c0_165 = arith.constant 0 : index
    %375 = vector.load %arg13[%c0_164, %c0_165] : memref<8x32xf32, #tpu.memory_space<vmem>>, vector<8x32xf32>
    %376 = vector.extract_strided_slice %348 {offsets = [0, 0], sizes = [8, 32], strides = [1, 1]} : vector<8x128xf32> to vector<8x32xf32>
    %377 = arith.negf %376 : vector<8x32xf32>
    %378 = math.exp %377 : vector<8x32xf32>
    %cst_166 = arith.constant 1.000000e+00 : f32
    %379 = vector.broadcast %cst_166 : f32 to vector<8x32xf32>
    %380 = arith.addf %379, %378 : vector<8x32xf32>
    %381 = arith.divf %379, %380 : vector<8x32xf32>
    %382 = vector.extract_strided_slice %348 {offsets = [0, 32], sizes = [8, 32], strides = [1, 1]} : vector<8x128xf32> to vector<8x32xf32>
    %383 = arith.negf %382 : vector<8x32xf32>
    %384 = math.exp %383 : vector<8x32xf32>
    %cst_167 = arith.constant 1.000000e+00 : f32
    %385 = vector.broadcast %cst_167 : f32 to vector<8x32xf32>
    %386 = arith.addf %385, %384 : vector<8x32xf32>
    %387 = arith.divf %385, %386 : vector<8x32xf32>
    %388 = vector.extract_strided_slice %348 {offsets = [0, 64], sizes = [8, 32], strides = [1, 1]} : vector<8x128xf32> to vector<8x32xf32>
    %389 = math.tanh %388 : vector<8x32xf32>
    %390 = vector.extract_strided_slice %348 {offsets = [0, 96], sizes = [8, 32], strides = [1, 1]} : vector<8x128xf32> to vector<8x32xf32>
    %391 = arith.negf %390 : vector<8x32xf32>
    %392 = math.exp %391 : vector<8x32xf32>
    %cst_168 = arith.constant 1.000000e+00 : f32
    %393 = vector.broadcast %cst_168 : f32 to vector<8x32xf32>
    %394 = arith.addf %393, %392 : vector<8x32xf32>
    %395 = arith.divf %393, %394 : vector<8x32xf32>
    %396 = arith.mulf %387, %375 : vector<8x32xf32>
    %397 = arith.mulf %381, %389 : vector<8x32xf32>
    %398 = arith.addf %396, %397 : vector<8x32xf32>
    %399 = math.tanh %398 : vector<8x32xf32>
    %400 = arith.mulf %395, %399 : vector<8x32xf32>
    %c0_169 = arith.constant 0 : index
    %c0_170 = arith.constant 0 : index
    %401 = vector.load %arg11[%c0_169, %c0_170] : memref<16x32xf32, #tpu.memory_space<vmem>>, vector<8x32xf32>
    tpu.vector_store %arg11[%c0_169, %c0_170], %374 {strides = array<i32>} : memref<16x32xf32, #tpu.memory_space<vmem>>, vector<8x32xf32>,
    %c8_171 = arith.constant 8 : index
    %c0_172 = arith.constant 0 : index
    %402 = vector.load %arg11[%c8_171, %c0_172] : memref<16x32xf32, #tpu.memory_space<vmem>>, vector<8x32xf32>
    tpu.vector_store %arg11[%c8_171, %c0_172], %400 {strides = array<i32>} : memref<16x32xf32, #tpu.memory_space<vmem>>, vector<8x32xf32>,
    %c0_173 = arith.constant 0 : index
    %c0_174 = arith.constant 0 : index
    %403 = vector.load %arg12[%c0_173, %c0_174] : memref<8x32xf32, #tpu.memory_space<vmem>>, vector<8x32xf32>
    tpu.vector_store %arg12[%c0_173, %c0_174], %372 {strides = array<i32>} : memref<8x32xf32, #tpu.memory_space<vmem>>, vector<8x32xf32>,
    %c0_175 = arith.constant 0 : index
    %c0_176 = arith.constant 0 : index
    %404 = vector.load %arg13[%c0_175, %c0_176] : memref<8x32xf32, #tpu.memory_space<vmem>>, vector<8x32xf32>
    tpu.vector_store %arg13[%c0_175, %c0_176], %398 {strides = array<i32>} : memref<8x32xf32, #tpu.memory_space<vmem>>, vector<8x32xf32>,
    %405 = arith.index_cast %c4_i32 : i32 to index
    %c0_177 = arith.constant 0 : index
    %c0_178 = arith.constant 0 : index
    %406 = vector.load %arg9[%405, %c0_177, %c0_178] : memref<8x8x64xf32, #tpu.memory_space<vmem>>, vector<1x8x32xf32>
    %407 = vector.shape_cast %406 : vector<1x8x32xf32> to vector<8x32xf32>
    %408 = vector.shape_cast %374 : vector<8x32xf32> to vector<1x8x32xf32>
    tpu.vector_store %arg9[%405, %c0_177, %c0_178], %408 {strides = array<i32>} : memref<8x8x64xf32, #tpu.memory_space<vmem>>, vector<1x8x32xf32>,
    %409 = arith.index_cast %334 : i32 to index
    %c0_179 = arith.constant 0 : index
    %c32_180 = arith.constant 32 : index
    %410 = vector.load %arg9[%409, %c0_179, %c32_180] : memref<8x8x64xf32, #tpu.memory_space<vmem>>, vector<1x8x32xf32>
    %411 = vector.shape_cast %410 : vector<1x8x32xf32> to vector<8x32xf32>
    %412 = vector.shape_cast %400 : vector<8x32xf32> to vector<1x8x32xf32>
    tpu.vector_store %arg9[%409, %c0_179, %c32_180], %412 {strides = array<i32>} : memref<8x8x64xf32, #tpu.memory_space<vmem>>, vector<1x8x32xf32>,
    %c5_i32 = arith.constant 5 : i32
    %c7_i32_181 = arith.constant 7 : i32
    %413 = arith.subi %c7_i32_181, %c5_i32 : i32
    %c0_182 = arith.constant 0 : index
    %c0_183 = arith.constant 0 : index
    %414 = vector.load %arg11[%c0_182, %c0_183] : memref<16x32xf32, #tpu.memory_space<vmem>>, vector<16x32xf32>
    %415 = arith.truncf %414 : vector<16x32xf32> to vector<16x32xbf16>
    %c0_184 = arith.constant 0 : index
    %c0_185 = arith.constant 0 : index
    %416 = vector.load %arg4[%c0_184, %c0_185] : memref<32x256xbf16, #tpu.memory_space<vmem>>, vector<32x256xbf16>
    %cst_186 = arith.constant dense<0.000000e+00> : vector<16x256xf32>
    %417 = tpu.matmul %415, %416, %cst_186 {dimension_numbers = #tpu.dot_dimension_numbers<[1], [0], [0], [1], [0, 0, 1, 1], [], []>} : vector<16x32xbf16>, vector<32x256xbf16>, vector<16x256xf32> -> vector<16x256xf32>
    %418 = arith.index_cast %c5_i32 : i32 to index
    %c0_187 = arith.constant 0 : index
    %c0_188 = arith.constant 0 : index
    %419 = vector.load %arg10[%418, %c0_187, %c0_188] : memref<8x8x256xf32, #tpu.memory_space<vmem>>, vector<1x8x128xf32>
    %420 = vector.shape_cast %419 : vector<1x8x128xf32> to vector<8x128xf32>
    %421 = vector.extract_strided_slice %417 {offsets = [0, 0], sizes = [8, 128], strides = [1, 1]} : vector<16x256xf32> to vector<8x128xf32>
    %422 = arith.addf %420, %421 : vector<8x128xf32>
    %423 = arith.index_cast %413 : i32 to index
    %c0_189 = arith.constant 0 : index
    %c128_190 = arith.constant 128 : index
    %424 = vector.load %arg10[%423, %c0_189, %c128_190] : memref<8x8x256xf32, #tpu.memory_space<vmem>>, vector<1x8x128xf32>
    %425 = vector.shape_cast %424 : vector<1x8x128xf32> to vector<8x128xf32>
    %426 = vector.extract_strided_slice %417 {offsets = [8, 128], sizes = [8, 128], strides = [1, 1]} : vector<16x256xf32> to vector<8x128xf32>
    %427 = arith.addf %425, %426 : vector<8x128xf32>
    %c0_191 = arith.constant 0 : index
    %c0_192 = arith.constant 0 : index
    %428 = vector.load %arg12[%c0_191, %c0_192] : memref<8x32xf32, #tpu.memory_space<vmem>>, vector<8x32xf32>
    %429 = vector.extract_strided_slice %422 {offsets = [0, 0], sizes = [8, 32], strides = [1, 1]} : vector<8x128xf32> to vector<8x32xf32>
    %430 = arith.negf %429 : vector<8x32xf32>
    %431 = math.exp %430 : vector<8x32xf32>
    %cst_193 = arith.constant 1.000000e+00 : f32
    %432 = vector.broadcast %cst_193 : f32 to vector<8x32xf32>
    %433 = arith.addf %432, %431 : vector<8x32xf32>
    %434 = arith.divf %432, %433 : vector<8x32xf32>
    %435 = vector.extract_strided_slice %422 {offsets = [0, 32], sizes = [8, 32], strides = [1, 1]} : vector<8x128xf32> to vector<8x32xf32>
    %436 = arith.negf %435 : vector<8x32xf32>
    %437 = math.exp %436 : vector<8x32xf32>
    %cst_194 = arith.constant 1.000000e+00 : f32
    %438 = vector.broadcast %cst_194 : f32 to vector<8x32xf32>
    %439 = arith.addf %438, %437 : vector<8x32xf32>
    %440 = arith.divf %438, %439 : vector<8x32xf32>
    %441 = vector.extract_strided_slice %422 {offsets = [0, 64], sizes = [8, 32], strides = [1, 1]} : vector<8x128xf32> to vector<8x32xf32>
    %442 = math.tanh %441 : vector<8x32xf32>
    %443 = vector.extract_strided_slice %422 {offsets = [0, 96], sizes = [8, 32], strides = [1, 1]} : vector<8x128xf32> to vector<8x32xf32>
    %444 = arith.negf %443 : vector<8x32xf32>
    %445 = math.exp %444 : vector<8x32xf32>
    %cst_195 = arith.constant 1.000000e+00 : f32
    %446 = vector.broadcast %cst_195 : f32 to vector<8x32xf32>
    %447 = arith.addf %446, %445 : vector<8x32xf32>
    %448 = arith.divf %446, %447 : vector<8x32xf32>
    %449 = arith.mulf %440, %428 : vector<8x32xf32>
    %450 = arith.mulf %434, %442 : vector<8x32xf32>
    %451 = arith.addf %449, %450 : vector<8x32xf32>
    %452 = math.tanh %451 : vector<8x32xf32>
    %453 = arith.mulf %448, %452 : vector<8x32xf32>
    %c0_196 = arith.constant 0 : index
    %c0_197 = arith.constant 0 : index
    %454 = vector.load %arg13[%c0_196, %c0_197] : memref<8x32xf32, #tpu.memory_space<vmem>>, vector<8x32xf32>
    %455 = vector.extract_strided_slice %427 {offsets = [0, 0], sizes = [8, 32], strides = [1, 1]} : vector<8x128xf32> to vector<8x32xf32>
    %456 = arith.negf %455 : vector<8x32xf32>
    %457 = math.exp %456 : vector<8x32xf32>
    %cst_198 = arith.constant 1.000000e+00 : f32
    %458 = vector.broadcast %cst_198 : f32 to vector<8x32xf32>
    %459 = arith.addf %458, %457 : vector<8x32xf32>
    %460 = arith.divf %458, %459 : vector<8x32xf32>
    %461 = vector.extract_strided_slice %427 {offsets = [0, 32], sizes = [8, 32], strides = [1, 1]} : vector<8x128xf32> to vector<8x32xf32>
    %462 = arith.negf %461 : vector<8x32xf32>
    %463 = math.exp %462 : vector<8x32xf32>
    %cst_199 = arith.constant 1.000000e+00 : f32
    %464 = vector.broadcast %cst_199 : f32 to vector<8x32xf32>
    %465 = arith.addf %464, %463 : vector<8x32xf32>
    %466 = arith.divf %464, %465 : vector<8x32xf32>
    %467 = vector.extract_strided_slice %427 {offsets = [0, 64], sizes = [8, 32], strides = [1, 1]} : vector<8x128xf32> to vector<8x32xf32>
    %468 = math.tanh %467 : vector<8x32xf32>
    %469 = vector.extract_strided_slice %427 {offsets = [0, 96], sizes = [8, 32], strides = [1, 1]} : vector<8x128xf32> to vector<8x32xf32>
    %470 = arith.negf %469 : vector<8x32xf32>
    %471 = math.exp %470 : vector<8x32xf32>
    %cst_200 = arith.constant 1.000000e+00 : f32
    %472 = vector.broadcast %cst_200 : f32 to vector<8x32xf32>
    %473 = arith.addf %472, %471 : vector<8x32xf32>
    %474 = arith.divf %472, %473 : vector<8x32xf32>
    %475 = arith.mulf %466, %454 : vector<8x32xf32>
    %476 = arith.mulf %460, %468 : vector<8x32xf32>
    %477 = arith.addf %475, %476 : vector<8x32xf32>
    %478 = math.tanh %477 : vector<8x32xf32>
    %479 = arith.mulf %474, %478 : vector<8x32xf32>
    %c0_201 = arith.constant 0 : index
    %c0_202 = arith.constant 0 : index
    %480 = vector.load %arg11[%c0_201, %c0_202] : memref<16x32xf32, #tpu.memory_space<vmem>>, vector<8x32xf32>
    tpu.vector_store %arg11[%c0_201, %c0_202], %453 {strides = array<i32>} : memref<16x32xf32, #tpu.memory_space<vmem>>, vector<8x32xf32>,
    %c8_203 = arith.constant 8 : index
    %c0_204 = arith.constant 0 : index
    %481 = vector.load %arg11[%c8_203, %c0_204] : memref<16x32xf32, #tpu.memory_space<vmem>>, vector<8x32xf32>
    tpu.vector_store %arg11[%c8_203, %c0_204], %479 {strides = array<i32>} : memref<16x32xf32, #tpu.memory_space<vmem>>, vector<8x32xf32>,
    %c0_205 = arith.constant 0 : index
    %c0_206 = arith.constant 0 : index
    %482 = vector.load %arg12[%c0_205, %c0_206] : memref<8x32xf32, #tpu.memory_space<vmem>>, vector<8x32xf32>
    tpu.vector_store %arg12[%c0_205, %c0_206], %451 {strides = array<i32>} : memref<8x32xf32, #tpu.memory_space<vmem>>, vector<8x32xf32>,
    %c0_207 = arith.constant 0 : index
    %c0_208 = arith.constant 0 : index
    %483 = vector.load %arg13[%c0_207, %c0_208] : memref<8x32xf32, #tpu.memory_space<vmem>>, vector<8x32xf32>
    tpu.vector_store %arg13[%c0_207, %c0_208], %477 {strides = array<i32>} : memref<8x32xf32, #tpu.memory_space<vmem>>, vector<8x32xf32>,
    %484 = arith.index_cast %c5_i32 : i32 to index
    %c0_209 = arith.constant 0 : index
    %c0_210 = arith.constant 0 : index
    %485 = vector.load %arg9[%484, %c0_209, %c0_210] : memref<8x8x64xf32, #tpu.memory_space<vmem>>, vector<1x8x32xf32>
    %486 = vector.shape_cast %485 : vector<1x8x32xf32> to vector<8x32xf32>
    %487 = vector.shape_cast %453 : vector<8x32xf32> to vector<1x8x32xf32>
    tpu.vector_store %arg9[%484, %c0_209, %c0_210], %487 {strides = array<i32>} : memref<8x8x64xf32, #tpu.memory_space<vmem>>, vector<1x8x32xf32>,
    %488 = arith.index_cast %413 : i32 to index
    %c0_211 = arith.constant 0 : index
    %c32_212 = arith.constant 32 : index
    %489 = vector.load %arg9[%488, %c0_211, %c32_212] : memref<8x8x64xf32, #tpu.memory_space<vmem>>, vector<1x8x32xf32>
    %490 = vector.shape_cast %489 : vector<1x8x32xf32> to vector<8x32xf32>
    %491 = vector.shape_cast %479 : vector<8x32xf32> to vector<1x8x32xf32>
    tpu.vector_store %arg9[%488, %c0_211, %c32_212], %491 {strides = array<i32>} : memref<8x8x64xf32, #tpu.memory_space<vmem>>, vector<1x8x32xf32>,
    %c6_i32 = arith.constant 6 : i32
    %c7_i32_213 = arith.constant 7 : i32
    %492 = arith.subi %c7_i32_213, %c6_i32 : i32
    %c0_214 = arith.constant 0 : index
    %c0_215 = arith.constant 0 : index
    %493 = vector.load %arg11[%c0_214, %c0_215] : memref<16x32xf32, #tpu.memory_space<vmem>>, vector<16x32xf32>
    %494 = arith.truncf %493 : vector<16x32xf32> to vector<16x32xbf16>
    %c0_216 = arith.constant 0 : index
    %c0_217 = arith.constant 0 : index
    %495 = vector.load %arg4[%c0_216, %c0_217] : memref<32x256xbf16, #tpu.memory_space<vmem>>, vector<32x256xbf16>
    %cst_218 = arith.constant dense<0.000000e+00> : vector<16x256xf32>
    %496 = tpu.matmul %494, %495, %cst_218 {dimension_numbers = #tpu.dot_dimension_numbers<[1], [0], [0], [1], [0, 0, 1, 1], [], []>} : vector<16x32xbf16>, vector<32x256xbf16>, vector<16x256xf32> -> vector<16x256xf32>
    %497 = arith.index_cast %c6_i32 : i32 to index
    %c0_219 = arith.constant 0 : index
    %c0_220 = arith.constant 0 : index
    %498 = vector.load %arg10[%497, %c0_219, %c0_220] : memref<8x8x256xf32, #tpu.memory_space<vmem>>, vector<1x8x128xf32>
    %499 = vector.shape_cast %498 : vector<1x8x128xf32> to vector<8x128xf32>
    %500 = vector.extract_strided_slice %496 {offsets = [0, 0], sizes = [8, 128], strides = [1, 1]} : vector<16x256xf32> to vector<8x128xf32>
    %501 = arith.addf %499, %500 : vector<8x128xf32>
    %502 = arith.index_cast %492 : i32 to index
    %c0_221 = arith.constant 0 : index
    %c128_222 = arith.constant 128 : index
    %503 = vector.load %arg10[%502, %c0_221, %c128_222] : memref<8x8x256xf32, #tpu.memory_space<vmem>>, vector<1x8x128xf32>
    %504 = vector.shape_cast %503 : vector<1x8x128xf32> to vector<8x128xf32>
    %505 = vector.extract_strided_slice %496 {offsets = [8, 128], sizes = [8, 128], strides = [1, 1]} : vector<16x256xf32> to vector<8x128xf32>
    %506 = arith.addf %504, %505 : vector<8x128xf32>
    %c0_223 = arith.constant 0 : index
    %c0_224 = arith.constant 0 : index
    %507 = vector.load %arg12[%c0_223, %c0_224] : memref<8x32xf32, #tpu.memory_space<vmem>>, vector<8x32xf32>
    %508 = vector.extract_strided_slice %501 {offsets = [0, 0], sizes = [8, 32], strides = [1, 1]} : vector<8x128xf32> to vector<8x32xf32>
    %509 = arith.negf %508 : vector<8x32xf32>
    %510 = math.exp %509 : vector<8x32xf32>
    %cst_225 = arith.constant 1.000000e+00 : f32
    %511 = vector.broadcast %cst_225 : f32 to vector<8x32xf32>
    %512 = arith.addf %511, %510 : vector<8x32xf32>
    %513 = arith.divf %511, %512 : vector<8x32xf32>
    %514 = vector.extract_strided_slice %501 {offsets = [0, 32], sizes = [8, 32], strides = [1, 1]} : vector<8x128xf32> to vector<8x32xf32>
    %515 = arith.negf %514 : vector<8x32xf32>
    %516 = math.exp %515 : vector<8x32xf32>
    %cst_226 = arith.constant 1.000000e+00 : f32
    %517 = vector.broadcast %cst_226 : f32 to vector<8x32xf32>
    %518 = arith.addf %517, %516 : vector<8x32xf32>
    %519 = arith.divf %517, %518 : vector<8x32xf32>
    %520 = vector.extract_strided_slice %501 {offsets = [0, 64], sizes = [8, 32], strides = [1, 1]} : vector<8x128xf32> to vector<8x32xf32>
    %521 = math.tanh %520 : vector<8x32xf32>
    %522 = vector.extract_strided_slice %501 {offsets = [0, 96], sizes = [8, 32], strides = [1, 1]} : vector<8x128xf32> to vector<8x32xf32>
    %523 = arith.negf %522 : vector<8x32xf32>
    %524 = math.exp %523 : vector<8x32xf32>
    %cst_227 = arith.constant 1.000000e+00 : f32
    %525 = vector.broadcast %cst_227 : f32 to vector<8x32xf32>
    %526 = arith.addf %525, %524 : vector<8x32xf32>
    %527 = arith.divf %525, %526 : vector<8x32xf32>
    %528 = arith.mulf %519, %507 : vector<8x32xf32>
    %529 = arith.mulf %513, %521 : vector<8x32xf32>
    %530 = arith.addf %528, %529 : vector<8x32xf32>
    %531 = math.tanh %530 : vector<8x32xf32>
    %532 = arith.mulf %527, %531 : vector<8x32xf32>
    %c0_228 = arith.constant 0 : index
    %c0_229 = arith.constant 0 : index
    %533 = vector.load %arg13[%c0_228, %c0_229] : memref<8x32xf32, #tpu.memory_space<vmem>>, vector<8x32xf32>
    %534 = vector.extract_strided_slice %506 {offsets = [0, 0], sizes = [8, 32], strides = [1, 1]} : vector<8x128xf32> to vector<8x32xf32>
    %535 = arith.negf %534 : vector<8x32xf32>
    %536 = math.exp %535 : vector<8x32xf32>
    %cst_230 = arith.constant 1.000000e+00 : f32
    %537 = vector.broadcast %cst_230 : f32 to vector<8x32xf32>
    %538 = arith.addf %537, %536 : vector<8x32xf32>
    %539 = arith.divf %537, %538 : vector<8x32xf32>
    %540 = vector.extract_strided_slice %506 {offsets = [0, 32], sizes = [8, 32], strides = [1, 1]} : vector<8x128xf32> to vector<8x32xf32>
    %541 = arith.negf %540 : vector<8x32xf32>
    %542 = math.exp %541 : vector<8x32xf32>
    %cst_231 = arith.constant 1.000000e+00 : f32
    %543 = vector.broadcast %cst_231 : f32 to vector<8x32xf32>
    %544 = arith.addf %543, %542 : vector<8x32xf32>
    %545 = arith.divf %543, %544 : vector<8x32xf32>
    %546 = vector.extract_strided_slice %506 {offsets = [0, 64], sizes = [8, 32], strides = [1, 1]} : vector<8x128xf32> to vector<8x32xf32>
    %547 = math.tanh %546 : vector<8x32xf32>
    %548 = vector.extract_strided_slice %506 {offsets = [0, 96], sizes = [8, 32], strides = [1, 1]} : vector<8x128xf32> to vector<8x32xf32>
    %549 = arith.negf %548 : vector<8x32xf32>
    %550 = math.exp %549 : vector<8x32xf32>
    %cst_232 = arith.constant 1.000000e+00 : f32
    %551 = vector.broadcast %cst_232 : f32 to vector<8x32xf32>
    %552 = arith.addf %551, %550 : vector<8x32xf32>
    %553 = arith.divf %551, %552 : vector<8x32xf32>
    %554 = arith.mulf %545, %533 : vector<8x32xf32>
    %555 = arith.mulf %539, %547 : vector<8x32xf32>
    %556 = arith.addf %554, %555 : vector<8x32xf32>
    %557 = math.tanh %556 : vector<8x32xf32>
    %558 = arith.mulf %553, %557 : vector<8x32xf32>
    %c0_233 = arith.constant 0 : index
    %c0_234 = arith.constant 0 : index
    %559 = vector.load %arg11[%c0_233, %c0_234] : memref<16x32xf32, #tpu.memory_space<vmem>>, vector<8x32xf32>
    tpu.vector_store %arg11[%c0_233, %c0_234], %532 {strides = array<i32>} : memref<16x32xf32, #tpu.memory_space<vmem>>, vector<8x32xf32>,
    %c8_235 = arith.constant 8 : index
    %c0_236 = arith.constant 0 : index
    %560 = vector.load %arg11[%c8_235, %c0_236] : memref<16x32xf32, #tpu.memory_space<vmem>>, vector<8x32xf32>
    tpu.vector_store %arg11[%c8_235, %c0_236], %558 {strides = array<i32>} : memref<16x32xf32, #tpu.memory_space<vmem>>, vector<8x32xf32>,
    %c0_237 = arith.constant 0 : index
    %c0_238 = arith.constant 0 : index
    %561 = vector.load %arg12[%c0_237, %c0_238] : memref<8x32xf32, #tpu.memory_space<vmem>>, vector<8x32xf32>
    tpu.vector_store %arg12[%c0_237, %c0_238], %530 {strides = array<i32>} : memref<8x32xf32, #tpu.memory_space<vmem>>, vector<8x32xf32>,
    %c0_239 = arith.constant 0 : index
    %c0_240 = arith.constant 0 : index
    %562 = vector.load %arg13[%c0_239, %c0_240] : memref<8x32xf32, #tpu.memory_space<vmem>>, vector<8x32xf32>
    tpu.vector_store %arg13[%c0_239, %c0_240], %556 {strides = array<i32>} : memref<8x32xf32, #tpu.memory_space<vmem>>, vector<8x32xf32>,
    %563 = arith.index_cast %c6_i32 : i32 to index
    %c0_241 = arith.constant 0 : index
    %c0_242 = arith.constant 0 : index
    %564 = vector.load %arg9[%563, %c0_241, %c0_242] : memref<8x8x64xf32, #tpu.memory_space<vmem>>, vector<1x8x32xf32>
    %565 = vector.shape_cast %564 : vector<1x8x32xf32> to vector<8x32xf32>
    %566 = vector.shape_cast %532 : vector<8x32xf32> to vector<1x8x32xf32>
    tpu.vector_store %arg9[%563, %c0_241, %c0_242], %566 {strides = array<i32>} : memref<8x8x64xf32, #tpu.memory_space<vmem>>, vector<1x8x32xf32>,
    %567 = arith.index_cast %492 : i32 to index
    %c0_243 = arith.constant 0 : index
    %c32_244 = arith.constant 32 : index
    %568 = vector.load %arg9[%567, %c0_243, %c32_244] : memref<8x8x64xf32, #tpu.memory_space<vmem>>, vector<1x8x32xf32>
    %569 = vector.shape_cast %568 : vector<1x8x32xf32> to vector<8x32xf32>
    %570 = vector.shape_cast %558 : vector<8x32xf32> to vector<1x8x32xf32>
    tpu.vector_store %arg9[%567, %c0_243, %c32_244], %570 {strides = array<i32>} : memref<8x8x64xf32, #tpu.memory_space<vmem>>, vector<1x8x32xf32>,
    %c7_i32_245 = arith.constant 7 : i32
    %c7_i32_246 = arith.constant 7 : i32
    %571 = arith.subi %c7_i32_246, %c7_i32_245 : i32
    %c0_247 = arith.constant 0 : index
    %c0_248 = arith.constant 0 : index
    %572 = vector.load %arg11[%c0_247, %c0_248] : memref<16x32xf32, #tpu.memory_space<vmem>>, vector<16x32xf32>
    %573 = arith.truncf %572 : vector<16x32xf32> to vector<16x32xbf16>
    %c0_249 = arith.constant 0 : index
    %c0_250 = arith.constant 0 : index
    %574 = vector.load %arg4[%c0_249, %c0_250] : memref<32x256xbf16, #tpu.memory_space<vmem>>, vector<32x256xbf16>
    %cst_251 = arith.constant dense<0.000000e+00> : vector<16x256xf32>
    %575 = tpu.matmul %573, %574, %cst_251 {dimension_numbers = #tpu.dot_dimension_numbers<[1], [0], [0], [1], [0, 0, 1, 1], [], []>} : vector<16x32xbf16>, vector<32x256xbf16>, vector<16x256xf32> -> vector<16x256xf32>
    %576 = arith.index_cast %c7_i32_245 : i32 to index
    %c0_252 = arith.constant 0 : index
    %c0_253 = arith.constant 0 : index
    %577 = vector.load %arg10[%576, %c0_252, %c0_253] : memref<8x8x256xf32, #tpu.memory_space<vmem>>, vector<1x8x128xf32>
    %578 = vector.shape_cast %577 : vector<1x8x128xf32> to vector<8x128xf32>
    %579 = vector.extract_strided_slice %575 {offsets = [0, 0], sizes = [8, 128], strides = [1, 1]} : vector<16x256xf32> to vector<8x128xf32>
    %580 = arith.addf %578, %579 : vector<8x128xf32>
    %581 = arith.index_cast %571 : i32 to index
    %c0_254 = arith.constant 0 : index
    %c128_255 = arith.constant 128 : index
    %582 = vector.load %arg10[%581, %c0_254, %c128_255] : memref<8x8x256xf32, #tpu.memory_space<vmem>>, vector<1x8x128xf32>
    %583 = vector.shape_cast %582 : vector<1x8x128xf32> to vector<8x128xf32>
    %584 = vector.extract_strided_slice %575 {offsets = [8, 128], sizes = [8, 128], strides = [1, 1]} : vector<16x256xf32> to vector<8x128xf32>
    %585 = arith.addf %583, %584 : vector<8x128xf32>
    %c0_256 = arith.constant 0 : index
    %c0_257 = arith.constant 0 : index
    %586 = vector.load %arg12[%c0_256, %c0_257] : memref<8x32xf32, #tpu.memory_space<vmem>>, vector<8x32xf32>
    %587 = vector.extract_strided_slice %580 {offsets = [0, 0], sizes = [8, 32], strides = [1, 1]} : vector<8x128xf32> to vector<8x32xf32>
    %588 = arith.negf %587 : vector<8x32xf32>
    %589 = math.exp %588 : vector<8x32xf32>
    %cst_258 = arith.constant 1.000000e+00 : f32
    %590 = vector.broadcast %cst_258 : f32 to vector<8x32xf32>
    %591 = arith.addf %590, %589 : vector<8x32xf32>
    %592 = arith.divf %590, %591 : vector<8x32xf32>
    %593 = vector.extract_strided_slice %580 {offsets = [0, 32], sizes = [8, 32], strides = [1, 1]} : vector<8x128xf32> to vector<8x32xf32>
    %594 = arith.negf %593 : vector<8x32xf32>
    %595 = math.exp %594 : vector<8x32xf32>
    %cst_259 = arith.constant 1.000000e+00 : f32
    %596 = vector.broadcast %cst_259 : f32 to vector<8x32xf32>
    %597 = arith.addf %596, %595 : vector<8x32xf32>
    %598 = arith.divf %596, %597 : vector<8x32xf32>
    %599 = vector.extract_strided_slice %580 {offsets = [0, 64], sizes = [8, 32], strides = [1, 1]} : vector<8x128xf32> to vector<8x32xf32>
    %600 = math.tanh %599 : vector<8x32xf32>
    %601 = vector.extract_strided_slice %580 {offsets = [0, 96], sizes = [8, 32], strides = [1, 1]} : vector<8x128xf32> to vector<8x32xf32>
    %602 = arith.negf %601 : vector<8x32xf32>
    %603 = math.exp %602 : vector<8x32xf32>
    %cst_260 = arith.constant 1.000000e+00 : f32
    %604 = vector.broadcast %cst_260 : f32 to vector<8x32xf32>
    %605 = arith.addf %604, %603 : vector<8x32xf32>
    %606 = arith.divf %604, %605 : vector<8x32xf32>
    %607 = arith.mulf %598, %586 : vector<8x32xf32>
    %608 = arith.mulf %592, %600 : vector<8x32xf32>
    %609 = arith.addf %607, %608 : vector<8x32xf32>
    %610 = math.tanh %609 : vector<8x32xf32>
    %611 = arith.mulf %606, %610 : vector<8x32xf32>
    %c0_261 = arith.constant 0 : index
    %c0_262 = arith.constant 0 : index
    %612 = vector.load %arg13[%c0_261, %c0_262] : memref<8x32xf32, #tpu.memory_space<vmem>>, vector<8x32xf32>
    %613 = vector.extract_strided_slice %585 {offsets = [0, 0], sizes = [8, 32], strides = [1, 1]} : vector<8x128xf32> to vector<8x32xf32>
    %614 = arith.negf %613 : vector<8x32xf32>
    %615 = math.exp %614 : vector<8x32xf32>
    %cst_263 = arith.constant 1.000000e+00 : f32
    %616 = vector.broadcast %cst_263 : f32 to vector<8x32xf32>
    %617 = arith.addf %616, %615 : vector<8x32xf32>
    %618 = arith.divf %616, %617 : vector<8x32xf32>
    %619 = vector.extract_strided_slice %585 {offsets = [0, 32], sizes = [8, 32], strides = [1, 1]} : vector<8x128xf32> to vector<8x32xf32>
    %620 = arith.negf %619 : vector<8x32xf32>
    %621 = math.exp %620 : vector<8x32xf32>
    %cst_264 = arith.constant 1.000000e+00 : f32
    %622 = vector.broadcast %cst_264 : f32 to vector<8x32xf32>
    %623 = arith.addf %622, %621 : vector<8x32xf32>
    %624 = arith.divf %622, %623 : vector<8x32xf32>
    %625 = vector.extract_strided_slice %585 {offsets = [0, 64], sizes = [8, 32], strides = [1, 1]} : vector<8x128xf32> to vector<8x32xf32>
    %626 = math.tanh %625 : vector<8x32xf32>
    %627 = vector.extract_strided_slice %585 {offsets = [0, 96], sizes = [8, 32], strides = [1, 1]} : vector<8x128xf32> to vector<8x32xf32>
    %628 = arith.negf %627 : vector<8x32xf32>
    %629 = math.exp %628 : vector<8x32xf32>
    %cst_265 = arith.constant 1.000000e+00 : f32
    %630 = vector.broadcast %cst_265 : f32 to vector<8x32xf32>
    %631 = arith.addf %630, %629 : vector<8x32xf32>
    %632 = arith.divf %630, %631 : vector<8x32xf32>
    %633 = arith.mulf %624, %612 : vector<8x32xf32>
    %634 = arith.mulf %618, %626 : vector<8x32xf32>
    %635 = arith.addf %633, %634 : vector<8x32xf32>
    %636 = math.tanh %635 : vector<8x32xf32>
    %637 = arith.mulf %632, %636 : vector<8x32xf32>
    %c0_266 = arith.constant 0 : index
    %c0_267 = arith.constant 0 : index
    %638 = vector.load %arg11[%c0_266, %c0_267] : memref<16x32xf32, #tpu.memory_space<vmem>>, vector<8x32xf32>
    tpu.vector_store %arg11[%c0_266, %c0_267], %611 {strides = array<i32>} : memref<16x32xf32, #tpu.memory_space<vmem>>, vector<8x32xf32>,
    %c8_268 = arith.constant 8 : index
    %c0_269 = arith.constant 0 : index
    %639 = vector.load %arg11[%c8_268, %c0_269] : memref<16x32xf32, #tpu.memory_space<vmem>>, vector<8x32xf32>
    tpu.vector_store %arg11[%c8_268, %c0_269], %637 {strides = array<i32>} : memref<16x32xf32, #tpu.memory_space<vmem>>, vector<8x32xf32>,
    %c0_270 = arith.constant 0 : index
    %c0_271 = arith.constant 0 : index
    %640 = vector.load %arg12[%c0_270, %c0_271] : memref<8x32xf32, #tpu.memory_space<vmem>>, vector<8x32xf32>
    tpu.vector_store %arg12[%c0_270, %c0_271], %609 {strides = array<i32>} : memref<8x32xf32, #tpu.memory_space<vmem>>, vector<8x32xf32>,
    %c0_272 = arith.constant 0 : index
    %c0_273 = arith.constant 0 : index
    %641 = vector.load %arg13[%c0_272, %c0_273] : memref<8x32xf32, #tpu.memory_space<vmem>>, vector<8x32xf32>
    tpu.vector_store %arg13[%c0_272, %c0_273], %635 {strides = array<i32>} : memref<8x32xf32, #tpu.memory_space<vmem>>, vector<8x32xf32>,
    %642 = arith.index_cast %c7_i32_245 : i32 to index
    %c0_274 = arith.constant 0 : index
    %c0_275 = arith.constant 0 : index
    %643 = vector.load %arg9[%642, %c0_274, %c0_275] : memref<8x8x64xf32, #tpu.memory_space<vmem>>, vector<1x8x32xf32>
    %644 = vector.shape_cast %643 : vector<1x8x32xf32> to vector<8x32xf32>
    %645 = vector.shape_cast %611 : vector<8x32xf32> to vector<1x8x32xf32>
    tpu.vector_store %arg9[%642, %c0_274, %c0_275], %645 {strides = array<i32>} : memref<8x8x64xf32, #tpu.memory_space<vmem>>, vector<1x8x32xf32>,
    %646 = arith.index_cast %571 : i32 to index
    %c0_276 = arith.constant 0 : index
    %c32_277 = arith.constant 32 : index
    %647 = vector.load %arg9[%646, %c0_276, %c32_277] : memref<8x8x64xf32, #tpu.memory_space<vmem>>, vector<1x8x32xf32>
    %648 = vector.shape_cast %647 : vector<1x8x32xf32> to vector<8x32xf32>
    %649 = vector.shape_cast %637 : vector<8x32xf32> to vector<1x8x32xf32>
    tpu.vector_store %arg9[%646, %c0_276, %c32_277], %649 {strides = array<i32>} : memref<8x8x64xf32, #tpu.memory_space<vmem>>, vector<1x8x32xf32>,
    %c8_i32 = arith.constant 8 : i32
    return
  }
  func.func @transform_0(%arg0: i32) -> (i32, i32, i32) {
    %c0_i32 = arith.constant 0 : i32
    %c0_i32_0 = arith.constant 0 : i32
    %c0_i32_1 = arith.constant 0 : i32
    return %c0_i32, %arg0, %c0_i32_0 : i32, i32, i32
  }
  func.func @transform_1(%arg0: i32) -> (i32, i32) {
    %c0_i32 = arith.constant 0 : i32
    %c0_i32_0 = arith.constant 0 : i32
    %c0_i32_1 = arith.constant 0 : i32
    return %c0_i32, %c0_i32_0 : i32, i32
  }
  func.func @transform_2(%arg0: i32) -> (i32, i32) {
    %c0_i32 = arith.constant 0 : i32
    %c0_i32_0 = arith.constant 0 : i32
    %c0_i32_1 = arith.constant 0 : i32
    return %c0_i32, %c0_i32_0 : i32, i32
  }
  func.func @transform_3(%arg0: i32) -> (i32, i32) {
    %c0_i32 = arith.constant 0 : i32
    %c0_i32_0 = arith.constant 0 : i32
    %c0_i32_1 = arith.constant 0 : i32
    return %c0_i32, %c0_i32_0 : i32, i32
  }
  func.func @transform_4(%arg0: i32) -> (i32, i32) {
    %c0_i32 = arith.constant 0 : i32
    %c0_i32_0 = arith.constant 0 : i32
    return %arg0, %c0_i32 : i32, i32
  }
  func.func @transform_5(%arg0: i32) -> (i32, i32) {
    %c0_i32 = arith.constant 0 : i32
    %c0_i32_0 = arith.constant 0 : i32
    return %arg0, %c0_i32 : i32, i32
  }
  func.func @transform_6(%arg0: i32) -> (i32, i32) {
    %c0_i32 = arith.constant 0 : i32
    %c0_i32_0 = arith.constant 0 : i32
    return %arg0, %c0_i32 : i32, i32
  }
  func.func @transform_7(%arg0: i32) -> (i32, i32) {
    %c0_i32 = arith.constant 0 : i32
    %c0_i32_0 = arith.constant 0 : i32
    return %arg0, %c0_i32 : i32, i32
  }
  func.func @transform_8(%arg0: i32) -> (i32, i32, i32) {
    %c0_i32 = arith.constant 0 : i32
    %c0_i32_0 = arith.constant 0 : i32
    %c0_i32_1 = arith.constant 0 : i32
    return %c0_i32, %arg0, %c0_i32_0 : i32, i32, i32
  }
}

module attributes {stable_mosaic.version = 11 : i64} {
  func.func @_crf_decode_kernel(%arg0: i32, %arg1: memref<8x8x64xf32, #tpu.memory_space<vmem>>, %arg2: memref<64x5xbf16, #tpu.memory_space<vmem>>, %arg3: memref<1x5xf32, #tpu.memory_space<vmem>>, %arg4: memref<5x5xf32, #tpu.memory_space<vmem>>, %arg5: memref<1x5xf32, #tpu.memory_space<vmem>>, %arg6: memref<1x5xf32, #tpu.memory_space<vmem>>, %arg7: memref<8x1xi32, #tpu.memory_space<vmem>>, %arg8: memref<1x8x8xi32, #tpu.memory_space<vmem>>, %arg9: memref<8x8x5xf32, #tpu.memory_space<vmem>>, %arg10: memref<8x5xf32, #tpu.memory_space<vmem>>, %arg11: memref<8x8x5xi32, #tpu.memory_space<vmem>>, %arg12: memref<8x1xi32, #tpu.memory_space<vmem>>, %arg13: memref<8x8xi32, #tpu.memory_space<vmem>>) attributes {dimension_semantics = [#tpu.dimension_semantics<parallel>], iteration_bounds = array<i64: 1>, scalar_prefetch = 0 : i64, scratch_operands = 5 : i64, tpu.core_type = #tpu.core_type<tc>, window_params = [{transform_indices = @transform_0, window_bounds = array<i64: 8, 8, 64>}, {pipeline_mode = #tpu.pipeline_mode<synchronous>, transform_indices = @transform_1, window_bounds = array<i64: 64, 5>}, {pipeline_mode = #tpu.pipeline_mode<synchronous>, transform_indices = @transform_2, window_bounds = array<i64: 1, 5>}, {pipeline_mode = #tpu.pipeline_mode<synchronous>, transform_indices = @transform_3, window_bounds = array<i64: 5, 5>}, {pipeline_mode = #tpu.pipeline_mode<synchronous>, transform_indices = @transform_4, window_bounds = array<i64: 1, 5>}, {pipeline_mode = #tpu.pipeline_mode<synchronous>, transform_indices = @transform_5, window_bounds = array<i64: 1, 5>}, {transform_indices = @transform_6, window_bounds = array<i64: 8, 1>}, {transform_indices = @transform_7, window_bounds = array<i64: 1, 8, 8>}]} {
    %c0 = arith.constant 0 : index
    %c0_0 = arith.constant 0 : index
    %c0_1 = arith.constant 0 : index
    %0 = vector.load %arg1[%c0, %c0_0, %c0_1] : memref<8x8x64xf32, #tpu.memory_space<vmem>>, vector<8x8x64xf32>
    %1 = vector.shape_cast %0 : vector<8x8x64xf32> to vector<64x64xf32>
    %2 = arith.truncf %1 : vector<64x64xf32> to vector<64x64xbf16>
    %c0_2 = arith.constant 0 : index
    %c0_3 = arith.constant 0 : index
    %3 = vector.load %arg2[%c0_2, %c0_3] : memref<64x5xbf16, #tpu.memory_space<vmem>>, vector<64x5xbf16>
    %cst = arith.constant dense<0.000000e+00> : vector<64x5xf32>
    %4 = tpu.matmul %2, %3, %cst {dimension_numbers = #tpu.dot_dimension_numbers<[1], [0], [0], [1], [0, 0, 1, 1], [], []>} : vector<64x64xbf16>, vector<64x5xbf16>, vector<64x5xf32> -> vector<64x5xf32>
    %c0_4 = arith.constant 0 : index
    %c0_5 = arith.constant 0 : index
    %5 = vector.load %arg3[%c0_4, %c0_5] : memref<1x5xf32, #tpu.memory_space<vmem>>, vector<1x5xf32>
    %6 = vector.broadcast %5 : vector<1x5xf32> to vector<64x5xf32>
    %7 = arith.addf %4, %6 : vector<64x5xf32>
    %8 = vector.shape_cast %7 : vector<64x5xf32> to vector<8x8x5xf32>
    %c0_6 = arith.constant 0 : index
    %c0_7 = arith.constant 0 : index
    %c0_8 = arith.constant 0 : index
    %9 = vector.load %arg9[%c0_6, %c0_7, %c0_8] : memref<8x8x5xf32, #tpu.memory_space<vmem>>, vector<8x8x5xf32>
    tpu.vector_store %arg9[%c0_6, %c0_7, %c0_8], %8 {strides = array<i32>} : memref<8x8x5xf32, #tpu.memory_space<vmem>>, vector<8x8x5xf32>,
    %c0_9 = arith.constant 0 : index
    %c0_10 = arith.constant 0 : index
    %10 = vector.load %arg4[%c0_9, %c0_10] : memref<5x5xf32, #tpu.memory_space<vmem>>, vector<5x5xf32>
    %11 = vector.shape_cast %10 : vector<5x5xf32> to vector<1x5x5xf32>
    %12 = tpu.iota {dimensions = array<i32: 2>} : vector<8x5x5xi32>
    %13 = tpu.iota {dimensions = array<i32: 1>} : vector<8x5xi32>
    %14 = tpu.iota {dimensions = array<i32: 1>} : vector<8x8xi32>
    %c0_11 = arith.constant 0 : index
    %c0_12 = arith.constant 0 : index
    %15 = vector.load %arg7[%c0_11, %c0_12] : memref<8x1xi32, #tpu.memory_space<vmem>>, vector<8x1xi32>
    %c0_13 = arith.constant 0 : index
    %c0_14 = arith.constant 0 : index
    %16 = vector.load %arg5[%c0_13, %c0_14] : memref<1x5xf32, #tpu.memory_space<vmem>>, vector<1x5xf32>
    %c0_15 = arith.constant 0 : index
    %c0_16 = arith.constant 0 : index
    %c0_17 = arith.constant 0 : index
    %17 = vector.load %arg9[%c0_15, %c0_16, %c0_17] : memref<8x8x5xf32, #tpu.memory_space<vmem>>, vector<1x8x5xf32>
    %18 = vector.shape_cast %17 : vector<1x8x5xf32> to vector<8x5xf32>
    %19 = vector.broadcast %16 : vector<1x5xf32> to vector<8x5xf32>
    %20 = arith.addf %19, %18 : vector<8x5xf32>
    %c0_18 = arith.constant 0 : index
    %c0_19 = arith.constant 0 : index
    %21 = vector.load %arg10[%c0_18, %c0_19] : memref<8x5xf32, #tpu.memory_space<vmem>>, vector<8x5xf32>
    tpu.vector_store %arg10[%c0_18, %c0_19], %20 {strides = array<i32>} : memref<8x5xf32, #tpu.memory_space<vmem>>, vector<8x5xf32>,
    %c1_i32 = arith.constant 1 : i32
    %c0_20 = arith.constant 0 : index
    %c0_21 = arith.constant 0 : index
    %22 = vector.load %arg10[%c0_20, %c0_21] : memref<8x5xf32, #tpu.memory_space<vmem>>, vector<8x5xf32>
    %23 = vector.shape_cast %22 : vector<8x5xf32> to vector<8x1x5xf32>
    %24 = vector.broadcast %23 : vector<8x1x5xf32> to vector<8x5x5xf32>
    %25 = vector.broadcast %11 : vector<1x5x5xf32> to vector<8x5x5xf32>
    %26 = arith.addf %24, %25 : vector<8x5x5xf32>
    %27 = arith.index_cast %c1_i32 : i32 to index
    %c0_22 = arith.constant 0 : index
    %c0_23 = arith.constant 0 : index
    %28 = vector.load %arg9[%27, %c0_22, %c0_23] : memref<8x8x5xf32, #tpu.memory_space<vmem>>, vector<1x8x5xf32>
    %29 = vector.shape_cast %28 : vector<1x8x5xf32> to vector<8x5xf32>
    %30 = vector.shape_cast %29 : vector<8x5xf32> to vector<8x5x1xf32>
    %31 = vector.broadcast %30 : vector<8x5x1xf32> to vector<8x5x5xf32>
    %32 = arith.addf %26, %31 : vector<8x5x5xf32>
    %cst_24 = arith.constant dense<0xFF800000> : vector<8x5xf32>
    %33 = vector.multi_reduction <maximumf>, %32, %cst_24 [2] : vector<8x5x5xf32> to vector<8x5xf32>
    %34 = vector.shape_cast %33 : vector<8x5xf32> to vector<8x5x1xf32>
    %35 = vector.broadcast %34 : vector<8x5x1xf32> to vector<8x5x5xf32>
    %36 = arith.cmpf oeq, %32, %35 : vector<8x5x5xf32>
    %c5_i32 = arith.constant 5 : i32
    %37 = vector.broadcast %c5_i32 : i32 to vector<8x5x5xi32>
    %38 = arith.select %36, %12, %37 : vector<8x5x5xi1>, vector<8x5x5xi32>
    %cst_25 = arith.constant dense<2147483647> : vector<8x5xi32>
    %39 = vector.multi_reduction <minsi>, %38, %cst_25 [2] : vector<8x5x5xi32> to vector<8x5xi32>
    %40 = vector.broadcast %c1_i32 : i32 to vector<8x1xi32>
    %41 = arith.cmpi sle, %40, %15 : vector<8x1xi32>
    %42 = vector.shape_cast %41 : vector<8x1xi1> to vector<8x1xi1>
    %43 = vector.broadcast %42 : vector<8x1xi1> to vector<8x5xi1>
    %44 = arith.select %43, %33, %22 : vector<8x5xi1>, vector<8x5xf32>
    %c0_26 = arith.constant 0 : index
    %c0_27 = arith.constant 0 : index
    %45 = vector.load %arg10[%c0_26, %c0_27] : memref<8x5xf32, #tpu.memory_space<vmem>>, vector<8x5xf32>
    tpu.vector_store %arg10[%c0_26, %c0_27], %44 {strides = array<i32>} : memref<8x5xf32, #tpu.memory_space<vmem>>, vector<8x5xf32>,
    %46 = arith.index_cast %c1_i32 : i32 to index
    %c0_28 = arith.constant 0 : index
    %c0_29 = arith.constant 0 : index
    %47 = vector.load %arg11[%46, %c0_28, %c0_29] : memref<8x8x5xi32, #tpu.memory_space<vmem>>, vector<1x8x5xi32>
    %48 = vector.shape_cast %47 : vector<1x8x5xi32> to vector<8x5xi32>
    %49 = vector.shape_cast %39 : vector<8x5xi32> to vector<1x8x5xi32>
    tpu.vector_store %arg11[%46, %c0_28, %c0_29], %49 {strides = array<i32>} : memref<8x8x5xi32, #tpu.memory_space<vmem>>, vector<1x8x5xi32>,
    %c2_i32 = arith.constant 2 : i32
    %c0_30 = arith.constant 0 : index
    %c0_31 = arith.constant 0 : index
    %50 = vector.load %arg10[%c0_30, %c0_31] : memref<8x5xf32, #tpu.memory_space<vmem>>, vector<8x5xf32>
    %51 = vector.shape_cast %50 : vector<8x5xf32> to vector<8x1x5xf32>
    %52 = vector.broadcast %51 : vector<8x1x5xf32> to vector<8x5x5xf32>
    %53 = vector.broadcast %11 : vector<1x5x5xf32> to vector<8x5x5xf32>
    %54 = arith.addf %52, %53 : vector<8x5x5xf32>
    %55 = arith.index_cast %c2_i32 : i32 to index
    %c0_32 = arith.constant 0 : index
    %c0_33 = arith.constant 0 : index
    %56 = vector.load %arg9[%55, %c0_32, %c0_33] : memref<8x8x5xf32, #tpu.memory_space<vmem>>, vector<1x8x5xf32>
    %57 = vector.shape_cast %56 : vector<1x8x5xf32> to vector<8x5xf32>
    %58 = vector.shape_cast %57 : vector<8x5xf32> to vector<8x5x1xf32>
    %59 = vector.broadcast %58 : vector<8x5x1xf32> to vector<8x5x5xf32>
    %60 = arith.addf %54, %59 : vector<8x5x5xf32>
    %cst_34 = arith.constant dense<0xFF800000> : vector<8x5xf32>
    %61 = vector.multi_reduction <maximumf>, %60, %cst_34 [2] : vector<8x5x5xf32> to vector<8x5xf32>
    %62 = vector.shape_cast %61 : vector<8x5xf32> to vector<8x5x1xf32>
    %63 = vector.broadcast %62 : vector<8x5x1xf32> to vector<8x5x5xf32>
    %64 = arith.cmpf oeq, %60, %63 : vector<8x5x5xf32>
    %c5_i32_35 = arith.constant 5 : i32
    %65 = vector.broadcast %c5_i32_35 : i32 to vector<8x5x5xi32>
    %66 = arith.select %64, %12, %65 : vector<8x5x5xi1>, vector<8x5x5xi32>
    %cst_36 = arith.constant dense<2147483647> : vector<8x5xi32>
    %67 = vector.multi_reduction <minsi>, %66, %cst_36 [2] : vector<8x5x5xi32> to vector<8x5xi32>
    %68 = vector.broadcast %c2_i32 : i32 to vector<8x1xi32>
    %69 = arith.cmpi sle, %68, %15 : vector<8x1xi32>
    %70 = vector.shape_cast %69 : vector<8x1xi1> to vector<8x1xi1>
    %71 = vector.broadcast %70 : vector<8x1xi1> to vector<8x5xi1>
    %72 = arith.select %71, %61, %50 : vector<8x5xi1>, vector<8x5xf32>
    %c0_37 = arith.constant 0 : index
    %c0_38 = arith.constant 0 : index
    %73 = vector.load %arg10[%c0_37, %c0_38] : memref<8x5xf32, #tpu.memory_space<vmem>>, vector<8x5xf32>
    tpu.vector_store %arg10[%c0_37, %c0_38], %72 {strides = array<i32>} : memref<8x5xf32, #tpu.memory_space<vmem>>, vector<8x5xf32>,
    %74 = arith.index_cast %c2_i32 : i32 to index
    %c0_39 = arith.constant 0 : index
    %c0_40 = arith.constant 0 : index
    %75 = vector.load %arg11[%74, %c0_39, %c0_40] : memref<8x8x5xi32, #tpu.memory_space<vmem>>, vector<1x8x5xi32>
    %76 = vector.shape_cast %75 : vector<1x8x5xi32> to vector<8x5xi32>
    %77 = vector.shape_cast %67 : vector<8x5xi32> to vector<1x8x5xi32>
    tpu.vector_store %arg11[%74, %c0_39, %c0_40], %77 {strides = array<i32>} : memref<8x8x5xi32, #tpu.memory_space<vmem>>, vector<1x8x5xi32>,
    %c3_i32 = arith.constant 3 : i32
    %c0_41 = arith.constant 0 : index
    %c0_42 = arith.constant 0 : index
    %78 = vector.load %arg10[%c0_41, %c0_42] : memref<8x5xf32, #tpu.memory_space<vmem>>, vector<8x5xf32>
    %79 = vector.shape_cast %78 : vector<8x5xf32> to vector<8x1x5xf32>
    %80 = vector.broadcast %79 : vector<8x1x5xf32> to vector<8x5x5xf32>
    %81 = vector.broadcast %11 : vector<1x5x5xf32> to vector<8x5x5xf32>
    %82 = arith.addf %80, %81 : vector<8x5x5xf32>
    %83 = arith.index_cast %c3_i32 : i32 to index
    %c0_43 = arith.constant 0 : index
    %c0_44 = arith.constant 0 : index
    %84 = vector.load %arg9[%83, %c0_43, %c0_44] : memref<8x8x5xf32, #tpu.memory_space<vmem>>, vector<1x8x5xf32>
    %85 = vector.shape_cast %84 : vector<1x8x5xf32> to vector<8x5xf32>
    %86 = vector.shape_cast %85 : vector<8x5xf32> to vector<8x5x1xf32>
    %87 = vector.broadcast %86 : vector<8x5x1xf32> to vector<8x5x5xf32>
    %88 = arith.addf %82, %87 : vector<8x5x5xf32>
    %cst_45 = arith.constant dense<0xFF800000> : vector<8x5xf32>
    %89 = vector.multi_reduction <maximumf>, %88, %cst_45 [2] : vector<8x5x5xf32> to vector<8x5xf32>
    %90 = vector.shape_cast %89 : vector<8x5xf32> to vector<8x5x1xf32>
    %91 = vector.broadcast %90 : vector<8x5x1xf32> to vector<8x5x5xf32>
    %92 = arith.cmpf oeq, %88, %91 : vector<8x5x5xf32>
    %c5_i32_46 = arith.constant 5 : i32
    %93 = vector.broadcast %c5_i32_46 : i32 to vector<8x5x5xi32>
    %94 = arith.select %92, %12, %93 : vector<8x5x5xi1>, vector<8x5x5xi32>
    %cst_47 = arith.constant dense<2147483647> : vector<8x5xi32>
    %95 = vector.multi_reduction <minsi>, %94, %cst_47 [2] : vector<8x5x5xi32> to vector<8x5xi32>
    %96 = vector.broadcast %c3_i32 : i32 to vector<8x1xi32>
    %97 = arith.cmpi sle, %96, %15 : vector<8x1xi32>
    %98 = vector.shape_cast %97 : vector<8x1xi1> to vector<8x1xi1>
    %99 = vector.broadcast %98 : vector<8x1xi1> to vector<8x5xi1>
    %100 = arith.select %99, %89, %78 : vector<8x5xi1>, vector<8x5xf32>
    %c0_48 = arith.constant 0 : index
    %c0_49 = arith.constant 0 : index
    %101 = vector.load %arg10[%c0_48, %c0_49] : memref<8x5xf32, #tpu.memory_space<vmem>>, vector<8x5xf32>
    tpu.vector_store %arg10[%c0_48, %c0_49], %100 {strides = array<i32>} : memref<8x5xf32, #tpu.memory_space<vmem>>, vector<8x5xf32>,
    %102 = arith.index_cast %c3_i32 : i32 to index
    %c0_50 = arith.constant 0 : index
    %c0_51 = arith.constant 0 : index
    %103 = vector.load %arg11[%102, %c0_50, %c0_51] : memref<8x8x5xi32, #tpu.memory_space<vmem>>, vector<1x8x5xi32>
    %104 = vector.shape_cast %103 : vector<1x8x5xi32> to vector<8x5xi32>
    %105 = vector.shape_cast %95 : vector<8x5xi32> to vector<1x8x5xi32>
    tpu.vector_store %arg11[%102, %c0_50, %c0_51], %105 {strides = array<i32>} : memref<8x8x5xi32, #tpu.memory_space<vmem>>, vector<1x8x5xi32>,
    %c4_i32 = arith.constant 4 : i32
    %c0_52 = arith.constant 0 : index
    %c0_53 = arith.constant 0 : index
    %106 = vector.load %arg10[%c0_52, %c0_53] : memref<8x5xf32, #tpu.memory_space<vmem>>, vector<8x5xf32>
    %107 = vector.shape_cast %106 : vector<8x5xf32> to vector<8x1x5xf32>
    %108 = vector.broadcast %107 : vector<8x1x5xf32> to vector<8x5x5xf32>
    %109 = vector.broadcast %11 : vector<1x5x5xf32> to vector<8x5x5xf32>
    %110 = arith.addf %108, %109 : vector<8x5x5xf32>
    %111 = arith.index_cast %c4_i32 : i32 to index
    %c0_54 = arith.constant 0 : index
    %c0_55 = arith.constant 0 : index
    %112 = vector.load %arg9[%111, %c0_54, %c0_55] : memref<8x8x5xf32, #tpu.memory_space<vmem>>, vector<1x8x5xf32>
    %113 = vector.shape_cast %112 : vector<1x8x5xf32> to vector<8x5xf32>
    %114 = vector.shape_cast %113 : vector<8x5xf32> to vector<8x5x1xf32>
    %115 = vector.broadcast %114 : vector<8x5x1xf32> to vector<8x5x5xf32>
    %116 = arith.addf %110, %115 : vector<8x5x5xf32>
    %cst_56 = arith.constant dense<0xFF800000> : vector<8x5xf32>
    %117 = vector.multi_reduction <maximumf>, %116, %cst_56 [2] : vector<8x5x5xf32> to vector<8x5xf32>
    %118 = vector.shape_cast %117 : vector<8x5xf32> to vector<8x5x1xf32>
    %119 = vector.broadcast %118 : vector<8x5x1xf32> to vector<8x5x5xf32>
    %120 = arith.cmpf oeq, %116, %119 : vector<8x5x5xf32>
    %c5_i32_57 = arith.constant 5 : i32
    %121 = vector.broadcast %c5_i32_57 : i32 to vector<8x5x5xi32>
    %122 = arith.select %120, %12, %121 : vector<8x5x5xi1>, vector<8x5x5xi32>
    %cst_58 = arith.constant dense<2147483647> : vector<8x5xi32>
    %123 = vector.multi_reduction <minsi>, %122, %cst_58 [2] : vector<8x5x5xi32> to vector<8x5xi32>
    %124 = vector.broadcast %c4_i32 : i32 to vector<8x1xi32>
    %125 = arith.cmpi sle, %124, %15 : vector<8x1xi32>
    %126 = vector.shape_cast %125 : vector<8x1xi1> to vector<8x1xi1>
    %127 = vector.broadcast %126 : vector<8x1xi1> to vector<8x5xi1>
    %128 = arith.select %127, %117, %106 : vector<8x5xi1>, vector<8x5xf32>
    %c0_59 = arith.constant 0 : index
    %c0_60 = arith.constant 0 : index
    %129 = vector.load %arg10[%c0_59, %c0_60] : memref<8x5xf32, #tpu.memory_space<vmem>>, vector<8x5xf32>
    tpu.vector_store %arg10[%c0_59, %c0_60], %128 {strides = array<i32>} : memref<8x5xf32, #tpu.memory_space<vmem>>, vector<8x5xf32>,
    %130 = arith.index_cast %c4_i32 : i32 to index
    %c0_61 = arith.constant 0 : index
    %c0_62 = arith.constant 0 : index
    %131 = vector.load %arg11[%130, %c0_61, %c0_62] : memref<8x8x5xi32, #tpu.memory_space<vmem>>, vector<1x8x5xi32>
    %132 = vector.shape_cast %131 : vector<1x8x5xi32> to vector<8x5xi32>
    %133 = vector.shape_cast %123 : vector<8x5xi32> to vector<1x8x5xi32>
    tpu.vector_store %arg11[%130, %c0_61, %c0_62], %133 {strides = array<i32>} : memref<8x8x5xi32, #tpu.memory_space<vmem>>, vector<1x8x5xi32>,
    %c5_i32_63 = arith.constant 5 : i32
    %c0_64 = arith.constant 0 : index
    %c0_65 = arith.constant 0 : index
    %134 = vector.load %arg10[%c0_64, %c0_65] : memref<8x5xf32, #tpu.memory_space<vmem>>, vector<8x5xf32>
    %135 = vector.shape_cast %134 : vector<8x5xf32> to vector<8x1x5xf32>
    %136 = vector.broadcast %135 : vector<8x1x5xf32> to vector<8x5x5xf32>
    %137 = vector.broadcast %11 : vector<1x5x5xf32> to vector<8x5x5xf32>
    %138 = arith.addf %136, %137 : vector<8x5x5xf32>
    %139 = arith.index_cast %c5_i32_63 : i32 to index
    %c0_66 = arith.constant 0 : index
    %c0_67 = arith.constant 0 : index
    %140 = vector.load %arg9[%139, %c0_66, %c0_67] : memref<8x8x5xf32, #tpu.memory_space<vmem>>, vector<1x8x5xf32>
    %141 = vector.shape_cast %140 : vector<1x8x5xf32> to vector<8x5xf32>
    %142 = vector.shape_cast %141 : vector<8x5xf32> to vector<8x5x1xf32>
    %143 = vector.broadcast %142 : vector<8x5x1xf32> to vector<8x5x5xf32>
    %144 = arith.addf %138, %143 : vector<8x5x5xf32>
    %cst_68 = arith.constant dense<0xFF800000> : vector<8x5xf32>
    %145 = vector.multi_reduction <maximumf>, %144, %cst_68 [2] : vector<8x5x5xf32> to vector<8x5xf32>
    %146 = vector.shape_cast %145 : vector<8x5xf32> to vector<8x5x1xf32>
    %147 = vector.broadcast %146 : vector<8x5x1xf32> to vector<8x5x5xf32>
    %148 = arith.cmpf oeq, %144, %147 : vector<8x5x5xf32>
    %c5_i32_69 = arith.constant 5 : i32
    %149 = vector.broadcast %c5_i32_69 : i32 to vector<8x5x5xi32>
    %150 = arith.select %148, %12, %149 : vector<8x5x5xi1>, vector<8x5x5xi32>
    %cst_70 = arith.constant dense<2147483647> : vector<8x5xi32>
    %151 = vector.multi_reduction <minsi>, %150, %cst_70 [2] : vector<8x5x5xi32> to vector<8x5xi32>
    %152 = vector.broadcast %c5_i32_63 : i32 to vector<8x1xi32>
    %153 = arith.cmpi sle, %152, %15 : vector<8x1xi32>
    %154 = vector.shape_cast %153 : vector<8x1xi1> to vector<8x1xi1>
    %155 = vector.broadcast %154 : vector<8x1xi1> to vector<8x5xi1>
    %156 = arith.select %155, %145, %134 : vector<8x5xi1>, vector<8x5xf32>
    %c0_71 = arith.constant 0 : index
    %c0_72 = arith.constant 0 : index
    %157 = vector.load %arg10[%c0_71, %c0_72] : memref<8x5xf32, #tpu.memory_space<vmem>>, vector<8x5xf32>
    tpu.vector_store %arg10[%c0_71, %c0_72], %156 {strides = array<i32>} : memref<8x5xf32, #tpu.memory_space<vmem>>, vector<8x5xf32>,
    %158 = arith.index_cast %c5_i32_63 : i32 to index
    %c0_73 = arith.constant 0 : index
    %c0_74 = arith.constant 0 : index
    %159 = vector.load %arg11[%158, %c0_73, %c0_74] : memref<8x8x5xi32, #tpu.memory_space<vmem>>, vector<1x8x5xi32>
    %160 = vector.shape_cast %159 : vector<1x8x5xi32> to vector<8x5xi32>
    %161 = vector.shape_cast %151 : vector<8x5xi32> to vector<1x8x5xi32>
    tpu.vector_store %arg11[%158, %c0_73, %c0_74], %161 {strides = array<i32>} : memref<8x8x5xi32, #tpu.memory_space<vmem>>, vector<1x8x5xi32>,
    %c6_i32 = arith.constant 6 : i32
    %c0_75 = arith.constant 0 : index
    %c0_76 = arith.constant 0 : index
    %162 = vector.load %arg10[%c0_75, %c0_76] : memref<8x5xf32, #tpu.memory_space<vmem>>, vector<8x5xf32>
    %163 = vector.shape_cast %162 : vector<8x5xf32> to vector<8x1x5xf32>
    %164 = vector.broadcast %163 : vector<8x1x5xf32> to vector<8x5x5xf32>
    %165 = vector.broadcast %11 : vector<1x5x5xf32> to vector<8x5x5xf32>
    %166 = arith.addf %164, %165 : vector<8x5x5xf32>
    %167 = arith.index_cast %c6_i32 : i32 to index
    %c0_77 = arith.constant 0 : index
    %c0_78 = arith.constant 0 : index
    %168 = vector.load %arg9[%167, %c0_77, %c0_78] : memref<8x8x5xf32, #tpu.memory_space<vmem>>, vector<1x8x5xf32>
    %169 = vector.shape_cast %168 : vector<1x8x5xf32> to vector<8x5xf32>
    %170 = vector.shape_cast %169 : vector<8x5xf32> to vector<8x5x1xf32>
    %171 = vector.broadcast %170 : vector<8x5x1xf32> to vector<8x5x5xf32>
    %172 = arith.addf %166, %171 : vector<8x5x5xf32>
    %cst_79 = arith.constant dense<0xFF800000> : vector<8x5xf32>
    %173 = vector.multi_reduction <maximumf>, %172, %cst_79 [2] : vector<8x5x5xf32> to vector<8x5xf32>
    %174 = vector.shape_cast %173 : vector<8x5xf32> to vector<8x5x1xf32>
    %175 = vector.broadcast %174 : vector<8x5x1xf32> to vector<8x5x5xf32>
    %176 = arith.cmpf oeq, %172, %175 : vector<8x5x5xf32>
    %c5_i32_80 = arith.constant 5 : i32
    %177 = vector.broadcast %c5_i32_80 : i32 to vector<8x5x5xi32>
    %178 = arith.select %176, %12, %177 : vector<8x5x5xi1>, vector<8x5x5xi32>
    %cst_81 = arith.constant dense<2147483647> : vector<8x5xi32>
    %179 = vector.multi_reduction <minsi>, %178, %cst_81 [2] : vector<8x5x5xi32> to vector<8x5xi32>
    %180 = vector.broadcast %c6_i32 : i32 to vector<8x1xi32>
    %181 = arith.cmpi sle, %180, %15 : vector<8x1xi32>
    %182 = vector.shape_cast %181 : vector<8x1xi1> to vector<8x1xi1>
    %183 = vector.broadcast %182 : vector<8x1xi1> to vector<8x5xi1>
    %184 = arith.select %183, %173, %162 : vector<8x5xi1>, vector<8x5xf32>
    %c0_82 = arith.constant 0 : index
    %c0_83 = arith.constant 0 : index
    %185 = vector.load %arg10[%c0_82, %c0_83] : memref<8x5xf32, #tpu.memory_space<vmem>>, vector<8x5xf32>
    tpu.vector_store %arg10[%c0_82, %c0_83], %184 {strides = array<i32>} : memref<8x5xf32, #tpu.memory_space<vmem>>, vector<8x5xf32>,
    %186 = arith.index_cast %c6_i32 : i32 to index
    %c0_84 = arith.constant 0 : index
    %c0_85 = arith.constant 0 : index
    %187 = vector.load %arg11[%186, %c0_84, %c0_85] : memref<8x8x5xi32, #tpu.memory_space<vmem>>, vector<1x8x5xi32>
    %188 = vector.shape_cast %187 : vector<1x8x5xi32> to vector<8x5xi32>
    %189 = vector.shape_cast %179 : vector<8x5xi32> to vector<1x8x5xi32>
    tpu.vector_store %arg11[%186, %c0_84, %c0_85], %189 {strides = array<i32>} : memref<8x8x5xi32, #tpu.memory_space<vmem>>, vector<1x8x5xi32>,
    %c7_i32 = arith.constant 7 : i32
    %c0_86 = arith.constant 0 : index
    %c0_87 = arith.constant 0 : index
    %190 = vector.load %arg10[%c0_86, %c0_87] : memref<8x5xf32, #tpu.memory_space<vmem>>, vector<8x5xf32>
    %191 = vector.shape_cast %190 : vector<8x5xf32> to vector<8x1x5xf32>
    %192 = vector.broadcast %191 : vector<8x1x5xf32> to vector<8x5x5xf32>
    %193 = vector.broadcast %11 : vector<1x5x5xf32> to vector<8x5x5xf32>
    %194 = arith.addf %192, %193 : vector<8x5x5xf32>
    %195 = arith.index_cast %c7_i32 : i32 to index
    %c0_88 = arith.constant 0 : index
    %c0_89 = arith.constant 0 : index
    %196 = vector.load %arg9[%195, %c0_88, %c0_89] : memref<8x8x5xf32, #tpu.memory_space<vmem>>, vector<1x8x5xf32>
    %197 = vector.shape_cast %196 : vector<1x8x5xf32> to vector<8x5xf32>
    %198 = vector.shape_cast %197 : vector<8x5xf32> to vector<8x5x1xf32>
    %199 = vector.broadcast %198 : vector<8x5x1xf32> to vector<8x5x5xf32>
    %200 = arith.addf %194, %199 : vector<8x5x5xf32>
    %cst_90 = arith.constant dense<0xFF800000> : vector<8x5xf32>
    %201 = vector.multi_reduction <maximumf>, %200, %cst_90 [2] : vector<8x5x5xf32> to vector<8x5xf32>
    %202 = vector.shape_cast %201 : vector<8x5xf32> to vector<8x5x1xf32>
    %203 = vector.broadcast %202 : vector<8x5x1xf32> to vector<8x5x5xf32>
    %204 = arith.cmpf oeq, %200, %203 : vector<8x5x5xf32>
    %c5_i32_91 = arith.constant 5 : i32
    %205 = vector.broadcast %c5_i32_91 : i32 to vector<8x5x5xi32>
    %206 = arith.select %204, %12, %205 : vector<8x5x5xi1>, vector<8x5x5xi32>
    %cst_92 = arith.constant dense<2147483647> : vector<8x5xi32>
    %207 = vector.multi_reduction <minsi>, %206, %cst_92 [2] : vector<8x5x5xi32> to vector<8x5xi32>
    %208 = vector.broadcast %c7_i32 : i32 to vector<8x1xi32>
    %209 = arith.cmpi sle, %208, %15 : vector<8x1xi32>
    %210 = vector.shape_cast %209 : vector<8x1xi1> to vector<8x1xi1>
    %211 = vector.broadcast %210 : vector<8x1xi1> to vector<8x5xi1>
    %212 = arith.select %211, %201, %190 : vector<8x5xi1>, vector<8x5xf32>
    %c0_93 = arith.constant 0 : index
    %c0_94 = arith.constant 0 : index
    %213 = vector.load %arg10[%c0_93, %c0_94] : memref<8x5xf32, #tpu.memory_space<vmem>>, vector<8x5xf32>
    tpu.vector_store %arg10[%c0_93, %c0_94], %212 {strides = array<i32>} : memref<8x5xf32, #tpu.memory_space<vmem>>, vector<8x5xf32>,
    %214 = arith.index_cast %c7_i32 : i32 to index
    %c0_95 = arith.constant 0 : index
    %c0_96 = arith.constant 0 : index
    %215 = vector.load %arg11[%214, %c0_95, %c0_96] : memref<8x8x5xi32, #tpu.memory_space<vmem>>, vector<1x8x5xi32>
    %216 = vector.shape_cast %215 : vector<1x8x5xi32> to vector<8x5xi32>
    %217 = vector.shape_cast %207 : vector<8x5xi32> to vector<1x8x5xi32>
    tpu.vector_store %arg11[%214, %c0_95, %c0_96], %217 {strides = array<i32>} : memref<8x8x5xi32, #tpu.memory_space<vmem>>, vector<1x8x5xi32>,
    %c7_i32_97 = arith.constant 7 : i32
    %c0_98 = arith.constant 0 : index
    %c0_99 = arith.constant 0 : index
    %218 = vector.load %arg10[%c0_98, %c0_99] : memref<8x5xf32, #tpu.memory_space<vmem>>, vector<8x5xf32>
    %c0_100 = arith.constant 0 : index
    %c0_101 = arith.constant 0 : index
    %219 = vector.load %arg6[%c0_100, %c0_101] : memref<1x5xf32, #tpu.memory_space<vmem>>, vector<1x5xf32>
    %220 = vector.broadcast %219 : vector<1x5xf32> to vector<8x5xf32>
    %221 = arith.addf %218, %220 : vector<8x5xf32>
    %cst_102 = arith.constant dense<0xFF800000> : vector<8xf32>
    %222 = vector.multi_reduction <maximumf>, %221, %cst_102 [1] : vector<8x5xf32> to vector<8xf32>
    %223 = vector.shape_cast %222 : vector<8xf32> to vector<8x1xf32>
    %224 = vector.broadcast %223 : vector<8x1xf32> to vector<8x5xf32>
    %225 = arith.cmpf oeq, %221, %224 : vector<8x5xf32>
    %c5_i32_103 = arith.constant 5 : i32
    %226 = vector.broadcast %c5_i32_103 : i32 to vector<8x5xi32>
    %227 = arith.select %225, %13, %226 : vector<8x5xi1>, vector<8x5xi32>
    %cst_104 = arith.constant dense<2147483647> : vector<8xi32>
    %228 = vector.multi_reduction <minsi>, %227, %cst_104 [1] : vector<8x5xi32> to vector<8xi32>
    %229 = vector.shape_cast %228 : vector<8xi32> to vector<8x1xi32>
    %c0_105 = arith.constant 0 : index
    %c0_106 = arith.constant 0 : index
    %230 = vector.load %arg12[%c0_105, %c0_106] : memref<8x1xi32, #tpu.memory_space<vmem>>, vector<8x1xi32>
    tpu.vector_store %arg12[%c0_105, %c0_106], %229 {strides = array<i32>} : memref<8x1xi32, #tpu.memory_space<vmem>>, vector<8x1xi32>,
    %c0_i32 = arith.constant 0 : i32
    %231 = vector.broadcast %c0_i32 : i32 to vector<8x8xi32>
    %c0_107 = arith.constant 0 : index
    %c0_108 = arith.constant 0 : index
    %232 = vector.load %arg13[%c0_107, %c0_108] : memref<8x8xi32, #tpu.memory_space<vmem>>, vector<8x8xi32>
    tpu.vector_store %arg13[%c0_107, %c0_108], %231 {strides = array<i32>} : memref<8x8xi32, #tpu.memory_space<vmem>>, vector<8x8xi32>,
    %c0_i32_109 = arith.constant 0 : i32
    %c7_i32_110 = arith.constant 7 : i32
    %233 = arith.subi %c7_i32_110, %c0_i32_109 : i32
    %c1_i32_111 = arith.constant 1 : i32
    %234 = arith.addi %233, %c1_i32_111 : i32
    %c7_i32_112 = arith.constant 7 : i32
    %235 = arith.minsi %234, %c7_i32_112 : i32
    %c0_113 = arith.constant 0 : index
    %c0_114 = arith.constant 0 : index
    %236 = vector.load %arg12[%c0_113, %c0_114] : memref<8x1xi32, #tpu.memory_space<vmem>>, vector<8x1xi32>
    %237 = arith.index_cast %235 : i32 to index
    %c0_115 = arith.constant 0 : index
    %c0_116 = arith.constant 0 : index
    %238 = vector.load %arg11[%237, %c0_115, %c0_116] : memref<8x8x5xi32, #tpu.memory_space<vmem>>, vector<1x8x5xi32>
    %239 = vector.shape_cast %238 : vector<1x8x5xi32> to vector<8x5xi32>
    %240 = vector.broadcast %236 : vector<8x1xi32> to vector<8x5xi32>
    %241 = arith.cmpi eq, %13, %240 : vector<8x5xi32>
    %c0_i32_117 = arith.constant 0 : i32
    %242 = vector.broadcast %c0_i32_117 : i32 to vector<8x5xi32>
    %243 = arith.select %241, %239, %242 : vector<8x5xi1>, vector<8x5xi32>
    %cst_118 = arith.constant dense<0> : vector<8xi32>
    %244 = vector.multi_reduction <add>, %243, %cst_118 [1] : vector<8x5xi32> to vector<8xi32>
    %245 = vector.shape_cast %244 : vector<8xi32> to vector<8x1xi32>
    %246 = vector.broadcast %233 : i32 to vector<8x1xi32>
    %247 = arith.cmpi slt, %246, %15 : vector<8x1xi32>
    %248 = arith.select %247, %245, %236 : vector<8x1xi1>, vector<8x1xi32>
    %c0_119 = arith.constant 0 : index
    %c0_120 = arith.constant 0 : index
    %249 = vector.load %arg12[%c0_119, %c0_120] : memref<8x1xi32, #tpu.memory_space<vmem>>, vector<8x1xi32>
    tpu.vector_store %arg12[%c0_119, %c0_120], %248 {strides = array<i32>} : memref<8x1xi32, #tpu.memory_space<vmem>>, vector<8x1xi32>,
    %250 = vector.broadcast %233 : i32 to vector<8x8xi32>
    %251 = arith.cmpi eq, %14, %250 : vector<8x8xi32>
    %c0_121 = arith.constant 0 : index
    %c0_122 = arith.constant 0 : index
    %252 = vector.load %arg13[%c0_121, %c0_122] : memref<8x8xi32, #tpu.memory_space<vmem>>, vector<8x8xi32>
    %253 = vector.shape_cast %248 : vector<8x1xi32> to vector<8x1xi32>
    %254 = vector.broadcast %253 : vector<8x1xi32> to vector<8x8xi32>
    %255 = arith.select %251, %254, %252 : vector<8x8xi1>, vector<8x8xi32>
    %c0_123 = arith.constant 0 : index
    %c0_124 = arith.constant 0 : index
    %256 = vector.load %arg13[%c0_123, %c0_124] : memref<8x8xi32, #tpu.memory_space<vmem>>, vector<8x8xi32>
    tpu.vector_store %arg13[%c0_123, %c0_124], %255 {strides = array<i32>} : memref<8x8xi32, #tpu.memory_space<vmem>>, vector<8x8xi32>,
    %c1_i32_125 = arith.constant 1 : i32
    %c7_i32_126 = arith.constant 7 : i32
    %257 = arith.subi %c7_i32_126, %c1_i32_125 : i32
    %c1_i32_127 = arith.constant 1 : i32
    %258 = arith.addi %257, %c1_i32_127 : i32
    %c7_i32_128 = arith.constant 7 : i32
    %259 = arith.minsi %258, %c7_i32_128 : i32
    %c0_129 = arith.constant 0 : index
    %c0_130 = arith.constant 0 : index
    %260 = vector.load %arg12[%c0_129, %c0_130] : memref<8x1xi32, #tpu.memory_space<vmem>>, vector<8x1xi32>
    %261 = arith.index_cast %259 : i32 to index
    %c0_131 = arith.constant 0 : index
    %c0_132 = arith.constant 0 : index
    %262 = vector.load %arg11[%261, %c0_131, %c0_132] : memref<8x8x5xi32, #tpu.memory_space<vmem>>, vector<1x8x5xi32>
    %263 = vector.shape_cast %262 : vector<1x8x5xi32> to vector<8x5xi32>
    %264 = vector.broadcast %260 : vector<8x1xi32> to vector<8x5xi32>
    %265 = arith.cmpi eq, %13, %264 : vector<8x5xi32>
    %c0_i32_133 = arith.constant 0 : i32
    %266 = vector.broadcast %c0_i32_133 : i32 to vector<8x5xi32>
    %267 = arith.select %265, %263, %266 : vector<8x5xi1>, vector<8x5xi32>
    %cst_134 = arith.constant dense<0> : vector<8xi32>
    %268 = vector.multi_reduction <add>, %267, %cst_134 [1] : vector<8x5xi32> to vector<8xi32>
    %269 = vector.shape_cast %268 : vector<8xi32> to vector<8x1xi32>
    %270 = vector.broadcast %257 : i32 to vector<8x1xi32>
    %271 = arith.cmpi slt, %270, %15 : vector<8x1xi32>
    %272 = arith.select %271, %269, %260 : vector<8x1xi1>, vector<8x1xi32>
    %c0_135 = arith.constant 0 : index
    %c0_136 = arith.constant 0 : index
    %273 = vector.load %arg12[%c0_135, %c0_136] : memref<8x1xi32, #tpu.memory_space<vmem>>, vector<8x1xi32>
    tpu.vector_store %arg12[%c0_135, %c0_136], %272 {strides = array<i32>} : memref<8x1xi32, #tpu.memory_space<vmem>>, vector<8x1xi32>,
    %274 = vector.broadcast %257 : i32 to vector<8x8xi32>
    %275 = arith.cmpi eq, %14, %274 : vector<8x8xi32>
    %c0_137 = arith.constant 0 : index
    %c0_138 = arith.constant 0 : index
    %276 = vector.load %arg13[%c0_137, %c0_138] : memref<8x8xi32, #tpu.memory_space<vmem>>, vector<8x8xi32>
    %277 = vector.shape_cast %272 : vector<8x1xi32> to vector<8x1xi32>
    %278 = vector.broadcast %277 : vector<8x1xi32> to vector<8x8xi32>
    %279 = arith.select %275, %278, %276 : vector<8x8xi1>, vector<8x8xi32>
    %c0_139 = arith.constant 0 : index
    %c0_140 = arith.constant 0 : index
    %280 = vector.load %arg13[%c0_139, %c0_140] : memref<8x8xi32, #tpu.memory_space<vmem>>, vector<8x8xi32>
    tpu.vector_store %arg13[%c0_139, %c0_140], %279 {strides = array<i32>} : memref<8x8xi32, #tpu.memory_space<vmem>>, vector<8x8xi32>,
    %c2_i32_141 = arith.constant 2 : i32
    %c7_i32_142 = arith.constant 7 : i32
    %281 = arith.subi %c7_i32_142, %c2_i32_141 : i32
    %c1_i32_143 = arith.constant 1 : i32
    %282 = arith.addi %281, %c1_i32_143 : i32
    %c7_i32_144 = arith.constant 7 : i32
    %283 = arith.minsi %282, %c7_i32_144 : i32
    %c0_145 = arith.constant 0 : index
    %c0_146 = arith.constant 0 : index
    %284 = vector.load %arg12[%c0_145, %c0_146] : memref<8x1xi32, #tpu.memory_space<vmem>>, vector<8x1xi32>
    %285 = arith.index_cast %283 : i32 to index
    %c0_147 = arith.constant 0 : index
    %c0_148 = arith.constant 0 : index
    %286 = vector.load %arg11[%285, %c0_147, %c0_148] : memref<8x8x5xi32, #tpu.memory_space<vmem>>, vector<1x8x5xi32>
    %287 = vector.shape_cast %286 : vector<1x8x5xi32> to vector<8x5xi32>
    %288 = vector.broadcast %284 : vector<8x1xi32> to vector<8x5xi32>
    %289 = arith.cmpi eq, %13, %288 : vector<8x5xi32>
    %c0_i32_149 = arith.constant 0 : i32
    %290 = vector.broadcast %c0_i32_149 : i32 to vector<8x5xi32>
    %291 = arith.select %289, %287, %290 : vector<8x5xi1>, vector<8x5xi32>
    %cst_150 = arith.constant dense<0> : vector<8xi32>
    %292 = vector.multi_reduction <add>, %291, %cst_150 [1] : vector<8x5xi32> to vector<8xi32>
    %293 = vector.shape_cast %292 : vector<8xi32> to vector<8x1xi32>
    %294 = vector.broadcast %281 : i32 to vector<8x1xi32>
    %295 = arith.cmpi slt, %294, %15 : vector<8x1xi32>
    %296 = arith.select %295, %293, %284 : vector<8x1xi1>, vector<8x1xi32>
    %c0_151 = arith.constant 0 : index
    %c0_152 = arith.constant 0 : index
    %297 = vector.load %arg12[%c0_151, %c0_152] : memref<8x1xi32, #tpu.memory_space<vmem>>, vector<8x1xi32>
    tpu.vector_store %arg12[%c0_151, %c0_152], %296 {strides = array<i32>} : memref<8x1xi32, #tpu.memory_space<vmem>>, vector<8x1xi32>,
    %298 = vector.broadcast %281 : i32 to vector<8x8xi32>
    %299 = arith.cmpi eq, %14, %298 : vector<8x8xi32>
    %c0_153 = arith.constant 0 : index
    %c0_154 = arith.constant 0 : index
    %300 = vector.load %arg13[%c0_153, %c0_154] : memref<8x8xi32, #tpu.memory_space<vmem>>, vector<8x8xi32>
    %301 = vector.shape_cast %296 : vector<8x1xi32> to vector<8x1xi32>
    %302 = vector.broadcast %301 : vector<8x1xi32> to vector<8x8xi32>
    %303 = arith.select %299, %302, %300 : vector<8x8xi1>, vector<8x8xi32>
    %c0_155 = arith.constant 0 : index
    %c0_156 = arith.constant 0 : index
    %304 = vector.load %arg13[%c0_155, %c0_156] : memref<8x8xi32, #tpu.memory_space<vmem>>, vector<8x8xi32>
    tpu.vector_store %arg13[%c0_155, %c0_156], %303 {strides = array<i32>} : memref<8x8xi32, #tpu.memory_space<vmem>>, vector<8x8xi32>,
    %c3_i32_157 = arith.constant 3 : i32
    %c7_i32_158 = arith.constant 7 : i32
    %305 = arith.subi %c7_i32_158, %c3_i32_157 : i32
    %c1_i32_159 = arith.constant 1 : i32
    %306 = arith.addi %305, %c1_i32_159 : i32
    %c7_i32_160 = arith.constant 7 : i32
    %307 = arith.minsi %306, %c7_i32_160 : i32
    %c0_161 = arith.constant 0 : index
    %c0_162 = arith.constant 0 : index
    %308 = vector.load %arg12[%c0_161, %c0_162] : memref<8x1xi32, #tpu.memory_space<vmem>>, vector<8x1xi32>
    %309 = arith.index_cast %307 : i32 to index
    %c0_163 = arith.constant 0 : index
    %c0_164 = arith.constant 0 : index
    %310 = vector.load %arg11[%309, %c0_163, %c0_164] : memref<8x8x5xi32, #tpu.memory_space<vmem>>, vector<1x8x5xi32>
    %311 = vector.shape_cast %310 : vector<1x8x5xi32> to vector<8x5xi32>
    %312 = vector.broadcast %308 : vector<8x1xi32> to vector<8x5xi32>
    %313 = arith.cmpi eq, %13, %312 : vector<8x5xi32>
    %c0_i32_165 = arith.constant 0 : i32
    %314 = vector.broadcast %c0_i32_165 : i32 to vector<8x5xi32>
    %315 = arith.select %313, %311, %314 : vector<8x5xi1>, vector<8x5xi32>
    %cst_166 = arith.constant dense<0> : vector<8xi32>
    %316 = vector.multi_reduction <add>, %315, %cst_166 [1] : vector<8x5xi32> to vector<8xi32>
    %317 = vector.shape_cast %316 : vector<8xi32> to vector<8x1xi32>
    %318 = vector.broadcast %305 : i32 to vector<8x1xi32>
    %319 = arith.cmpi slt, %318, %15 : vector<8x1xi32>
    %320 = arith.select %319, %317, %308 : vector<8x1xi1>, vector<8x1xi32>
    %c0_167 = arith.constant 0 : index
    %c0_168 = arith.constant 0 : index
    %321 = vector.load %arg12[%c0_167, %c0_168] : memref<8x1xi32, #tpu.memory_space<vmem>>, vector<8x1xi32>
    tpu.vector_store %arg12[%c0_167, %c0_168], %320 {strides = array<i32>} : memref<8x1xi32, #tpu.memory_space<vmem>>, vector<8x1xi32>,
    %322 = vector.broadcast %305 : i32 to vector<8x8xi32>
    %323 = arith.cmpi eq, %14, %322 : vector<8x8xi32>
    %c0_169 = arith.constant 0 : index
    %c0_170 = arith.constant 0 : index
    %324 = vector.load %arg13[%c0_169, %c0_170] : memref<8x8xi32, #tpu.memory_space<vmem>>, vector<8x8xi32>
    %325 = vector.shape_cast %320 : vector<8x1xi32> to vector<8x1xi32>
    %326 = vector.broadcast %325 : vector<8x1xi32> to vector<8x8xi32>
    %327 = arith.select %323, %326, %324 : vector<8x8xi1>, vector<8x8xi32>
    %c0_171 = arith.constant 0 : index
    %c0_172 = arith.constant 0 : index
    %328 = vector.load %arg13[%c0_171, %c0_172] : memref<8x8xi32, #tpu.memory_space<vmem>>, vector<8x8xi32>
    tpu.vector_store %arg13[%c0_171, %c0_172], %327 {strides = array<i32>} : memref<8x8xi32, #tpu.memory_space<vmem>>, vector<8x8xi32>,
    %c4_i32_173 = arith.constant 4 : i32
    %c7_i32_174 = arith.constant 7 : i32
    %329 = arith.subi %c7_i32_174, %c4_i32_173 : i32
    %c1_i32_175 = arith.constant 1 : i32
    %330 = arith.addi %329, %c1_i32_175 : i32
    %c7_i32_176 = arith.constant 7 : i32
    %331 = arith.minsi %330, %c7_i32_176 : i32
    %c0_177 = arith.constant 0 : index
    %c0_178 = arith.constant 0 : index
    %332 = vector.load %arg12[%c0_177, %c0_178] : memref<8x1xi32, #tpu.memory_space<vmem>>, vector<8x1xi32>
    %333 = arith.index_cast %331 : i32 to index
    %c0_179 = arith.constant 0 : index
    %c0_180 = arith.constant 0 : index
    %334 = vector.load %arg11[%333, %c0_179, %c0_180] : memref<8x8x5xi32, #tpu.memory_space<vmem>>, vector<1x8x5xi32>
    %335 = vector.shape_cast %334 : vector<1x8x5xi32> to vector<8x5xi32>
    %336 = vector.broadcast %332 : vector<8x1xi32> to vector<8x5xi32>
    %337 = arith.cmpi eq, %13, %336 : vector<8x5xi32>
    %c0_i32_181 = arith.constant 0 : i32
    %338 = vector.broadcast %c0_i32_181 : i32 to vector<8x5xi32>
    %339 = arith.select %337, %335, %338 : vector<8x5xi1>, vector<8x5xi32>
    %cst_182 = arith.constant dense<0> : vector<8xi32>
    %340 = vector.multi_reduction <add>, %339, %cst_182 [1] : vector<8x5xi32> to vector<8xi32>
    %341 = vector.shape_cast %340 : vector<8xi32> to vector<8x1xi32>
    %342 = vector.broadcast %329 : i32 to vector<8x1xi32>
    %343 = arith.cmpi slt, %342, %15 : vector<8x1xi32>
    %344 = arith.select %343, %341, %332 : vector<8x1xi1>, vector<8x1xi32>
    %c0_183 = arith.constant 0 : index
    %c0_184 = arith.constant 0 : index
    %345 = vector.load %arg12[%c0_183, %c0_184] : memref<8x1xi32, #tpu.memory_space<vmem>>, vector<8x1xi32>
    tpu.vector_store %arg12[%c0_183, %c0_184], %344 {strides = array<i32>} : memref<8x1xi32, #tpu.memory_space<vmem>>, vector<8x1xi32>,
    %346 = vector.broadcast %329 : i32 to vector<8x8xi32>
    %347 = arith.cmpi eq, %14, %346 : vector<8x8xi32>
    %c0_185 = arith.constant 0 : index
    %c0_186 = arith.constant 0 : index
    %348 = vector.load %arg13[%c0_185, %c0_186] : memref<8x8xi32, #tpu.memory_space<vmem>>, vector<8x8xi32>
    %349 = vector.shape_cast %344 : vector<8x1xi32> to vector<8x1xi32>
    %350 = vector.broadcast %349 : vector<8x1xi32> to vector<8x8xi32>
    %351 = arith.select %347, %350, %348 : vector<8x8xi1>, vector<8x8xi32>
    %c0_187 = arith.constant 0 : index
    %c0_188 = arith.constant 0 : index
    %352 = vector.load %arg13[%c0_187, %c0_188] : memref<8x8xi32, #tpu.memory_space<vmem>>, vector<8x8xi32>
    tpu.vector_store %arg13[%c0_187, %c0_188], %351 {strides = array<i32>} : memref<8x8xi32, #tpu.memory_space<vmem>>, vector<8x8xi32>,
    %c5_i32_189 = arith.constant 5 : i32
    %c7_i32_190 = arith.constant 7 : i32
    %353 = arith.subi %c7_i32_190, %c5_i32_189 : i32
    %c1_i32_191 = arith.constant 1 : i32
    %354 = arith.addi %353, %c1_i32_191 : i32
    %c7_i32_192 = arith.constant 7 : i32
    %355 = arith.minsi %354, %c7_i32_192 : i32
    %c0_193 = arith.constant 0 : index
    %c0_194 = arith.constant 0 : index
    %356 = vector.load %arg12[%c0_193, %c0_194] : memref<8x1xi32, #tpu.memory_space<vmem>>, vector<8x1xi32>
    %357 = arith.index_cast %355 : i32 to index
    %c0_195 = arith.constant 0 : index
    %c0_196 = arith.constant 0 : index
    %358 = vector.load %arg11[%357, %c0_195, %c0_196] : memref<8x8x5xi32, #tpu.memory_space<vmem>>, vector<1x8x5xi32>
    %359 = vector.shape_cast %358 : vector<1x8x5xi32> to vector<8x5xi32>
    %360 = vector.broadcast %356 : vector<8x1xi32> to vector<8x5xi32>
    %361 = arith.cmpi eq, %13, %360 : vector<8x5xi32>
    %c0_i32_197 = arith.constant 0 : i32
    %362 = vector.broadcast %c0_i32_197 : i32 to vector<8x5xi32>
    %363 = arith.select %361, %359, %362 : vector<8x5xi1>, vector<8x5xi32>
    %cst_198 = arith.constant dense<0> : vector<8xi32>
    %364 = vector.multi_reduction <add>, %363, %cst_198 [1] : vector<8x5xi32> to vector<8xi32>
    %365 = vector.shape_cast %364 : vector<8xi32> to vector<8x1xi32>
    %366 = vector.broadcast %353 : i32 to vector<8x1xi32>
    %367 = arith.cmpi slt, %366, %15 : vector<8x1xi32>
    %368 = arith.select %367, %365, %356 : vector<8x1xi1>, vector<8x1xi32>
    %c0_199 = arith.constant 0 : index
    %c0_200 = arith.constant 0 : index
    %369 = vector.load %arg12[%c0_199, %c0_200] : memref<8x1xi32, #tpu.memory_space<vmem>>, vector<8x1xi32>
    tpu.vector_store %arg12[%c0_199, %c0_200], %368 {strides = array<i32>} : memref<8x1xi32, #tpu.memory_space<vmem>>, vector<8x1xi32>,
    %370 = vector.broadcast %353 : i32 to vector<8x8xi32>
    %371 = arith.cmpi eq, %14, %370 : vector<8x8xi32>
    %c0_201 = arith.constant 0 : index
    %c0_202 = arith.constant 0 : index
    %372 = vector.load %arg13[%c0_201, %c0_202] : memref<8x8xi32, #tpu.memory_space<vmem>>, vector<8x8xi32>
    %373 = vector.shape_cast %368 : vector<8x1xi32> to vector<8x1xi32>
    %374 = vector.broadcast %373 : vector<8x1xi32> to vector<8x8xi32>
    %375 = arith.select %371, %374, %372 : vector<8x8xi1>, vector<8x8xi32>
    %c0_203 = arith.constant 0 : index
    %c0_204 = arith.constant 0 : index
    %376 = vector.load %arg13[%c0_203, %c0_204] : memref<8x8xi32, #tpu.memory_space<vmem>>, vector<8x8xi32>
    tpu.vector_store %arg13[%c0_203, %c0_204], %375 {strides = array<i32>} : memref<8x8xi32, #tpu.memory_space<vmem>>, vector<8x8xi32>,
    %c6_i32_205 = arith.constant 6 : i32
    %c7_i32_206 = arith.constant 7 : i32
    %377 = arith.subi %c7_i32_206, %c6_i32_205 : i32
    %c1_i32_207 = arith.constant 1 : i32
    %378 = arith.addi %377, %c1_i32_207 : i32
    %c7_i32_208 = arith.constant 7 : i32
    %379 = arith.minsi %378, %c7_i32_208 : i32
    %c0_209 = arith.constant 0 : index
    %c0_210 = arith.constant 0 : index
    %380 = vector.load %arg12[%c0_209, %c0_210] : memref<8x1xi32, #tpu.memory_space<vmem>>, vector<8x1xi32>
    %381 = arith.index_cast %379 : i32 to index
    %c0_211 = arith.constant 0 : index
    %c0_212 = arith.constant 0 : index
    %382 = vector.load %arg11[%381, %c0_211, %c0_212] : memref<8x8x5xi32, #tpu.memory_space<vmem>>, vector<1x8x5xi32>
    %383 = vector.shape_cast %382 : vector<1x8x5xi32> to vector<8x5xi32>
    %384 = vector.broadcast %380 : vector<8x1xi32> to vector<8x5xi32>
    %385 = arith.cmpi eq, %13, %384 : vector<8x5xi32>
    %c0_i32_213 = arith.constant 0 : i32
    %386 = vector.broadcast %c0_i32_213 : i32 to vector<8x5xi32>
    %387 = arith.select %385, %383, %386 : vector<8x5xi1>, vector<8x5xi32>
    %cst_214 = arith.constant dense<0> : vector<8xi32>
    %388 = vector.multi_reduction <add>, %387, %cst_214 [1] : vector<8x5xi32> to vector<8xi32>
    %389 = vector.shape_cast %388 : vector<8xi32> to vector<8x1xi32>
    %390 = vector.broadcast %377 : i32 to vector<8x1xi32>
    %391 = arith.cmpi slt, %390, %15 : vector<8x1xi32>
    %392 = arith.select %391, %389, %380 : vector<8x1xi1>, vector<8x1xi32>
    %c0_215 = arith.constant 0 : index
    %c0_216 = arith.constant 0 : index
    %393 = vector.load %arg12[%c0_215, %c0_216] : memref<8x1xi32, #tpu.memory_space<vmem>>, vector<8x1xi32>
    tpu.vector_store %arg12[%c0_215, %c0_216], %392 {strides = array<i32>} : memref<8x1xi32, #tpu.memory_space<vmem>>, vector<8x1xi32>,
    %394 = vector.broadcast %377 : i32 to vector<8x8xi32>
    %395 = arith.cmpi eq, %14, %394 : vector<8x8xi32>
    %c0_217 = arith.constant 0 : index
    %c0_218 = arith.constant 0 : index
    %396 = vector.load %arg13[%c0_217, %c0_218] : memref<8x8xi32, #tpu.memory_space<vmem>>, vector<8x8xi32>
    %397 = vector.shape_cast %392 : vector<8x1xi32> to vector<8x1xi32>
    %398 = vector.broadcast %397 : vector<8x1xi32> to vector<8x8xi32>
    %399 = arith.select %395, %398, %396 : vector<8x8xi1>, vector<8x8xi32>
    %c0_219 = arith.constant 0 : index
    %c0_220 = arith.constant 0 : index
    %400 = vector.load %arg13[%c0_219, %c0_220] : memref<8x8xi32, #tpu.memory_space<vmem>>, vector<8x8xi32>
    tpu.vector_store %arg13[%c0_219, %c0_220], %399 {strides = array<i32>} : memref<8x8xi32, #tpu.memory_space<vmem>>, vector<8x8xi32>,
    %c7_i32_221 = arith.constant 7 : i32
    %c7_i32_222 = arith.constant 7 : i32
    %401 = arith.subi %c7_i32_222, %c7_i32_221 : i32
    %c1_i32_223 = arith.constant 1 : i32
    %402 = arith.addi %401, %c1_i32_223 : i32
    %c7_i32_224 = arith.constant 7 : i32
    %403 = arith.minsi %402, %c7_i32_224 : i32
    %c0_225 = arith.constant 0 : index
    %c0_226 = arith.constant 0 : index
    %404 = vector.load %arg12[%c0_225, %c0_226] : memref<8x1xi32, #tpu.memory_space<vmem>>, vector<8x1xi32>
    %405 = arith.index_cast %403 : i32 to index
    %c0_227 = arith.constant 0 : index
    %c0_228 = arith.constant 0 : index
    %406 = vector.load %arg11[%405, %c0_227, %c0_228] : memref<8x8x5xi32, #tpu.memory_space<vmem>>, vector<1x8x5xi32>
    %407 = vector.shape_cast %406 : vector<1x8x5xi32> to vector<8x5xi32>
    %408 = vector.broadcast %404 : vector<8x1xi32> to vector<8x5xi32>
    %409 = arith.cmpi eq, %13, %408 : vector<8x5xi32>
    %c0_i32_229 = arith.constant 0 : i32
    %410 = vector.broadcast %c0_i32_229 : i32 to vector<8x5xi32>
    %411 = arith.select %409, %407, %410 : vector<8x5xi1>, vector<8x5xi32>
    %cst_230 = arith.constant dense<0> : vector<8xi32>
    %412 = vector.multi_reduction <add>, %411, %cst_230 [1] : vector<8x5xi32> to vector<8xi32>
    %413 = vector.shape_cast %412 : vector<8xi32> to vector<8x1xi32>
    %414 = vector.broadcast %401 : i32 to vector<8x1xi32>
    %415 = arith.cmpi slt, %414, %15 : vector<8x1xi32>
    %416 = arith.select %415, %413, %404 : vector<8x1xi1>, vector<8x1xi32>
    %c0_231 = arith.constant 0 : index
    %c0_232 = arith.constant 0 : index
    %417 = vector.load %arg12[%c0_231, %c0_232] : memref<8x1xi32, #tpu.memory_space<vmem>>, vector<8x1xi32>
    tpu.vector_store %arg12[%c0_231, %c0_232], %416 {strides = array<i32>} : memref<8x1xi32, #tpu.memory_space<vmem>>, vector<8x1xi32>,
    %418 = vector.broadcast %401 : i32 to vector<8x8xi32>
    %419 = arith.cmpi eq, %14, %418 : vector<8x8xi32>
    %c0_233 = arith.constant 0 : index
    %c0_234 = arith.constant 0 : index
    %420 = vector.load %arg13[%c0_233, %c0_234] : memref<8x8xi32, #tpu.memory_space<vmem>>, vector<8x8xi32>
    %421 = vector.shape_cast %416 : vector<8x1xi32> to vector<8x1xi32>
    %422 = vector.broadcast %421 : vector<8x1xi32> to vector<8x8xi32>
    %423 = arith.select %419, %422, %420 : vector<8x8xi1>, vector<8x8xi32>
    %c0_235 = arith.constant 0 : index
    %c0_236 = arith.constant 0 : index
    %424 = vector.load %arg13[%c0_235, %c0_236] : memref<8x8xi32, #tpu.memory_space<vmem>>, vector<8x8xi32>
    tpu.vector_store %arg13[%c0_235, %c0_236], %423 {strides = array<i32>} : memref<8x8xi32, #tpu.memory_space<vmem>>, vector<8x8xi32>,
    %c8_i32 = arith.constant 8 : i32
    %c0_237 = arith.constant 0 : index
    %c0_238 = arith.constant 0 : index
    %425 = vector.load %arg13[%c0_237, %c0_238] : memref<8x8xi32, #tpu.memory_space<vmem>>, vector<8x8xi32>
    %c0_239 = arith.constant 0 : index
    %c0_240 = arith.constant 0 : index
    %c0_241 = arith.constant 0 : index
    %426 = vector.load %arg8[%c0_239, %c0_240, %c0_241] : memref<1x8x8xi32, #tpu.memory_space<vmem>>, vector<1x8x8xi32>
    %427 = vector.shape_cast %426 : vector<1x8x8xi32> to vector<8x8xi32>
    %428 = vector.shape_cast %425 : vector<8x8xi32> to vector<1x8x8xi32>
    tpu.vector_store %arg8[%c0_239, %c0_240, %c0_241], %428 {strides = array<i32>} : memref<1x8x8xi32, #tpu.memory_space<vmem>>, vector<1x8x8xi32>,
    return
  }
  func.func @transform_0(%arg0: i32) -> (i32, i32, i32) {
    %c0_i32 = arith.constant 0 : i32
    %c0_i32_0 = arith.constant 0 : i32
    %c0_i32_1 = arith.constant 0 : i32
    return %c0_i32, %arg0, %c0_i32_0 : i32, i32, i32
  }
  func.func @transform_1(%arg0: i32) -> (i32, i32) {
    %c0_i32 = arith.constant 0 : i32
    %c0_i32_0 = arith.constant 0 : i32
    %c0_i32_1 = arith.constant 0 : i32
    return %c0_i32, %c0_i32_0 : i32, i32
  }
  func.func @transform_2(%arg0: i32) -> (i32, i32) {
    %c0_i32 = arith.constant 0 : i32
    %c0_i32_0 = arith.constant 0 : i32
    %c0_i32_1 = arith.constant 0 : i32
    return %c0_i32, %c0_i32_0 : i32, i32
  }
  func.func @transform_3(%arg0: i32) -> (i32, i32) {
    %c0_i32 = arith.constant 0 : i32
    %c0_i32_0 = arith.constant 0 : i32
    %c0_i32_1 = arith.constant 0 : i32
    return %c0_i32, %c0_i32_0 : i32, i32
  }
  func.func @transform_4(%arg0: i32) -> (i32, i32) {
    %c0_i32 = arith.constant 0 : i32
    %c0_i32_0 = arith.constant 0 : i32
    %c0_i32_1 = arith.constant 0 : i32
    return %c0_i32, %c0_i32_0 : i32, i32
  }
  func.func @transform_5(%arg0: i32) -> (i32, i32) {
    %c0_i32 = arith.constant 0 : i32
    %c0_i32_0 = arith.constant 0 : i32
    %c0_i32_1 = arith.constant 0 : i32
    return %c0_i32, %c0_i32_0 : i32, i32
  }
  func.func @transform_6(%arg0: i32) -> (i32, i32) {
    %c0_i32 = arith.constant 0 : i32
    %c0_i32_0 = arith.constant 0 : i32
    return %arg0, %c0_i32 : i32, i32
  }
  func.func @transform_7(%arg0: i32) -> (i32, i32, i32) {
    %c0_i32 = arith.constant 0 : i32
    %c0_i32_0 = arith.constant 0 : i32
    %c0_i32_1 = arith.constant 0 : i32
    return %arg0, %c0_i32, %c0_i32_0 : i32, i32, i32
  }
}

</mosaic_0001>

<bundles_post_ra>
// kernel: _forward_device.2
= control target key start
LH: loop header
LB: loop body
LE: loop exit
PB: predicated region body
PF: predicated region fallthrough
CT: control target
= control target key end

     0   :  { %vm148_vm0 = vcmask 261120   ;;  %vm60_vm1 = vcmask 130048   ;;  %s2481_s1 = inlined_call_operand.vmem [shape: bf16[16,256], index: 1, kind: input, shape index: {}]   ;;  %s2482_s3 = inlined_call_operand.vmem [shape: bf16[32,256], index: 3, kind: input, shape index: {}]   ;;  %s2483_s0 = inlined_call_operand.vmem [shape: f32[8,8,16], index: 0, kind: input, shape index: {}]   ;;  %s2484_s4 = inlined_call_operand.vmem [shape: f32[8,32], index: 4, kind: input, shape index: {}]   ;;  %s2485_s6 = inlined_call_operand.vmem [shape: f32[8,32], index: 6, kind: input, shape index: {}]   ;;  %s2486_s5 = inlined_call_operand.vmem [shape: f32[8,32], index: 5, kind: input, shape index: {}]   ;;  %s2487_s7 = inlined_call_operand.vmem [shape: f32[8,32], index: 7, kind: input, shape index: {}]   ;;  %s2488_s2 = inlined_call_operand.vmem [shape: f32[1,256], index: 2, kind: input, shape index: {}]   ;;  %s2489_s8 = inlined_call_operand.vmem [shape: f32[8,8,64], index: 8, kind: output, shape index: {}]  }
   0x1   :  { %v1717_v0 = vld [vmem:[%s2481_s1 + $0x4] sm:$0xf]  ;;  %v1531_v1 = vld [vmem:[%s2481_s1 + $0x8] sm:$0xf0]  ;;  %v1553_v2 = vld [vmem:[%s2482_s3 + $0x10] sm:$0xf] }
   0x2   :  { %v1534_v3 = vor.u32 %v1717_v0, %v1531_v1  ;;  %v1722_v4 = vld [vmem:[%s2482_s3 + $0x14] sm:$0xf0]  ;;  %v30_v5 = vld [vmem:[%s2483_s0] sm:$0xff]  ;;  %v31_v6 = vld [vmem:[%s2483_s0 + $0x8] sm:$0xff] }
   0x3   :  { %v1554_v7 = vor.u32 %v1722_v4, %v1553_v2  ;;  %v38_v8 = vpack.c.bf16 %v31_v6, %v30_v5  ;;  %v1545_v9 = vld [vmem:[%s2482_s3] sm:$0xf]  ;;  %v1720_v10 = vld [vmem:[%s2482_s3 + $0x4] sm:$0xf0]  ;;  %v1721_v17 = vld [vmem:[%s2482_s3 + $0x14] sm:$0xf] }
   0x4   :  { %v147_v11 = vld [vmem:[%s2484_s4] sm:$0xff]  ;;  %109 = vmatpush.bf16.msra.mxu1 %v1534_v3  ;;  %v1718_v14 = vld [vmem:[%s2481_s1 + $0x4] sm:$0xf0]  ;;  %v1546_v15 = vor.u32 %v1720_v10, %v1545_v9  ;;  %v1555_v18 = vld [vmem:[%s2482_s3 + $0x18] sm:$0xf0] }
   0x5   :  { %149 = vst.msk [vmem:[#allocation3] sm:$0xff] %vm148_vm0, %v147_v11  ;;  %v150_v12 = vld [vmem:[%s2485_s6] sm:$0xff]  ;;  %192 = vmatpush.bf16.msra.mxu2 %v1554_v7  ;;  %v1558_v19 = vor.u32 %v1721_v17, %v1555_v18  ;;  %v1547_v21 = vld [vmem:[%s2482_s3 + $0x8] sm:$0xf0]  ;;  %v32_v26 = vld [vmem:[%s2483_s0 + $0x10] sm:$0xff] }
   0x6   :  { %v1529_v13 = vld [vmem:[%s2481_s1] sm:$0xf]  ;;  %151 = vst.msk [vmem:[#allocation3 + $0x8] sm:$0xff] %vm148_vm0, %v150_v12  ;;  %v1719_v20 = vld [vmem:[%s2482_s3 + $0x4] sm:$0xf]  ;;  %v33_v27 = vld [vmem:[%s2483_s0 + $0x18] sm:$0xff] }
   0x7   :  { %v1530_v16 = vor.u32 %v1718_v14, %v1529_v13  ;;  %1539 = vmatmul.msk.bf16.vlgmr.msra.gmra.mxu1 %vm60_vm1, %v38_v8  ;;  %205 = vmatpush.bf16.msra.mxu3 %v1558_v19  ;;  %v1550_v22 = vor.u32 %v1719_v20, %v1547_v21  ;;  %v39_v28 = vpack.c.bf16 %v33_v27, %v32_v26  ;;  %v152_v29 = vld [vmem:[%s2486_s5] sm:$0xff]  ;;  %v35_v33 = vld [vmem:[%s2483_s0 + $0x28] sm:$0xff]  ;;  %s1882_s5 = smov 32   ;;  %v36_v36 = vld [vmem:[%s2483_s0 + $0x30] sm:$0xff] }
   0x8   :  { %v154_v30 = vld [vmem:[%s2487_s7] sm:$0xff]  ;;  %153 = vst.msk [vmem:[#allocation4] sm:$0xff] %vm148_vm0, %v152_v29  ;;  %v37_v37 = vld [vmem:[%s2483_s0 + $0x38] sm:$0xff] }
   0x9   :  { %80 = vmatpush.bf16.msra.mxu0 %v1530_v16  ;;  %193 = vmatpush.bf16.msra.mxu2 %v1546_v15  ;;  %155 = vst.msk [vmem:[#allocation5] sm:$0xff] %vm148_vm0, %v154_v30  ;;  %v34_v32 = vld [vmem:[%s2483_s0 + $0x20] sm:$0xff]  ;;  %v41_v38 = vpack.c.bf16 %v37_v37, %v36_v36  ;;  %s1883_s0 = smov 64  }
   0xa   :  { %v40_v34 = vpack.c.bf16 %v35_v33, %v34_v32  ;;  %v44_v39 = vld [vmem:[%s2488_s2] sm:$0x3]  ;;  %s1884_s2 = smov 96  }
   0xb   :  { %206 = vmatpush.bf16.msra.mxu3 %v1550_v22  ;;  %v47_v40 = vperm.slane %v44_v39, 1  ;;  %v2023_v43 = vperm.slane %v44_v39, 0 }
   0xc   :  { %1535 = vmatmul.msk.bf16.vlgmr.msra.gmra.mxu0 %vm60_vm1, %v38_v8  ;;  %v156_v23 = vld [vmem:[#allocation3] sm:$0xff] }
   0xd   :  { %v157_v24 = vld [vmem:[#allocation3 + $0x8] sm:$0xff] }
   0xe   :  { %v158_v25 = vpack.c.bf16 %v157_v24, %v156_v23 }
   0xf   :  { %v217_v31 = vld [vmem:[#allocation4] sm:$0xff] }
  0x10   :  { %1559 = vmatmul.msk.bf16.vlgmr.msra.gmra.mxu2 %vm148_vm0, %v158_v25  ;;  %1560 = vmatmul.msk.bf16.vlgmr.msra.gmra.mxu3 %vm148_vm0, %v158_v25  ;;  %v259_v35 = vld [vmem:[#allocation5] sm:$0xff] }
  0x11   :  { %239 = vrot.lane.b32.xlu1 %v217_v31, %s1882_s5 }
  0x17   :  { %1540 = vmatmul.msk.bf16.gmra.mxu1 %vm60_vm1, %v39_v28 }
  0x19   :  { %281 = vrot.lane.b32.xlu1 %v259_v35, %s1882_s5 }
  0x1c   :  { %1536 = vmatmul.msk.bf16.gmra.mxu0 %vm60_vm1, %v39_v28 }
  0x27   :  { %1541 = vmatmul.msk.bf16.gmra.mxu1 %vm60_vm1, %v40_v34 }
  0x2c   :  { %1537 = vmatmul.msk.bf16.gmra.mxu0 %vm60_vm1, %v40_v34 }
  0x37   :  { %1542 = vmatmul.msk.bf16.gmra.mxu1 %vm60_vm1, %v41_v38 }
  0x3c   :  { %1538 = vmatmul.msk.bf16.gmra.mxu0 %vm60_vm1, %v41_v38 }
  0x83   :  { %v240_v34 = vpop.permute.xlu1 %239 }
  0x84   :  { %v111_v41 = vpop.f32.mrf.mxu1 }
  0x85   :  { %v2021_v42 = vadd.f32 %v111_v41, %v47_v40 }
  0x89   :  { %v82_v45 = vpop.f32.mrf.mxu0 }
  0x8a   :  { %v83_v47 = vadd.f32 %v82_v45, %v2023_v43 }
  0x8b   :  { %v282_v39 = vpop.permute.xlu1 %281 }
  0x8c   :  { %v113_v44 = vpop.f32.mrf.mxu1 }
  0x8d   :  { %v2025_v46 = vadd.f32 %v113_v44, %v47_v40 }
  0x93   :  { %v195_v48 = vpop.f32.mrf.mxu2  ;;  %v208_v50 = vpop.f32.mrf.mxu3 }
  0x94   :  { %v213_v49 = vadd.f32 %v195_v48, %v83_v47  ;;  %v116_v51 = vpop.f32.mrf.mxu1 }
  0x95   :  { %v2028_v52 = vadd.f32 %v116_v51, %v47_v40 }
  0x96   :  { %1754 = vtanh.f32 %v213_v49  ;;  %v1561_v4 = vmul.f32 -1.442695, %v213_v49 }
  0x9b   :  { %v197_v53 = vpop.f32.mrf.mxu2  ;;  %v209_v1 = vpop.f32.mrf.mxu3 }
  0x9c   :  { %v1755_v54 = vpop.eup %1754  ;;  %v118_v55 = vpop.f32.mrf.mxu1 }
  0x9d   :  { %244 = vrot.lane.b32.xlu0 %v1755_v54, %s1883_s0  ;;  %v2031_v56 = vadd.f32 %v118_v55, %v47_v40 }
  0xa4   :  { %v121_v57 = vpop.f32.mrf.mxu1 }
  0xa5   :  { %v2033_v58 = vadd.f32 %v121_v57, %v47_v40  ;;  %v1725_v57 = vld [vmem:[%s2482_s3 + $0x14] sm:$0xf] }
  0xac   :  { %v123_v59 = vpop.f32.mrf.mxu1 }
  0xad   :  { %v2035_v60 = vadd.f32 %v123_v59, %v47_v40  ;;  %v1576_v59 = vld [vmem:[%s2482_s3 + $0x18] sm:$0xf0] }
  0xb4   :  { %v126_v61 = vpop.f32.mrf.mxu1 }
  0xb5   :  { %v2037_v62 = vadd.f32 %v126_v61, %v47_v40  ;;  %v1579_v61 = vor.u32 %v1725_v57, %v1576_v59 }
  0xb7   :  { %377 = vmatpush.bf16.msrb.mxu3 %v1579_v61 }
  0xbc   :  { %v128_v63 = vpop.f32.mrf.mxu1 }
  0xbd   :  { %v129_v0 = vadd.f32 %v128_v63, %v47_v40  ;;  %v1574_v63 = vld [vmem:[%s2482_s3 + $0x10] sm:$0xf] }
  0xbf   :  { %v216_v2 = vadd.f32 %v209_v1, %v129_v0  ;;  %v1726_v0 = vld [vmem:[%s2482_s3 + $0x14] sm:$0xf0]  ;;  %v1723_v1 = vld [vmem:[%s2482_s3 + $0x4] sm:$0xf] }
  0xc1   :  { %1756 = vtanh.f32 %v216_v2  ;;  %v1562_v16 = vmul.f32 -1.442695, %v216_v2  ;;  %v1575_v2 = vor.u32 %v1726_v0, %v1574_v63 }
  0xc2   :  { %1758 = vpow2.f32 %v1561_v4  ;;  %v1566_v4 = vld [vmem:[%s2482_s3] sm:$0xf] }
  0xc3   :  { %364 = vmatpush.bf16.msrb.mxu2 %v1575_v2 }
  0xc7   :  { %v1757_v3 = vpop.eup %1756 }
  0xc8   :  { %286 = vrot.lane.b32.xlu0 %v1757_v3, %s1883_s0  ;;  %v1759_v5 = vpop.eup %1758  ;;  %v1568_v3 = vld [vmem:[%s2482_s3 + $0x8] sm:$0xf0] }
  0xc9   :  { %v221_v6 = vadd.f32 1.0, %v1759_v5  ;;  %v1724_v5 = vld [vmem:[%s2482_s3 + $0x4] sm:$0xf0] }
  0xcb   :  { %1760 = vrcp.f32 %v221_v6  ;;  %vm227_vm2 = vweird.f32 %v221_v6  ;;  %v233_v11 = vand.u32 2147483648, %v221_v6  ;;  %v231_v13 = vand.u32 2147483647, %v221_v6 }
  0xcc   :  { %1762 = vpow2.f32 %v1562_v16 }
  0xcd   :  { %v234_v14 = vor.u32 1.1754944e-38, %v233_v11  ;;  %vm232_vm5 = vcmp.eq.f32.partialorder %v231_v13, 8.507059e+37 }
  0xd1   :  { %v1761_v7 = vpop.eup %1760 }
  0xd2   :  { %v223_v8 = vmul.f32 %v1761_v7, %v221_v6  ;;  %vm228_vm3 = vweird.f32 %v1761_v7  ;;  %v1763_v20 = vpop.eup %1762  ;;  %v1571_v6 = vor.u32 %v1723_v1, %v1568_v3 }
  0xd3   :  { %vm229_vm4 = vmor %vm227_vm2, %vm228_vm3  ;;  %v263_v21 = vadd.f32 1.0, %v1763_v20 }
  0xd4   :  { %v224_v9 = vsub.f32 1.0, %v223_v8  ;;  %378 = vmatpush.bf16.msrb.mxu3 %v1571_v6 }
  0xd5   :  { %1764 = vrcp.f32 %v263_v21  ;;  %v275_v27 = vand.u32 2147483648, %v263_v21  ;;  %vm269_vm7 = vweird.f32 %v263_v21  ;;  %v273_v28 = vand.u32 2147483647, %v263_v21 }
  0xd6   :  { %v225_v10 = vmul.f32 %v1761_v7, %v224_v9 }
  0xd7   :  { %v276_v30 = vor.u32 1.1754944e-38, %v275_v27  ;;  %vm274_vm9 = vcmp.eq.f32.partialorder %v273_v28, 8.507059e+37 }
  0xd8   :  { %v226_v12 = vadd.f32 %v1761_v7, %v225_v10 }
  0xda   :  { %v230_v15 = vsel %vm229_vm4, %v1761_v7, %v226_v12  ;;  %v1567_v7 = vor.u32 %v1724_v5, %v1566_v4  ;;  %v84_v12 = vpop.f32.mrf.mxu0 }
  0xdb   :  { %v235_v17 = vsel %vm232_vm5, %v234_v14, %v230_v15  ;;  %v1765_v22 = vpop.eup %1764  ;;  %v85_v13 = vadd.f32 %v84_v12, %v2023_v43 }
  0xdc   :  { %v265_v23 = vmul.f32 %v1765_v22, %v263_v21  ;;  %vm270_vm6 = vweird.f32 %v1765_v22  ;;  %v242_v35 = vmul.f32 %v240_v34, %v235_v17  ;;  %365 = vmatpush.bf16.msrb.mxu2 %v1567_v7 }
  0xdd   :  { %vm271_vm8 = vmor %vm269_vm7, %vm270_vm6 }
  0xde   :  { %v266_v24 = vsub.f32 1.0, %v265_v23 }
  0xe0   :  { %v267_v25 = vmul.f32 %v1765_v22, %v266_v24 }
  0xe2   :  { %v268_v26 = vadd.f32 %v1765_v22, %v267_v25 }
  0xe4   :  { %v272_v29 = vsel %vm271_vm8, %v1765_v22, %v268_v26 }
  0xe5   :  { %v277_v31 = vsel %vm274_vm9, %v276_v30, %v272_v29 }
  0xe6   :  { %v284_v40 = vmul.f32 %v282_v39, %v277_v31 }
 0x10f   :  { %v245_v18 = vpop.permute.xlu0 %244 }
 0x110   :  { %v247_v19 = vmul.f32 %v245_v18, %v235_v17 }
 0x112   :  { %249 = vrot.lane.b32.xlu2 %v247_v19, %s1882_s5 }
 0x13a   :  { %v287_v32 = vpop.permute.xlu0 %286 }
 0x13b   :  { %v289_v33 = vmul.f32 %v287_v32, %v277_v31 }
 0x13d   :  { %291 = vrot.lane.b32.xlu2 %v289_v33, %s1882_s5 }
 0x16c   :  { %v250_v36 = vpop.permute.xlu2 %249 }
 0x16d   :  { %v252_v37 = vadd.f32 %v250_v36, %v242_v35 }
 0x16f   :  { %1766 = vtanh.f32 %v252_v37 }
 0x175   :  { %v1767_v38 = vpop.eup %1766 }
 0x176   :  { %255 = vrot.lane.b32.xlu0 %v1767_v38, %s1883_s0 }
 0x197   :  { %v292_v41 = vpop.permute.xlu2 %291 }
 0x198   :  { %v294_v44 = vadd.f32 %v292_v41, %v284_v40 }
 0x19a   :  { %1768 = vtanh.f32 %v294_v44 }
 0x1a0   :  { %v1769_v45 = vpop.eup %1768 }
 0x1a1   :  { %297 = vrot.lane.b32.xlu1 %v1769_v45, %s1883_s0 }
 0x1a9   :  { %312 = vrot.lane.b32.xlu1 %v252_v37, %s1884_s2 }
 0x1e8   :  { %v256_v47 = vpop.permute.xlu0 %255 }
 0x1e9   :  { %v258_v48 = vmul.f32 %v256_v47, %v235_v17 }
 0x1eb   :  { %302 = vrot.lane.b32.xlu2 %v258_v48, %s1882_s5 }
 0x1f3   :  { %317 = vrot.lane.b32.xlu2 %v294_v44, %s1884_s2 }
 0x213   :  { %v298_v49 = vpop.permute.xlu1 %297 }
 0x214   :  { %v2047_v50 = vmul.f32 %v298_v49, %v277_v31 }
 0x216   :  { %307 = vrot.lane.b32.xlu0 %v2047_v50, %s1882_s5 }
 0x21b   :  { %v313_v51 = vpop.permute.xlu1 %312 }
 0x21c   :  { %315 = vst.msk [vmem:[#allocation4] sm:$0xff] %vm148_vm0, %v313_v51 }
 0x223   :  { %v390_v53 = vld [vmem:[#allocation4] sm:$0xff] }
 0x224   :  { %412 = vrot.lane.b32.xlu2 %v390_v53, %s1882_s5 }
 0x245   :  { %v303_v54 = vpop.permute.xlu2 %302 }
 0x246   :  { %305 = vst.msk [vmem:[#allocation3] sm:$0xff] %vm148_vm0, %v303_v54 }
 0x247   :  { %321 = vst.msk [vmem:[%s2489_s8] sm:$0xff] %vm148_vm0, %v303_v54 }
 0x24d   :  { %v318_v55 = vpop.permute.xlu2 %317  ;;  %v328_v9 = vld [vmem:[#allocation3] sm:$0xff] }
 0x24e   :  { %320 = vst.msk [vmem:[#allocation5] sm:$0xff] %vm148_vm0, %v318_v55 }
 0x255   :  { %v432_v22 = vld [vmem:[#allocation5] sm:$0xff] }
 0x27e   :  { %v413_v59 = vpop.permute.xlu2 %412 }
 0x288   :  { %v308_v8 = vpop.permute.xlu0 %307 }
 0x289   :  { %310 = vst.msk [vmem:[#allocation3 + $0x8] sm:$0xff] %vm148_vm0, %v308_v8 }
 0x290   :  { %v329_v10 = vld [vmem:[#allocation3 + $0x8] sm:$0xff] }
 0x291   :  { %v330_v11 = vpack.c.bf16 %v329_v10, %v328_v9 }
 0x293   :  { %1580 = vmatmul.msk.bf16.vlgmr.msrb.gmra.mxu2 %vm148_vm0, %v330_v11  ;;  %1581 = vmatmul.msk.bf16.vlgmr.msrb.gmra.mxu3 %vm148_vm0, %v330_v11 }
 0x316   :  { %v367_v14 = vpop.f32.mrf.mxu2  ;;  %v380_v15 = vpop.f32.mrf.mxu3 }
 0x317   :  { %v386_v16 = vadd.f32 %v367_v14, %v85_v13  ;;  %v1729_v13 = vld [vmem:[%s2482_s3 + $0x14] sm:$0xf]  ;;  %v1598_v14 = vld [vmem:[%s2482_s3 + $0x18] sm:$0xf0] }
 0x318   :  { %v1601_v15 = vor.u32 %v1729_v13, %v1598_v14 }
 0x319   :  { %1770 = vtanh.f32 %v386_v16  ;;  %v1582_v23 = vmul.f32 -1.442695, %v386_v16  ;;  %v1596_v16 = vld [vmem:[%s2482_s3 + $0x10] sm:$0xf] }
 0x31a   :  { %550 = vmatpush.bf16.msra.mxu3 %v1601_v15 }
 0x31e   :  { %v369_v17 = vpop.f32.mrf.mxu2  ;;  %v381_v18 = vpop.f32.mrf.mxu3 }
 0x31f   :  { %v1771_v19 = vpop.eup %1770  ;;  %v389_v20 = vadd.f32 %v381_v18, %v2037_v62  ;;  %v1730_v17 = vld [vmem:[%s2482_s3 + $0x14] sm:$0xf0]  ;;  %v1727_v18 = vld [vmem:[%s2482_s3 + $0x4] sm:$0xf] }
 0x320   :  { %417 = vrot.lane.b32.xlu0 %v1771_v19, %s1883_s0  ;;  %v1597_v19 = vor.u32 %v1730_v17, %v1596_v16 }
 0x321   :  { %1772 = vtanh.f32 %v389_v20  ;;  %v1583_v24 = vmul.f32 -1.442695, %v389_v20  ;;  %v1590_v20 = vld [vmem:[%s2482_s3 + $0x8] sm:$0xf0] }
 0x322   :  { %1774 = vpow2.f32 %v1582_v23  ;;  %v1593_v23 = vor.u32 %v1727_v18, %v1590_v20  ;;  %537 = vmatpush.bf16.msra.mxu2 %v1597_v19 }
 0x323   :  { %1776 = vpow2.f32 %v1583_v24 }
 0x324   :  { %551 = vmatpush.bf16.msra.mxu3 %v1593_v23 }
 0x327   :  { %v1773_v21 = vpop.eup %1772 }
 0x328   :  { %459 = vrot.lane.b32.xlu1 %v1773_v21, %s1883_s0  ;;  %454 = vrot.lane.b32.xlu0 %v432_v22, %s1882_s5  ;;  %v1775_v25 = vpop.eup %1774  ;;  %v1588_v21 = vld [vmem:[%s2482_s3] sm:$0xf]  ;;  %v1728_v22 = vld [vmem:[%s2482_s3 + $0x4] sm:$0xf0] }
 0x329   :  { %v394_v26 = vadd.f32 1.0, %v1775_v25  ;;  %v1777_v27 = vpop.eup %1776  ;;  %v1589_v24 = vor.u32 %v1728_v22, %v1588_v21 }
 0x32a   :  { %v436_v28 = vadd.f32 1.0, %v1777_v27 }
 0x32b   :  { %1778 = vrcp.f32 %v394_v26  ;;  %v406_v36 = vand.u32 2147483648, %v394_v26  ;;  %vm400_vm11 = vweird.f32 %v394_v26  ;;  %v404_v37 = vand.u32 2147483647, %v394_v26  ;;  %538 = vmatpush.bf16.msra.mxu2 %v1589_v24 }
 0x32c   :  { %1780 = vrcp.f32 %v436_v28  ;;  %v448_v48 = vand.u32 2147483648, %v436_v28  ;;  %vm442_vm15 = vweird.f32 %v436_v28  ;;  %v446_v49 = vand.u32 2147483647, %v436_v28 }
 0x32d   :  { %v407_v40 = vor.u32 1.1754944e-38, %v406_v36  ;;  %vm405_vm13 = vcmp.eq.f32.partialorder %v404_v37, 8.507059e+37 }
 0x32e   :  { %v449_v53 = vor.u32 1.1754944e-38, %v448_v48  ;;  %vm447_vm2 = vcmp.eq.f32.partialorder %v446_v49, 8.507059e+37 }
 0x331   :  { %v1779_v29 = vpop.eup %1778 }
 0x332   :  { %v396_v62 = vmul.f32 %v1779_v29, %v394_v26  ;;  %v1781_v31 = vpop.eup %1780  ;;  %vm401_vm10 = vweird.f32 %v1779_v29 }
 0x333   :  { %v438_v33 = vmul.f32 %v1781_v31, %v436_v28  ;;  %vm402_vm12 = vmor %vm400_vm11, %vm401_vm10  ;;  %vm443_vm14 = vweird.f32 %v1781_v31 }
 0x334   :  { %v397_v30 = vsub.f32 1.0, %v396_v62  ;;  %vm444_vm1 = vmor %vm442_vm15, %vm443_vm14 }
 0x335   :  { %v439_v35 = vsub.f32 1.0, %v438_v33 }
 0x336   :  { %v398_v32 = vmul.f32 %v1779_v29, %v397_v30  ;;  %v87_v30 = vpop.f32.mrf.mxu0 }
 0x337   :  { %v440_v39 = vmul.f32 %v1781_v31, %v439_v35 }
 0x338   :  { %v399_v34 = vadd.f32 %v1779_v29, %v398_v32 }
 0x339   :  { %v441_v47 = vadd.f32 %v1781_v31, %v440_v39 }
 0x33a   :  { %v403_v38 = vsel %vm402_vm12, %v1779_v29, %v399_v34 }
 0x33b   :  { %v408_v44 = vsel %vm405_vm13, %v407_v40, %v403_v38  ;;  %v445_v51 = vsel %vm444_vm1, %v1781_v31, %v441_v47  ;;  %v88_v31 = vadd.f32 %v87_v30, %v2023_v43 }
 0x33c   :  { %v450_v55 = vsel %vm447_vm2, %v449_v53, %v445_v51  ;;  %v415_v3 = vmul.f32 %v413_v59, %v408_v44 }
 0x392   :  { %v418_v41 = vpop.permute.xlu0 %417 }
 0x393   :  { %v420_v45 = vmul.f32 %v418_v41, %v408_v44 }
 0x395   :  { %422 = vrot.lane.b32.xlu1 %v420_v45, %s1882_s5 }
 0x39a   :  { %v460_v54 = vpop.permute.xlu1 %459  ;;  %v455_v61 = vpop.permute.xlu0 %454 }
 0x39b   :  { %v462_v57 = vmul.f32 %v460_v54, %v450_v55  ;;  %v457_v63 = vmul.f32 %v455_v61, %v450_v55 }
 0x39d   :  { %464 = vrot.lane.b32.xlu2 %v462_v57, %s1882_s5 }
 0x3f7   :  { %v465_v0 = vpop.permute.xlu2 %464 }
 0x3f8   :  { %v467_v1 = vadd.f32 %v465_v0, %v457_v63 }
 0x3fa   :  { %1782 = vtanh.f32 %v467_v1 }
 0x400   :  { %v1783_v2 = vpop.eup %1782 }
 0x401   :  { %470 = vrot.lane.b32.xlu1 %v1783_v2, %s1883_s0 }
 0x407   :  { %v423_v4 = vpop.permute.xlu1 %422 }
 0x408   :  { %v425_v5 = vadd.f32 %v423_v4, %v415_v3 }
 0x40a   :  { %1784 = vtanh.f32 %v425_v5  ;;  %485 = vrot.lane.b32.xlu1 %v425_v5, %s1884_s2 }
 0x410   :  { %v1785_v6 = vpop.eup %1784 }
 0x411   :  { %428 = vrot.lane.b32.xlu0 %v1785_v6, %s1883_s0 }
 0x473   :  { %v471_v7 = vpop.permute.xlu1 %470 }
 0x474   :  { %v2096_v8 = vmul.f32 %v471_v7, %v450_v55 }
 0x476   :  { %480 = vrot.lane.b32.xlu0 %v2096_v8, %s1882_s5 }
 0x47c   :  { %v486_v9 = vpop.permute.xlu1 %485 }
 0x47d   :  { %488 = vst.msk [vmem:[#allocation4] sm:$0xff] %vm148_vm0, %v486_v9 }
 0x483   :  { %v429_v10 = vpop.permute.xlu0 %428 }
 0x484   :  { %v431_v11 = vmul.f32 %v429_v10, %v408_v44  ;;  %v563_v12 = vld [vmem:[#allocation4] sm:$0xff] }
 0x486   :  { %475 = vrot.lane.b32.xlu2 %v431_v11, %s1882_s5 }
 0x48e   :  { %490 = vrot.lane.b32.xlu2 %v467_v1, %s1884_s2 }
 0x496   :  { %585 = vrot.lane.b32.xlu2 %v563_v12, %s1882_s5 }
 0x4e0   :  { %v476_v25 = vpop.permute.xlu2 %475 }
 0x4e1   :  { %478 = vst.msk [vmem:[#allocation3] sm:$0xff] %vm148_vm0, %v476_v25 }
 0x4e2   :  { %1584 = vst.msk [vmem:[%s2489_s8 + $0x8] sm:$0xff] %vm148_vm0, %v476_v25 }
 0x4e8   :  { %v491_v26 = vpop.permute.xlu2 %490  ;;  %v481_v27 = vpop.permute.xlu0 %480  ;;  %v501_v28 = vld [vmem:[#allocation3] sm:$0xff] }
 0x4e9   :  { %493 = vst.msk [vmem:[#allocation5] sm:$0xff] %vm148_vm0, %v491_v26 }
 0x4ea   :  { %483 = vst.msk [vmem:[#allocation3 + $0x8] sm:$0xff] %vm148_vm0, %v481_v27 }
 0x4f0   :  { %v605_v40 = vld [vmem:[#allocation5] sm:$0xff]  ;;  %v586_v16 = vpop.permute.xlu2 %585 }
 0x4f1   :  { %v502_v29 = vld [vmem:[#allocation3 + $0x8] sm:$0xff] }
 0x4f2   :  { %v503_v62 = vpack.c.bf16 %v502_v29, %v501_v28 }
 0x4f4   :  { %1602 = vmatmul.msk.bf16.vlgmr.msra.gmra.mxu2 %vm148_vm0, %v503_v62  ;;  %1603 = vmatmul.msk.bf16.vlgmr.msra.gmra.mxu3 %vm148_vm0, %v503_v62 }
 0x577   :  { %v540_v32 = vpop.f32.mrf.mxu2  ;;  %v553_v33 = vpop.f32.mrf.mxu3 }
 0x578   :  { %v559_v34 = vadd.f32 %v540_v32, %v88_v31  ;;  %v1733_v31 = vld [vmem:[%s2482_s3 + $0x14] sm:$0xf]  ;;  %v1620_v32 = vld [vmem:[%s2482_s3 + $0x18] sm:$0xf0] }
 0x579   :  { %v1623_v33 = vor.u32 %v1733_v31, %v1620_v32 }
 0x57a   :  { %1786 = vtanh.f32 %v559_v34  ;;  %v1604_v41 = vmul.f32 -1.442695, %v559_v34  ;;  %v1618_v34 = vld [vmem:[%s2482_s3 + $0x10] sm:$0xf] }
 0x57b   :  { %723 = vmatpush.bf16.msrb.mxu3 %v1623_v33 }
 0x57f   :  { %v542_v35 = vpop.f32.mrf.mxu2  ;;  %v554_v36 = vpop.f32.mrf.mxu3 }
 0x580   :  { %v1787_v37 = vpop.eup %1786  ;;  %v562_v38 = vadd.f32 %v554_v36, %v2035_v60  ;;  %v1734_v35 = vld [vmem:[%s2482_s3 + $0x14] sm:$0xf0]  ;;  %v1731_v36 = vld [vmem:[%s2482_s3 + $0x4] sm:$0xf] }
 0x581   :  { %590 = vrot.lane.b32.xlu0 %v1787_v37, %s1883_s0  ;;  %v1619_v37 = vor.u32 %v1734_v35, %v1618_v34 }
 0x582   :  { %1788 = vtanh.f32 %v562_v38  ;;  %v1605_v44 = vmul.f32 -1.442695, %v562_v38  ;;  %v1612_v38 = vld [vmem:[%s2482_s3 + $0x8] sm:$0xf0] }
 0x583   :  { %1790 = vpow2.f32 %v1604_v41  ;;  %v1615_v41 = vor.u32 %v1731_v36, %v1612_v38  ;;  %710 = vmatpush.bf16.msrb.mxu2 %v1619_v37 }
 0x584   :  { %1792 = vpow2.f32 %v1605_v44 }
 0x585   :  { %724 = vmatpush.bf16.msrb.mxu3 %v1615_v41 }
 0x588   :  { %v1789_v39 = vpop.eup %1788 }
 0x589   :  { %632 = vrot.lane.b32.xlu1 %v1789_v39, %s1883_s0  ;;  %627 = vrot.lane.b32.xlu0 %v605_v40, %s1882_s5  ;;  %v1791_v45 = vpop.eup %1790  ;;  %v1610_v39 = vld [vmem:[%s2482_s3] sm:$0xf]  ;;  %v1732_v40 = vld [vmem:[%s2482_s3 + $0x4] sm:$0xf0] }
 0x58a   :  { %v567_v47 = vadd.f32 1.0, %v1791_v45  ;;  %v1793_v48 = vpop.eup %1792  ;;  %v1611_v44 = vor.u32 %v1732_v40, %v1610_v39 }
 0x58b   :  { %v609_v49 = vadd.f32 1.0, %v1793_v48 }
 0x58c   :  { %1794 = vrcp.f32 %v567_v47  ;;  %v579_v63 = vand.u32 2147483648, %v567_v47  ;;  %vm573_vm4 = vweird.f32 %v567_v47  ;;  %v577_v0 = vand.u32 2147483647, %v567_v47  ;;  %711 = vmatpush.bf16.msrb.mxu2 %v1611_v44 }
 0x58d   :  { %1796 = vrcp.f32 %v609_v49  ;;  %v621_v9 = vand.u32 2147483648, %v609_v49  ;;  %vm615_vm8 = vweird.f32 %v609_v49  ;;  %v619_v10 = vand.u32 2147483647, %v609_v49 }
 0x58e   :  { %v580_v3 = vor.u32 1.1754944e-38, %v579_v63  ;;  %vm578_vm6 = vcmp.eq.f32.partialorder %v577_v0, 8.507059e+37 }
 0x58f   :  { %v622_v12 = vor.u32 1.1754944e-38, %v621_v9  ;;  %vm620_vm10 = vcmp.eq.f32.partialorder %v619_v10, 8.507059e+37 }
 0x592   :  { %v1795_v51 = vpop.eup %1794 }
 0x593   :  { %v569_v60 = vmul.f32 %v1795_v51, %v567_v47  ;;  %v1797_v54 = vpop.eup %1796  ;;  %vm574_vm3 = vweird.f32 %v1795_v51 }
 0x594   :  { %v611_v57 = vmul.f32 %v1797_v54, %v609_v49  ;;  %vm575_vm5 = vmor %vm573_vm4, %vm574_vm3  ;;  %vm616_vm7 = vweird.f32 %v1797_v54 }
 0x595   :  { %v570_v53 = vsub.f32 1.0, %v569_v60  ;;  %vm617_vm9 = vmor %vm615_vm8, %vm616_vm7 }
 0x596   :  { %v612_v61 = vsub.f32 1.0, %v611_v57 }
 0x597   :  { %v571_v55 = vmul.f32 %v1795_v51, %v570_v53  ;;  %v89_v53 = vpop.f32.mrf.mxu0 }
 0x598   :  { %v613_v2 = vmul.f32 %v1797_v54, %v612_v61 }
 0x599   :  { %v572_v59 = vadd.f32 %v1795_v51, %v571_v55 }
 0x59a   :  { %v614_v7 = vadd.f32 %v1797_v54, %v613_v2 }
 0x59b   :  { %v576_v1 = vsel %vm575_vm5, %v1795_v51, %v572_v59 }
 0x59c   :  { %v581_v5 = vsel %vm578_vm6, %v580_v3, %v576_v1  ;;  %v618_v11 = vsel %vm617_vm9, %v1797_v54, %v614_v7  ;;  %v90_v54 = vadd.f32 %v89_v53, %v2023_v43 }
 0x59d   :  { %v623_v14 = vsel %vm620_vm10, %v622_v12, %v618_v11  ;;  %v588_v22 = vmul.f32 %v586_v16, %v581_v5 }
 0x5f3   :  { %v591_v4 = vpop.permute.xlu0 %590 }
 0x5f4   :  { %v593_v6 = vmul.f32 %v591_v4, %v581_v5 }
 0x5f6   :  { %595 = vrot.lane.b32.xlu1 %v593_v6, %s1882_s5 }
 0x5fb   :  { %v633_v13 = vpop.permute.xlu1 %632  ;;  %v628_v17 = vpop.permute.xlu0 %627 }
 0x5fc   :  { %v635_v15 = vmul.f32 %v633_v13, %v623_v14  ;;  %v630_v18 = vmul.f32 %v628_v17, %v623_v14 }
 0x5fe   :  { %637 = vrot.lane.b32.xlu2 %v635_v15, %s1882_s5 }
 0x658   :  { %v638_v19 = vpop.permute.xlu2 %637 }
 0x659   :  { %v640_v20 = vadd.f32 %v638_v19, %v630_v18 }
 0x65b   :  { %1798 = vtanh.f32 %v640_v20 }
 0x661   :  { %v1799_v21 = vpop.eup %1798 }
 0x662   :  { %643 = vrot.lane.b32.xlu1 %v1799_v21, %s1883_s0 }
 0x668   :  { %v596_v23 = vpop.permute.xlu1 %595 }
 0x669   :  { %v598_v24 = vadd.f32 %v596_v23, %v588_v22 }
 0x66b   :  { %1800 = vtanh.f32 %v598_v24  ;;  %658 = vrot.lane.b32.xlu1 %v598_v24, %s1884_s2 }
 0x671   :  { %v1801_v25 = vpop.eup %1800 }
 0x672   :  { %601 = vrot.lane.b32.xlu0 %v1801_v25, %s1883_s0 }
 0x6d4   :  { %v644_v26 = vpop.permute.xlu1 %643 }
 0x6d5   :  { %v2147_v27 = vmul.f32 %v644_v26, %v623_v14 }
 0x6d7   :  { %653 = vrot.lane.b32.xlu0 %v2147_v27, %s1882_s5 }
 0x6dd   :  { %v659_v28 = vpop.permute.xlu1 %658 }
 0x6de   :  { %661 = vst.msk [vmem:[#allocation4] sm:$0xff] %vm148_vm0, %v659_v28 }
 0x6e4   :  { %v602_v29 = vpop.permute.xlu0 %601 }
 0x6e5   :  { %v604_v62 = vmul.f32 %v602_v29, %v581_v5  ;;  %v736_v30 = vld [vmem:[#allocation4] sm:$0xff] }
 0x6e7   :  { %648 = vrot.lane.b32.xlu2 %v604_v62, %s1882_s5 }
 0x6ef   :  { %663 = vrot.lane.b32.xlu2 %v640_v20, %s1884_s2 }
 0x6f7   :  { %758 = vrot.lane.b32.xlu2 %v736_v30, %s1882_s5 }
 0x741   :  { %v649_v45 = vpop.permute.xlu2 %648 }
 0x742   :  { %651 = vst.msk [vmem:[#allocation3] sm:$0xff] %vm148_vm0, %v649_v45 }
 0x743   :  { %1606 = vst.msk [vmem:[%s2489_s8 + $0x10] sm:$0xff] %vm148_vm0, %v649_v45 }
 0x749   :  { %v664_v47 = vpop.permute.xlu2 %663  ;;  %v654_v48 = vpop.permute.xlu0 %653  ;;  %v674_v49 = vld [vmem:[#allocation3] sm:$0xff] }
 0x74a   :  { %666 = vst.msk [vmem:[#allocation5] sm:$0xff] %vm148_vm0, %v664_v47 }
 0x74b   :  { %656 = vst.msk [vmem:[#allocation3 + $0x8] sm:$0xff] %vm148_vm0, %v654_v48 }
 0x751   :  { %v778_v3 = vld [vmem:[#allocation5] sm:$0xff]  ;;  %v759_v34 = vpop.permute.xlu2 %758 }
 0x752   :  { %v675_v51 = vld [vmem:[#allocation3 + $0x8] sm:$0xff] }
 0x753   :  { %v676_v60 = vpack.c.bf16 %v675_v51, %v674_v49  ;;  %v1737_v49 = vld [vmem:[%s2482_s3 + $0x14] sm:$0xf]  ;;  %v1642_v51 = vld [vmem:[%s2482_s3 + $0x18] sm:$0xf0] }
 0x754   :  { %v1645_v53 = vor.u32 %v1737_v49, %v1642_v51 }
 0x755   :  { %1624 = vmatmul.msk.bf16.vlgmr.msrb.gmra.mxu2 %vm148_vm0, %v676_v60  ;;  %1625 = vmatmul.msk.bf16.vlgmr.msrb.gmra.mxu3 %vm148_vm0, %v676_v60  ;;  %v1640_v60 = vld [vmem:[%s2482_s3 + $0x10] sm:$0xf] }
 0x756   :  { %896 = vmatpush.bf16.msrb.mxu1 %v1645_v53 }
 0x7d8   :  { %v713_v55 = vpop.f32.mrf.mxu2  ;;  %v726_v57 = vpop.f32.mrf.mxu3 }
 0x7d9   :  { %v732_v59 = vadd.f32 %v713_v55, %v90_v54  ;;  %v1738_v54 = vld [vmem:[%s2482_s3 + $0x14] sm:$0xf0]  ;;  %v1735_v55 = vld [vmem:[%s2482_s3 + $0x4] sm:$0xf]  ;;  %v1634_v57 = vld [vmem:[%s2482_s3 + $0x8] sm:$0xf0] }
 0x7db   :  { %1802 = vtanh.f32 %v732_v59  ;;  %v1626_v4 = vmul.f32 -1.442695, %v732_v59  ;;  %v1641_v59 = vor.u32 %v1738_v54, %v1640_v60 }
 0x7dd   :  { %883 = vmatpush.bf16.msrb.mxu0 %v1641_v59 }
 0x7e0   :  { %v715_v61 = vpop.f32.mrf.mxu2  ;;  %v727_v63 = vpop.f32.mrf.mxu3 }
 0x7e1   :  { %v1803_v0 = vpop.eup %1802  ;;  %v735_v1 = vadd.f32 %v727_v63, %v2033_v58  ;;  %v1632_v61 = vld [vmem:[%s2482_s3] sm:$0xf]  ;;  %v1736_v63 = vld [vmem:[%s2482_s3 + $0x4] sm:$0xf0] }
 0x7e2   :  { %763 = vrot.lane.b32.xlu0 %v1803_v0, %s1883_s0  ;;  %v1637_v0 = vor.u32 %v1735_v55, %v1634_v57 }
 0x7e3   :  { %1804 = vtanh.f32 %v735_v1  ;;  %v1627_v5 = vmul.f32 -1.442695, %v735_v1  ;;  %v1633_v1 = vor.u32 %v1736_v63, %v1632_v61 }
 0x7e4   :  { %1806 = vpow2.f32 %v1626_v4  ;;  %897 = vmatpush.bf16.msrb.mxu1 %v1637_v0 }
 0x7e5   :  { %1808 = vpow2.f32 %v1627_v5  ;;  %884 = vmatpush.bf16.msrb.mxu0 %v1633_v1 }
 0x7e9   :  { %v1805_v2 = vpop.eup %1804 }
 0x7ea   :  { %805 = vrot.lane.b32.xlu1 %v1805_v2, %s1883_s0  ;;  %800 = vrot.lane.b32.xlu0 %v778_v3, %s1882_s5  ;;  %v1807_v6 = vpop.eup %1806 }
 0x7eb   :  { %v740_v7 = vadd.f32 1.0, %v1807_v6  ;;  %v1809_v9 = vpop.eup %1808 }
 0x7ec   :  { %v782_v10 = vadd.f32 1.0, %v1809_v9 }
 0x7ed   :  { %1810 = vrcp.f32 %v740_v7  ;;  %v752_v18 = vand.u32 2147483648, %v740_v7  ;;  %vm746_vm12 = vweird.f32 %v740_v7  ;;  %v750_v19 = vand.u32 2147483647, %v740_v7 }
 0x7ee   :  { %1812 = vrcp.f32 %v782_v10  ;;  %v794_v28 = vand.u32 2147483648, %v782_v10  ;;  %vm788_vm1 = vweird.f32 %v782_v10  ;;  %v792_v29 = vand.u32 2147483647, %v782_v10 }
 0x7ef   :  { %v753_v22 = vor.u32 1.1754944e-38, %v752_v18  ;;  %vm751_vm14 = vcmp.eq.f32.partialorder %v750_v19, 8.507059e+37 }
 0x7f0   :  { %v795_v30 = vor.u32 1.1754944e-38, %v794_v28  ;;  %vm793_vm3 = vcmp.eq.f32.partialorder %v792_v29, 8.507059e+37 }
 0x7f3   :  { %v1811_v11 = vpop.eup %1810 }
 0x7f4   :  { %v742_v58 = vmul.f32 %v1811_v11, %v740_v7  ;;  %v1813_v13 = vpop.eup %1812  ;;  %vm747_vm11 = vweird.f32 %v1811_v11 }
 0x7f5   :  { %v784_v15 = vmul.f32 %v1813_v13, %v782_v10  ;;  %vm748_vm13 = vmor %vm746_vm12, %vm747_vm11  ;;  %vm789_vm15 = vweird.f32 %v1813_v13 }
 0x7f6   :  { %v743_v12 = vsub.f32 1.0, %v742_v58  ;;  %vm790_vm2 = vmor %vm788_vm1, %vm789_vm15 }
 0x7f7   :  { %v785_v17 = vsub.f32 1.0, %v784_v15 }
 0x7f8   :  { %v744_v14 = vmul.f32 %v1811_v11, %v743_v12  ;;  %v92_v12 = vpop.f32.mrf.mxu0 }
 0x7f9   :  { %v786_v21 = vmul.f32 %v1813_v13, %v785_v17 }
 0x7fa   :  { %v745_v16 = vadd.f32 %v1811_v11, %v744_v14 }
 0x7fb   :  { %v787_v26 = vadd.f32 %v1813_v13, %v786_v21 }
 0x7fc   :  { %v749_v20 = vsel %vm748_vm13, %v1811_v11, %v745_v16  ;;  %v93_v16 = vadd.f32 %v92_v12, %v2023_v43 }
 0x7fd   :  { %v754_v24 = vsel %vm751_vm14, %v753_v22, %v749_v20  ;;  %v791_v62 = vsel %vm790_vm2, %v1813_v13, %v787_v26 }
 0x7fe   :  { %v796_v32 = vsel %vm793_vm3, %v795_v30, %v791_v62  ;;  %v761_v40 = vmul.f32 %v759_v34, %v754_v24 }
 0x800   :  { %v2239_v13 = vpop.f32.mrf.mxu0 }
 0x808   :  { %v2241_v14 = vpop.f32.mrf.mxu0 }
 0x810   :  { %v2243_v15 = vpop.f32.mrf.mxu0 }
 0x854   :  { %v764_v23 = vpop.permute.xlu0 %763 }
 0x855   :  { %v766_v25 = vmul.f32 %v764_v23, %v754_v24 }
 0x857   :  { %768 = vrot.lane.b32.xlu1 %v766_v25, %s1882_s5 }
 0x85c   :  { %v806_v31 = vpop.permute.xlu1 %805  ;;  %v801_v35 = vpop.permute.xlu0 %800 }
 0x85d   :  { %v808_v33 = vmul.f32 %v806_v31, %v796_v32  ;;  %v803_v36 = vmul.f32 %v801_v35, %v796_v32 }
 0x85f   :  { %810 = vrot.lane.b32.xlu2 %v808_v33, %s1882_s5 }
 0x8b9   :  { %v811_v37 = vpop.permute.xlu2 %810 }
 0x8ba   :  { %v813_v38 = vadd.f32 %v811_v37, %v803_v36 }
 0x8bc   :  { %1814 = vtanh.f32 %v813_v38 }
 0x8c2   :  { %v1815_v39 = vpop.eup %1814 }
 0x8c3   :  { %816 = vrot.lane.b32.xlu1 %v1815_v39, %s1883_s0 }
 0x8c9   :  { %v769_v41 = vpop.permute.xlu1 %768 }
 0x8ca   :  { %v771_v44 = vadd.f32 %v769_v41, %v761_v40 }
 0x8cc   :  { %1816 = vtanh.f32 %v771_v44  ;;  %831 = vrot.lane.b32.xlu1 %v771_v44, %s1884_s2 }
 0x8d2   :  { %v1817_v45 = vpop.eup %1816 }
 0x8d3   :  { %774 = vrot.lane.b32.xlu0 %v1817_v45, %s1883_s0 }
 0x935   :  { %v817_v47 = vpop.permute.xlu1 %816 }
 0x936   :  { %v2198_v48 = vmul.f32 %v817_v47, %v796_v32 }
 0x938   :  { %826 = vrot.lane.b32.xlu0 %v2198_v48, %s1882_s5 }
 0x93e   :  { %v832_v2 = vpop.permute.xlu1 %831 }
 0x93f   :  { %834 = vst.msk [vmem:[#allocation4] sm:$0xff] %vm148_vm0, %v832_v2 }
 0x945   :  { %v775_v3 = vpop.permute.xlu0 %774 }
 0x946   :  { %v777_v4 = vmul.f32 %v775_v3, %v754_v24  ;;  %v907_v5 = vld [vmem:[#allocation4] sm:$0xff] }
 0x948   :  { %821 = vrot.lane.b32.xlu2 %v777_v4, %s1882_s5 }
 0x950   :  { %836 = vrot.lane.b32.xlu2 %v813_v38, %s1884_s2 }
 0x958   :  { %929 = vrot.lane.b32.xlu2 %v907_v5, %s1882_s5 }
 0x9a2   :  { %v822_v6 = vpop.permute.xlu2 %821 }
 0x9a3   :  { %824 = vst.msk [vmem:[#allocation3] sm:$0xff] %vm148_vm0, %v822_v6 }
 0x9a4   :  { %1628 = vst.msk [vmem:[%s2489_s8 + $0x18] sm:$0xff] %vm148_vm0, %v822_v6 }
 0x9aa   :  { %v837_v7 = vpop.permute.xlu2 %836  ;;  %v827_v9 = vpop.permute.xlu0 %826  ;;  %v847_v10 = vld [vmem:[#allocation3] sm:$0xff] }
 0x9ab   :  { %839 = vst.msk [vmem:[#allocation5] sm:$0xff] %vm148_vm0, %v837_v7 }
 0x9ac   :  { %829 = vst.msk [vmem:[#allocation3 + $0x8] sm:$0xff] %vm148_vm0, %v827_v9 }
 0x9b2   :  { %v949_v25 = vld [vmem:[#allocation5] sm:$0xff]  ;;  %v930_v0 = vpop.permute.xlu2 %929 }
 0x9b3   :  { %v848_v11 = vld [vmem:[#allocation3 + $0x8] sm:$0xff] }
 0x9b4   :  { %v849_v58 = vpack.c.bf16 %v848_v11, %v847_v10 }
 0x9b6   :  { %1646 = vmatmul.msk.bf16.vlgmr.msrb.gmra.mxu0 %vm148_vm0, %v849_v58  ;;  %1647 = vmatmul.msk.bf16.vlgmr.msrb.gmra.mxu1 %vm148_vm0, %v849_v58 }
 0xa33   :  { %v886_v17 = vpop.f32.mrf.mxu0  ;;  %v899_v18 = vpop.f32.mrf.mxu1 }
 0xa34   :  { %v904_v19 = vadd.f32 %v886_v17, %v93_v16 }
 0xa36   :  { %1818 = vtanh.f32 %v904_v19  ;;  %v1648_v26 = vmul.f32 -1.442695, %v904_v19  ;;  %v1741_v19 = vld [vmem:[%s2482_s3 + $0x14] sm:$0xf] }
 0xa3b   :  { %v888_v20 = vpop.f32.mrf.mxu0  ;;  %v900_v21 = vpop.f32.mrf.mxu1 }
 0xa3c   :  { %v1819_v22 = vpop.eup %1818  ;;  %v906_v23 = vadd.f32 %v900_v21, %v2031_v56  ;;  %v1664_v20 = vld [vmem:[%s2482_s3 + $0x18] sm:$0xf0] }
 0xa3d   :  { %934 = vrot.lane.b32.xlu0 %v1819_v22, %s1883_s0  ;;  %v1667_v21 = vor.u32 %v1741_v19, %v1664_v20  ;;  %v1662_v22 = vld [vmem:[%s2482_s3 + $0x10] sm:$0xf] }
 0xa3e   :  { %1820 = vtanh.f32 %v906_v23  ;;  %v1649_v28 = vmul.f32 -1.442695, %v906_v23  ;;  %v1742_v23 = vld [vmem:[%s2482_s3 + $0x14] sm:$0xf0] }
 0xa3f   :  { %1822 = vpow2.f32 %v1648_v26  ;;  %1065 = vmatpush.bf16.msra.mxu3 %v1667_v21  ;;  %v1656_v26 = vld [vmem:[%s2482_s3 + $0x8] sm:$0xf0] }
 0xa40   :  { %1824 = vpow2.f32 %v1649_v28  ;;  %v1654_v28 = vld [vmem:[%s2482_s3] sm:$0xf] }
 0xa44   :  { %v1821_v24 = vpop.eup %1820 }
 0xa45   :  { %976 = vrot.lane.b32.xlu1 %v1821_v24, %s1883_s0  ;;  %971 = vrot.lane.b32.xlu0 %v949_v25, %s1882_s5  ;;  %v1823_v29 = vpop.eup %1822  ;;  %v1739_v24 = vld [vmem:[%s2482_s3 + $0x4] sm:$0xf]  ;;  %v1663_v25 = vor.u32 %v1742_v23, %v1662_v22 }
 0xa46   :  { %v911_v62 = vadd.f32 1.0, %v1823_v29  ;;  %v1825_v30 = vpop.eup %1824  ;;  %v1740_v29 = vld [vmem:[%s2482_s3 + $0x4] sm:$0xf0] }
 0xa47   :  { %v953_v31 = vadd.f32 1.0, %v1825_v30  ;;  %1052 = vmatpush.bf16.msra.mxu2 %v1663_v25  ;;  %v1655_v30 = vor.u32 %v1740_v29, %v1654_v28 }
 0xa48   :  { %1826 = vrcp.f32 %v911_v62  ;;  %v923_v39 = vand.u32 2147483648, %v911_v62  ;;  %vm917_vm5 = vweird.f32 %v911_v62  ;;  %v921_v40 = vand.u32 2147483647, %v911_v62 }
 0xa49   :  { %1828 = vrcp.f32 %v953_v31  ;;  %v965_v53 = vand.u32 2147483648, %v953_v31  ;;  %vm959_vm9 = vweird.f32 %v953_v31  ;;  %v963_v54 = vand.u32 2147483647, %v953_v31 }
 0xa4a   :  { %v924_v45 = vor.u32 1.1754944e-38, %v923_v39  ;;  %vm922_vm7 = vcmp.eq.f32.partialorder %v921_v40, 8.507059e+37 }
 0xa4b   :  { %v966_v57 = vor.u32 1.1754944e-38, %v965_v53  ;;  %vm964_vm11 = vcmp.eq.f32.partialorder %v963_v54, 8.507059e+37  ;;  %1053 = vmatpush.bf16.msra.mxu2 %v1655_v30 }
 0xa4e   :  { %v1827_v32 = vpop.eup %1826 }
 0xa4f   :  { %v913_v56 = vmul.f32 %v1827_v32, %v911_v62  ;;  %v1829_v34 = vpop.eup %1828  ;;  %vm918_vm4 = vweird.f32 %v1827_v32  ;;  %v1659_v62 = vor.u32 %v1739_v24, %v1656_v26 }
 0xa50   :  { %v955_v36 = vmul.f32 %v1829_v34, %v953_v31  ;;  %vm919_vm6 = vmor %vm917_vm5, %vm918_vm4  ;;  %vm960_vm8 = vweird.f32 %v1829_v34 }
 0xa51   :  { %v914_v33 = vsub.f32 1.0, %v913_v56  ;;  %vm961_vm10 = vmor %vm959_vm9, %vm960_vm8  ;;  %1066 = vmatpush.bf16.msra.mxu3 %v1659_v62 }
 0xa52   :  { %v956_v38 = vsub.f32 1.0, %v955_v36  ;;  %v95_v36 = vadd.f32 %v2239_v13, %v2023_v43 }
 0xa53   :  { %v915_v35 = vmul.f32 %v1827_v32, %v914_v33 }
 0xa54   :  { %v957_v44 = vmul.f32 %v1829_v34, %v956_v38 }
 0xa55   :  { %v916_v37 = vadd.f32 %v1827_v32, %v915_v35 }
 0xa56   :  { %v958_v60 = vadd.f32 %v1829_v34, %v957_v44 }
 0xa57   :  { %v920_v41 = vsel %vm919_vm6, %v1827_v32, %v916_v37 }
 0xa58   :  { %v925_v49 = vsel %vm922_vm7, %v924_v45, %v920_v41  ;;  %v962_v55 = vsel %vm961_vm10, %v1829_v34, %v958_v60 }
 0xa59   :  { %v967_v61 = vsel %vm964_vm11, %v966_v57, %v962_v55  ;;  %v932_v6 = vmul.f32 %v930_v0, %v925_v49 }
 0xaaf   :  { %v935_v47 = vpop.permute.xlu0 %934 }
 0xab0   :  { %v937_v51 = vmul.f32 %v935_v47, %v925_v49 }
 0xab2   :  { %939 = vrot.lane.b32.xlu1 %v937_v51, %s1882_s5 }
 0xab7   :  { %v977_v59 = vpop.permute.xlu1 %976  ;;  %v972_v1 = vpop.permute.xlu0 %971 }
 0xab8   :  { %v979_v63 = vmul.f32 %v977_v59, %v967_v61  ;;  %v974_v2 = vmul.f32 %v972_v1, %v967_v61 }
 0xaba   :  { %981 = vrot.lane.b32.xlu2 %v979_v63, %s1882_s5 }
 0xb14   :  { %v982_v3 = vpop.permute.xlu2 %981 }
 0xb15   :  { %v984_v4 = vadd.f32 %v982_v3, %v974_v2 }
 0xb17   :  { %1830 = vtanh.f32 %v984_v4 }
 0xb1d   :  { %v1831_v5 = vpop.eup %1830 }
 0xb1e   :  { %987 = vrot.lane.b32.xlu1 %v1831_v5, %s1883_s0 }
 0xb24   :  { %v940_v7 = vpop.permute.xlu1 %939 }
 0xb25   :  { %v942_v9 = vadd.f32 %v940_v7, %v932_v6 }
 0xb27   :  { %1832 = vtanh.f32 %v942_v9  ;;  %1002 = vrot.lane.b32.xlu1 %v942_v9, %s1884_s2 }
 0xb2d   :  { %v1833_v10 = vpop.eup %1832 }
 0xb2e   :  { %945 = vrot.lane.b32.xlu0 %v1833_v10, %s1883_s0 }
 0xb90   :  { %v988_v11 = vpop.permute.xlu1 %987 }
 0xb91   :  { %v2255_v58 = vmul.f32 %v988_v11, %v967_v61 }
 0xb93   :  { %997 = vrot.lane.b32.xlu0 %v2255_v58, %s1882_s5 }
 0xb99   :  { %v1003_v12 = vpop.permute.xlu1 %1002 }
 0xb9a   :  { %1005 = vst.msk [vmem:[#allocation4] sm:$0xff] %vm148_vm0, %v1003_v12 }
 0xba0   :  { %v946_v16 = vpop.permute.xlu0 %945 }
 0xba1   :  { %v948_v17 = vmul.f32 %v946_v16, %v925_v49  ;;  %v1076_v18 = vld [vmem:[#allocation4] sm:$0xff] }
 0xba3   :  { %992 = vrot.lane.b32.xlu2 %v948_v17, %s1882_s5 }
 0xbab   :  { %1007 = vrot.lane.b32.xlu2 %v984_v4, %s1884_s2 }
 0xbb3   :  { %1098 = vrot.lane.b32.xlu2 %v1076_v18, %s1882_s5 }
 0xbfd   :  { %v2287_v31 = vpop.permute.xlu2 %992 }
 0xbfe   :  { %995 = vst.msk [vmem:[#allocation3] sm:$0xff] %vm148_vm0, %v2287_v31 }
 0xc05   :  { %v1008_v32 = vpop.permute.xlu2 %1007  ;;  %v998_v56 = vpop.permute.xlu0 %997  ;;  %v1016_v33 = vld [vmem:[#allocation3] sm:$0xff] }
 0xc06   :  { %1010 = vst.msk [vmem:[#allocation5] sm:$0xff] %vm148_vm0, %v1008_v32 }
 0xc07   :  { %1000 = vst.msk [vmem:[#allocation3 + $0x8] sm:$0xff] %vm148_vm0, %v998_v56 }
 0xc0d   :  { %v1118_v49 = vld [vmem:[#allocation5] sm:$0xff]  ;;  %v1099_v23 = vpop.permute.xlu2 %1098 }
 0xc0e   :  { %v1017_v34 = vld [vmem:[#allocation3 + $0x8] sm:$0xff] }
 0xc0f   :  { %v1018_v35 = vpack.c.bf16 %v1017_v34, %v1016_v33 }
 0xc11   :  { %1668 = vmatmul.msk.bf16.vlgmr.msra.gmra.mxu2 %vm148_vm0, %v1018_v35  ;;  %1669 = vmatmul.msk.bf16.vlgmr.msra.gmra.mxu3 %vm148_vm0, %v1018_v35 }
 0xc94   :  { %v1055_v37 = vpop.f32.mrf.mxu2  ;;  %v1068_v38 = vpop.f32.mrf.mxu3 }
 0xc95   :  { %v1073_v39 = vadd.f32 %v1055_v37, %v95_v36 }
 0xc97   :  { %1834 = vtanh.f32 %v1073_v39  ;;  %v1670_v51 = vmul.f32 -1.442695, %v1073_v39  ;;  %v1745_v39 = vld [vmem:[%s2482_s3 + $0x14] sm:$0xf] }
 0xc9c   :  { %v1057_v40 = vpop.f32.mrf.mxu2  ;;  %v1069_v41 = vpop.f32.mrf.mxu3 }
 0xc9d   :  { %v1835_v44 = vpop.eup %1834  ;;  %v1075_v45 = vadd.f32 %v1069_v41, %v2028_v52  ;;  %v1686_v40 = vld [vmem:[%s2482_s3 + $0x18] sm:$0xf0] }
 0xc9e   :  { %1103 = vrot.lane.b32.xlu0 %v1835_v44, %s1883_s0  ;;  %v1689_v41 = vor.u32 %v1745_v39, %v1686_v40  ;;  %v1684_v44 = vld [vmem:[%s2482_s3 + $0x10] sm:$0xf] }
 0xc9f   :  { %1836 = vtanh.f32 %v1075_v45  ;;  %v1671_v13 = vmul.f32 -1.442695, %v1075_v45  ;;  %v1746_v45 = vld [vmem:[%s2482_s3 + $0x14] sm:$0xf0] }
 0xca0   :  { %1838 = vpow2.f32 %v1670_v51  ;;  %1234 = vmatpush.bf16.msra.mxu1 %v1689_v41  ;;  %v1678_v51 = vld [vmem:[%s2482_s3 + $0x8] sm:$0xf0] }
 0xca1   :  { %1840 = vpow2.f32 %v1671_v13  ;;  %v1676_v13 = vld [vmem:[%s2482_s3] sm:$0xf] }
 0xca5   :  { %v1837_v47 = vpop.eup %1836 }
 0xca6   :  { %1145 = vrot.lane.b32.xlu1 %v1837_v47, %s1883_s0  ;;  %1140 = vrot.lane.b32.xlu0 %v1118_v49, %s1882_s5  ;;  %v1839_v60 = vpop.eup %1838  ;;  %v1743_v47 = vld [vmem:[%s2482_s3 + $0x4] sm:$0xf]  ;;  %v1685_v49 = vor.u32 %v1746_v45, %v1684_v44 }
 0xca7   :  { %v1080_v53 = vadd.f32 1.0, %v1839_v60  ;;  %v1841_v54 = vpop.eup %1840  ;;  %v1744_v60 = vld [vmem:[%s2482_s3 + $0x4] sm:$0xf0] }
 0xca8   :  { %v1122_v55 = vadd.f32 1.0, %v1841_v54  ;;  %1221 = vmatpush.bf16.msra.mxu0 %v1685_v49  ;;  %v1677_v54 = vor.u32 %v1744_v60, %v1676_v13 }
 0xca9   :  { %1842 = vrcp.f32 %v1080_v53  ;;  %v1092_v3 = vand.u32 2147483648, %v1080_v53  ;;  %vm1086_vm13 = vweird.f32 %v1080_v53  ;;  %v1090_v4 = vand.u32 2147483647, %v1080_v53 }
 0xcaa   :  { %1844 = vrcp.f32 %v1122_v55  ;;  %v1134_v16 = vand.u32 2147483648, %v1122_v55  ;;  %vm1128_vm2 = vweird.f32 %v1122_v55  ;;  %v1132_v17 = vand.u32 2147483647, %v1122_v55 }
 0xcab   :  { %v1093_v7 = vor.u32 1.1754944e-38, %v1092_v3  ;;  %vm1091_vm15 = vcmp.eq.f32.partialorder %v1090_v4, 8.507059e+37 }
 0xcac   :  { %v1135_v19 = vor.u32 1.1754944e-38, %v1134_v16  ;;  %vm1133_vm4 = vcmp.eq.f32.partialorder %v1132_v17, 8.507059e+37  ;;  %1222 = vmatpush.bf16.msra.mxu0 %v1677_v54 }
 0xcaf   :  { %v1843_v57 = vpop.eup %1842 }
 0xcb0   :  { %v1082_v52 = vmul.f32 %v1843_v57, %v1080_v53  ;;  %v1845_v61 = vpop.eup %1844  ;;  %vm1087_vm12 = vweird.f32 %v1843_v57  ;;  %v1681_v53 = vor.u32 %v1743_v47, %v1678_v51 }
 0xcb1   :  { %v1124_v0 = vmul.f32 %v1845_v61, %v1122_v55  ;;  %vm1088_vm14 = vmor %vm1086_vm13, %vm1087_vm12  ;;  %vm1129_vm1 = vweird.f32 %v1845_v61 }
 0xcb2   :  { %v1083_v59 = vsub.f32 1.0, %v1082_v52  ;;  %vm1130_vm3 = vmor %vm1128_vm2, %vm1129_vm1  ;;  %1235 = vmatpush.bf16.msra.mxu1 %v1681_v53 }
 0xcb3   :  { %v1125_v2 = vsub.f32 1.0, %v1124_v0  ;;  %v98_v0 = vadd.f32 %v2241_v14, %v2023_v43 }
 0xcb4   :  { %v1084_v63 = vmul.f32 %v1843_v57, %v1083_v59 }
 0xcb5   :  { %v1126_v6 = vmul.f32 %v1845_v61, %v1125_v2 }
 0xcb6   :  { %v1085_v1 = vadd.f32 %v1843_v57, %v1084_v63 }
 0xcb7   :  { %v1127_v12 = vadd.f32 %v1845_v61, %v1126_v6 }
 0xcb8   :  { %v1089_v5 = vsel %vm1088_vm14, %v1843_v57, %v1085_v1 }
 0xcb9   :  { %v1094_v10 = vsel %vm1091_vm15, %v1093_v7, %v1089_v5  ;;  %v1131_v18 = vsel %vm1130_vm3, %v1845_v61, %v1127_v12 }
 0xcba   :  { %v1136_v21 = vsel %vm1133_vm4, %v1135_v19, %v1131_v18  ;;  %v1101_v62 = vmul.f32 %v1099_v23, %v1094_v10 }
 0xd10   :  { %v1104_v9 = vpop.permute.xlu0 %1103 }
 0xd11   :  { %v1106_v11 = vmul.f32 %v1104_v9, %v1094_v10 }
 0xd13   :  { %1108 = vrot.lane.b32.xlu1 %v1106_v11, %s1882_s5 }
 0xd18   :  { %v1146_v20 = vpop.permute.xlu1 %1145  ;;  %v1141_v24 = vpop.permute.xlu0 %1140 }
 0xd19   :  { %v1148_v22 = vmul.f32 %v1146_v20, %v1136_v21  ;;  %v1143_v25 = vmul.f32 %v1141_v24, %v1136_v21 }
 0xd1b   :  { %1150 = vrot.lane.b32.xlu2 %v1148_v22, %s1882_s5 }
 0xd75   :  { %v1151_v26 = vpop.permute.xlu2 %1150 }
 0xd76   :  { %v1153_v28 = vadd.f32 %v1151_v26, %v1143_v25 }
 0xd78   :  { %1846 = vtanh.f32 %v1153_v28 }
 0xd7e   :  { %v1847_v29 = vpop.eup %1846 }
 0xd7f   :  { %1156 = vrot.lane.b32.xlu1 %v1847_v29, %s1883_s0 }
 0xd85   :  { %v1109_v30 = vpop.permute.xlu1 %1108 }
 0xd86   :  { %v1111_v32 = vadd.f32 %v1109_v30, %v1101_v62 }
 0xd88   :  { %1848 = vtanh.f32 %v1111_v32  ;;  %1171 = vrot.lane.b32.xlu1 %v1111_v32, %s1884_s2 }
 0xd8e   :  { %v1849_v56 = vpop.eup %1848 }
 0xd8f   :  { %1114 = vrot.lane.b32.xlu0 %v1849_v56, %s1883_s0 }
 0xdf1   :  { %v1157_v33 = vpop.permute.xlu1 %1156 }
 0xdf2   :  { %v2306_v34 = vmul.f32 %v1157_v33, %v1136_v21 }
 0xdf4   :  { %1166 = vrot.lane.b32.xlu0 %v2306_v34, %s1882_s5 }
 0xdfa   :  { %v1172_v35 = vpop.permute.xlu1 %1171 }
 0xdfb   :  { %1174 = vst.msk [vmem:[#allocation4] sm:$0xff] %vm148_vm0, %v1172_v35 }
 0xe01   :  { %v1115_v36 = vpop.permute.xlu0 %1114 }
 0xe02   :  { %v1117_v37 = vmul.f32 %v1115_v36, %v1094_v10  ;;  %v1245_v38 = vld [vmem:[#allocation4] sm:$0xff] }
 0xe04   :  { %1161 = vrot.lane.b32.xlu2 %v1117_v37, %s1882_s5 }
 0xe0c   :  { %1176 = vrot.lane.b32.xlu2 %v1153_v28, %s1884_s2 }
 0xe14   :  { %1267 = vrot.lane.b32.xlu2 %v1245_v38, %s1882_s5 }
 0xe5e   :  { %v2338_v55 = vpop.permute.xlu2 %1161 }
 0xe5f   :  { %1164 = vst.msk [vmem:[#allocation3] sm:$0xff] %vm148_vm0, %v2338_v55 }
 0xe66   :  { %v1177_v57 = vpop.permute.xlu2 %1176  ;;  %v1167_v52 = vpop.permute.xlu0 %1166  ;;  %v1185_v59 = vld [vmem:[#allocation3] sm:$0xff] }
 0xe67   :  { %1179 = vst.msk [vmem:[#allocation5] sm:$0xff] %vm148_vm0, %v1177_v57 }
 0xe68   :  { %1169 = vst.msk [vmem:[#allocation3 + $0x8] sm:$0xff] %vm148_vm0, %v1167_v52 }
 0xe6e   :  { %v1287_v10 = vld [vmem:[#allocation5] sm:$0xff]  ;;  %v1268_v45 = vpop.permute.xlu2 %1267 }
 0xe6f   :  { %v1186_v61 = vld [vmem:[#allocation3 + $0x8] sm:$0xff] }
 0xe70   :  { %v1187_v63 = vpack.c.bf16 %v1186_v61, %v1185_v59 }
 0xe72   :  { %1690 = vmatmul.msk.bf16.vlgmr.msra.gmra.mxu0 %vm148_vm0, %v1187_v63  ;;  %1691 = vmatmul.msk.bf16.vlgmr.msra.gmra.mxu1 %vm148_vm0, %v1187_v63 }
 0xeef   :  { %v1224_v1 = vpop.f32.mrf.mxu0  ;;  %v1237_v2 = vpop.f32.mrf.mxu1 }
 0xef0   :  { %v1242_v3 = vadd.f32 %v1224_v1, %v98_v0 }
 0xef2   :  { %1850 = vtanh.f32 %v1242_v3  ;;  %v1692_v11 = vmul.f32 -1.442695, %v1242_v3  ;;  %v1706_v3 = vld [vmem:[%s2482_s3 + $0x10] sm:$0xf] }
 0xef7   :  { %v1226_v4 = vpop.f32.mrf.mxu0  ;;  %v1238_v5 = vpop.f32.mrf.mxu1 }
 0xef8   :  { %v1851_v6 = vpop.eup %1850  ;;  %v1244_v7 = vadd.f32 %v1238_v5, %v2025_v46  ;;  %v1750_v4 = vld [vmem:[%s2482_s3 + $0x14] sm:$0xf0] }
 0xef9   :  { %1272 = vrot.lane.b32.xlu0 %v1851_v6, %s1883_s0  ;;  %v1707_v5 = vor.u32 %v1750_v4, %v1706_v3  ;;  %v1698_v6 = vld [vmem:[%s2482_s3] sm:$0xf] }
 0xefa   :  { %1852 = vtanh.f32 %v1244_v7  ;;  %v1693_v14 = vmul.f32 -1.442695, %v1244_v7  ;;  %v1748_v7 = vld [vmem:[%s2482_s3 + $0x4] sm:$0xf0] }
 0xefb   :  { %1854 = vpow2.f32 %v1692_v11  ;;  %1390 = vmatpush.bf16.msrb.mxu2 %v1707_v5  ;;  %v1708_v11 = vld [vmem:[%s2482_s3 + $0x18] sm:$0xf0] }
 0xefc   :  { %1856 = vpow2.f32 %v1693_v14  ;;  %v1747_v14 = vld [vmem:[%s2482_s3 + $0x4] sm:$0xf] }
 0xf00   :  { %v1853_v9 = vpop.eup %1852 }
 0xf01   :  { %1314 = vrot.lane.b32.xlu1 %v1853_v9, %s1883_s0  ;;  %1309 = vrot.lane.b32.xlu0 %v1287_v10, %s1882_s5  ;;  %v1855_v12 = vpop.eup %1854  ;;  %v1749_v9 = vld [vmem:[%s2482_s3 + $0x14] sm:$0xf]  ;;  %v1699_v10 = vor.u32 %v1748_v7, %v1698_v6 }
 0xf02   :  { %v1249_v16 = vadd.f32 1.0, %v1855_v12  ;;  %v1857_v17 = vpop.eup %1856  ;;  %v1700_v12 = vld [vmem:[%s2482_s3 + $0x8] sm:$0xf0] }
 0xf03   :  { %v1291_v18 = vadd.f32 1.0, %v1857_v17  ;;  %1391 = vmatpush.bf16.msrb.mxu2 %v1699_v10  ;;  %v1703_v17 = vor.u32 %v1747_v14, %v1700_v12 }
 0xf04   :  { %1858 = vrcp.f32 %v1249_v16  ;;  %v1261_v26 = vand.u32 2147483648, %v1249_v16  ;;  %vm1255_vm6 = vweird.f32 %v1249_v16  ;;  %v1259_v28 = vand.u32 2147483647, %v1249_v16 }
 0xf05   :  { %1860 = vrcp.f32 %v1291_v18  ;;  %v1303_v36 = vand.u32 2147483648, %v1291_v18  ;;  %vm1297_vm10 = vweird.f32 %v1291_v18  ;;  %v1301_v37 = vand.u32 2147483647, %v1291_v18 }
 0xf06   :  { %v1262_v30 = vor.u32 1.1754944e-38, %v1261_v26  ;;  %vm1260_vm8 = vcmp.eq.f32.partialorder %v1259_v28, 8.507059e+37 }
 0xf07   :  { %v1304_v39 = vor.u32 1.1754944e-38, %v1303_v36  ;;  %vm1302_vm12 = vcmp.eq.f32.partialorder %v1301_v37, 8.507059e+37 }
 0xf0a   :  { %v1859_v19 = vpop.eup %1858 }
 0xf0b   :  { %v1251_v46 = vmul.f32 %v1859_v19, %v1249_v16  ;;  %v1861_v21 = vpop.eup %1860  ;;  %vm1256_vm5 = vweird.f32 %v1859_v19  ;;  %v1711_v16 = vor.u32 %v1749_v9, %v1708_v11 }
 0xf0c   :  { %v1293_v23 = vmul.f32 %v1861_v21, %v1291_v18  ;;  %vm1257_vm7 = vmor %vm1255_vm6, %vm1256_vm5  ;;  %vm1298_vm9 = vweird.f32 %v1861_v21  ;;  %vm326_vm6 = vcmask 523520  }
 0xf0d   :  { %v1252_v20 = vsub.f32 1.0, %v1251_v46  ;;  %vm1299_vm11 = vmor %vm1297_vm10, %vm1298_vm9  ;;  %1403 = vmatpush.bf16.msrb.mxu3 %v1711_v16 }
 0xf0e   :  { %v1294_v25 = vsub.f32 1.0, %v1293_v23  ;;  %v100_v23 = vadd.f32 %v2243_v15, %v2023_v43 }
 0xf0f   :  { %v1253_v22 = vmul.f32 %v1859_v19, %v1252_v20 }
 0xf10   :  { %v1295_v62 = vmul.f32 %v1861_v21, %v1294_v25 }
 0xf11   :  { %v1254_v24 = vadd.f32 %v1859_v19, %v1253_v22  ;;  %1404 = vmatpush.bf16.msrb.mxu3 %v1703_v17 }
 0xf12   :  { %v1296_v35 = vadd.f32 %v1861_v21, %v1295_v62 }
 0xf13   :  { %v1258_v29 = vsel %vm1257_vm7, %v1859_v19, %v1254_v24 }
 0xf14   :  { %v1263_v56 = vsel %vm1260_vm8, %v1262_v30, %v1258_v29  ;;  %v1300_v38 = vsel %vm1299_vm11, %v1861_v21, %v1296_v35 }
 0xf15   :  { %v1305_v41 = vsel %vm1302_vm12, %v1304_v39, %v1300_v38  ;;  %v1270_v53 = vmul.f32 %v1268_v45, %v1263_v56 }
 0xf6b   :  { %v1273_v32 = vpop.permute.xlu0 %1272 }
 0xf6c   :  { %v1275_v33 = vmul.f32 %v1273_v32, %v1263_v56 }
 0xf6e   :  { %1277 = vrot.lane.b32.xlu1 %v1275_v33, %s1882_s5 }
 0xf73   :  { %v1315_v40 = vpop.permute.xlu1 %1314  ;;  %v1310_v47 = vpop.permute.xlu0 %1309 }
 0xf74   :  { %v1317_v44 = vmul.f32 %v1315_v40, %v1305_v41  ;;  %v1312_v49 = vmul.f32 %v1310_v47, %v1305_v41 }
 0xf76   :  { %1319 = vrot.lane.b32.xlu2 %v1317_v44, %s1882_s5 }
 0xfd0   :  { %v1320_v51 = vpop.permute.xlu2 %1319 }
 0xfd1   :  { %v1322_v13 = vadd.f32 %v1320_v51, %v1312_v49 }
 0xfd3   :  { %1862 = vtanh.f32 %v1322_v13 }
 0xfd9   :  { %v1863_v60 = vpop.eup %1862 }
 0xfda   :  { %1325 = vrot.lane.b32.xlu1 %v1863_v60, %s1883_s0 }
 0xfe0   :  { %v1278_v54 = vpop.permute.xlu1 %1277 }
 0xfe1   :  { %v1280_v57 = vadd.f32 %v1278_v54, %v1270_v53 }
 0xfe3   :  { %1864 = vtanh.f32 %v1280_v57  ;;  %1340 = vrot.lane.b32.xlu1 %v1280_v57, %s1884_s2 }
 0xfe9   :  { %v1865_v52 = vpop.eup %1864 }
 0xfea   :  { %1283 = vrot.lane.b32.xlu0 %v1865_v52, %s1883_s0 }
0x104c   :  { %v1326_v59 = vpop.permute.xlu1 %1325 }
0x104d   :  { %v2357_v61 = vmul.f32 %v1326_v59, %v1305_v41 }
0x104f   :  { %1335 = vrot.lane.b32.xlu0 %v2357_v61, %s1882_s5 }
0x1055   :  { %v1341_v63 = vpop.permute.xlu1 %1340 }
0x1056   :  { %1343 = vst.msk [vmem:[#allocation4] sm:$0xff] %vm148_vm0, %v1341_v63 }
0x105c   :  { %v1284_v0 = vpop.permute.xlu0 %1283 }
0x105d   :  { %v1286_v1 = vmul.f32 %v1284_v0, %v1263_v56  ;;  %v1414_v2 = vld [vmem:[#allocation4] sm:$0xff] }
0x105f   :  { %1330 = vrot.lane.b32.xlu2 %v1286_v1, %s1882_s5 }
0x1067   :  { %1345 = vrot.lane.b32.xlu2 %v1322_v13, %s1884_s2 }
0x106f   :  { %1436 = vrot.lane.b32.xlu2 %v1414_v2, %s1882_s5 }
0x10b9   :  { %v2389_v18 = vpop.permute.xlu2 %1330 }
0x10ba   :  { %1333 = vst.msk [vmem:[#allocation3] sm:$0xff] %vm148_vm0, %v2389_v18 }
0x10c1   :  { %v1346_v19 = vpop.permute.xlu2 %1345  ;;  %v1336_v46 = vpop.permute.xlu0 %1335  ;;  %v1354_v20 = vld [vmem:[#allocation3] sm:$0xff] }
0x10c2   :  { %1348 = vst.msk [vmem:[#allocation5] sm:$0xff] %vm148_vm0, %v1346_v19 }
0x10c3   :  { %1338 = vst.msk [vmem:[#allocation3 + $0x8] sm:$0xff] %vm148_vm0, %v1336_v46 }
0x10c9   :  { %v1456_v56 = vld [vmem:[#allocation5] sm:$0xff]  ;;  %v1437_v6 = vpop.permute.xlu2 %1436 }
0x10ca   :  { %v1355_v21 = vld [vmem:[#allocation3 + $0x8] sm:$0xff] }
0x10cb   :  { %v1356_v22 = vpack.c.bf16 %v1355_v21, %v1354_v20 }
0x10cd   :  { %1712 = vmatmul.msk.bf16.vlgmr.msrb.gmra.mxu2 %vm148_vm0, %v1356_v22  ;;  %1713 = vmatmul.msk.bf16.vlgmr.msrb.gmra.mxu3 %vm148_vm0, %v1356_v22 }
0x1150   :  { %v1393_v24 = vpop.f32.mrf.mxu2  ;;  %v1406_v25 = vpop.f32.mrf.mxu3 }
0x1151   :  { %v1411_v26 = vadd.f32 %v1393_v24, %v100_v23 }
0x1153   :  { %1866 = vtanh.f32 %v1411_v26  ;;  %v1714_v33 = vmul.f32 -1.442695, %v1411_v26 }
0x1158   :  { %v1395_v28 = vpop.f32.mrf.mxu2  ;;  %v1407_v29 = vpop.f32.mrf.mxu3 }
0x1159   :  { %v1867_v62 = vpop.eup %1866  ;;  %v1413_v30 = vadd.f32 %v1407_v29, %v2021_v42 }
0x115a   :  { %1441 = vrot.lane.b32.xlu0 %v1867_v62, %s1883_s0 }
0x115b   :  { %1868 = vtanh.f32 %v1413_v30  ;;  %v1715_v43 = vmul.f32 -1.442695, %v1413_v30 }
0x115c   :  { %1870 = vpow2.f32 %v1714_v33 }
0x115d   :  { %1872 = vpow2.f32 %v1715_v43 }
0x1161   :  { %v1869_v32 = vpop.eup %1868 }
0x1162   :  { %1483 = vrot.lane.b32.xlu1 %v1869_v32, %s1883_s0  ;;  %1478 = vrot.lane.b32.xlu0 %v1456_v56, %s1882_s5  ;;  %v1871_v15 = vpop.eup %1870 }
0x1163   :  { %v1418_v35 = vadd.f32 1.0, %v1871_v15  ;;  %v1873_v36 = vpop.eup %1872 }
0x1164   :  { %v1460_v37 = vadd.f32 1.0, %v1873_v36 }
0x1165   :  { %1874 = vrcp.f32 %v1418_v35  ;;  %v1430_v49 = vand.u32 2147483648, %v1418_v35  ;;  %vm1424_vm14 = vweird.f32 %v1418_v35  ;;  %v1428_v51 = vand.u32 2147483647, %v1418_v35 }
0x1166   :  { %1876 = vrcp.f32 %v1460_v37  ;;  %v1472_v63 = vand.u32 2147483648, %v1460_v37  ;;  %vm1466_vm3 = vweird.f32 %v1460_v37  ;;  %v1470_v0 = vand.u32 2147483647, %v1460_v37 }
0x1167   :  { %v1431_v53 = vor.u32 1.1754944e-38, %v1430_v49  ;;  %vm1429_vm1 = vcmp.eq.f32.partialorder %v1428_v51, 8.507059e+37 }
0x1168   :  { %v1473_v2 = vor.u32 1.1754944e-38, %v1472_v63  ;;  %vm1471_vm5 = vcmp.eq.f32.partialorder %v1470_v0, 8.507059e+37 }
0x116b   :  { %v1875_v38 = vpop.eup %1874 }
0x116c   :  { %v1420_v42 = vmul.f32 %v1875_v38, %v1418_v35  ;;  %v1877_v40 = vpop.eup %1876  ;;  %vm1425_vm13 = vweird.f32 %v1875_v38 }
0x116d   :  { %v1462_v44 = vmul.f32 %v1877_v40, %v1460_v37  ;;  %vm1426_vm15 = vmor %vm1424_vm14, %vm1425_vm13  ;;  %vm1467_vm2 = vweird.f32 %v1877_v40 }
0x116e   :  { %v1421_v39 = vsub.f32 1.0, %v1420_v42  ;;  %vm1468_vm4 = vmor %vm1466_vm3, %vm1467_vm2 }
0x116f   :  { %v1463_v47 = vsub.f32 1.0, %v1462_v44 }
0x1170   :  { %v1422_v41 = vmul.f32 %v1875_v38, %v1421_v39 }
0x1171   :  { %v1464_v60 = vmul.f32 %v1877_v40, %v1463_v47 }
0x1172   :  { %v1423_v45 = vadd.f32 %v1875_v38, %v1422_v41 }
0x1173   :  { %v1465_v59 = vadd.f32 %v1877_v40, %v1464_v60 }
0x1174   :  { %v1427_v13 = vsel %vm1426_vm15, %v1875_v38, %v1423_v45 }
0x1175   :  { %v1432_v57 = vsel %vm1429_vm1, %v1431_v53, %v1427_v13  ;;  %v1469_v1 = vsel %vm1468_vm4, %v1877_v40, %v1465_v59 }
0x1176   :  { %v1474_v4 = vsel %vm1471_vm5, %v1473_v2, %v1469_v1 }
0x11cc   :  { %v1442_v54 = vpop.permute.xlu0 %1441 }
0x11cd   :  { %v1444_v52 = vmul.f32 %v1442_v54, %v1432_v57 }
0x11cf   :  { %1446 = vrot.lane.b32.xlu1 %v1444_v52, %s1882_s5 }
0x11d4   :  { %v1484_v3 = vpop.permute.xlu1 %1483  ;;  %v1479_v7 = vpop.permute.xlu0 %1478 }
0x11d5   :  { %v1486_v5 = vmul.f32 %v1484_v3, %v1474_v4  ;;  %v1481_v9 = vmul.f32 %v1479_v7, %v1474_v4 }
0x11d7   :  { %1488 = vrot.lane.b32.xlu2 %v1486_v5, %s1882_s5 }
0x11df   :  { %322 = vrot.lane.b32.xlu2 %v2047_v50, %s1883_s0  ;;  %v1439_v50 = vmul.f32 %v1437_v6, %v1432_v57 }
0x11e7   :  { %842 = vrot.lane.b32.xlu2 %v2198_v48, %s1883_s0 }
0x11ef   :  { %1350 = vrot.lane.b32.xlu2 %v2357_v61, %s1883_s0 }
0x1231   :  { %v1489_v10 = vpop.permute.xlu2 %1488 }
0x1232   :  { %v1491_v11 = vadd.f32 %v1489_v10, %v1481_v9 }
0x1234   :  { %1878 = vtanh.f32 %v1491_v11 }
0x1239   :  { %v323_v14 = vpop.permute.xlu2 %322 }
0x123a   :  { %v1879_v12 = vpop.eup %1878  ;;  %1563 = vst.msk [vmem:[%s2489_s8 + $0x38] sm:$0xff] %vm326_vm6, %v323_v14 }
0x123b   :  { %1494 = vrot.lane.b32.xlu1 %v1879_v12, %s1883_s0 }
0x1241   :  { %v843_v48 = vpop.permute.xlu2 %842  ;;  %v1447_v16 = vpop.permute.xlu1 %1446 }
0x1242   :  { %1629 = vst.msk [vmem:[%s2489_s8 + $0x20] sm:$0xff] %vm326_vm6, %v843_v48  ;;  %v1449_v61 = vadd.f32 %v1447_v16, %v1439_v50 }
0x1243   :  { %1650 = vst.msk [vmem:[%s2489_s8 + $0x20] sm:$0xff] %vm148_vm0, %v2287_v31  ;;  %669 = vrot.lane.b32.xlu1 %v2147_v27, %s1883_s0 }
0x1244   :  { %1880 = vtanh.f32 %v1449_v61  ;;  %1509 = vrot.lane.b32.xlu2 %v1449_v61, %s1884_s2 }
0x1249   :  { %v1351_v17 = vpop.permute.xlu2 %1350 }
0x124a   :  { %v1881_v19 = vpop.eup %1880  ;;  %1695 = vst.msk [vmem:[%s2489_s8 + $0x8] sm:$0xff] %vm326_vm6, %v1351_v17 }
0x124b   :  { %1181 = vrot.lane.b32.xlu1 %v2306_v34, %s1883_s0  ;;  %1452 = vrot.lane.b32.xlu0 %v1881_v19, %s1883_s0 }
0x1253   :  { %496 = vrot.lane.b32.xlu0 %v2096_v8, %s1883_s0 }
0x125b   :  { %1012 = vrot.lane.b32.xlu0 %v2255_v58, %s1883_s0 }
0x129e   :  { %v1510_v27 = vpop.permute.xlu2 %1509 }
0x129f   :  { %1512 = vst.msk [vmem:[#allocation4] sm:$0xff] %vm148_vm0, %v1510_v27 }
0x12ad   :  { %v1495_v31 = vpop.permute.xlu1 %1494 }
0x12ae   :  { %v1497_v46 = vmul.f32 %v1495_v31, %v1474_v4 }
0x12b0   :  { %1504 = vrot.lane.b32.xlu1 %v1497_v46, %s1882_s5 }
0x12b5   :  { %v670_v20 = vpop.permute.xlu1 %669 }
0x12b6   :  { %1607 = vst.msk [vmem:[%s2489_s8 + $0x28] sm:$0xff] %vm326_vm6, %v670_v20 }
0x12b7   :  { %1672 = vst.msk [vmem:[%s2489_s8 + $0x28] sm:$0xff] %vm148_vm0, %v2338_v55 }
0x12b8   :  { %1519 = vrot.lane.b32.xlu1 %v1497_v46, %s1883_s0 }
0x12bd   :  { %v1182_v8 = vpop.permute.xlu1 %1181  ;;  %v1453_v58 = vpop.permute.xlu0 %1452 }
0x12be   :  { %1673 = vst.msk [vmem:[%s2489_s8 + $0x10] sm:$0xff] %vm326_vm6, %v1182_v8  ;;  %v1455_v34 = vmul.f32 %v1453_v58, %v1432_v57 }
0x12c0   :  { %1499 = vrot.lane.b32.xlu0 %v1455_v34, %s1882_s5 }
0x12c5   :  { %v497_v21 = vpop.permute.xlu0 %496 }
0x12c6   :  { %1585 = vst.msk [vmem:[%s2489_s8 + $0x30] sm:$0xff] %vm326_vm6, %v497_v21 }
0x12c7   :  { %1694 = vst.msk [vmem:[%s2489_s8 + $0x30] sm:$0xff] %vm148_vm0, %v2389_v18 }
0x12c8   :  { %1514 = vrot.lane.b32.xlu0 %v1491_v11, %s1884_s2 }
0x12cd   :  { %v1013_v55 = vpop.permute.xlu0 %1012 }
0x12ce   :  { %1651 = vst.msk [vmem:[%s2489_s8 + $0x18] sm:$0xff] %vm326_vm6, %v1013_v55 }
0x1322   :  { %v1505_v22 = vpop.permute.xlu1 %1504 }
0x1323   :  { %1507 = vst.msk [vmem:[#allocation3 + $0x8] sm:$0xff] %vm148_vm0, %v1505_v22 }
0x132a   :  { %v1520_v23 = vpop.permute.xlu1 %1519 }
0x132b   :  { %1522 = vst.msk [vmem:[%s2489_s8] sm:$0xff] %vm326_vm6, %v1520_v23 }
0x1332   :  { %v1500_v24 = vpop.permute.xlu0 %1499 }
0x1333   :  { %1502 = vst.msk [vmem:[#allocation3] sm:$0xff] %vm148_vm0, %v1500_v24 }
0x1334   :  { %1716 = vst.msk [vmem:[%s2489_s8 + $0x38] sm:$0xff] %vm148_vm0, %v1500_v24 }
0x133a   :  { %v1515_v18 = vpop.permute.xlu0 %1514 }
0x133b   :  { %1517 = vst.msk [vmem:[#allocation5] sm:$0xff] %vm148_vm0, %v1515_v18 }

// kernel: _forward_device.3
= control target key start
LH: loop header
LB: loop body
LE: loop exit
PB: predicated region body
PF: predicated region fallthrough
CT: control target
= control target key end

     0   :  { %v4630_v1 = vmov 0   ;;  %vm75_vm4 = vcmask 523264   ;;  %v127_v22 = vlaneseq  ;;  %vm117_vm5 = vcmask 39936   ;;  %s4622_s1 = inlined_call_operand.vmem [shape: bf16[64,5], index: 1, kind: input, shape index: {}]   ;;  %s4623_s6 = inlined_call_operand.vmem [shape: s32[8,1], index: 6, kind: input, shape index: {}]   ;;  %s4624_s2 = inlined_call_operand.vmem [shape: f32[1,5], index: 2, kind: input, shape index: {}]   ;;  %s4625_s0 = inlined_call_operand.vmem [shape: f32[8,8,64], index: 0, kind: input, shape index: {}]   ;;  %s4626_s4 = inlined_call_operand.vmem [shape: f32[1,5], index: 4, kind: input, shape index: {}]   ;;  %s4627_s3 = inlined_call_operand.vmem [shape: f32[5,5], index: 3, kind: input, shape index: {}]   ;;  %s4628_s5 = inlined_call_operand.vmem [shape: f32[1,5], index: 5, kind: input, shape index: {}]   ;;  %s4629_s7 = inlined_call_operand.vmem [shape: s32[1,8,8], index: 7, kind: output, shape index: {}]  }
   0x1   :  { %v2600_v0 = vld [vmem:[%s4622_s1 + $0x18] sm:$0xff]  ;;  %2615 = vset.pattern.permute.xlu2 %v4630_v1  ;;  %2616 = vset.pattern.permute.xlu1 %v4630_v1  ;;  %v2599_v2 = vld [vmem:[%s4622_s1 + $0x10] sm:$0xff]  ;;  %v2687_v3 = vld [vmem:[%s4623_s6] sm:$0xff]  ;;  %vm236_vm7 = vcmask 36864   ;;  %vm419_vm8 = vcmask 1041409   ;;  %vm421_vm9 = vcmask 1042434  }
   0x2   :  { %2614 = vset.pattern.permute.xlu0 %v4630_v1  ;;  %2601 = vmatpush.bf16.msra.mxu1 %v2600_v0  ;;  %vm712_vm0 = vcmp.ge.s32.totalorder %v2687_v3, 2  ;;  %vm1020_vm1 = vcmp.ge.s32.totalorder %v2687_v3, 3  ;;  %vm397_vm2 = vcmp.ge.s32.totalorder %v2687_v3, 1  ;;  %v2598_v4 = vld [vmem:[%s4622_s1 + $0x8] sm:$0xff]  ;;  %v2597_v8 = vld [vmem:[%s4622_s1] sm:$0xff]  ;;  %v29_v9 = vld [vmem:[%s4625_s0 + $0x10] sm:$0xff] }
   0x3   :  { %2602 = vmatpush.bf16.msra.mxu2 %v2600_v0  ;;  %92 = vmatpush.bf16.msra.mxu0 %v2600_v0  ;;  %v713_v5 = vsel %vm712_vm0, 1, %v4630_v1  ;;  %v1021_v6 = vsel %vm1020_vm1, 1, %v4630_v1  ;;  %v398_v7 = vsel %vm397_vm2, 1, %v4630_v1  ;;  %v30_v10 = vld [vmem:[%s4625_s0 + $0x18] sm:$0xff]  ;;  %v31_v11 = vld [vmem:[%s4625_s0 + $0x20] sm:$0xff]  ;;  %v32_v12 = vld [vmem:[%s4625_s0 + $0x28] sm:$0xff] }
   0x4   :  { %2603 = vmatpush.bf16.msra.mxu3 %v2600_v0  ;;  %715 = vperm.xlu2 %2615, %v713_v5   ;;  %v27_v13 = vld [vmem:[%s4625_s0] sm:$0xff]  ;;  %vm1328_vm3 = vcmp.ge.s32.totalorder %v2687_v3, 4  ;;  %v28_v14 = vld [vmem:[%s4625_s0 + $0x8] sm:$0xff]  ;;  %v33_v15 = vld [vmem:[%s4625_s0 + $0x30] sm:$0xff]  ;;  %v36_v17 = vpack.c.bf16 %v30_v10, %v29_v9  ;;  %v37_v18 = vpack.c.bf16 %v32_v12, %v31_v11  ;;  %v2728_v23 = vshrl.u32 %v127_v22, 7 }
   0x5   :  { %1023 = vperm.xlu1 %2616, %v1021_v6   ;;  %400 = vperm.xlu0 %2614, %v398_v7   ;;  %v34_v16 = vld [vmem:[%s4625_s0 + $0x38] sm:$0xff]  ;;  %v1329_v19 = vsel %vm1328_vm3, 1, %v4630_v1  ;;  %v35_v20 = vpack.c.bf16 %v28_v14, %v27_v13  ;;  %v2736_v24 = vld [vmem:[%s4624_s2] ss:$0 sm:$0xff]  ;;  %vm1636_vm6 = vcmp.ge.s32.totalorder %v2687_v3, 5  ;;  %vm423_vm10 = vcmask 1043459  }
   0x6   :  { %2604 = vmatpush.bf16.msra.mxu1 %v2599_v2  ;;  %v38_v21 = vpack.c.bf16 %v34_v16, %v33_v15  ;;  %v2628_v32 = vld [vmem:[%s4626_s4] ss:$0 sm:$0xff]  ;;  %vm425_vm11 = vcmask 1044484   ;;  %vm427_vm12 = vcmask 1045509   ;;  %vm429_vm13 = vcmask 1046534  }
   0x7   :  { %2605 = vmatpush.bf16.msra.mxu2 %v2599_v2  ;;  %93 = vmatpush.bf16.msra.mxu0 %v2599_v2  ;;  %vm431_vm14 = vcmask 1047559  }
   0x8   :  { %2606 = vmatpush.bf16.msra.mxu3 %v2599_v2 }
   0xa   :  { %2607 = vmatpush.bf16.msra.mxu1 %v2598_v4 }
   0xb   :  { %2608 = vmatpush.bf16.msra.mxu2 %v2598_v4  ;;  %94 = vmatpush.bf16.msra.mxu0 %v2598_v4 }
   0xc   :  { %2609 = vmatpush.bf16.msra.mxu3 %v2598_v4  ;;  %1331 = vperm.xlu2 %2615, %v1329_v19  }
   0xd   :  { %2617 = vset.pattern.permute.xlu1 %v2728_v23  ;;  %2619 = vset.pattern.permute.xlu0 %v2728_v23 }
   0xe   :  { %2610 = vmatpush.bf16.msra.mxu1 %v2597_v8 }
   0xf   :  { %2611 = vmatpush.bf16.msra.mxu2 %v2597_v8  ;;  %95 = vmatpush.bf16.msra.mxu0 %v2597_v8 }
  0x10   :  { %2612 = vmatpush.bf16.msra.mxu3 %v2597_v8 }
  0x11   :  { %2594 = vmatmul.msk.bf16.vlgmr.msra.gmra.mxu1 %vm75_vm4, %v36_v17 }
  0x12   :  { %2595 = vmatmul.msk.bf16.vlgmr.msra.gmra.mxu2 %vm75_vm4, %v37_v18  ;;  %2593 = vmatmul.msk.bf16.vlgmr.msra.gmra.mxu0 %vm75_vm4, %v35_v20 }
  0x13   :  { %2596 = vmatmul.msk.bf16.vlgmr.msra.gmra.mxu3 %vm75_vm4, %v38_v21 }
  0x14   :  { %2618 = vset.pattern.permute.xlu2 %v2728_v23 }
  0x5e   :  { %v2756_v13 = vpop.permute.xlu2 %715 }
  0x5f   :  { %vm717_vm0 = vcmp.eq.s32.totalorder %v2756_v13, 1 }
  0x66   :  { %v2758_v19 = vpop.permute.xlu2 %1331 }
  0x67   :  { %vm1333_vm3 = vcmp.eq.s32.totalorder %v2758_v19, 1 }
  0x77   :  { %v2769_v3 = vpop.permute.xlu0 %400 }
  0x78   :  { %vm402_vm15 = vcmp.eq.s32.totalorder %v2769_v3, 1 }
  0x8e   :  { %v102_v25 = vpop.f32.mrf.mxu1 }
  0x8f   :  { %v103_v26 = vadd.f32 %v2736_v24, %v102_v25  ;;  %v97_v27 = vpop.f32.mrf.mxu0 }
  0x90   :  { %v98_v28 = vadd.f32 %v2736_v24, %v97_v27 }
  0x91   :  { %120 = vst.msk [vmem:[#allocation2 + $0x10] sm:$0xff] %vm117_vm5, %v103_v26 }
  0x92   :  { %118 = vst.msk [vmem:[#allocation2] sm:$0xff] %vm117_vm5, %v98_v28 }
  0x95   :  { %v107_v29 = vpop.f32.mrf.mxu2 }
  0x96   :  { %v108_v30 = vadd.f32 %v2736_v24, %v107_v29  ;;  %v104_v31 = vpop.f32.mrf.mxu1  ;;  %v112_v9 = vpop.f32.mrf.mxu3 }
  0x97   :  { %v105_v33 = vadd.f32 %v2736_v24, %v104_v31  ;;  %v99_v34 = vpop.f32.mrf.mxu0  ;;  %v113_v10 = vadd.f32 %v2736_v24, %v112_v9 }
  0x98   :  { %122 = vst.msk [vmem:[#allocation2 + $0x20] sm:$0xff] %vm117_vm5, %v108_v30  ;;  %v487_v35 = vld [vmem:[#allocation2 + $0x10] sm:$0xff]  ;;  %v100_v36 = vadd.f32 %v2736_v24, %v99_v34  ;;  %v1637_v30 = vsel %vm1636_vm6, 1, %v4630_v1 }
  0x99   :  { %121 = vst.msk [vmem:[#allocation2 + $0x18] sm:$0xff] %vm117_vm5, %v105_v33  ;;  %v530_v37 = vperm.slane %v487_v35, 6  ;;  %v495_v38 = vperm.slane %v487_v35, 1  ;;  %v488_v39 = vperm.slane %v487_v35, 0  ;;  %v131_v40 = vld [vmem:[#allocation2] sm:$0xff]  ;;  %v509_v46 = vperm.slane %v487_v35, 3 }
  0x9a   :  { %v135_v41 = vadd.f32 %v2628_v32, %v131_v40  ;;  %119 = vst.msk [vmem:[#allocation2 + $0x8] sm:$0xff] %vm117_vm5, %v100_v36  ;;  %v502_v47 = vperm.slane %v487_v35, 2  ;;  %v523_v49 = vperm.slane %v487_v35, 5  ;;  %v516_v50 = vperm.slane %v487_v35, 4 }
  0x9b   :  { %535 = vperm.xlu0 %2619, %v530_v37   ;;  %500 = vperm.xlu2 %2618, %v495_v38   ;;  %v537_v53 = vperm.slane %v487_v35, 7  ;;  %124 = vst.msk [vmem:[#allocation2 + $0x30] sm:$0xff] %vm117_vm5, %v113_v10  ;;  %v2774_v35 = vpop.permute.xlu1 %1023 }
  0x9c   :  { %493 = vperm.xlu1 %2617, %v488_v39   ;;  %136 = vst.msk [vmem:[#allocation3] sm:$0xff] %vm117_vm5, %v135_v41  ;;  %vm1025_vm1 = vcmp.eq.s32.totalorder %v2774_v35, 1 }
  0x9d   :  { %v109_v42 = vpop.f32.mrf.mxu2 }
  0x9e   :  { %v110_v43 = vadd.f32 %v2736_v24, %v109_v42  ;;  %v114_v27 = vpop.f32.mrf.mxu3 }
  0x9f   :  { %v1103_v44 = vld [vmem:[#allocation2 + $0x20] sm:$0xff]  ;;  %v115_v28 = vadd.f32 %v2736_v24, %v114_v27 }
  0xa0   :  { %v1104_v45 = vperm.slane %v1103_v44, 0  ;;  %123 = vst.msk [vmem:[#allocation2 + $0x28] sm:$0xff] %vm117_vm5, %v110_v43  ;;  %v1118_v48 = vperm.slane %v1103_v44, 2  ;;  %v1139_v51 = vperm.slane %v1103_v44, 5  ;;  %v1111_v52 = vperm.slane %v1103_v44, 1  ;;  %v795_v0 = vld [vmem:[#allocation2 + $0x18] sm:$0xff] }
  0xa1   :  { %v171_v54 = vld [vmem:[#allocation2 + $0x8] sm:$0xff]  ;;  %v1132_v56 = vperm.slane %v1103_v44, 4  ;;  %v1125_v57 = vperm.slane %v1103_v44, 3  ;;  %v1153_v59 = vperm.slane %v1103_v44, 7  ;;  %v1146_v60 = vperm.slane %v1103_v44, 6  ;;  %125 = vst.msk [vmem:[#allocation2 + $0x38] sm:$0xff] %vm117_vm5, %v115_v28 }
  0xa2   :  { %v172_v55 = vperm.slane %v171_v54, 0  ;;  %v179_v58 = vperm.slane %v171_v54, 1  ;;  %v200_v61 = vperm.slane %v171_v54, 4  ;;  %v214_v62 = vperm.slane %v171_v54, 6  ;;  %v2771_v24 = vld [vmem:[#allocation2 + $0x30] sm:$0xff] }
  0xa3   :  { %1109 = vperm.xlu0 %2619, %v1104_v45   ;;  %514 = vperm.xlu2 %2618, %v509_v46   ;;  %v186_v63 = vperm.slane %v171_v54, 2  ;;  %v207_v2 = vperm.slane %v171_v54, 5  ;;  %v796_v4 = vperm.slane %v795_v0, 0  ;;  %v193_v5 = vperm.slane %v171_v54, 3 }
  0xa4   :  { %507 = vperm.xlu1 %2617, %v502_v47   ;;  %v817_v6 = vperm.slane %v795_v0, 3  ;;  %v810_v7 = vperm.slane %v795_v0, 2  ;;  %v221_v8 = vperm.slane %v171_v54, 7  ;;  %v838_v11 = vperm.slane %v795_v0, 6 }
  0xa5   :  { %v831_v12 = vperm.slane %v795_v0, 5  ;;  %v803_v14 = vperm.slane %v795_v0, 1  ;;  %v824_v18 = vperm.slane %v795_v0, 4  ;;  %v845_v25 = vperm.slane %v795_v0, 7 }
  0xa6   :  { %v1720_v37 = vperm.slane %v2771_v24, 0  ;;  %v1727_v38 = vperm.slane %v2771_v24, 1 }
  0xa7   :  { %v1411_v15 = vld [vmem:[#allocation2 + $0x28] sm:$0xff] }
  0xa8   :  { %v1433_v16 = vperm.slane %v1411_v15, 3  ;;  %v1412_v17 = vperm.slane %v1411_v15, 0  ;;  %v1454_v20 = vperm.slane %v1411_v15, 6  ;;  %v1426_v21 = vperm.slane %v1411_v15, 2 }
  0xa9   :  { %v1440_v29 = vperm.slane %v1411_v15, 4  ;;  %v1419_v31 = vperm.slane %v1411_v15, 1  ;;  %v1461_v33 = vperm.slane %v1411_v15, 7  ;;  %v1447_v34 = vperm.slane %v1411_v15, 5 }
  0xab   :  { %1123 = vperm.xlu0 %2619, %v1118_v48   ;;  %528 = vperm.xlu2 %2618, %v523_v49   ;;  %v2800_v49 = vld [vmem:[#allocation3] sm:$0xff] }
  0xac   :  { %521 = vperm.xlu1 %2617, %v516_v50   ;;  %v139_v54 = vrot.slane %v2800_v49, 1  ;;  %v140_v0 = vrot.slane %v2800_v49, 2  ;;  %v144_v10 = vrot.slane %v2800_v49, 6  ;;  %v142_v27 = vrot.slane %v2800_v49, 4 }
  0xb3   :  { %1144 = vperm.xlu0 %2619, %v1139_v51   ;;  %1116 = vperm.xlu2 %2618, %v1111_v52   ;;  %v146_v51 = vperm.slane %v2800_v49, 0  ;;  %v2808_v52 = vld [vmem:[%s4627_s3] sm:$0x1f] }
  0xb4   :  { %542 = vperm.xlu1 %2617, %v537_v53  }
  0xb5   :  { %v162_v53 = vadd.f32 %v146_v51, %v2808_v52 }
  0xbb   :  { %1137 = vperm.xlu2 %2618, %v1132_v56   ;;  %177 = vperm.xlu0 %2619, %v172_v55  }
  0xbc   :  { %1130 = vperm.xlu1 %2617, %v1125_v57  }
  0xc3   :  { %1158 = vperm.xlu2 %2618, %v1153_v59   ;;  %184 = vperm.xlu0 %2619, %v179_v58  }
  0xc4   :  { %1151 = vperm.xlu1 %2617, %v1146_v60   ;;  %v147_v60 = vperm.slane %v139_v54, 0 }
  0xcb   :  { %205 = vperm.xlu2 %2618, %v200_v61   ;;  %219 = vperm.xlu0 %2619, %v214_v62   ;;  %v143_v61 = vrot.slane %v2800_v49, 5  ;;  %v163_v62 = vadd.f32 %v147_v60, %v2808_v52 }
  0xcc   :  { %191 = vperm.xlu1 %2617, %v186_v63  }
  0xd3   :  { %212 = vperm.xlu2 %2618, %v207_v2   ;;  %801 = vperm.xlu0 %2619, %v796_v4   ;;  %v151_v2 = vperm.slane %v143_v61, 0 }
  0xd4   :  { %198 = vperm.xlu1 %2617, %v193_v5  }
  0xd5   :  { %v167_v9 = vadd.f32 %v151_v2, %v2808_v52 }
  0xdb   :  { %822 = vperm.xlu2 %2618, %v817_v6   ;;  %815 = vperm.xlu0 %2619, %v810_v7  }
  0xdc   :  { %226 = vperm.xlu1 %2617, %v221_v8   ;;  %v148_v8 = vperm.slane %v140_v0, 0 }
  0xe3   :  { %843 = vperm.xlu2 %2618, %v838_v11   ;;  %836 = vperm.xlu0 %2619, %v831_v12   ;;  %v164_v12 = vadd.f32 %v148_v8, %v2808_v52 }
  0xe4   :  { %808 = vperm.xlu1 %2617, %v803_v14   ;;  %v141_v14 = vrot.slane %v2800_v49, 3 }
  0xeb   :  { %1438 = vperm.xlu2 %2618, %v1433_v16   ;;  %1417 = vperm.xlu0 %2619, %v1412_v17   ;;  %v152_v17 = vperm.slane %v144_v10, 0 }
  0xec   :  { %829 = vperm.xlu1 %2617, %v824_v18  }
  0xed   :  { %v168_v28 = vadd.f32 %v152_v17, %v2808_v52 }
  0xf3   :  { %1459 = vperm.xlu2 %2618, %v1454_v20   ;;  %1431 = vperm.xlu0 %2619, %v1426_v21   ;;  %v149_v21 = vperm.slane %v141_v14, 0 }
  0xf4   :  { %850 = vperm.xlu1 %2617, %v845_v25  }
  0xf5   :  { %v2760_v26 = vpop.permute.xlu2 %500 }
  0xfb   :  { %1445 = vperm.xlu0 %2619, %v1440_v29   ;;  %2620 = vset.pattern.permute.xlu2 %v4630_v1 }
  0xfc   :  { %1424 = vperm.xlu1 %2617, %v1419_v31   ;;  %1639 = vperm.xlu2 %2620, %v1637_v30   ;;  %v165_v30 = vadd.f32 %v149_v21, %v2808_v52 }
  0xfd   :  { %v2767_v32 = vpop.permute.xlu2 %514 }
 0x103   :  { %1466 = vperm.xlu0 %2619, %v1461_v33   ;;  %v150_v33 = vperm.slane %v142_v27, 0 }
 0x104   :  { %1452 = vperm.xlu1 %2617, %v1447_v34   ;;  %2621 = vset.pattern.permute.xlu2 %v2728_v23 }
 0x105   :  { %v2776_v36 = vpop.permute.xlu2 %528  ;;  %v166_v51 = vadd.f32 %v150_v33, %v2808_v52 }
 0x10b   :  { %1725 = vperm.xlu0 %2619, %v1720_v37  }
 0x10c   :  { %1732 = vperm.xlu1 %2617, %v1727_v38  }
 0x10d   :  { %v2780_v39 = vpop.permute.xlu0 %535  ;;  %v2784_v41 = vpop.permute.xlu2 %1116 }
 0x10e   :  { %v2782_v40 = vpop.permute.xlu1 %493 }
 0x115   :  { %v2786_v42 = vpop.permute.xlu0 %1109  ;;  %v2790_v44 = vpop.permute.xlu2 %1137 }
 0x116   :  { %v2788_v43 = vpop.permute.xlu1 %507 }
 0x11d   :  { %v2792_v45 = vpop.permute.xlu0 %1123  ;;  %v2796_v47 = vpop.permute.xlu2 %1158 }
 0x11e   :  { %v2794_v46 = vpop.permute.xlu1 %521 }
 0x125   :  { %v2798_v48 = vpop.permute.xlu0 %1144  ;;  %v206_v58 = vpop.permute.xlu2 %205 }
 0x126   :  { %v2802_v50 = vpop.permute.xlu1 %542  ;;  %v2852_v54 = vadd.f32 %v206_v58, %v166_v51  ;;  %v1748_v58 = vperm.slane %v2771_v24, 4 }
 0x128   :  { %4702 = vst [vmem:[#allocation13_spill] sm:$0xff] %v2852_v54 }
 0x12d   :  { %v178_v55 = vpop.permute.xlu0 %177  ;;  %v213_v7 = vpop.permute.xlu2 %212 }
 0x12e   :  { %v2812_v56 = vpop.permute.xlu1 %1130  ;;  %v2814_v57 = vadd.f32 %v178_v55, %v162_v53  ;;  %v2829_v11 = vadd.f32 %v213_v7, %v167_v9  ;;  %v145_v53 = vrot.slane %v2800_v49, 7 }
 0x130   :  { %4696 = vst [vmem:[#allocation7_spill] sm:$0xff] %v2814_v57  ;;  %v237_v59 = vsel %vm236_vm7, %v2814_v57, -inf  ;;  %v252_v18 = vsel %vm236_vm7, %v2829_v11, -inf  ;;  %v153_v55 = vperm.slane %v145_v53, 0 }
 0x131   :  { %238 = vmax.xlane.f32.xlu2 %v237_v59  ;;  %4698 = vst [vmem:[#allocation9_spill] sm:$0xff] %v2829_v11  ;;  %v249_v59 = vsel %vm236_vm7, %v2852_v54, -inf }
 0x132   :  { %v169_v61 = vadd.f32 %v153_v55, %v2808_v52  ;;  %v2909_v55 = vand.u32 127, %v127_v22 }
 0x135   :  { %v185_v63 = vpop.permute.xlu0 %184  ;;  %v2872_v10 = vpop.permute.xlu2 %822 }
 0x136   :  { %v2821_v4 = vpop.permute.xlu1 %1151  ;;  %v2823_v5 = vadd.f32 %v185_v63, %v163_v62  ;;  %v1734_v62 = vperm.slane %v2771_v24, 2 }
 0x138   :  { %4697 = vst [vmem:[#allocation8_spill] sm:$0xff] %v2823_v5  ;;  %v240_v6 = vsel %vm236_vm7, %v2823_v5, -inf }
 0x139   :  { %241 = vmax.xlane.f32.xlu0 %v240_v6  ;;  %v1741_v6 = vperm.slane %v2771_v24, 3 }
 0x13d   :  { %v220_v25 = vpop.permute.xlu0 %219 }
 0x13e   :  { %v192_v15 = vpop.permute.xlu1 %191  ;;  %v2841_v29 = vadd.f32 %v220_v25, %v168_v28 }
 0x13f   :  { %v2833_v16 = vadd.f32 %v192_v15, %v164_v12  ;;  %v2878_v15 = vpop.permute.xlu2 %843 }
 0x140   :  { %4700 = vst [vmem:[#allocation11_spill] sm:$0xff] %v2841_v29  ;;  %v255_v38 = vsel %vm236_vm7, %v2841_v29, -inf }
 0x141   :  { %4699 = vst [vmem:[#allocation10_spill] sm:$0xff] %v2833_v16  ;;  %v243_v20 = vsel %vm236_vm7, %v2833_v16, -inf  ;;  %253 = vmax.xlane.f32.xlu0 %v252_v18 }
 0x142   :  { %244 = vmax.xlane.f32.xlu1 %v243_v20 }
 0x145   :  { %v2863_v2 = vpop.permute.xlu0 %801 }
 0x146   :  { %v199_v31 = vpop.permute.xlu1 %198 }
 0x147   :  { %v2844_v34 = vadd.f32 %v199_v31, %v165_v30  ;;  %v2884_v20 = vpop.permute.xlu2 %1438 }
 0x149   :  { %4701 = vst [vmem:[#allocation12_spill] sm:$0xff] %v2844_v34  ;;  %v246_v37 = vsel %vm236_vm7, %v2844_v34, -inf }
 0x14a   :  { %247 = vmax.xlane.f32.xlu2 %v246_v37  ;;  %256 = vmax.xlane.f32.xlu1 %v255_v38 }
 0x14d   :  { %v2866_v7 = vpop.permute.xlu0 %815 }
 0x14e   :  { %v227_v60 = vpop.permute.xlu1 %226 }
 0x14f   :  { %v2858_v63 = vadd.f32 %v227_v60, %v169_v61  ;;  %v2890_v27 = vpop.permute.xlu2 %1459 }
 0x151   :  { %4703 = vst [vmem:[#allocation14_spill] sm:$0xff] %v2858_v63  ;;  %v258_v0 = vsel %vm236_vm7, %v2858_v63, -inf }
 0x152   :  { %250 = vmax.xlane.f32.xlu2 %v249_v59 }
 0x155   :  { %1739 = vperm.xlu0 %2619, %v1734_v62   ;;  %v2868_v8 = vpop.permute.xlu0 %836 }
 0x156   :  { %v2870_v9 = vpop.permute.xlu1 %808 }
 0x157   :  { %v2894_v30 = vpop.permute.xlu2 %1639 }
 0x158   :  { %vm1641_vm4 = vcmp.eq.s32.totalorder %v2894_v30, 1 }
 0x15a   :  { %259 = vmax.xlane.f32.xlu2 %v258_v0 }
 0x15d   :  { %v2874_v12 = vpop.permute.xlu0 %1417 }
 0x15e   :  { %v2876_v14 = vpop.permute.xlu1 %829 }
 0x163   :  { %1753 = vperm.xlu1 %2617, %v1748_v58  }
 0x165   :  { %v2880_v17 = vpop.permute.xlu0 %1431 }
 0x166   :  { %v2882_v18 = vpop.permute.xlu1 %850 }
 0x16d   :  { %v2886_v21 = vpop.permute.xlu0 %1445 }
 0x16e   :  { %v2888_v25 = vpop.permute.xlu1 %1424 }
 0x172   :  { %1746 = vperm.xlu2 %2621, %v1741_v6  }
 0x175   :  { %v2892_v28 = vpop.permute.xlu0 %1466 }
 0x176   :  { %v2896_v31 = vpop.permute.xlu1 %1452 }
 0x17d   :  { %v2898_v33 = vpop.permute.xlu0 %1725 }
 0x17e   :  { %v2902_v38 = vpop.permute.xlu1 %1732 }
 0x1a4   :  { %v2900_v37 = vpop.xlane.xlu2 %238 }
 0x1a5   :  { %4704 = vst [vmem:[#allocation15_spill] sm:$0xff] %v2900_v37  ;;  %v411_v62 = vperm.slane %v2900_v37, %v2909_v55 }
 0x1ac   :  { %v2904_v51 = vpop.xlane.xlu0 %241 }
 0x1ad   :  { %4705 = vst [vmem:[#allocation16_spill] sm:$0xff] %v2904_v51  ;;  %v412_v60 = vperm.slane %v2904_v51, %v2909_v55 }
 0x1af   :  { %v420_v22 = vsel %vm419_vm8, %v412_v60, %v411_v62 }
 0x1b4   :  { %v2927_v29 = vpop.xlane.xlu0 %253 }
 0x1b5   :  { %v2911_v59 = vpop.xlane.xlu1 %244  ;;  %4709 = vst [vmem:[#allocation20_spill] sm:$0xff] %v2927_v29  ;;  %v416_v11 = vperm.slane %v2927_v29, %v2909_v55 }
 0x1b6   :  { %4707 = vst [vmem:[#allocation18_spill] sm:$0xff] %v2911_v59  ;;  %v413_v61 = vperm.slane %v2911_v59, %v2909_v55 }
 0x1b8   :  { %v422_v1 = vsel %vm421_vm9, %v413_v61, %v420_v22 }
 0x1bd   :  { %v2906_v53 = vpop.xlane.xlu2 %247  ;;  %v2933_v16 = vpop.xlane.xlu1 %256 }
 0x1be   :  { %4706 = vst [vmem:[#allocation17_spill] sm:$0xff] %v2906_v53  ;;  %v414_v0 = vperm.slane %v2906_v53, %v2909_v55  ;;  %v417_v62 = vperm.slane %v2933_v16, %v2909_v55 }
 0x1bf   :  { %4710 = vst [vmem:[#allocation21_spill] sm:$0xff] %v2933_v16 }
 0x1c0   :  { %v424_v63 = vsel %vm423_vm10, %v414_v0, %v422_v1 }
 0x1c5   :  { %v2921_v58 = vpop.xlane.xlu2 %250 }
 0x1c6   :  { %4708 = vst [vmem:[#allocation19_spill] sm:$0xff] %v2921_v58  ;;  %v415_v6 = vperm.slane %v2921_v58, %v2909_v55 }
 0x1c8   :  { %v426_v54 = vsel %vm425_vm11, %v415_v6, %v424_v63 }
 0x1c9   :  { %v428_v60 = vsel %vm427_vm12, %v416_v11, %v426_v54 }
 0x1ca   :  { %v430_v0 = vsel %vm429_vm13, %v417_v62, %v428_v60 }
 0x1cd   :  { %v2938_v61 = vpop.xlane.xlu2 %259 }
 0x1ce   :  { %4711 = vst [vmem:[#allocation22_spill] sm:$0xff] %v2938_v61  ;;  %v418_v1 = vperm.slane %v2938_v61, %v2909_v55 }
 0x1d0   :  { %v432_v63 = vsel %vm431_vm14, %v418_v1, %v430_v0 }
 0x1d1   :  { %v434_v22 = vsel %vm402_vm15, %v432_v63, %v2800_v49 }
 0x1d2   :  { %435 = vst.msk [vmem:[#allocation3] sm:$0xff] %vm117_vm5, %v434_v22 }
 0x1d9   :  { %v2947_v11 = vld [vmem:[#allocation3] sm:$0xff] }
 0x1da   :  { %v462_v54 = vperm.slane %v2947_v11, 0  ;;  %v456_v6 = vrot.slane %v2947_v11, 2  ;;  %v455_v16 = vrot.slane %v2947_v11, 1  ;;  %v457_v61 = vrot.slane %v2947_v11, 3 }
 0x1db   :  { %v460_v60 = vrot.slane %v2947_v11, 6  ;;  %v458_v3 = vrot.slane %v2947_v11, 4  ;;  %v459_v34 = vrot.slane %v2947_v11, 5 }
 0x1dc   :  { %v478_v62 = vadd.f32 %v462_v54, %v2808_v52  ;;  %v464_v1 = vperm.slane %v456_v6, 0  ;;  %v463_v49 = vperm.slane %v455_v16, 0  ;;  %v465_v0 = vperm.slane %v457_v61, 0 }
 0x1dd   :  { %v468_v63 = vperm.slane %v460_v60, 0  ;;  %v466_v59 = vperm.slane %v458_v3, 0 }
 0x1de   :  { %v2957_v22 = vadd.f32 %v2782_v40, %v478_v62  ;;  %v480_v58 = vadd.f32 %v464_v1, %v2808_v52  ;;  %v479_v29 = vadd.f32 %v463_v49, %v2808_v52  ;;  %v481_v61 = vadd.f32 %v465_v0, %v2808_v52 }
 0x1df   :  { %v461_v40 = vrot.slane %v2947_v11, 7  ;;  %v484_v60 = vadd.f32 %v468_v63, %v2808_v52  ;;  %v482_v3 = vadd.f32 %v466_v59, %v2808_v52  ;;  %v1755_v63 = vperm.slane %v2771_v24, 5 }
 0x1e0   :  { %4712 = vst [vmem:[#allocation23_spill] sm:$0xff] %v2957_v22  ;;  %v552_v53 = vsel %vm236_vm7, %v2957_v22, -inf  ;;  %v2965_v57 = vadd.f32 %v2788_v43, %v480_v58  ;;  %v2968_v16 = vadd.f32 %v2760_v26, %v479_v29  ;;  %v2979_v26 = vadd.f32 %v2767_v32, %v481_v61 }
 0x1e1   :  { %553 = vmax.xlane.f32.xlu2 %v552_v53  ;;  %v467_v43 = vperm.slane %v459_v34, 0  ;;  %v2982_v29 = vadd.f32 %v2780_v39, %v484_v60  ;;  %v2985_v53 = vadd.f32 %v2794_v46, %v482_v3  ;;  %v469_v58 = vperm.slane %v461_v40, 0  ;;  %v3007_v40 = vpop.permute.xlu2 %1746 }
 0x1e2   :  { %4713 = vst [vmem:[#allocation24_spill] sm:$0xff] %v2965_v57  ;;  %v558_v54 = vsel %vm236_vm7, %v2965_v57, -inf  ;;  %v555_v6 = vsel %vm236_vm7, %v2968_v16, -inf  ;;  %v561_v62 = vsel %vm236_vm7, %v2979_v26, -inf  ;;  %v1762_v61 = vperm.slane %v2771_v24, 6 }
 0x1e3   :  { %4714 = vst [vmem:[#allocation25_spill] sm:$0xff] %v2968_v16  ;;  %559 = vmax.xlane.f32.xlu0 %v558_v54  ;;  %556 = vmax.xlane.f32.xlu1 %v555_v6  ;;  %v483_v1 = vadd.f32 %v467_v43, %v2808_v52  ;;  %v570_v59 = vsel %vm236_vm7, %v2982_v29, -inf  ;;  %v564_v32 = vsel %vm236_vm7, %v2985_v53, -inf  ;;  %v485_v34 = vadd.f32 %v469_v58, %v2808_v52 }
 0x1e4   :  { %4715 = vst [vmem:[#allocation26_spill] sm:$0xff] %v2979_v26 }
 0x1e5   :  { %4716 = vst [vmem:[#allocation27_spill] sm:$0xff] %v2982_v29  ;;  %v2996_v39 = vadd.f32 %v2776_v36, %v483_v1  ;;  %v2999_v46 = vadd.f32 %v2802_v50, %v485_v34  ;;  %v3009_v36 = vpop.permute.xlu1 %1753  ;;  %v3011_v50 = vpop.permute.xlu0 %1739 }
 0x1e6   :  { %4717 = vst [vmem:[#allocation28_spill] sm:$0xff] %v2985_v53 }
 0x1e7   :  { %4718 = vst [vmem:[#allocation29_spill] sm:$0xff] %v2996_v39  ;;  %v567_v49 = vsel %vm236_vm7, %v2996_v39, -inf  ;;  %v573_v0 = vsel %vm236_vm7, %v2999_v46, -inf }
 0x1e8   :  { %4719 = vst [vmem:[#allocation30_spill] sm:$0xff] %v2999_v46 }
 0x1e9   :  { %562 = vmax.xlane.f32.xlu2 %v561_v62 }
 0x1eb   :  { %571 = vmax.xlane.f32.xlu0 %v570_v59  ;;  %565 = vmax.xlane.f32.xlu1 %v564_v32 }
 0x1f1   :  { %568 = vmax.xlane.f32.xlu2 %v567_v49 }
 0x1f3   :  { %574 = vmax.xlane.f32.xlu1 %v573_v0 }
 0x1ff   :  { %1760 = vperm.xlu0 %2619, %v1755_v63  }
 0x209   :  { %1767 = vperm.xlu2 %2621, %v1762_v61  }
 0x254   :  { %v3013_v54 = vpop.xlane.xlu2 %553 }
 0x255   :  { %4720 = vst [vmem:[#allocation31_spill] sm:$0xff] %v3013_v54  ;;  %v726_v58 = vperm.slane %v3013_v54, %v2909_v55 }
 0x256   :  { %v3015_v6 = vpop.xlane.xlu1 %556  ;;  %v3017_v60 = vpop.xlane.xlu0 %559 }
 0x257   :  { %4721 = vst [vmem:[#allocation32_spill] sm:$0xff] %v3015_v6  ;;  %v727_v3 = vperm.slane %v3015_v6, %v2909_v55  ;;  %v728_v62 = vperm.slane %v3017_v60, %v2909_v55 }
 0x258   :  { %4722 = vst [vmem:[#allocation33_spill] sm:$0xff] %v3017_v60 }
 0x259   :  { %v734_v59 = vsel %vm419_vm8, %v727_v3, %v726_v58 }
 0x25a   :  { %v735_v34 = vsel %vm421_vm9, %v728_v62, %v734_v59 }
 0x25c   :  { %v3021_v43 = vpop.xlane.xlu2 %562 }
 0x25d   :  { %4723 = vst [vmem:[#allocation34_spill] sm:$0xff] %v3021_v43  ;;  %v729_v32 = vperm.slane %v3021_v43, %v2909_v55 }
 0x25e   :  { %v3027_v1 = vpop.xlane.xlu1 %565  ;;  %v3036_v63 = vpop.xlane.xlu0 %571 }
 0x25f   :  { %4724 = vst [vmem:[#allocation35_spill] sm:$0xff] %v3027_v1  ;;  %v730_v49 = vperm.slane %v3027_v1, %v2909_v55  ;;  %v736_v0 = vsel %vm423_vm10, %v729_v32, %v735_v34  ;;  %v732_v3 = vperm.slane %v3036_v63, %v2909_v55 }
 0x260   :  { %4725 = vst [vmem:[#allocation36_spill] sm:$0xff] %v3036_v63 }
 0x261   :  { %v737_v5 = vsel %vm425_vm11, %v730_v49, %v736_v0 }
 0x264   :  { %v3038_v61 = vpop.xlane.xlu2 %568 }
 0x265   :  { %4726 = vst [vmem:[#allocation37_spill] sm:$0xff] %v3038_v61  ;;  %v731_v37 = vperm.slane %v3038_v61, %v2909_v55 }
 0x266   :  { %v3045_v58 = vpop.xlane.xlu1 %574 }
 0x267   :  { %4727 = vst [vmem:[#allocation38_spill] sm:$0xff] %v3045_v58  ;;  %v738_v62 = vsel %vm427_vm12, %v731_v37, %v737_v5  ;;  %v733_v59 = vperm.slane %v3045_v58, %v2909_v55 }
 0x268   :  { %v739_v32 = vsel %vm429_vm13, %v732_v3, %v738_v62 }
 0x269   :  { %v740_v34 = vsel %vm431_vm14, %v733_v59, %v739_v32 }
 0x26a   :  { %v742_v51 = vsel %vm717_vm0, %v740_v34, %v2947_v11 }
 0x26b   :  { %743 = vst.msk [vmem:[#allocation3] sm:$0xff] %vm117_vm5, %v742_v51 }
 0x272   :  { %v3055_v49 = vld [vmem:[#allocation3] sm:$0xff] }
 0x273   :  { %v770_v0 = vperm.slane %v3055_v49, 0  ;;  %v764_v29 = vrot.slane %v3055_v49, 2  ;;  %v763_v5 = vrot.slane %v3055_v49, 1  ;;  %v765_v37 = vrot.slane %v3055_v49, 3 }
 0x274   :  { %v767_v3 = vrot.slane %v3055_v49, 5  ;;  %v766_v13 = vrot.slane %v3055_v49, 4  ;;  %v768_v53 = vrot.slane %v3055_v49, 6 }
 0x275   :  { %v786_v62 = vadd.f32 %v770_v0, %v2808_v52  ;;  %v772_v59 = vperm.slane %v764_v29, 0  ;;  %v771_v11 = vperm.slane %v763_v5, 0  ;;  %v773_v32 = vperm.slane %v765_v37, 0 }
 0x276   :  { %v775_v51 = vperm.slane %v767_v3, 0  ;;  %v774_v58 = vperm.slane %v766_v13, 0 }
 0x277   :  { %v3065_v34 = vadd.f32 %v2863_v2, %v786_v62  ;;  %v788_v63 = vadd.f32 %v772_v59, %v2808_v52  ;;  %v787_v46 = vadd.f32 %v771_v11, %v2808_v52  ;;  %v789_v0 = vadd.f32 %v773_v32, %v2808_v52 }
 0x278   :  { %v769_v2 = vrot.slane %v3055_v49, 7  ;;  %v791_v3 = vadd.f32 %v775_v51, %v2808_v52  ;;  %v790_v13 = vadd.f32 %v774_v58, %v2808_v52  ;;  %v1769_v51 = vperm.slane %v2771_v24, 7 }
 0x279   :  { %4728 = vst [vmem:[#allocation39_spill] sm:$0xff] %v3065_v34  ;;  %v860_v1 = vsel %vm236_vm7, %v3065_v34, -inf  ;;  %v3073_v39 = vadd.f32 %v2866_v7, %v788_v63  ;;  %v3076_v29 = vadd.f32 %v2870_v9, %v787_v46  ;;  %v3087_v7 = vadd.f32 %v2872_v10, %v789_v0 }
 0x27a   :  { %861 = vmax.xlane.f32.xlu0 %v860_v1  ;;  %v776_v9 = vperm.slane %v768_v53, 0  ;;  %v3090_v46 = vadd.f32 %v2868_v8, %v791_v3  ;;  %v3093_v1 = vadd.f32 %v2876_v14, %v790_v13  ;;  %v777_v63 = vperm.slane %v769_v2, 0  ;;  %v3115_v2 = vpop.permute.xlu0 %1760 }
 0x27b   :  { %4729 = vst [vmem:[#allocation40_spill] sm:$0xff] %v3073_v39  ;;  %v866_v5 = vsel %vm236_vm7, %v3073_v39, -inf  ;;  %v863_v37 = vsel %vm236_vm7, %v3076_v29, -inf  ;;  %v869_v62 = vsel %vm236_vm7, %v3087_v7, -inf  ;;  %v4736_v0 = vmov 0  }
 0x27c   :  { %4730 = vst [vmem:[#allocation41_spill] sm:$0xff] %v3076_v29  ;;  %867 = vmax.xlane.f32.xlu1 %v866_v5  ;;  %864 = vmax.xlane.f32.xlu2 %v863_v37  ;;  %v792_v59 = vadd.f32 %v776_v9, %v2808_v52  ;;  %v875_v58 = vsel %vm236_vm7, %v3090_v46, -inf  ;;  %v872_v10 = vsel %vm236_vm7, %v3093_v1, -inf  ;;  %v793_v53 = vadd.f32 %v777_v63, %v2808_v52 }
 0x27d   :  { %4731 = vst [vmem:[#allocation42_spill] sm:$0xff] %v3087_v7 }
 0x27e   :  { %4732 = vst [vmem:[#allocation43_spill] sm:$0xff] %v3090_v46  ;;  %v3104_v8 = vadd.f32 %v2878_v15, %v792_v59  ;;  %v3107_v14 = vadd.f32 %v2882_v18, %v793_v53  ;;  %v3117_v15 = vpop.permute.xlu2 %1767 }
 0x27f   :  { %4733 = vst [vmem:[#allocation44_spill] sm:$0xff] %v3093_v1 }
 0x280   :  { %4734 = vst [vmem:[#allocation45_spill] sm:$0xff] %v3104_v8  ;;  %v878_v11 = vsel %vm236_vm7, %v3104_v8, -inf  ;;  %v881_v32 = vsel %vm236_vm7, %v3107_v14, -inf }
 0x281   :  { %4735 = vst [vmem:[#allocation46_spill] sm:$0xff] %v3107_v14 }
 0x282   :  { %870 = vmax.xlane.f32.xlu0 %v869_v62 }
 0x284   :  { %876 = vmax.xlane.f32.xlu1 %v875_v58  ;;  %873 = vmax.xlane.f32.xlu2 %v872_v10 }
 0x28a   :  { %879 = vmax.xlane.f32.xlu0 %v878_v11 }
 0x28c   :  { %882 = vmax.xlane.f32.xlu2 %v881_v32 }
 0x29d   :  { %1774 = vperm.xlu1 %2617, %v1769_v51  }
 0x2a5   :  { %2622 = vset.pattern.permute.xlu1 %v4736_v0 }
 0x2ed   :  { %v3119_v5 = vpop.xlane.xlu0 %861 }
 0x2ee   :  { %4737 = vst [vmem:[#allocation47_spill] sm:$0xff] %v3119_v5  ;;  %v1034_v13 = vperm.slane %v3119_v5, %v2909_v55 }
 0x2ef   :  { %v3121_v18 = vpop.xlane.xlu1 %867  ;;  %v3123_v37 = vpop.xlane.xlu2 %864 }
 0x2f0   :  { %4738 = vst [vmem:[#allocation48_spill] sm:$0xff] %v3121_v18  ;;  %v1035_v3 = vperm.slane %v3123_v37, %v2909_v55  ;;  %v1036_v24 = vperm.slane %v3121_v18, %v2909_v55 }
 0x2f1   :  { %4739 = vst [vmem:[#allocation49_spill] sm:$0xff] %v3123_v37 }
 0x2f2   :  { %v1042_v9 = vsel %vm419_vm8, %v1035_v3, %v1034_v13 }
 0x2f3   :  { %v1043_v58 = vsel %vm421_vm9, %v1036_v24, %v1042_v9 }
 0x2f5   :  { %v3132_v63 = vpop.xlane.xlu0 %870 }
 0x2f6   :  { %4740 = vst [vmem:[#allocation50_spill] sm:$0xff] %v3132_v63  ;;  %v1037_v62 = vperm.slane %v3132_v63, %v2909_v55 }
 0x2f7   :  { %v3136_v59 = vpop.xlane.xlu2 %873  ;;  %v3139_v10 = vpop.xlane.xlu1 %876 }
 0x2f8   :  { %4741 = vst [vmem:[#allocation51_spill] sm:$0xff] %v3136_v59  ;;  %v1044_v53 = vsel %vm423_vm10, %v1037_v62, %v1043_v58  ;;  %v1038_v11 = vperm.slane %v3136_v59, %v2909_v55  ;;  %v1039_v32 = vperm.slane %v3139_v10, %v2909_v55 }
 0x2f9   :  { %4742 = vst [vmem:[#allocation52_spill] sm:$0xff] %v3139_v10 }
 0x2fa   :  { %v1045_v51 = vsel %vm425_vm11, %v1038_v11, %v1044_v53 }
 0x2fb   :  { %v1046_v61 = vsel %vm427_vm12, %v1039_v32, %v1045_v51 }
 0x2fd   :  { %v3147_v3 = vpop.xlane.xlu0 %879 }
 0x2fe   :  { %4743 = vst [vmem:[#allocation53_spill] sm:$0xff] %v3147_v3  ;;  %v1040_v13 = vperm.slane %v3147_v3, %v2909_v55 }
 0x2ff   :  { %v3152_v24 = vpop.xlane.xlu2 %882 }
 0x300   :  { %4744 = vst [vmem:[#allocation54_spill] sm:$0xff] %v3152_v24  ;;  %v1047_v9 = vsel %vm429_vm13, %v1040_v13, %v1046_v61  ;;  %v1041_v62 = vperm.slane %v3152_v24, %v2909_v55 }
 0x302   :  { %v1048_v58 = vsel %vm431_vm14, %v1041_v62, %v1047_v9 }
 0x303   :  { %v1050_v53 = vsel %vm1025_vm1, %v1048_v58, %v3055_v49 }
 0x304   :  { %1051 = vst.msk [vmem:[#allocation3] sm:$0xff] %vm117_vm5, %v1050_v53 }
 0x30b   :  { %v3161_v11 = vld [vmem:[#allocation3] sm:$0xff] }
 0x30c   :  { %v1078_v57 = vperm.slane %v3161_v11, 0  ;;  %v1072_v32 = vrot.slane %v3161_v11, 2  ;;  %v1071_v51 = vrot.slane %v3161_v11, 1  ;;  %v1073_v61 = vrot.slane %v3161_v11, 3 }
 0x30d   :  { %v1075_v13 = vrot.slane %v3161_v11, 5  ;;  %v1074_v35 = vrot.slane %v3161_v11, 4  ;;  %v1076_v54 = vrot.slane %v3161_v11, 6 }
 0x30e   :  { %v1094_v9 = vadd.f32 %v1078_v57, %v2808_v52  ;;  %v1080_v62 = vperm.slane %v1072_v32, 0  ;;  %v1079_v49 = vperm.slane %v1071_v51, 0  ;;  %v1081_v58 = vperm.slane %v1073_v61, 0 }
 0x30f   :  { %v1083_v53 = vperm.slane %v1075_v13, 0  ;;  %v1082_v22 = vperm.slane %v1074_v35, 0 }
 0x310   :  { %v3171_v60 = vadd.f32 %v2786_v42, %v1094_v9  ;;  %v1096_v26 = vadd.f32 %v1080_v62, %v2808_v52  ;;  %v1095_v43 = vadd.f32 %v1079_v49, %v2808_v52  ;;  %v1097_v32 = vadd.f32 %v1081_v58, %v2808_v52 }
 0x311   :  { %v1077_v42 = vrot.slane %v3161_v11, 7  ;;  %v1099_v13 = vadd.f32 %v1083_v53, %v2808_v52  ;;  %v1098_v35 = vadd.f32 %v1082_v22, %v2808_v52  ;;  %v3219_v53 = vld [vmem:[#allocation2 + $0x38] sm:$0xff] }
 0x312   :  { %4745 = vst [vmem:[#allocation55_spill] sm:$0xff] %v3171_v60  ;;  %v1168_v16 = vsel %vm236_vm7, %v3171_v60, -inf  ;;  %v3179_v6 = vadd.f32 %v2792_v45, %v1096_v26  ;;  %v3182_v57 = vadd.f32 %v2784_v41, %v1095_v43  ;;  %v3193_v41 = vadd.f32 %v2812_v56, %v1097_v32 }
 0x313   :  { %1169 = vmax.xlane.f32.xlu0 %v1168_v16  ;;  %v1084_v45 = vperm.slane %v1076_v54, 0  ;;  %v3196_v16 = vadd.f32 %v2798_v48, %v1099_v13  ;;  %v3199_v26 = vadd.f32 %v2790_v44, %v1098_v35  ;;  %v1085_v43 = vperm.slane %v1077_v42, 0 }
 0x314   :  { %4746 = vst [vmem:[#allocation56_spill] sm:$0xff] %v3179_v6  ;;  %v1174_v51 = vsel %vm236_vm7, %v3179_v6, -inf  ;;  %v1171_v61 = vsel %vm236_vm7, %v3182_v57, -inf  ;;  %v1177_v9 = vsel %vm236_vm7, %v3193_v41, -inf  ;;  %v2035_v32 = vperm.slane %v3219_v53, 1 }
 0x315   :  { %4747 = vst [vmem:[#allocation57_spill] sm:$0xff] %v3182_v57  ;;  %1175 = vmax.xlane.f32.xlu2 %v1174_v51  ;;  %1172 = vmax.xlane.f32.xlu1 %v1171_v61  ;;  %v1100_v62 = vadd.f32 %v1084_v45, %v2808_v52  ;;  %v1183_v22 = vsel %vm236_vm7, %v3196_v16, -inf  ;;  %v1180_v56 = vsel %vm236_vm7, %v3199_v26, -inf  ;;  %v1101_v54 = vadd.f32 %v1085_v43, %v2808_v52  ;;  %v3231_v51 = vpop.permute.xlu1 %1774 }
 0x316   :  { %4748 = vst [vmem:[#allocation58_spill] sm:$0xff] %v3193_v41  ;;  %v2028_v42 = vperm.slane %v3219_v53, 0 }
 0x317   :  { %4749 = vst [vmem:[#allocation59_spill] sm:$0xff] %v3196_v16  ;;  %v3210_v44 = vadd.f32 %v2821_v4, %v1100_v62  ;;  %v3213_v48 = vadd.f32 %v2796_v47, %v1101_v54  ;;  %v3226_v47 = vld [vmem:[%s4623_s6] sm:$0xff] }
 0x318   :  { %4750 = vst [vmem:[#allocation60_spill] sm:$0xff] %v3199_v26  ;;  %vm1944_vm2 = vcmp.ge.s32.totalorder %v3226_v47, 6  ;;  %vm2252_vm15 = vcmp.ge.s32.totalorder %v3226_v47, 7 }
 0x319   :  { %4751 = vst [vmem:[#allocation61_spill] sm:$0xff] %v3210_v44  ;;  %v1186_v49 = vsel %vm236_vm7, %v3210_v44, -inf  ;;  %v1189_v58 = vsel %vm236_vm7, %v3213_v48, -inf  ;;  %v1945_v4 = vsel %vm1944_vm2, 1, %v4736_v0 }
 0x31a   :  { %4752 = vst [vmem:[#allocation62_spill] sm:$0xff] %v3213_v48 }
 0x31b   :  { %1178 = vmax.xlane.f32.xlu0 %v1177_v9 }
 0x31d   :  { %1184 = vmax.xlane.f32.xlu2 %v1183_v22  ;;  %1181 = vmax.xlane.f32.xlu1 %v1180_v56 }
 0x323   :  { %1187 = vmax.xlane.f32.xlu0 %v1186_v49 }
 0x325   :  { %1190 = vmax.xlane.f32.xlu1 %v1189_v58 }
 0x335   :  { %2040 = vperm.xlu2 %2621, %v2035_v32  }
 0x337   :  { %2033 = vperm.xlu0 %2619, %v2028_v42  }
 0x33e   :  { %1947 = vperm.xlu1 %2622, %v1945_v4  }
 0x346   :  { %2623 = vset.pattern.permute.xlu1 %v2728_v23 }
 0x386   :  { %v3233_v61 = vpop.xlane.xlu0 %1169 }
 0x387   :  { %4753 = vst [vmem:[#allocation63_spill] sm:$0xff] %v3233_v61  ;;  %v1342_v43 = vperm.slane %v3233_v61, %v2909_v55 }
 0x388   :  { %v3235_v13 = vpop.xlane.xlu2 %1175  ;;  %v3237_v35 = vpop.xlane.xlu1 %1172 }
 0x389   :  { %4754 = vst [vmem:[#allocation64_spill] sm:$0xff] %v3235_v13  ;;  %v1343_v45 = vperm.slane %v3237_v35, %v2909_v55  ;;  %v1344_v9 = vperm.slane %v3235_v13, %v2909_v55 }
 0x38b   :  { %v1350_v62 = vsel %vm419_vm8, %v1343_v45, %v1342_v43 }
 0x38c   :  { %v1351_v54 = vsel %vm421_vm9, %v1344_v9, %v1350_v62 }
 0x38e   :  { %v3246_v23 = vpop.xlane.xlu0 %1178 }
 0x38f   :  { %4755 = vst [vmem:[#allocation65_spill] sm:$0xff] %v3246_v23  ;;  %v1345_v22 = vperm.slane %v3246_v23, %v2909_v55 }
 0x390   :  { %v3250_v56 = vpop.xlane.xlu1 %1181  ;;  %v3253_v49 = vpop.xlane.xlu2 %1184 }
 0x391   :  { %4756 = vst [vmem:[#allocation66_spill] sm:$0xff] %v3250_v56  ;;  %v1352_v58 = vsel %vm423_vm10, %v1345_v22, %v1351_v54  ;;  %v1346_v32 = vperm.slane %v3250_v56, %v2909_v55  ;;  %v1347_v42 = vperm.slane %v3253_v49, %v2909_v55 }
 0x392   :  { %4757 = vst [vmem:[#allocation67_spill] sm:$0xff] %v3253_v49 }
 0x393   :  { %v1353_v4 = vsel %vm425_vm11, %v1346_v32, %v1352_v58 }
 0x394   :  { %v1354_v8 = vsel %vm427_vm12, %v1347_v42, %v1353_v4 }
 0x396   :  { %v3261_v45 = vpop.xlane.xlu0 %1187 }
 0x397   :  { %4758 = vst [vmem:[#allocation68_spill] sm:$0xff] %v3261_v45  ;;  %v1348_v43 = vperm.slane %v3261_v45, %v2909_v55 }
 0x398   :  { %v3266_v9 = vpop.xlane.xlu1 %1190 }
 0x399   :  { %4759 = vst [vmem:[#allocation69_spill] sm:$0xff] %v3266_v9  ;;  %v1355_v62 = vsel %vm429_vm13, %v1348_v43, %v1354_v8  ;;  %v1349_v22 = vperm.slane %v3266_v9, %v2909_v55 }
 0x39b   :  { %v1356_v54 = vsel %vm431_vm14, %v1349_v22, %v1355_v62 }
 0x39c   :  { %v1358_v58 = vsel %vm1333_vm3, %v1356_v54, %v3161_v11 }
 0x39d   :  { %1359 = vst.msk [vmem:[#allocation3] sm:$0xff] %vm117_vm5, %v1358_v58 }
 0x3a4   :  { %v3275_v32 = vld [vmem:[#allocation3] sm:$0xff] }
 0x3a5   :  { %v1386_v3 = vperm.slane %v3275_v32, 0  ;;  %v1380_v42 = vrot.slane %v3275_v32, 2  ;;  %v1379_v4 = vrot.slane %v3275_v32, 1  ;;  %v1382_v8 = vrot.slane %v3275_v32, 4 }
 0x3a6   :  { %v1384_v43 = vrot.slane %v3275_v32, 6  ;;  %v1381_v19 = vrot.slane %v3275_v32, 3  ;;  %v1385_v39 = vrot.slane %v3275_v32, 7 }
 0x3a7   :  { %v1402_v62 = vadd.f32 %v1386_v3, %v2808_v52  ;;  %v1388_v22 = vperm.slane %v1380_v42, 0  ;;  %v1387_v11 = vperm.slane %v1379_v4, 0  ;;  %v1390_v54 = vperm.slane %v1382_v8, 0 }
 0x3a8   :  { %v1392_v58 = vperm.slane %v1384_v43, 0  ;;  %v1389_v59 = vperm.slane %v1381_v19, 0 }
 0x3a9   :  { %v3285_v14 = vadd.f32 %v2874_v12, %v1402_v62  ;;  %v1404_v24 = vadd.f32 %v1388_v22, %v2808_v52  ;;  %v1403_v1 = vadd.f32 %v1387_v11, %v2808_v52  ;;  %v1406_v42 = vadd.f32 %v1390_v54, %v2808_v52 }
 0x3aa   :  { %v1383_v12 = vrot.slane %v3275_v32, 5  ;;  %v1408_v43 = vadd.f32 %v1392_v58, %v2808_v52  ;;  %v1405_v19 = vadd.f32 %v1389_v59, %v2808_v52  ;;  %v2042_v58 = vperm.slane %v3219_v53, 2 }
 0x3ab   :  { %v1476_v18 = vsel %vm236_vm7, %v3285_v14, -inf  ;;  %v3293_v34 = vadd.f32 %v2880_v17, %v1404_v24  ;;  %v3296_v3 = vadd.f32 %v2888_v25, %v1403_v1  ;;  %v3307_v17 = vadd.f32 %v2886_v21, %v1406_v42 }
 0x3ac   :  { %1477 = vmax.xlane.f32.xlu1 %v1476_v18  ;;  %v1393_v25 = vperm.slane %v1385_v39, 0  ;;  %v3310_v1 = vadd.f32 %v2890_v27, %v1408_v43  ;;  %v3313_v18 = vadd.f32 %v2884_v20, %v1405_v19  ;;  %v1391_v24 = vperm.slane %v1383_v12, 0 }
 0x3ad   :  { %v1482_v4 = vsel %vm236_vm7, %v3293_v34, -inf  ;;  %v1479_v8 = vsel %vm236_vm7, %v3296_v3, -inf  ;;  %v1488_v62 = vsel %vm236_vm7, %v3307_v17, -inf  ;;  %v2049_v42 = vperm.slane %v3219_v53, 3 }
 0x3ae   :  { %1483 = vmax.xlane.f32.xlu0 %v1482_v4  ;;  %1480 = vmax.xlane.f32.xlu2 %v1479_v8  ;;  %v1409_v22 = vadd.f32 %v1393_v25, %v2808_v52  ;;  %v1494_v59 = vsel %vm236_vm7, %v3310_v1, -inf  ;;  %v1485_v21 = vsel %vm236_vm7, %v3313_v18, -inf  ;;  %v1407_v39 = vadd.f32 %v1391_v24, %v2808_v52  ;;  %v3340_v4 = vpop.permute.xlu0 %2033 }
 0x3af   :  { %v2056_v12 = vperm.slane %v3219_v53, 4 }
 0x3b0   :  { %v3324_v20 = vadd.f32 %v2892_v28, %v1409_v22  ;;  %v3327_v27 = vadd.f32 %v2896_v31, %v1407_v39  ;;  %v3336_v28 = vpop.permute.xlu1 %1947  ;;  %v3338_v31 = vpop.permute.xlu2 %2040 }
 0x3b1   :  { %vm1949_vm6 = vcmp.eq.s32.totalorder %v3336_v28, 1 }
 0x3b2   :  { %v1497_v11 = vsel %vm236_vm7, %v3324_v20, -inf  ;;  %v1491_v54 = vsel %vm236_vm7, %v3327_v27, -inf }
 0x3b4   :  { %1489 = vmax.xlane.f32.xlu1 %v1488_v62 }
 0x3b6   :  { %1495 = vmax.xlane.f32.xlu0 %v1494_v59  ;;  %1486 = vmax.xlane.f32.xlu2 %v1485_v21 }
 0x3bc   :  { %1498 = vmax.xlane.f32.xlu1 %v1497_v11 }
 0x3be   :  { %1492 = vmax.xlane.f32.xlu2 %v1491_v54 }
 0x3ca   :  { %2047 = vperm.xlu0 %2619, %v2042_v58  }
 0x3d5   :  { %2054 = vperm.xlu1 %2623, %v2049_v42  }
 0x3d6   :  { %2061 = vperm.xlu2 %2621, %v2056_v12  }
 0x41f   :  { %v3342_v8 = vpop.xlane.xlu1 %1477 }
 0x420   :  { %v1650_v22 = vperm.slane %v3342_v8, %v2909_v55 }
 0x421   :  { %v3344_v43 = vpop.xlane.xlu2 %1480  ;;  %v3346_v19 = vpop.xlane.xlu0 %1483 }
 0x422   :  { %v1651_v24 = vperm.slane %v3344_v43, %v2909_v55  ;;  %v1652_v59 = vperm.slane %v3346_v19, %v2909_v55 }
 0x424   :  { %v1658_v21 = vsel %vm419_vm8, %v1651_v24, %v1650_v22 }
 0x425   :  { %v1659_v11 = vsel %vm421_vm9, %v1652_v59, %v1658_v21 }
 0x427   :  { %v3348_v25 = vpop.xlane.xlu1 %1489 }
 0x428   :  { %v1654_v42 = vperm.slane %v3348_v25, %v2909_v55 }
 0x429   :  { %v3352_v62 = vpop.xlane.xlu2 %1486  ;;  %v3362_v54 = vpop.xlane.xlu0 %1495 }
 0x42a   :  { %v1653_v39 = vperm.slane %v3352_v62, %v2909_v55  ;;  %v1656_v24 = vperm.slane %v3362_v54, %v2909_v55 }
 0x42c   :  { %v1660_v58 = vsel %vm423_vm10, %v1653_v39, %v1659_v11 }
 0x42d   :  { %v1661_v22 = vsel %vm425_vm11, %v1654_v42, %v1660_v58 }
 0x42f   :  { %v3367_v12 = vpop.xlane.xlu1 %1498 }
 0x430   :  { %v1657_v59 = vperm.slane %v3367_v12, %v2909_v55 }
 0x431   :  { %v3369_v5 = vpop.xlane.xlu2 %1492 }
 0x432   :  { %v1655_v46 = vperm.slane %v3369_v5, %v2909_v55 }
 0x434   :  { %v1662_v21 = vsel %vm427_vm12, %v1655_v46, %v1661_v22 }
 0x435   :  { %v1663_v39 = vsel %vm429_vm13, %v1656_v24, %v1662_v21 }
 0x436   :  { %v1664_v11 = vsel %vm431_vm14, %v1657_v59, %v1663_v39 }
 0x437   :  { %v1666_v10 = vsel %vm1641_vm4, %v1664_v11, %v3275_v32 }
 0x438   :  { %1667 = vst.msk [vmem:[#allocation3] sm:$0xff] %vm117_vm5, %v1666_v10 }
 0x43f   :  { %v3384_v7 = vld [vmem:[#allocation3] sm:$0xff] }
 0x440   :  { %v1694_v63 = vperm.slane %v3384_v7, 0  ;;  %v1688_v58 = vrot.slane %v3384_v7, 2  ;;  %v1687_v42 = vrot.slane %v3384_v7, 1  ;;  %v1689_v46 = vrot.slane %v3384_v7, 3 }
 0x441   :  { %v1691_v24 = vrot.slane %v3384_v7, 5  ;;  %v1690_v30 = vrot.slane %v3384_v7, 4  ;;  %v1692_v44 = vrot.slane %v3384_v7, 6 }
 0x442   :  { %v1710_v22 = vadd.f32 %v1694_v63, %v2808_v52  ;;  %v1696_v59 = vperm.slane %v1688_v58, 0  ;;  %v1695_v32 = vperm.slane %v1687_v42, 0  ;;  %v1697_v21 = vperm.slane %v1689_v46, 0 }
 0x443   :  { %v1699_v10 = vperm.slane %v1691_v24, 0  ;;  %v1698_v37 = vperm.slane %v1690_v30, 0 }
 0x444   :  { %v3394_v39 = vadd.f32 %v2898_v33, %v1710_v22  ;;  %v1712_v11 = vadd.f32 %v1696_v59, %v2808_v52  ;;  %v1711_v29 = vadd.f32 %v1695_v32, %v2808_v52  ;;  %v1713_v58 = vadd.f32 %v1697_v21, %v2808_v52 }
 0x445   :  { %v1693_v33 = vrot.slane %v3384_v7, 7  ;;  %v1715_v24 = vadd.f32 %v1699_v10, %v2808_v52  ;;  %v1714_v30 = vadd.f32 %v1698_v37, %v2808_v52 }
 0x446   :  { %v1784_v45 = vsel %vm236_vm7, %v3394_v39, -inf  ;;  %v3402_v48 = vadd.f32 %v3011_v50, %v1712_v11  ;;  %v3405_v63 = vadd.f32 %v2902_v38, %v1711_v29  ;;  %v3416_v38 = vadd.f32 %v3007_v40, %v1713_v58  ;;  %v3448_v58 = vpop.permute.xlu2 %2061 }
 0x447   :  { %1785 = vmax.xlane.f32.xlu0 %v1784_v45  ;;  %v1700_v50 = vperm.slane %v1692_v44, 0  ;;  %v3419_v29 = vadd.f32 %v3115_v2, %v1715_v24  ;;  %v3422_v45 = vadd.f32 %v3009_v36, %v1714_v30  ;;  %v1701_v22 = vperm.slane %v1693_v33, 0  ;;  %v2055_v33 = vpop.permute.xlu1 %2054 }
 0x448   :  { %v1790_v42 = vsel %vm236_vm7, %v3402_v48, -inf  ;;  %v1787_v46 = vsel %vm236_vm7, %v3405_v63, -inf  ;;  %v1793_v59 = vsel %vm236_vm7, %v3416_v38, -inf  ;;  %v2070_v11 = vperm.slane %v3219_v53, 6 }
 0x449   :  { %1791 = vmax.xlane.f32.xlu1 %v1790_v42  ;;  %1788 = vmax.xlane.f32.xlu2 %v1787_v46  ;;  %v1716_v32 = vadd.f32 %v1700_v50, %v2808_v52  ;;  %v1799_v37 = vsel %vm236_vm7, %v3419_v29, -inf  ;;  %v1796_v40 = vsel %vm236_vm7, %v3422_v45, -inf  ;;  %v1717_v44 = vadd.f32 %v1701_v22, %v2808_v52 }
 0x44a   :  { %v2063_v52 = vperm.slane %v3219_v53, 5 }
 0x44b   :  { %v3433_v36 = vadd.f32 %v3117_v15, %v1716_v32  ;;  %v3436_v2 = vadd.f32 %v3231_v51, %v1717_v44  ;;  %v2077_v15 = vperm.slane %v3219_v53, 7  ;;  %v2048_v51 = vpop.permute.xlu0 %2047 }
 0x44d   :  { %v1802_v21 = vsel %vm236_vm7, %v3433_v36, -inf  ;;  %v1805_v10 = vsel %vm236_vm7, %v3436_v2, -inf }
 0x44f   :  { %1794 = vmax.xlane.f32.xlu0 %v1793_v59 }
 0x451   :  { %1800 = vmax.xlane.f32.xlu1 %v1799_v37  ;;  %1797 = vmax.xlane.f32.xlu2 %v1796_v40 }
 0x457   :  { %1803 = vmax.xlane.f32.xlu0 %v1802_v21 }
 0x459   :  { %1806 = vmax.xlane.f32.xlu2 %v1805_v10 }
 0x46a   :  { %2075 = vperm.xlu1 %2623, %v2070_v11  }
 0x46b   :  { %2068 = vperm.xlu0 %2619, %v2063_v52  }
 0x471   :  { %2082 = vperm.xlu2 %2621, %v2077_v15  }
 0x472   :  { %2625 = vset.pattern.permute.xlu1 %v4736_v0 }
 0x473   :  { %2626 = vset.pattern.permute.xlu0 %v4736_v0 }
 0x479   :  { %2624 = vset.pattern.permute.xlu2 %v4736_v0 }
 0x4ba   :  { %v3450_v42 = vpop.xlane.xlu0 %1785 }
 0x4bb   :  { %v1958_v30 = vperm.slane %v3450_v42, %v2909_v55 }
 0x4bc   :  { %v3452_v46 = vpop.xlane.xlu2 %1788  ;;  %v3454_v24 = vpop.xlane.xlu1 %1791 }
 0x4bd   :  { %v1959_v53 = vperm.slane %v3452_v46, %v2909_v55  ;;  %v1960_v50 = vperm.slane %v3454_v24, %v2909_v55 }
 0x4bf   :  { %v1966_v22 = vsel %vm419_vm8, %v1959_v53, %v1958_v30 }
 0x4c0   :  { %v1967_v40 = vsel %vm421_vm9, %v1960_v50, %v1966_v22 }
 0x4c2   :  { %v3463_v59 = vpop.xlane.xlu0 %1794 }
 0x4c3   :  { %v1961_v32 = vperm.slane %v3463_v59, %v2909_v55 }
 0x4c4   :  { %v3467_v37 = vpop.xlane.xlu2 %1797  ;;  %v3472_v21 = vpop.xlane.xlu1 %1800 }
 0x4c5   :  { %v1962_v44 = vperm.slane %v3467_v37, %v2909_v55  ;;  %v1968_v10 = vsel %vm423_vm10, %v1961_v32, %v1967_v40  ;;  %v1963_v11 = vperm.slane %v3472_v21, %v2909_v55 }
 0x4c7   :  { %v1969_v52 = vsel %vm425_vm11, %v1962_v44, %v1968_v10 }
 0x4c8   :  { %v1970_v30 = vsel %vm427_vm12, %v1963_v11, %v1969_v52 }
 0x4ca   :  { %v3478_v15 = vpop.xlane.xlu0 %1803 }
 0x4cb   :  { %v1964_v53 = vperm.slane %v3478_v15, %v2909_v55 }
 0x4cc   :  { %v3483_v50 = vpop.xlane.xlu2 %1806 }
 0x4cd   :  { %v1971_v22 = vsel %vm429_vm13, %v1964_v53, %v1970_v30  ;;  %v1965_v9 = vperm.slane %v3483_v50, %v2909_v55 }
 0x4cf   :  { %v1972_v32 = vsel %vm431_vm14, %v1965_v9, %v1971_v22 }
 0x4d0   :  { %v1974_v40 = vsel %vm1949_vm6, %v1972_v32, %v3384_v7  ;;  %v2631_v7 = vld [vmem:[%s4627_s3] sm:$0x1f] }
 0x4d1   :  { %1975 = vst.msk [vmem:[#allocation3] sm:$0xff] %vm117_vm5, %v1974_v40 }
 0x4d8   :  { %v3492_v44 = vld [vmem:[#allocation3] sm:$0xff] }
 0x4d9   :  { %v1999_v10 = vrot.slane %v3492_v44, 5  ;;  %v2002_v11 = vperm.slane %v3492_v44, 0  ;;  %v1996_v52 = vrot.slane %v3492_v44, 2  ;;  %v1995_v53 = vrot.slane %v3492_v44, 1 }
 0x4da   :  { %v1997_v30 = vrot.slane %v3492_v44, 3  ;;  %v1998_v28 = vrot.slane %v3492_v44, 4  ;;  %v2000_v61 = vrot.slane %v3492_v44, 6 }
 0x4db   :  { %v2018_v9 = vadd.f32 %v2631_v7, %v2002_v11  ;;  %v2004_v22 = vperm.slane %v1996_v52, 0  ;;  %v2003_v32 = vperm.slane %v1995_v53, 0  ;;  %v2007_v56 = vperm.slane %v1999_v10, 0 }
 0x4dc   :  { %v2005_v40 = vperm.slane %v1997_v30, 0  ;;  %v2006_v60 = vperm.slane %v1998_v28, 0  ;;  %v2001_v52 = vrot.slane %v3492_v44, 7  ;;  %v2008_v28 = vperm.slane %v2000_v61, 0 }
 0x4dd   :  { %v3504_v26 = vadd.f32 %v3340_v4, %v2018_v9  ;;  %v2020_v6 = vadd.f32 %v2631_v7, %v2004_v22  ;;  %v2019_v13 = vadd.f32 %v2631_v7, %v2003_v32  ;;  %v2023_v4 = vadd.f32 %v2631_v7, %v2007_v56  ;;  %v2069_v9 = vpop.permute.xlu0 %2068  ;;  %v2076_v32 = vpop.permute.xlu1 %2075 }
 0x4de   :  { %v2021_v49 = vadd.f32 %v2631_v7, %v2005_v40  ;;  %v2022_v30 = vadd.f32 %v2631_v7, %v2006_v60 }
 0x4df   :  { %v2092_v16 = vsel %vm236_vm7, %v3504_v26, -inf  ;;  %v3509_v41 = vadd.f32 %v2048_v51, %v2020_v6  ;;  %v3512_v11 = vadd.f32 %v3338_v31, %v2019_v13  ;;  %v2009_v6 = vperm.slane %v2001_v52, 0 }
 0x4e0   :  { %2093 = vmax.xlane.f32.xlu0 %v2092_v16  ;;  %v3519_v16 = vadd.f32 %v2055_v33, %v2021_v49  ;;  %v3521_v51 = vadd.f32 %v2069_v9, %v2023_v4  ;;  %v2088_v13 = vadd.f32 %v3448_v58, %v2022_v30  ;;  %v2024_v31 = vadd.f32 %v2631_v7, %v2008_v28  ;;  %v2083_v49 = vpop.permute.xlu2 %2082 }
 0x4e1   :  { %v2098_v10 = vsel %vm236_vm7, %v3509_v41, -inf  ;;  %v2095_v53 = vsel %vm236_vm7, %v3512_v11, -inf  ;;  %v2025_v22 = vadd.f32 %v2631_v7, %v2009_v6  ;;  %v2253_v52 = vsel %vm2252_vm15, 1, %v4736_v0 }
 0x4e2   :  { %2099 = vmax.xlane.f32.xlu2 %v2098_v10  ;;  %2096 = vmax.xlane.f32.xlu1 %v2095_v53  ;;  %v2101_v56 = vsel %vm236_vm7, %v3519_v16, -inf  ;;  %v2107_v60 = vsel %vm236_vm7, %v3521_v51, -inf  ;;  %v2104_v61 = vsel %vm236_vm7, %v2088_v13, -inf  ;;  %v3529_v40 = vadd.f32 %v2076_v32, %v2024_v31 }
 0x4e3   :  { %v3531_v33 = vadd.f32 %v2083_v49, %v2025_v22 }
 0x4e4   :  { %v2110_v58 = vsel %vm236_vm7, %v3529_v40, -inf }
 0x4e5   :  { %v2113_v7 = vsel %vm236_vm7, %v3531_v33, -inf }
 0x4e8   :  { %2102 = vmax.xlane.f32.xlu0 %v2101_v56 }
 0x4ea   :  { %2108 = vmax.xlane.f32.xlu2 %v2107_v60  ;;  %2105 = vmax.xlane.f32.xlu1 %v2104_v61 }
 0x4f0   :  { %2111 = vmax.xlane.f32.xlu0 %v2110_v58 }
 0x4f2   :  { %2114 = vmax.xlane.f32.xlu1 %v2113_v7 }
 0x502   :  { %2255 = vperm.xlu2 %2624, %v2253_v52  }
 0x553   :  { %v2094_v4 = vpop.xlane.xlu0 %2093 }
 0x554   :  { %v2266_v28 = vperm.slane %v2094_v4, %v2909_v55  ;;  %vm2116_vm2 = vcmp.eq.f32.partialorder %v3504_v26, %v2094_v4 }
 0x555   :  { %v2100_v10 = vpop.xlane.xlu2 %2099  ;;  %v3539_v53 = vpop.xlane.xlu1 %2096 }
 0x556   :  { %v2267_v30 = vperm.slane %v3539_v53, %v2909_v55  ;;  %v2268_v9 = vperm.slane %v2100_v10, %v2909_v55  ;;  %vm2118_vm3 = vcmp.eq.f32.partialorder %v3509_v41, %v2100_v10  ;;  %vm2117_vm15 = vcmp.eq.f32.partialorder %v3512_v11, %v3539_v53 }
 0x558   :  { %v2274_v6 = vsel %vm419_vm8, %v2267_v30, %v2266_v28 }
 0x559   :  { %v2275_v56 = vsel %vm421_vm9, %v2268_v9, %v2274_v6 }
 0x55b   :  { %v3546_v31 = vpop.xlane.xlu0 %2102 }
 0x55c   :  { %v2269_v47 = vperm.slane %v3546_v31, %v2909_v55 }
 0x55d   :  { %v2109_v22 = vpop.xlane.xlu2 %2108  ;;  %v2106_v32 = vpop.xlane.xlu1 %2105 }
 0x55e   :  { %v2276_v60 = vsel %vm423_vm10, %v2269_v47, %v2275_v56  ;;  %vm2120_vm0 = vcmp.eq.f32.partialorder %v2088_v13, %v2106_v32  ;;  %v2270_v61 = vperm.slane %v2106_v32, %v2909_v55  ;;  %v2271_v58 = vperm.slane %v2109_v22, %v2909_v55 }
 0x55f   :  { %v2128_v49 = vsel %vm2120_vm0, %v2909_v55, 5  ;;  %vm2121_vm4 = vcmp.eq.f32.partialorder %v3521_v51, %v2109_v22 }
 0x560   :  { %v3556_v7 = vsel %vm236_vm7, %v2128_v49, 2147483647  ;;  %v2277_v52 = vsel %vm425_vm11, %v2270_v61, %v2276_v60 }
 0x561   :  { %v2194_v30 = vshra.s32 %v3556_v7, 16  ;;  %v2278_v13 = vsel %vm427_vm12, %v2271_v58, %v2277_v52  ;;  %v2629_v58 = vld [vmem:[%s4628_s5] ss:$0 sm:$0xff] }
 0x563   :  { %v3560_v28 = vpop.xlane.xlu0 %2111  ;;  %v3564_v6 = vcvt.s32.f32 %v2194_v30  ;;  %v2124_v30 = vsel %vm2116_vm2, %v2909_v55, 5 }
 0x564   :  { %v2272_v9 = vperm.slane %v3560_v28, %v2909_v55 }
 0x565   :  { %2197 = vmin.xlane.f32.xlu2 %v3564_v6  ;;  %v2115_v47 = vpop.xlane.xlu1 %2114  ;;  %v2256_v56 = vpop.permute.xlu2 %2255 }
 0x566   :  { %v2279_v32 = vsel %vm429_vm13, %v2272_v9, %v2278_v13  ;;  %v2273_v49 = vperm.slane %v2115_v47, %v2909_v55  ;;  %vm2257_vm1 = vcmp.eq.s32.totalorder %v2256_v56, 1  ;;  %v2132_v13 = vsel %vm236_vm7, %v2124_v30, 2147483647 }
 0x567   :  { %v2126_v56 = vsel %vm2118_vm3, %v2909_v55, 5  ;;  %vm2123_vm6 = vcmp.eq.f32.partialorder %v3531_v33, %v2115_v47  ;;  %vm2122_vm3 = vcmp.eq.f32.partialorder %v3529_v40, %v3560_v28 }
 0x568   :  { %v2280_v60 = vsel %vm431_vm14, %v2273_v49, %v2279_v32  ;;  %v2162_v26 = vsel %vm236_vm7, %v2126_v56, 2147483647  ;;  %v2129_v49 = vsel %vm2121_vm4, %v2909_v55, 5  ;;  %v2131_v10 = vsel %vm2123_vm6, %v2909_v55, 5 }
 0x569   :  { %v2282_v61 = vsel %vm2257_vm1, %v2280_v60, %v3492_v44  ;;  %v2134_v44 = vshra.s32 %v2132_v13, 16  ;;  %v2164_v4 = vshra.s32 %v2162_v26, 16  ;;  %v2133_v56 = vand.u32 65535, %v2132_v13 }
 0x56a   :  { %2283 = vst.msk [vmem:[#allocation3] sm:$0xff] %vm117_vm5, %v2282_v61  ;;  %v3586_v61 = vsel %vm236_vm7, %v2129_v49, 2147483647  ;;  %vm2119_vm1 = vcmp.eq.f32.partialorder %v3519_v16, %v3546_v31  ;;  %v2163_v53 = vand.u32 65535, %v2162_v26  ;;  %v2193_v26 = vand.u32 65535, %v3556_v7 }
 0x56b   :  { %v2136_v32 = vcvt.s32.f32 %v2134_v44  ;;  %v2166_v60 = vcvt.s32.f32 %v2164_v4  ;;  %v2209_v41 = vshra.s32 %v3586_v61, 16 }
 0x56c   :  { %v2195_v40 = vcvt.s32.f32 %v2193_v26 }
 0x571   :  { %v2301_v52 = vld [vmem:[#allocation3] sm:$0xff] }
 0x572   :  { %v2306_v0 = vadd.f32 %v2629_v58, %v2301_v52  ;;  %v3591_v58 = vcvt.s32.f32 %v2209_v41  ;;  %v2237_v52 = vsel %vm236_vm7, %v2131_v10, 2147483647  ;;  %v2135_v10 = vcvt.s32.f32 %v2133_v56 }
 0x573   :  { %v2239_v51 = vshra.s32 %v2237_v52, 16 }
 0x574   :  { %v2307_v9 = vsel %vm117_vm5, %v2306_v0, -inf }
 0x575   :  { %2308 = vmax.xlane.f32.xlu0 %v2307_v9  ;;  %v2241_v22 = vcvt.s32.f32 %v2239_v51  ;;  %v2125_v9 = vsel %vm2117_vm15, %v2909_v55, 5  ;;  %v2127_v51 = vsel %vm2119_vm1, %v2909_v55, 5 }
 0x576   :  { %v2147_v49 = vsel %vm236_vm7, %v2125_v9, 2147483647  ;;  %v2177_v13 = vsel %vm236_vm7, %v2127_v51, 2147483647  ;;  %v2165_v9 = vcvt.s32.f32 %v2163_v53 }
 0x577   :  { %v2149_v11 = vshra.s32 %v2147_v49, 16  ;;  %v2179_v31 = vshra.s32 %v2177_v13, 16  ;;  %v2178_v57 = vand.u32 65535, %v2177_v13 }
 0x579   :  { %v2181_v56 = vcvt.s32.f32 %v2179_v31 }
 0x57d   :  { %2137 = vmin.xlane.f32.xlu0 %v2136_v32 }
 0x585   :  { %2167 = vmin.xlane.f32.xlu0 %v2166_v60 }
 0x58d   :  { %2212 = vmin.xlane.f32.xlu0 %v3591_v58 }
 0x595   :  { %2242 = vmin.xlane.f32.xlu0 %v2241_v22 }
 0x5e8   :  { %v2309_v30 = vpop.xlane.xlu0 %2308 }
 0x5e9   :  { %vm2310_vm0 = vcmp.eq.f32.partialorder %v2306_v0, %v2309_v30  ;;  %v2151_v30 = vcvt.s32.f32 %v2149_v11  ;;  %v2238_v11 = vand.u32 65535, %v2237_v52 }
 0x5ea   :  { %v2311_v33 = vsel %vm2310_vm0, %v2909_v55, 5 }
 0x5eb   :  { %v2312_v47 = vsel %vm117_vm5, %v2311_v33, 2147483647  ;;  %v2240_v7 = vcvt.s32.f32 %v2238_v11 }
 0x5ec   :  { %v2314_v44 = vshra.s32 %v2312_v47, 16  ;;  %v2313_v26 = vand.u32 65535, %v2312_v47 }
 0x5ee   :  { %v2316_v4 = vcvt.s32.f32 %v2314_v44  ;;  %v2130_v44 = vsel %vm2122_vm3, %v2909_v55, 5  ;;  %v2315_v52 = vcvt.s32.f32 %v2313_v26 }
 0x5f0   :  { %2317 = vmin.xlane.f32.xlu1 %v2316_v4  ;;  %v3601_v41 = vpop.xlane.xlu0 %2137 }
 0x5f1   :  { %vm2139_vm2 = vcmp.eq.f32.partialorder %v2136_v32, %v3601_v41  ;;  %v3613_v32 = vpop.xlane.xlu2 %2197 }
 0x5f2   :  { %v2140_v0 = vsel %vm2139_vm2, %v2135_v10, inf  ;;  %vm2199_vm6 = vcmp.eq.f32.partialorder %v3564_v6, %v3613_v32  ;;  %v2222_v10 = vsel %vm236_vm7, %v2130_v44, 2147483647 }
 0x5f3   :  { %2141 = vmin.xlane.f32.xlu0 %v2140_v0  ;;  %v2200_v28 = vsel %vm2199_vm6, %v2195_v40, inf  ;;  %vm2327_vm6 = vcmask 7168  }
 0x5f8   :  { %2152 = vmin.xlane.f32.xlu1 %v2151_v30  ;;  %v3608_v33 = vpop.xlane.xlu0 %2167 }
 0x5f9   :  { %vm2169_vm4 = vcmp.eq.f32.partialorder %v2166_v60, %v3608_v33  ;;  %v2224_v60 = vshra.s32 %v2222_v10, 16 }
 0x5fa   :  { %v2170_v16 = vsel %vm2169_vm4, %v2165_v9, inf }
 0x5fb   :  { %2171 = vmin.xlane.f32.xlu0 %v2170_v16  ;;  %v2226_v53 = vcvt.s32.f32 %v2224_v60  ;;  %v2148_v16 = vand.u32 65535, %v2147_v49  ;;  %v2223_v60 = vand.u32 65535, %v2222_v10 }
 0x5fd   :  { %v2150_v44 = vcvt.s32.f32 %v2148_v16 }
 0x600   :  { %2182 = vmin.xlane.f32.xlu1 %v2181_v56  ;;  %v3620_v0 = vpop.xlane.xlu0 %2212 }
 0x601   :  { %vm2214_vm4 = vcmp.eq.f32.partialorder %v3591_v58, %v3620_v0 }
 0x603   :  { %2201 = vmin.xlane.f32.xlu0 %v2200_v28 }
 0x608   :  { %2227 = vmin.xlane.f32.xlu1 %v2226_v53  ;;  %v3622_v51 = vpop.xlane.xlu0 %2242 }
 0x609   :  { %vm2244_vm15 = vcmp.eq.f32.partialorder %v2241_v22, %v3622_v51  ;;  %v2225_v22 = vcvt.s32.f32 %v2223_v60 }
 0x60a   :  { %v2245_v9 = vsel %vm2244_vm15, %v2240_v7, inf  ;;  %v2180_v7 = vcvt.s32.f32 %v2178_v57  ;;  %v2144_v57 = vcvt.f32.s32 %v3601_v41  ;;  %vm1810_vm15 = vcmp.eq.f32.partialorder %v3402_v48, %v3454_v24 }
 0x60b   :  { %2246 = vmin.xlane.f32.xlu0 %v2245_v9 }
 0x60c   :  { %v2145_v58 = vshll.u32 %v2144_v57, 16 }
 0x663   :  { %v2318_v6 = vpop.xlane.xlu1 %2317 }
 0x664   :  { %vm2319_vm1 = vcmp.eq.f32.partialorder %v2316_v4, %v2318_v6 }
 0x665   :  { %v2320_v28 = vsel %vm2319_vm1, %v2315_v52, inf }
 0x666   :  { %v2142_v4 = vpop.xlane.xlu0 %2141 }
 0x667   :  { %v2143_v52 = vcvt.f32.s32 %v2142_v4 }
 0x66b   :  { %v2153_v31 = vpop.xlane.xlu1 %2152 }
 0x66c   :  { %vm2154_vm0 = vcmp.eq.f32.partialorder %v2151_v30, %v2153_v31  ;;  %v2208_v30 = vand.u32 65535, %v3586_v61  ;;  %v2159_v16 = vcvt.f32.s32 %v2153_v31  ;;  %v2174_v61 = vcvt.f32.s32 %v3608_v33 }
 0x66d   :  { %v2155_v23 = vsel %vm2154_vm0, %v2150_v44, inf  ;;  %v2204_v33 = vcvt.f32.s32 %v3613_v32  ;;  %vm1808_vm0 = vcmp.eq.f32.partialorder %v3394_v39, %v3450_v42 }
 0x66e   :  { %2156 = vmin.xlane.f32.xlu1 %v2155_v23  ;;  %v2210_v23 = vcvt.s32.f32 %v2208_v30  ;;  %v2172_v10 = vpop.xlane.xlu0 %2171  ;;  %v2146_v30 = vadd.s32 %v2145_v58, %v2143_v52 }
 0x66f   :  { %v2205_v32 = vshll.u32 %v2204_v33, 16 }
 0x670   :  { %v2215_v47 = vsel %vm2214_vm4, %v2210_v23, inf  ;;  %v2284_v4 = vperm.slane %v2146_v30, %v2909_v55  ;;  %vm1813_vm4 = vcmp.eq.f32.partialorder %v3419_v29, %v3472_v21 }
 0x673   :  { %v2183_v40 = vpop.xlane.xlu1 %2182 }
 0x674   :  { %vm2184_vm2 = vcmp.eq.f32.partialorder %v2181_v56, %v2183_v40  ;;  %v2324_v56 = vcvt.f32.s32 %v2318_v6  ;;  %v2189_v23 = vcvt.f32.s32 %v2183_v40  ;;  %v2175_v6 = vshll.u32 %v2174_v61, 16 }
 0x675   :  { %v2185_v49 = vsel %vm2184_vm2, %v2180_v7, inf  ;;  %vm1809_vm2 = vcmp.eq.f32.partialorder %v3405_v63, %v3452_v46 }
 0x676   :  { %2321 = vmin.xlane.f32.xlu1 %v2320_v28  ;;  %v2325_v26 = vshll.u32 %v2324_v56, 16  ;;  %v2160_v28 = vshll.u32 %v2159_v16, 16  ;;  %v1817_v42 = vsel %vm1809_vm2, %v2909_v55, 5  ;;  %vm1812_vm2 = vcmp.eq.f32.partialorder %v3422_v45, %v3467_v37 }
 0x67b   :  { %v2228_v11 = vpop.xlane.xlu1 %2227 }
 0x67c   :  { %vm2229_vm3 = vcmp.eq.f32.partialorder %v2226_v53, %v2228_v11 }
 0x67d   :  { %v2230_v9 = vsel %vm2229_vm3, %v2225_v22, inf  ;;  %v2202_v22 = vpop.xlane.xlu0 %2201  ;;  %vm1811_vm3 = vcmp.eq.f32.partialorder %v3416_v38, %v3463_v59 }
 0x67e   :  { %2231 = vmin.xlane.f32.xlu2 %v2230_v9  ;;  %2186 = vmin.xlane.f32.xlu1 %v2185_v49  ;;  %v2173_v49 = vcvt.f32.s32 %v2172_v10  ;;  %v2203_v40 = vcvt.f32.s32 %v2202_v22 }
 0x680   :  { %v2176_v31 = vadd.s32 %v2175_v6, %v2173_v49  ;;  %v2206_v22 = vadd.s32 %v2205_v32, %v2203_v40 }
 0x682   :  { %v2286_v10 = vperm.slane %v2176_v31, %v2909_v55 }
 0x686   :  { %2216 = vmin.xlane.f32.xlu1 %v2215_v47 }
 0x6e1   :  { %v2157_v13 = vpop.xlane.xlu1 %2156 }
 0x6e2   :  { %v2158_v53 = vcvt.f32.s32 %v2157_v13  ;;  %v2190_v13 = vshll.u32 %v2189_v23, 16 }
 0x6e4   :  { %v2161_v7 = vadd.s32 %v2160_v28, %v2158_v53  ;;  %v2219_v28 = vcvt.f32.s32 %v3620_v0 }
 0x6e6   :  { %v2285_v41 = vperm.slane %v2161_v7, %v2909_v55  ;;  %v2220_v23 = vshll.u32 %v2219_v28, 16 }
 0x6e8   :  { %v2292_v16 = vsel %vm419_vm8, %v2285_v41, %v2284_v4 }
 0x6e9   :  { %v2322_v44 = vpop.xlane.xlu1 %2321  ;;  %v2293_v7 = vsel %vm421_vm9, %v2286_v10, %v2292_v16  ;;  %v1818_v10 = vsel %vm1810_vm15, %v2909_v55, 5  ;;  %vm1814_vm15 = vcmp.eq.f32.partialorder %v3433_v36, %v3478_v15 }
 0x6ea   :  { %v2323_v60 = vcvt.f32.s32 %v2322_v44  ;;  %v2234_v44 = vcvt.f32.s32 %v2228_v11  ;;  %v3657_v40 = vsel %vm236_vm7, %v1818_v10, 2147483647 }
 0x6ec   :  { %v2326_v9 = vadd.s32 %v2325_v26, %v2323_v60  ;;  %v2247_v26 = vpop.xlane.xlu0 %2246  ;;  %v2249_v60 = vcvt.f32.s32 %v3622_v51  ;;  %v2235_v11 = vshll.u32 %v2234_v44, 16  ;;  %v1856_v44 = vshra.s32 %v3657_v40, 16 }
 0x6ee   :  { %2328 = vst.msk [vmem:[#allocation5] sm:$0xff] %vm2327_vm6, %v2326_v9  ;;  %v2248_v9 = vcvt.f32.s32 %v2247_v26  ;;  %v2250_v6 = vshll.u32 %v2249_v60, 16  ;;  %v3660_v26 = vcvt.s32.f32 %v1856_v44 }
 0x6f0   :  { %v2251_v31 = vadd.s32 %v2250_v6, %v2248_v9 }
 0x6f1   :  { %v2187_v47 = vpop.xlane.xlu1 %2186  ;;  %v2232_v57 = vpop.xlane.xlu2 %2231 }
 0x6f2   :  { %v2188_v56 = vcvt.f32.s32 %v2187_v47  ;;  %v2233_v58 = vcvt.f32.s32 %v2232_v57  ;;  %v2288_v47 = vperm.slane %v2206_v22, %v2909_v55  ;;  %v2291_v33 = vperm.slane %v2251_v31, %v2909_v55 }
 0x6f3   :  { %v1822_v31 = vsel %vm1814_vm15, %v2909_v55, 5 }
 0x6f4   :  { %v2191_v53 = vadd.s32 %v2190_v13, %v2188_v56  ;;  %v2236_v0 = vadd.s32 %v2235_v11, %v2233_v58  ;;  %v3681_v11 = vsel %vm236_vm7, %v1817_v42, 2147483647 }
 0x6f5   :  { %v3636_v52 = vld [vmem:[#allocation5] sm:$0xff] }
 0x6f6   :  { %v2287_v61 = vperm.slane %v2191_v53, %v2909_v55  ;;  %2334 = vperm.xlu1 %2625, %v3636_v52   ;;  %v2290_v13 = vperm.slane %v2236_v0, %v2909_v55 }
 0x6f8   :  { %v2294_v49 = vsel %vm423_vm10, %v2287_v61, %v2293_v7  ;;  %v1816_v61 = vsel %vm1808_vm0, %v2909_v55, 5  ;;  %vm1815_vm0 = vcmp.eq.f32.partialorder %v3436_v2, %v3483_v50 }
 0x6f9   :  { %v2217_v30 = vpop.xlane.xlu1 %2216  ;;  %v2295_v56 = vsel %vm425_vm11, %v2288_v47, %v2294_v49  ;;  %v3672_v49 = vsel %vm236_vm7, %v1816_v61, 2147483647  ;;  %v3706_v47 = vsel %vm236_vm7, %v1822_v31, 2147483647  ;;  %v1823_v21 = vsel %vm1815_vm0, %v2909_v55, 5 }
 0x6fa   :  { %v2218_v41 = vcvt.f32.s32 %v2217_v30  ;;  %v1826_v39 = vshra.s32 %v3672_v49, 16  ;;  %v1841_v30 = vshra.s32 %v3681_v11, 16  ;;  %v1916_v29 = vshra.s32 %v3706_v47, 16 }
 0x6fc   :  { %v2221_v51 = vadd.s32 %v2220_v23, %v2218_v41  ;;  %v3678_v22 = vcvt.s32.f32 %v1826_v39  ;;  %v1819_v23 = vsel %vm1811_vm3, %v2909_v55, 5  ;;  %v3688_v6 = vcvt.s32.f32 %v1841_v30 }
 0x6fd   :  { %v3691_v63 = vsel %vm236_vm7, %v1819_v23, 2147483647  ;;  %v1821_v41 = vsel %vm1813_vm4, %v2909_v55, 5 }
 0x6fe   :  { %v2289_v4 = vperm.slane %v2221_v51, %v2909_v55  ;;  %v1871_v46 = vshra.s32 %v3691_v63, 16  ;;  %v1899_v38 = vsel %vm236_vm7, %v1821_v41, 2147483647 }
 0x6ff   :  { %v1901_v59 = vshra.s32 %v1899_v38, 16  ;;  %v1900_v42 = vand.u32 65535, %v1899_v38  ;;  %v1825_v38 = vand.u32 65535, %v3672_v49 }
 0x700   :  { %v2296_v16 = vsel %vm427_vm12, %v2289_v4, %v2295_v56  ;;  %v3698_v0 = vcvt.s32.f32 %v1871_v46  ;;  %v3712_v4 = vcvt.s32.f32 %v1916_v29 }
 0x701   :  { %v2297_v57 = vsel %vm429_vm13, %v2290_v13, %v2296_v16  ;;  %v1903_v51 = vcvt.s32.f32 %v1901_v59  ;;  %v3715_v13 = vsel %vm236_vm7, %v1823_v21, 2147483647  ;;  %v1902_v30 = vcvt.s32.f32 %v1900_v42 }
 0x702   :  { %v2298_v53 = vsel %vm431_vm14, %v2291_v33, %v2297_v57  ;;  %v1931_v36 = vshra.s32 %v3715_v13, 16  ;;  %v3725_v57 = vld [vmem:[%s4623_s6] sm:$0xff]  ;;  %v1827_v21 = vcvt.s32.f32 %v1825_v38 }
 0x703   :  { %2300 = vst.msk [vmem:[#allocation4 + $0x38] sm:$0xff] %vm117_vm5, %v2298_v53 }
 0x704   :  { %v3719_v15 = vcvt.s32.f32 %v1931_v36 }
 0x70a   :  { %v3665_v60 = vld [vmem:[#allocation4 + $0x38] sm:$0xff] }
 0x720   :  { %1859 = vmin.xlane.f32.xlu1 %v3660_v26 }
 0x768   :  { %v2335_v28 = vpop.permute.xlu1 %2334 }
 0x769   :  { %vm2336_vm1 = vcmp.eq.s32.totalorder %v2909_v55, %v2335_v28 }
 0x76a   :  { %v2337_v48 = vsel %vm2336_vm1, %v3665_v60, 0  ;;  %vm2351_vm1 = vcmp.gt.s32.totalorder %v3725_v57, 7 }
 0x76b   :  { %v2338_v24 = vsel %vm117_vm5, %v2337_v48, 0  ;;  %v1820_v48 = vsel %vm1812_vm2, %v2909_v55, 5 }
 0x76c   :  { %v2340_v32 = vshrl.u32 %v2338_v24, 16  ;;  %v2339_v58 = vand.u32 65535, %v2338_v24  ;;  %v3744_v61 = vsel %vm236_vm7, %v1820_v48, 2147483647 }
 0x76e   :  { %v2342_v7 = vcvt.s32.f32 %v2340_v32  ;;  %v2341_v9 = vcvt.s32.f32 %v2339_v58 }
 0x770   :  { %2345 = vadd.xlane.f32.xlu2 %v2342_v7  ;;  %2343 = vadd.xlane.f32.xlu0 %v2341_v9  ;;  %v1855_v9 = vand.u32 65535, %v3657_v40 }
 0x772   :  { %v1857_v45 = vcvt.s32.f32 %v1855_v9 }
 0x778   :  { %1829 = vmin.xlane.f32.xlu0 %v3678_v22 }
 0x780   :  { %1844 = vmin.xlane.f32.xlu0 %v3688_v6 }
 0x788   :  { %1874 = vmin.xlane.f32.xlu0 %v3698_v0 }
 0x790   :  { %1904 = vmin.xlane.f32.xlu0 %v1903_v51 }
 0x793   :  { %v3752_v7 = vpop.xlane.xlu1 %1859 }
 0x794   :  { %vm1861_vm3 = vcmp.eq.f32.partialorder %v3660_v26, %v3752_v7 }
 0x795   :  { %v1862_v37 = vsel %vm1861_vm3, %v1857_v45, inf  ;;  %vm1500_vm3 = vcmp.eq.f32.partialorder %v3285_v14, %v3342_v8  ;;  %v1885_v45 = vand.u32 65535, %v3744_v61 }
 0x798   :  { %1919 = vmin.xlane.f32.xlu0 %v3712_v4 }
 0x7a0   :  { %1934 = vmin.xlane.f32.xlu0 %v3719_v15 }
 0x7e3   :  { %v2346_v56 = vpop.xlane.xlu2 %2345  ;;  %v2344_v33 = vpop.xlane.xlu0 %2343 }
 0x7e4   :  { %v2348_v2 = vcvt.f32.s32 %v2346_v56  ;;  %v2347_v16 = vcvt.f32.s32 %v2344_v33  ;;  %v1870_v33 = vand.u32 65535, %v3691_v63 }
 0x7e6   :  { %v2349_v50 = vshll.u32 %v2348_v2, 16  ;;  %v1872_v49 = vcvt.s32.f32 %v1870_v33 }
 0x7e8   :  { %v2350_v53 = vadd.s32 %v2349_v50, %v2347_v16 }
 0x7ea   :  { %v3729_v10 = vsel %vm2351_vm1, %v2350_v53, %v3636_v52  ;;  %v1886_v52 = vshra.s32 %v3744_v61, 16 }
 0x7eb   :  { %2353 = vst.msk [vmem:[#allocation5] sm:$0xff] %vm2327_vm6, %v3729_v10  ;;  %v3736_v28 = vpop.xlane.xlu0 %1829 }
 0x7ec   :  { %v3747_v32 = vcvt.s32.f32 %v1886_v52  ;;  %vm1831_vm0 = vcmp.eq.f32.partialorder %v3678_v22, %v3736_v28 }
 0x7ed   :  { %v1832_v36 = vsel %vm1831_vm0, %v1827_v21, inf  ;;  %vm1504_vm0 = vcmp.eq.f32.partialorder %v3307_v17, %v3348_v25 }
 0x7ee   :  { %v1512_v53 = vsel %vm1504_vm0, %v2909_v55, 5  ;;  %vm1505_vm0 = vcmp.eq.f32.partialorder %v3327_v27, %v3369_v5 }
 0x7f2   :  { %v3733_v44 = vld [vmem:[#allocation5] sm:$0xff] }
 0x7f3   :  { %2364 = vperm.xlu2 %2624, %v3733_v44   ;;  %v3741_v24 = vpop.xlane.xlu0 %1844 }
 0x7f4   :  { %vm1846_vm1 = vcmp.eq.f32.partialorder %v3688_v6, %v3741_v24  ;;  %v1508_v6 = vsel %vm1500_vm3, %v2909_v55, 5  ;;  %vm1501_vm3 = vcmp.eq.f32.partialorder %v3296_v3, %v3344_v43 }
 0x7f5   :  { %v3781_v16 = vsel %vm236_vm7, %v1508_v6, 2147483647  ;;  %v1509_v61 = vsel %vm1501_vm3, %v2909_v55, 5  ;;  %v1851_v6 = vcvt.f32.s32 %v3741_v24 }
 0x7f6   :  { %v1518_v14 = vshra.s32 %v3781_v16, 16 }
 0x7fb   :  { %v3749_v58 = vpop.xlane.xlu0 %1874 }
 0x7fc   :  { %vm1876_vm2 = vcmp.eq.f32.partialorder %v3698_v0, %v3749_v58  ;;  %v3787_v0 = vcvt.s32.f32 %v1518_v14 }
 0x7fd   :  { %v1877_v2 = vsel %vm1876_vm2, %v1872_v49, inf }
 0x803   :  { %v3757_v39 = vpop.xlane.xlu0 %1904 }
 0x804   :  { %vm1906_vm4 = vcmp.eq.f32.partialorder %v1903_v51, %v3757_v39  ;;  %v1840_v51 = vand.u32 65535, %v3681_v11  ;;  %v1915_v11 = vand.u32 65535, %v3706_v47 }
 0x805   :  { %v1907_v23 = vsel %vm1906_vm4, %v1902_v30, inf }
 0x806   :  { %v1917_v50 = vcvt.s32.f32 %v1915_v11 }
 0x80b   :  { %v3774_v22 = vpop.xlane.xlu0 %1919 }
 0x80c   :  { %vm1921_vm4 = vcmp.eq.f32.partialorder %v3712_v4, %v3774_v22 }
 0x80d   :  { %v1922_v63 = vsel %vm1921_vm4, %v1917_v50, inf }
 0x813   :  { %v3824_v30 = vpop.xlane.xlu0 %1934 }
 0x814   :  { %vm1936_vm4 = vcmp.eq.f32.partialorder %v3719_v15, %v3824_v30 }
 0x81c   :  { %1889 = vmin.xlane.f32.xlu2 %v3747_v32 }
 0x824   :  { %1863 = vmin.xlane.f32.xlu2 %v1862_v37 }
 0x82c   :  { %1908 = vmin.xlane.f32.xlu2 %v1907_v23  ;;  %v1930_v23 = vand.u32 65535, %v3715_v13 }
 0x84d   :  { %v2365_v46 = vpop.permute.xlu2 %2364 }
 0x84e   :  { %vm2366_vm15 = vcmp.eq.s32.totalorder %v2909_v55, %v2365_v46  ;;  %v1932_v46 = vcvt.s32.f32 %v1930_v23 }
 0x84f   :  { %v2367_v41 = vsel %vm2366_vm15, %v3665_v60, 0  ;;  %v1842_v60 = vcvt.s32.f32 %v1840_v51  ;;  %vm1502_vm15 = vcmp.eq.f32.partialorder %v3293_v34, %v3346_v19  ;;  %v3800_v34 = vsel %vm236_vm7, %v1512_v53, 2147483647 }
 0x850   :  { %v2368_v40 = vsel %vm117_vm5, %v2367_v41, 0  ;;  %v1510_v8 = vsel %vm1502_vm15, %v2909_v55, 5  ;;  %v1578_v19 = vshra.s32 %v3800_v34, 16  ;;  %v1937_v41 = vsel %vm1936_vm4, %v1932_v46, inf }
 0x851   :  { %v2369_v59 = vand.u32 65535, %v2368_v40  ;;  %v2370_v26 = vshrl.u32 %v2368_v40, 16  ;;  %v1847_v56 = vsel %vm1846_vm1, %v1842_v60, inf  ;;  %v3790_v47 = vsel %vm236_vm7, %v1510_v8, 2147483647 }
 0x852   :  { %v1548_v4 = vshra.s32 %v3790_v47, 16  ;;  %vm1507_vm1 = vcmp.eq.f32.partialorder %v3324_v20, %v3367_v12  ;;  %v3807_v9 = vcvt.s32.f32 %v1578_v19  ;;  %v1887_v12 = vcvt.s32.f32 %v1885_v45 }
 0x853   :  { %v2372_v31 = vcvt.s32.f32 %v2370_v26  ;;  %v2371_v29 = vcvt.s32.f32 %v2369_v59  ;;  %v1515_v52 = vsel %vm1507_vm1, %v2909_v55, 5  ;;  %v3831_v40 = vsel %vm236_vm7, %v1509_v61, 2147483647 }
 0x854   :  { %v3797_v48 = vcvt.s32.f32 %v1548_v4  ;;  %v3810_v17 = vsel %vm236_vm7, %v1515_v52, 2147483647  ;;  %vm1503_vm15 = vcmp.eq.f32.partialorder %v3313_v18, %v3352_v62  ;;  %v1533_v3 = vshra.s32 %v3831_v40, 16 }
 0x855   :  { %2375 = vadd.xlane.f32.xlu0 %v2372_v31  ;;  %2373 = vadd.xlane.f32.xlu1 %v2371_v29  ;;  %v1623_v25 = vshra.s32 %v3810_v17, 16  ;;  %v1511_v43 = vsel %vm1503_vm15, %v2909_v55, 5  ;;  %v1513_v59 = vsel %vm1505_vm0, %v2909_v55, 5  ;;  %vm2381_vm1 = vcmp.gt.s32.totalorder %v3725_v57, 6 }
 0x856   :  { %v3840_v13 = vsel %vm236_vm7, %v1511_v43, 2147483647  ;;  %v3850_v18 = vsel %vm236_vm7, %v1513_v59, 2147483647  ;;  %v1852_v53 = vshll.u32 %v1851_v6, 16  ;;  %v1911_v61 = vcvt.f32.s32 %v3757_v39 }
 0x857   :  { %v3815_v37 = vcvt.s32.f32 %v1623_v25  ;;  %v1563_v15 = vshra.s32 %v3840_v13, 16  ;;  %v1593_v62 = vshra.s32 %v3850_v18, 16 }
 0x859   :  { %v3847_v26 = vcvt.s32.f32 %v1563_v15  ;;  %v3854_v31 = vcvt.s32.f32 %v1593_v62 }
 0x85d   :  { %1833 = vmin.xlane.f32.xlu0 %v1832_v36  ;;  %1848 = vmin.xlane.f32.xlu1 %v1847_v56 }
 0x865   :  { %1878 = vmin.xlane.f32.xlu0 %v1877_v2 }
 0x86d   :  { %1923 = vmin.xlane.f32.xlu0 %v1922_v63 }
 0x875   :  { %1521 = vmin.xlane.f32.xlu0 %v3787_v0 }
 0x87d   :  { %1551 = vmin.xlane.f32.xlu0 %v3797_v48 }
 0x885   :  { %1581 = vmin.xlane.f32.xlu0 %v3807_v9 }
 0x88d   :  { %1626 = vmin.xlane.f32.xlu0 %v3815_v37 }
 0x88f   :  { %v3818_v20 = vpop.xlane.xlu2 %1889 }
 0x890   :  { %vm1891_vm2 = vcmp.eq.f32.partialorder %v3747_v32, %v3818_v20  ;;  %v3837_v32 = vcvt.s32.f32 %v1533_v3  ;;  %v1896_v24 = vcvt.f32.s32 %v3818_v20 }
 0x891   :  { %v1892_v42 = vsel %vm1891_vm2, %v1887_v12, inf  ;;  %vm1506_vm2 = vcmp.eq.f32.partialorder %v3310_v1, %v3362_v54  ;;  %v1881_v1 = vcvt.f32.s32 %v3749_v58  ;;  %v1866_v54 = vcvt.f32.s32 %v3752_v7 }
 0x892   :  { %1893 = vmin.xlane.f32.xlu1 %v1892_v42  ;;  %v1514_v33 = vsel %vm1506_vm2, %v2909_v55, 5  ;;  %v1897_v43 = vshll.u32 %v1896_v24, 16 }
 0x893   :  { %v3870_v49 = vsel %vm236_vm7, %v1514_v33, 2147483647  ;;  %v1867_v42 = vshll.u32 %v1866_v54, 16 }
 0x894   :  { %v1608_v50 = vshra.s32 %v3870_v49, 16 }
 0x896   :  { %v3877_v19 = vcvt.s32.f32 %v1608_v50 }
 0x897   :  { %v1864_v2 = vpop.xlane.xlu2 %1863 }
 0x898   :  { %v1865_v12 = vcvt.f32.s32 %v1864_v2 }
 0x89a   :  { %1938 = vmin.xlane.f32.xlu1 %v1937_v41  ;;  %v1868_v41 = vadd.s32 %v1867_v42, %v1865_v12 }
 0x89c   :  { %v1978_v39 = vperm.slane %v1868_v41, %v2909_v55  ;;  %v1517_v41 = vand.u32 65535, %v3781_v16  ;;  %v1547_v16 = vand.u32 65535, %v3790_v47  ;;  %v1577_v47 = vand.u32 65535, %v3800_v34 }
 0x89f   :  { %v1909_v23 = vpop.xlane.xlu2 %1908 }
 0x8a0   :  { %v1910_v15 = vcvt.f32.s32 %v1909_v23 }
 0x8a2   :  { %1536 = vmin.xlane.f32.xlu1 %v3837_v32 }
 0x8aa   :  { %1566 = vmin.xlane.f32.xlu1 %v3847_v26 }
 0x8b2   :  { %1596 = vmin.xlane.f32.xlu1 %v3854_v31 }
 0x8c8   :  { %v2374_v29 = vpop.xlane.xlu1 %2373  ;;  %v2376_v38 = vpop.xlane.xlu0 %2375 }
 0x8c9   :  { %v2378_v5 = vcvt.f32.s32 %v2376_v38  ;;  %v2377_v27 = vcvt.f32.s32 %v2374_v29  ;;  %v1926_v29 = vcvt.f32.s32 %v3774_v22  ;;  %v1912_v38 = vshll.u32 %v1911_v61, 16 }
 0x8cb   :  { %v2379_v51 = vshll.u32 %v2378_v5, 16  ;;  %v1927_v2 = vshll.u32 %v1926_v29, 16 }
 0x8cd   :  { %v2380_v21 = vadd.s32 %v2379_v51, %v2377_v27 }
 0x8cf   :  { %v3859_v60 = vsel %vm2381_vm1, %v2380_v21, %v3733_v44  ;;  %v1836_v44 = vcvt.f32.s32 %v3736_v28  ;;  %v1882_v28 = vshll.u32 %v1881_v1, 16  ;;  %v1941_v21 = vcvt.f32.s32 %v3824_v30 }
 0x8d0   :  { %2383 = vst.msk [vmem:[#allocation5] sm:$0xff] %vm2327_vm6, %v3859_v60  ;;  %v1834_v56 = vpop.xlane.xlu0 %1833  ;;  %v1849_v11 = vpop.xlane.xlu1 %1848 }
 0x8d1   :  { %v1850_v63 = vcvt.f32.s32 %v1849_v11  ;;  %v1835_v14 = vcvt.f32.s32 %v1834_v56  ;;  %v1837_v4 = vshll.u32 %v1836_v44, 16  ;;  %v1913_v56 = vadd.s32 %v1912_v38, %v1910_v15 }
 0x8d2   :  { %v1519_v15 = vcvt.s32.f32 %v1517_v41  ;;  %v4770_v41 = vld [vmem:[#allocation60_spill] sm:$0xff] }
 0x8d3   :  { %v1853_v52 = vadd.s32 %v1852_v53, %v1850_v63  ;;  %v1838_v25 = vadd.s32 %v1837_v4, %v1835_v14  ;;  %v1942_v63 = vshll.u32 %v1941_v21, 16  ;;  %v1981_v14 = vperm.slane %v1913_v56, %v2909_v55  ;;  %v4760_v21 = vld [vmem:[#allocation57_spill] sm:$0xff] }
 0x8d5   :  { %v1977_v46 = vperm.slane %v1853_v52, %v2909_v55  ;;  %v1976_v58 = vperm.slane %v1838_v25, %v2909_v55 }
 0x8d7   :  { %v3863_v36 = vld [vmem:[#allocation5] sm:$0xff]  ;;  %v1984_v20 = vsel %vm419_vm8, %v1977_v46, %v1976_v58 }
 0x8d8   :  { %2394 = vperm.xlu2 %2624, %v3863_v36   ;;  %v1879_v8 = vpop.xlane.xlu0 %1878  ;;  %v1985_v11 = vsel %vm421_vm9, %v1978_v39, %v1984_v20 }
 0x8d9   :  { %v1880_v45 = vcvt.f32.s32 %v1879_v8 }
 0x8db   :  { %v1883_v7 = vadd.s32 %v1882_v28, %v1880_v45 }
 0x8dd   :  { %v1979_v5 = vperm.slane %v1883_v7, %v2909_v55  ;;  %v1532_v7 = vand.u32 65535, %v3831_v40  ;;  %v1562_v40 = vand.u32 65535, %v3840_v13  ;;  %v1592_v13 = vand.u32 65535, %v3850_v18 }
 0x8de   :  { %v1622_v18 = vand.u32 65535, %v3810_v17 }
 0x8df   :  { %v1986_v44 = vsel %vm423_vm10, %v1979_v5, %v1985_v11  ;;  %v4762_v11 = vld [vmem:[#allocation58_spill] sm:$0xff] }
 0x8e0   :  { %v1924_v59 = vpop.xlane.xlu0 %1923 }
 0x8e1   :  { %v1925_v51 = vcvt.f32.s32 %v1924_v59 }
 0x8e3   :  { %v1928_v22 = vadd.s32 %v1927_v2, %v1925_v51  ;;  %v4761_v2 = vld [vmem:[#allocation65_spill] sm:$0xff] }
 0x8e5   :  { %v1982_v30 = vperm.slane %v1928_v22, %v2909_v55 }
 0x8e8   :  { %v3901_v28 = vpop.xlane.xlu0 %1521 }
 0x8e9   :  { %vm1523_vm4 = vcmp.eq.f32.partialorder %v3787_v0, %v3901_v28  ;;  %v1564_v0 = vcvt.s32.f32 %v1562_v40  ;;  %v4771_v40 = vld [vmem:[#allocation69_spill] sm:$0xff] }
 0x8ea   :  { %v1524_v29 = vsel %vm1523_vm4, %v1519_v15, inf  ;;  %vm1193_vm4 = vcmp.eq.f32.partialorder %v4760_v21, %v3237_v35 }
 0x8eb   :  { %v1201_v34 = vsel %vm1193_vm4, %v2909_v55, 5 }
 0x901   :  { %1611 = vmin.xlane.f32.xlu2 %v3877_v19 }
 0x905   :  { %v1894_v3 = vpop.xlane.xlu1 %1893 }
 0x906   :  { %v1895_v62 = vcvt.f32.s32 %v1894_v3  ;;  %v3912_v3 = vpop.xlane.xlu0 %1551 }
 0x907   :  { %vm1553_vm0 = vcmp.eq.f32.partialorder %v3797_v48, %v3912_v3  ;;  %v1594_v48 = vcvt.s32.f32 %v1592_v13 }
 0x908   :  { %v1898_v27 = vadd.s32 %v1897_v43, %v1895_v62  ;;  %v1534_v43 = vcvt.s32.f32 %v1532_v7 }
 0x90a   :  { %v1980_v33 = vperm.slane %v1898_v27, %v2909_v55 }
 0x90c   :  { %v1987_v6 = vsel %vm425_vm11, %v1980_v33, %v1986_v44  ;;  %v3941_v33 = vsel %vm236_vm7, %v1201_v34, 2147483647 }
 0x90d   :  { %v1939_v50 = vpop.xlane.xlu1 %1938  ;;  %v1988_v4 = vsel %vm427_vm12, %v1981_v14, %v1987_v6  ;;  %v1225_v35 = vshra.s32 %v3941_v33, 16  ;;  %v4764_v6 = vld [vmem:[#allocation59_spill] sm:$0xff] }
 0x90e   :  { %v1940_v8 = vcvt.f32.s32 %v1939_v50  ;;  %v1989_v54 = vsel %vm429_vm13, %v1982_v30, %v1988_v4  ;;  %v3922_v38 = vpop.xlane.xlu0 %1581  ;;  %v4766_v30 = vld [vmem:[#allocation55_spill] sm:$0xff] }
 0x90f   :  { %vm1583_vm2 = vcmp.eq.f32.partialorder %v3807_v9, %v3922_v38  ;;  %v1624_v9 = vcvt.s32.f32 %v1622_v18  ;;  %v3947_v22 = vcvt.s32.f32 %v1225_v35  ;;  %v1528_v18 = vcvt.f32.s32 %v3901_v28 }
 0x910   :  { %v1943_v53 = vadd.s32 %v1942_v63, %v1940_v8 }
 0x911   :  { %v1529_v35 = vshll.u32 %v1528_v18, 16  ;;  %v4774_v18 = vld [vmem:[#allocation61_spill] sm:$0xff] }
 0x912   :  { %v1983_v1 = vperm.slane %v1943_v53, %v2909_v55  ;;  %v4765_v53 = vld [vmem:[#allocation63_spill] sm:$0xff] }
 0x914   :  { %v1990_v52 = vsel %vm431_vm14, %v1983_v1, %v1989_v54  ;;  %v1607_v54 = vand.u32 65535, %v3870_v49 }
 0x915   :  { %1992 = vst.msk [vmem:[#allocation4 + $0x30] sm:$0xff] %vm117_vm5, %v1990_v52  ;;  %v3904_v61 = vpop.xlane.xlu1 %1536 }
 0x916   :  { %vm1538_vm15 = vcmp.eq.f32.partialorder %v3837_v32, %v3904_v61  ;;  %v1549_v32 = vcvt.s32.f32 %v1547_v16  ;;  %v3934_v56 = vpop.xlane.xlu0 %1626  ;;  %v4772_v16 = vld [vmem:[#allocation62_spill] sm:$0xff]  ;;  %v1543_v34 = vcvt.f32.s32 %v3904_v61 }
 0x917   :  { %v1539_v62 = vsel %vm1538_vm15, %v1534_v43, inf  ;;  %vm1628_vm15 = vcmp.eq.f32.partialorder %v3815_v37, %v3934_v56  ;;  %v4763_v37 = vld [vmem:[#allocation67_spill] sm:$0xff] }
 0x918   :  { %v1554_v5 = vsel %vm1553_vm0, %v1549_v32, inf  ;;  %vm1195_vm0 = vcmp.eq.f32.partialorder %v4762_v11, %v4761_v2 }
 0x919   :  { %v1203_v44 = vsel %vm1195_vm0, %v2909_v55, 5  ;;  %vm1199_vm0 = vcmp.eq.f32.partialorder %v4772_v16, %v4771_v40 }
 0x91a   :  { %v3950_v17 = vsel %vm236_vm7, %v1203_v44, 2147483647  ;;  %v1207_v32 = vsel %vm1199_vm0, %v2909_v55, 5  ;;  %v1544_v44 = vshll.u32 %v1543_v34, 16 }
 0x91b   :  { %v1255_v50 = vshra.s32 %v3950_v17, 16 }
 0x91c   :  { %v2392_v45 = vld [vmem:[#allocation4 + $0x30] sm:$0xff] }
 0x91d   :  { %v3914_v59 = vpop.xlane.xlu1 %1566  ;;  %v3957_v14 = vcvt.s32.f32 %v1255_v50 }
 0x91e   :  { %vm1568_vm1 = vcmp.eq.f32.partialorder %v3847_v26, %v3914_v59  ;;  %v1579_v26 = vcvt.s32.f32 %v1577_v47  ;;  %v1573_v28 = vcvt.f32.s32 %v3914_v59  ;;  %v1588_v59 = vcvt.f32.s32 %v3922_v38 }
 0x91f   :  { %v1569_v20 = vsel %vm1568_vm1, %v1564_v0, inf  ;;  %vm1197_vm1 = vcmp.eq.f32.partialorder %v4764_v6, %v4763_v37  ;;  %v1224_v38 = vand.u32 65535, %v3941_v33 }
 0x920   :  { %v1584_v51 = vsel %vm1583_vm2, %v1579_v26, inf  ;;  %v1205_v63 = vsel %vm1197_vm1, %v2909_v55, 5  ;;  %vm1192_vm2 = vcmp.eq.f32.partialorder %v4766_v30, %v4765_v53  ;;  %vm2411_vm1 = vcmp.gt.s32.totalorder %v3725_v57, 5 }
 0x921   :  { %v3960_v8 = vsel %vm236_vm7, %v1205_v63, 2147483647  ;;  %v1200_v52 = vsel %vm1192_vm2, %v2909_v55, 5  ;;  %v1589_v16 = vshll.u32 %v1588_v59, 16  ;;  %v4776_v59 = vld [vmem:[#allocation41_spill] sm:$0xff] }
 0x922   :  { %v1285_v4 = vshra.s32 %v3960_v8, 16 }
 0x924   :  { %v3966_v1 = vcvt.s32.f32 %v1285_v4  ;;  %v1558_v4 = vcvt.f32.s32 %v3912_v3 }
 0x925   :  { %v3924_v27 = vpop.xlane.xlu1 %1596 }
 0x926   :  { %v1603_v33 = vcvt.f32.s32 %v3924_v27 }
 0x932   :  { %v2395_v25 = vpop.permute.xlu2 %2394 }
 0x933   :  { %vm2396_vm3 = vcmp.eq.s32.totalorder %v2909_v55, %v2395_v25 }
 0x934   :  { %v2397_v12 = vsel %vm2396_vm3, %v2392_v45, 0  ;;  %vm1598_vm3 = vcmp.eq.f32.partialorder %v3854_v31, %v3924_v27  ;;  %v1629_v31 = vsel %vm1628_vm15, %v1624_v9, inf  ;;  %v1609_v45 = vcvt.s32.f32 %v1607_v54 }
 0x935   :  { %v2398_v24 = vsel %vm117_vm5, %v2397_v12, 0  ;;  %v1599_v39 = vsel %vm1598_vm3, %v1594_v48, inf }
 0x936   :  { %v2399_v42 = vand.u32 65535, %v2398_v24  ;;  %v2400_v23 = vshrl.u32 %v2398_v24, 16  ;;  %v3976_v24 = vsel %vm236_vm7, %v1200_v52, 2147483647 }
 0x937   :  { %v1210_v49 = vshra.s32 %v3976_v24, 16 }
 0x938   :  { %v2402_v46 = vcvt.s32.f32 %v2400_v23  ;;  %v2401_v58 = vcvt.s32.f32 %v2399_v42  ;;  %v4767_v42 = vld [vmem:[#allocation64_spill] sm:$0xff] }
 0x939   :  { %v4768_v23 = vld [vmem:[#allocation56_spill] sm:$0xff] }
 0x93a   :  { %2405 = vadd.xlane.f32.xlu1 %v2402_v46  ;;  %2403 = vadd.xlane.f32.xlu0 %v2401_v58  ;;  %vm1194_vm4 = vcmp.eq.f32.partialorder %v4768_v23, %v4767_v42  ;;  %v3982_v58 = vcvt.s32.f32 %v1210_v49 }
 0x93b   :  { %v1202_v46 = vsel %vm1194_vm4, %v2909_v55, 5 }
 0x93c   :  { %v3985_v7 = vsel %vm236_vm7, %v1202_v46, 2147483647 }
 0x93d   :  { %v1240_v43 = vshra.s32 %v3985_v7, 16 }
 0x942   :  { %1540 = vmin.xlane.f32.xlu0 %v1539_v62  ;;  %1525 = vmin.xlane.f32.xlu1 %v1524_v29  ;;  %v3992_v62 = vcvt.s32.f32 %v1240_v43 }
 0x94a   :  { %1570 = vmin.xlane.f32.xlu0 %v1569_v20  ;;  %1555 = vmin.xlane.f32.xlu1 %v1554_v5  ;;  %v4005_v5 = vsel %vm236_vm7, %v1207_v32, 2147483647 }
 0x94b   :  { %v1315_v13 = vshra.s32 %v4005_v5, 16 }
 0x94d   :  { %v4009_v47 = vcvt.s32.f32 %v1315_v13 }
 0x952   :  { %1600 = vmin.xlane.f32.xlu0 %v1599_v39  ;;  %1585 = vmin.xlane.f32.xlu1 %v1584_v51 }
 0x95a   :  { %1630 = vmin.xlane.f32.xlu0 %v1629_v31 }
 0x962   :  { %1228 = vmin.xlane.f32.xlu0 %v3947_v22 }
 0x96a   :  { %1258 = vmin.xlane.f32.xlu0 %v3957_v14 }
 0x972   :  { %1288 = vmin.xlane.f32.xlu0 %v3966_v1 }
 0x974   :  { %v3971_v25 = vpop.xlane.xlu2 %1611 }
 0x975   :  { %vm1613_vm3 = vcmp.eq.f32.partialorder %v3877_v19, %v3971_v25  ;;  %v4769_v19 = vld [vmem:[#allocation66_spill] sm:$0xff] }
 0x976   :  { %v1614_v12 = vsel %vm1613_vm3, %v1609_v45, inf  ;;  %vm1196_vm15 = vcmp.eq.f32.partialorder %v4770_v41, %v4769_v19  ;;  %v1559_v45 = vshll.u32 %v1558_v4, 16 }
 0x977   :  { %1615 = vmin.xlane.f32.xlu1 %v1614_v12  ;;  %v1204_v15 = vsel %vm1196_vm15, %v2909_v55, 5  ;;  %v1574_v12 = vshll.u32 %v1573_v28, 16 }
 0x978   :  { %v3995_v29 = vsel %vm236_vm7, %v1204_v15, 2147483647 }
 0x979   :  { %v1270_v0 = vshra.s32 %v3995_v29, 16 }
 0x97b   :  { %v4002_v20 = vcvt.s32.f32 %v1270_v0 }
 0x97f   :  { %1213 = vmin.xlane.f32.xlu1 %v3982_v58 }
 0x987   :  { %1243 = vmin.xlane.f32.xlu1 %v3992_v62 }
 0x98f   :  { %1273 = vmin.xlane.f32.xlu1 %v4002_v20 }
 0x997   :  { %1318 = vmin.xlane.f32.xlu1 %v4009_v47 }
 0x9ad   :  { %v2406_v48 = vpop.xlane.xlu1 %2405  ;;  %v2404_v26 = vpop.xlane.xlu0 %2403 }
 0x9ae   :  { %v2408_v39 = vcvt.f32.s32 %v2406_v48  ;;  %v2407_v21 = vcvt.f32.s32 %v2404_v26 }
 0x9b0   :  { %v2409_v51 = vshll.u32 %v2408_v39, 16 }
 0x9b2   :  { %v2410_v9 = vadd.s32 %v2409_v51, %v2407_v21  ;;  %v1226_v51 = vcvt.s32.f32 %v1224_v38  ;;  %v4773_v21 = vld [vmem:[#allocation68_spill] sm:$0xff] }
 0x9b3   :  { %vm1198_vm3 = vcmp.eq.f32.partialorder %v4774_v18, %v4773_v21 }
 0x9b4   :  { %v4016_v31 = vsel %vm2411_vm1, %v2410_v9, %v3863_v36  ;;  %v1206_v9 = vsel %vm1198_vm3, %v2909_v55, 5 }
 0x9b5   :  { %2413 = vst.msk [vmem:[#allocation5] sm:$0xff] %vm2327_vm6, %v4016_v31  ;;  %v1526_v2 = vpop.xlane.xlu1 %1525  ;;  %v1541_v11 = vpop.xlane.xlu0 %1540 }
 0x9b6   :  { %v1527_v37 = vcvt.f32.s32 %v1526_v2  ;;  %v1542_v6 = vcvt.f32.s32 %v1541_v11  ;;  %v4044_v2 = vsel %vm236_vm7, %v1206_v9, 2147483647 }
 0x9b7   :  { %v1300_v11 = vshra.s32 %v4044_v2, 16 }
 0x9b8   :  { %v1530_v50 = vadd.s32 %v1529_v35, %v1527_v37  ;;  %v1545_v63 = vadd.s32 %v1544_v44, %v1542_v6  ;;  %v1633_v37 = vcvt.f32.s32 %v3934_v56  ;;  %v1618_v6 = vcvt.f32.s32 %v3971_v25 }
 0x9b9   :  { %v4048_v44 = vcvt.s32.f32 %v1300_v11 }
 0x9ba   :  { %v1668_v61 = vperm.slane %v1530_v50, %v2909_v55  ;;  %v1669_v36 = vperm.slane %v1545_v63, %v2909_v55  ;;  %v1634_v4 = vshll.u32 %v1633_v37, 16 }
 0x9bc   :  { %v1676_v53 = vsel %vm419_vm8, %v1669_v36, %v1668_v61  ;;  %v4025_v30 = vld [vmem:[#allocation5] sm:$0xff]  ;;  %v1619_v61 = vshll.u32 %v1618_v6, 16 }
 0x9bd   :  { %v1556_v54 = vpop.xlane.xlu1 %1555  ;;  %2424 = vperm.xlu2 %2624, %v4025_v30   ;;  %v1571_v52 = vpop.xlane.xlu0 %1570 }
 0x9be   :  { %v1557_v42 = vcvt.f32.s32 %v1556_v54  ;;  %v1572_v23 = vcvt.f32.s32 %v1571_v52 }
 0x9c0   :  { %v1560_v49 = vadd.s32 %v1559_v45, %v1557_v42  ;;  %v1575_v3 = vadd.s32 %v1574_v12, %v1572_v23 }
 0x9c2   :  { %v1670_v46 = vperm.slane %v1560_v49, %v2909_v55  ;;  %v1671_v19 = vperm.slane %v1575_v3, %v2909_v55  ;;  %v4775_v3 = vld [vmem:[#allocation49_spill] sm:$0xff] }
 0x9c3   :  { %vm885_vm4 = vcmp.eq.f32.partialorder %v4776_v59, %v4775_v3  ;;  %v4782_v3 = vld [vmem:[#allocation39_spill] sm:$0xff] }
 0x9c4   :  { %v1677_v41 = vsel %vm421_vm9, %v1670_v46, %v1676_v53  ;;  %v1314_v46 = vand.u32 65535, %v4005_v5 }
 0x9c5   :  { %v1678_v43 = vsel %vm423_vm10, %v1671_v19, %v1677_v41  ;;  %v1586_v15 = vpop.xlane.xlu1 %1585  ;;  %v1601_v40 = vpop.xlane.xlu0 %1600  ;;  %v893_v19 = vsel %vm885_vm4, %v2909_v55, 5 }
 0x9c6   :  { %v1587_v0 = vcvt.f32.s32 %v1586_v15  ;;  %v1602_v35 = vcvt.f32.s32 %v1601_v40  ;;  %v4075_v40 = vsel %vm236_vm7, %v893_v19, 2147483647 }
 0x9c8   :  { %v1590_v32 = vadd.s32 %v1589_v16, %v1587_v0  ;;  %v4777_v16 = vld [vmem:[#allocation50_spill] sm:$0xff] }
 0x9c9   :  { %v4778_v0 = vld [vmem:[#allocation42_spill] sm:$0xff] }
 0x9ca   :  { %v1672_v13 = vperm.slane %v1590_v32, %v2909_v55  ;;  %vm887_vm0 = vcmp.eq.f32.partialorder %v4778_v0, %v4777_v16  ;;  %v917_v32 = vshra.s32 %v4075_v40, 16 }
 0x9cb   :  { %v895_v5 = vsel %vm887_vm0, %v2909_v55, 5 }
 0x9cc   :  { %v1679_v48 = vsel %vm425_vm11, %v1672_v13, %v1678_v43  ;;  %v1316_v43 = vcvt.s32.f32 %v1314_v46  ;;  %v4081_v13 = vcvt.s32.f32 %v917_v32  ;;  %v4786_v32 = vld [vmem:[#allocation44_spill] sm:$0xff] }
 0x9cd   :  { %v1631_v26 = vpop.xlane.xlu0 %1630 }
 0x9ce   :  { %v1632_v63 = vcvt.f32.s32 %v1631_v26  ;;  %v4780_v26 = vld [vmem:[#allocation43_spill] sm:$0xff] }
 0x9d0   :  { %v1635_v54 = vadd.s32 %v1634_v4, %v1632_v63  ;;  %v1209_v4 = vand.u32 65535, %v3976_v24  ;;  %v1284_v24 = vand.u32 65535, %v3960_v8  ;;  %v4781_v8 = vld [vmem:[#allocation47_spill] sm:$0xff] }
 0x9d2   :  { %v1675_v56 = vperm.slane %v1635_v54, %v2909_v55 }
 0x9d5   :  { %v4036_v39 = vpop.xlane.xlu0 %1228 }
 0x9d6   :  { %vm1230_vm2 = vcmp.eq.f32.partialorder %v3947_v22, %v4036_v39  ;;  %v1604_v22 = vshll.u32 %v1603_v33, 16 }
 0x9d7   :  { %v1231_v34 = vsel %vm1230_vm2, %v1226_v51, inf }
 0x9d8   :  { %1232 = vmin.xlane.f32.xlu1 %v1231_v34  ;;  %v1605_v50 = vadd.s32 %v1604_v22, %v1602_v35 }
 0x9da   :  { %v1673_v53 = vperm.slane %v1605_v50, %v2909_v55 }
 0x9dc   :  { %v1680_v45 = vsel %vm427_vm12, %v1673_v53, %v1679_v48  ;;  %v4084_v48 = vsel %vm236_vm7, %v895_v5, 2147483647 }
 0x9dd   :  { %v947_v51 = vshra.s32 %v4084_v48, 16  ;;  %v4099_v50 = vpop.xlane.xlu0 %1258 }
 0x9de   :  { %vm1260_vm3 = vcmp.eq.f32.partialorder %v3957_v14, %v4099_v50 }
 0x9df   :  { %v4093_v35 = vcvt.s32.f32 %v947_v51  ;;  %v4787_v51 = vld [vmem:[#allocation54_spill] sm:$0xff] }
 0x9e6   :  { %1303 = vmin.xlane.f32.xlu2 %v4048_v44 }
 0x9ea   :  { %v1616_v28 = vpop.xlane.xlu1 %1615 }
 0x9eb   :  { %v1617_v36 = vcvt.f32.s32 %v1616_v28  ;;  %v1254_v28 = vand.u32 65535, %v3950_v17  ;;  %v1239_v17 = vand.u32 65535, %v3985_v7 }
 0x9ed   :  { %v1620_v27 = vadd.s32 %v1619_v61, %v1617_v36  ;;  %v1211_v36 = vcvt.s32.f32 %v1209_v4  ;;  %v1256_v53 = vcvt.s32.f32 %v1254_v28  ;;  %v1241_v14 = vcvt.s32.f32 %v1239_v17 }
 0x9ef   :  { %v1674_v52 = vperm.slane %v1620_v27, %v2909_v55  ;;  %v1261_v27 = vsel %vm1260_vm3, %v1256_v53, inf }
 0x9f1   :  { %v1681_v12 = vsel %vm429_vm13, %v1674_v52, %v1680_v45  ;;  %v4111_v52 = vpop.xlane.xlu0 %1288 }
 0x9f2   :  { %v1682_v25 = vsel %vm431_vm14, %v1675_v56, %v1681_v12  ;;  %v4059_v42 = vpop.xlane.xlu1 %1213  ;;  %v1269_v12 = vand.u32 65535, %v3995_v29 }
 0x9f3   :  { %1684 = vst.msk [vmem:[#allocation4 + $0x28] sm:$0xff] %vm117_vm5, %v1682_v25  ;;  %vm1215_vm4 = vcmp.eq.f32.partialorder %v3982_v58, %v4059_v42  ;;  %v1286_v58 = vcvt.s32.f32 %v1284_v24 }
 0x9f4   :  { %v1216_v54 = vsel %vm1215_vm4, %v1211_v36, inf  ;;  %v1271_v7 = vcvt.s32.f32 %v1269_v12  ;;  %v1235_v36 = vcvt.f32.s32 %v4036_v39 }
 0x9fa   :  { %v4062_v23 = vpop.xlane.xlu1 %1243  ;;  %v2422_v21 = vld [vmem:[#allocation4 + $0x28] sm:$0xff] }
 0x9fb   :  { %vm1245_vm0 = vcmp.eq.f32.partialorder %v3992_v62, %v4062_v23 }
 0x9fc   :  { %v1246_v45 = vsel %vm1245_vm0, %v1241_v14, inf  ;;  %v1236_v14 = vshll.u32 %v1235_v36, 16 }
 0xa02   :  { %v4064_v49 = vpop.xlane.xlu1 %1273 }
 0xa0a   :  { %v4070_v41 = vpop.xlane.xlu1 %1318 }
 0xa0b   :  { %vm1320_vm15 = vcmp.eq.f32.partialorder %v4009_v47, %v4070_v41  ;;  %v4779_v47 = vld [vmem:[#allocation52_spill] sm:$0xff] }
 0xa0c   :  { %v1321_v15 = vsel %vm1320_vm15, %v1316_v43, inf  ;;  %vm889_vm1 = vcmp.eq.f32.partialorder %v4780_v26, %v4779_v47  ;;  %vm1290_vm15 = vcmp.eq.f32.partialorder %v3966_v1, %v4111_v52  ;;  %v1299_v1 = vand.u32 65535, %v4044_v2  ;;  %v4784_v43 = vld [vmem:[#allocation40_spill] sm:$0xff] }
 0xa0d   :  { %1322 = vmin.xlane.f32.xlu2 %v1321_v15  ;;  %v897_v18 = vsel %vm889_vm1, %v2909_v55, 5  ;;  %v1291_v56 = vsel %vm1290_vm15, %v1286_v58, inf  ;;  %vm1275_vm1 = vcmp.eq.f32.partialorder %v4002_v20, %v4064_v49  ;;  %v4783_v20 = vld [vmem:[#allocation48_spill] sm:$0xff] }
 0xa0e   :  { %v4096_v37 = vsel %vm236_vm7, %v897_v18, 2147483647  ;;  %v1276_v25 = vsel %vm1275_vm1, %v1271_v7, inf  ;;  %v1301_v46 = vcvt.s32.f32 %v1299_v1  ;;  %vm886_vm4 = vcmp.eq.f32.partialorder %v4784_v43, %v4783_v20 }
 0xa0f   :  { %v977_v63 = vshra.s32 %v4096_v37, 16  ;;  %v894_v2 = vsel %vm886_vm4, %v2909_v55, 5  ;;  %vm2441_vm1 = vcmp.gt.s32.totalorder %v3725_v57, 4  ;;  %v1250_v57 = vcvt.f32.s32 %v4062_v23 }
 0xa10   :  { %v4140_v0 = vsel %vm236_vm7, %v894_v2, 2147483647 }
 0xa11   :  { %v4108_v61 = vcvt.s32.f32 %v977_v63  ;;  %v932_v5 = vshra.s32 %v4140_v0, 16  ;;  %v1251_v20 = vshll.u32 %v1250_v57, 16 }
 0xa13   :  { %v4147_v26 = vcvt.s32.f32 %v932_v5 }
 0xa15   :  { %920 = vmin.xlane.f32.xlu2 %v4081_v13 }
 0xa17   :  { %v2425_v38 = vpop.permute.xlu2 %2424 }
 0xa18   :  { %vm2426_vm2 = vcmp.eq.s32.totalorder %v2909_v55, %v2425_v38 }
 0xa19   :  { %v2427_v34 = vsel %vm2426_vm2, %v2422_v21, 0  ;;  %vm884_vm2 = vcmp.eq.f32.partialorder %v4782_v3, %v4781_v8  ;;  %v4788_v21 = vld [vmem:[#allocation46_spill] sm:$0xff]  ;;  %v1265_v8 = vcvt.f32.s32 %v4099_v50  ;;  %v1280_v50 = vcvt.f32.s32 %v4064_v49 }
 0xa1a   :  { %v2428_v9 = vsel %vm117_vm5, %v2427_v34, 0  ;;  %v892_v62 = vsel %vm884_vm2, %v2909_v55, 5  ;;  %vm891_vm0 = vcmp.eq.f32.partialorder %v4788_v21, %v4787_v51 }
 0xa1b   :  { %v2429_v11 = vand.u32 65535, %v2428_v9  ;;  %v2430_v33 = vshrl.u32 %v2428_v9, 16  ;;  %v4131_v19 = vsel %vm236_vm7, %v892_v62, 2147483647  ;;  %v899_v34 = vsel %vm891_vm0, %v2909_v55, 5 }
 0xa1c   :  { %v902_v15 = vshra.s32 %v4131_v19, 16  ;;  %v1281_v51 = vshll.u32 %v1280_v50, 16 }
 0xa1d   :  { %950 = vmin.xlane.f32.xlu2 %v4093_v35  ;;  %v2432_v22 = vcvt.s32.f32 %v2430_v33  ;;  %v2431_v6 = vcvt.s32.f32 %v2429_v11  ;;  %v4160_v11 = vsel %vm236_vm7, %v899_v34, 2147483647 }
 0xa1e   :  { %v4137_v16 = vcvt.s32.f32 %v902_v15  ;;  %v1007_v33 = vshra.s32 %v4160_v11, 16 }
 0xa1f   :  { %2435 = vadd.xlane.f32.xlu0 %v2432_v22  ;;  %2433 = vadd.xlane.f32.xlu1 %v2431_v6 }
 0xa20   :  { %v4164_v22 = vcvt.s32.f32 %v1007_v33 }
 0xa25   :  { %980 = vmin.xlane.f32.xlu2 %v4108_v61 }
 0xa27   :  { %1217 = vmin.xlane.f32.xlu0 %v1216_v54  ;;  %1262 = vmin.xlane.f32.xlu1 %v1261_v27  ;;  %v1220_v27 = vcvt.f32.s32 %v4059_v42 }
 0xa2f   :  { %1247 = vmin.xlane.f32.xlu0 %v1246_v45  ;;  %1292 = vmin.xlane.f32.xlu1 %v1291_v56  ;;  %v1221_v56 = vshll.u32 %v1220_v27, 16 }
 0xa37   :  { %1277 = vmin.xlane.f32.xlu0 %v1276_v25 }
 0xa4b   :  { %v1233_v6 = vpop.xlane.xlu1 %1232 }
 0xa4c   :  { %v1234_v17 = vcvt.f32.s32 %v1233_v6  ;;  %v4789_v6 = vld [vmem:[#allocation53_spill] sm:$0xff] }
 0xa4e   :  { %v1237_v12 = vadd.s32 %v1236_v14, %v1234_v17  ;;  %v1325_v17 = vcvt.f32.s32 %v4070_v41 }
 0xa50   :  { %v1361_v42 = vperm.slane %v1237_v12, %v2909_v55  ;;  %v1326_v12 = vshll.u32 %v1325_v17, 16  ;;  %v4791_v17 = vld [vmem:[#allocation32_spill] sm:$0xff] }
 0xa59   :  { %v4126_v59 = vpop.xlane.xlu2 %1303 }
 0xa5a   :  { %vm1305_vm3 = vcmp.eq.f32.partialorder %v4048_v44, %v4126_v59  ;;  %v4785_v44 = vld [vmem:[#allocation51_spill] sm:$0xff]  ;;  %v1310_v14 = vcvt.f32.s32 %v4126_v59 }
 0xa5b   :  { %v1306_v29 = vsel %vm1305_vm3, %v1301_v46, inf  ;;  %vm888_vm15 = vcmp.eq.f32.partialorder %v4786_v32, %v4785_v44  ;;  %v1266_v46 = vshll.u32 %v1265_v8, 16 }
 0xa5c   :  { %1307 = vmin.xlane.f32.xlu0 %v1306_v29  ;;  %v896_v47 = vsel %vm888_vm15, %v2909_v55, 5 }
 0xa5d   :  { %v4150_v38 = vsel %vm236_vm7, %v896_v47, 2147483647 }
 0xa5e   :  { %v962_v18 = vshra.s32 %v4150_v38, 16 }
 0xa60   :  { %v4157_v9 = vcvt.s32.f32 %v962_v18 }
 0xa64   :  { %905 = vmin.xlane.f32.xlu0 %v4137_v16 }
 0xa6c   :  { %935 = vmin.xlane.f32.xlu0 %v4147_v26 }
 0xa74   :  { %965 = vmin.xlane.f32.xlu0 %v4157_v9 }
 0xa7c   :  { %1010 = vmin.xlane.f32.xlu0 %v4164_v22 }
 0xa92   :  { %v2434_v63 = vpop.xlane.xlu1 %2433  ;;  %v2436_v4 = vpop.xlane.xlu0 %2435 }
 0xa93   :  { %v2438_v28 = vcvt.f32.s32 %v2436_v4  ;;  %v2437_v53 = vcvt.f32.s32 %v2434_v63  ;;  %v4790_v63 = vld [vmem:[#allocation45_spill] sm:$0xff] }
 0xa94   :  { %vm890_vm2 = vcmp.eq.f32.partialorder %v4790_v63, %v4789_v6 }
 0xa95   :  { %v2439_v54 = vshll.u32 %v2438_v28, 16  ;;  %v898_v49 = vsel %vm890_vm2, %v2909_v55, 5 }
 0xa96   :  { %v4194_v4 = vsel %vm236_vm7, %v898_v49, 2147483647 }
 0xa97   :  { %v2440_v24 = vadd.s32 %v2439_v54, %v2437_v53  ;;  %v992_v28 = vshra.s32 %v4194_v4, 16  ;;  %v1295_v53 = vcvt.f32.s32 %v4111_v52  ;;  %v1323_v54 = vpop.xlane.xlu2 %1322 }
 0xa99   :  { %v4171_v58 = vsel %vm2441_vm1, %v2440_v24, %v4025_v30  ;;  %v4198_v27 = vcvt.s32.f32 %v992_v28 }
 0xa9a   :  { %2443 = vst.msk [vmem:[#allocation5] sm:$0xff] %vm2327_vm6, %v4171_v58  ;;  %v1218_v45 = vpop.xlane.xlu0 %1217  ;;  %v1263_v39 = vpop.xlane.xlu1 %1262 }
 0xa9b   :  { %v1219_v7 = vcvt.f32.s32 %v1218_v45  ;;  %v1264_v1 = vcvt.f32.s32 %v1263_v39  ;;  %v1296_v45 = vshll.u32 %v1295_v53, 16 }
 0xa9d   :  { %v1222_v25 = vadd.s32 %v1221_v56, %v1219_v7  ;;  %v1267_v15 = vadd.s32 %v1266_v46, %v1264_v1  ;;  %v1324_v56 = vcvt.f32.s32 %v1323_v54 }
 0xa9f   :  { %v1360_v3 = vperm.slane %v1222_v25, %v2909_v55  ;;  %v1363_v44 = vperm.slane %v1267_v15, %v2909_v55  ;;  %v1311_v25 = vshll.u32 %v1310_v14, 16  ;;  %v1327_v57 = vadd.s32 %v1326_v12, %v1324_v56 }
 0xaa0   :  { %v991_v12 = vand.u32 65535, %v4194_v4 }
 0xaa1   :  { %v1368_v30 = vsel %vm419_vm8, %v1361_v42, %v1360_v3  ;;  %v4180_v62 = vld [vmem:[#allocation5] sm:$0xff]  ;;  %v1367_v41 = vperm.slane %v1327_v57, %v2909_v55 }
 0xaa2   :  { %2454 = vperm.xlu1 %2625, %v4180_v62   ;;  %v1248_v29 = vpop.xlane.xlu0 %1247  ;;  %v1293_v36 = vpop.xlane.xlu1 %1292 }
 0xaa3   :  { %v1249_v43 = vcvt.f32.s32 %v1248_v29  ;;  %v1294_v24 = vcvt.f32.s32 %v1293_v36 }
 0xaa5   :  { %v1252_v2 = vadd.s32 %v1251_v20, %v1249_v43  ;;  %v1297_v7 = vadd.s32 %v1296_v45, %v1294_v24  ;;  %v4792_v24 = vld [vmem:[#allocation25_spill] sm:$0xff]  ;;  %v4794_v45 = vld [vmem:[#allocation23_spill] sm:$0xff] }
 0xaa7   :  { %v1362_v23 = vperm.slane %v1252_v2, %v2909_v55  ;;  %v1365_v52 = vperm.slane %v1297_v7, %v2909_v55 }
 0xaa9   :  { %v1369_v32 = vsel %vm421_vm9, %v1362_v23, %v1368_v30  ;;  %v4214_v23 = vpop.xlane.xlu2 %920 }
 0xaaa   :  { %v1370_v5 = vsel %vm423_vm10, %v1363_v44, %v1369_v32  ;;  %v1278_v47 = vpop.xlane.xlu0 %1277  ;;  %vm922_vm4 = vcmp.eq.f32.partialorder %v4081_v13, %v4214_v23 }
 0xaab   :  { %v1279_v21 = vcvt.f32.s32 %v1278_v47  ;;  %v901_v47 = vand.u32 65535, %v4131_v19  ;;  %v931_v19 = vand.u32 65535, %v4140_v0  ;;  %v961_v0 = vand.u32 65535, %v4150_v38 }
 0xaad   :  { %v1282_v18 = vadd.s32 %v1281_v51, %v1279_v21 }
 0xaaf   :  { %v1364_v34 = vperm.slane %v1282_v18, %v2909_v55  ;;  %v903_v18 = vcvt.s32.f32 %v901_v47 }
 0xab1   :  { %v1371_v33 = vsel %vm425_vm11, %v1364_v34, %v1370_v5  ;;  %v916_v5 = vand.u32 65535, %v4075_v40  ;;  %v4224_v34 = vpop.xlane.xlu2 %950  ;;  %v946_v40 = vand.u32 65535, %v4084_v48  ;;  %v976_v48 = vand.u32 65535, %v4096_v37 }
 0xab2   :  { %v1372_v1 = vsel %vm427_vm12, %v1365_v52, %v1371_v33  ;;  %vm952_vm0 = vcmp.eq.f32.partialorder %v4093_v35, %v4224_v34  ;;  %v1006_v37 = vand.u32 65535, %v4160_v11 }
 0xab3   :  { %v918_v21 = vcvt.s32.f32 %v916_v5  ;;  %v948_v13 = vcvt.s32.f32 %v946_v40  ;;  %v978_v35 = vcvt.s32.f32 %v976_v48  ;;  %v4802_v5 = vld [vmem:[#allocation28_spill] sm:$0xff] }
 0xab5   :  { %v923_v33 = vsel %vm922_vm4, %v918_v21, inf  ;;  %v953_v49 = vsel %vm952_vm0, %v948_v13, inf  ;;  %vm577_vm4 = vcmp.eq.f32.partialorder %v4792_v24, %v4791_v17  ;;  %v4803_v13 = vld [vmem:[#allocation38_spill] sm:$0xff] }
 0xab6   :  { %v585_v38 = vsel %vm577_vm4, %v2909_v55, 5 }
 0xab7   :  { %v4254_v7 = vsel %vm236_vm7, %v585_v38, 2147483647  ;;  %v4325_v38 = vld [vmem:[%s4623_s6] sm:$0xff] }
 0xab9   :  { %v4234_v36 = vpop.xlane.xlu2 %980 }
 0xaba   :  { %vm982_vm2 = vcmp.eq.f32.partialorder %v4108_v61, %v4234_v36  ;;  %v1008_v61 = vcvt.s32.f32 %v1006_v37 }
 0xabb   :  { %v983_v53 = vsel %vm982_vm2, %v978_v35, inf }
 0xacc   :  { %995 = vmin.xlane.f32.xlu1 %v4198_v27 }
 0xacf   :  { %v1308_v39 = vpop.xlane.xlu0 %1307 }
 0xad0   :  { %v1309_v8 = vcvt.f32.s32 %v1308_v39  ;;  %v4795_v39 = vld [vmem:[#allocation34_spill] sm:$0xff] }
 0xad2   :  { %v1312_v42 = vadd.s32 %v1311_v25, %v1309_v8  ;;  %v4796_v25 = vld [vmem:[#allocation26_spill] sm:$0xff]  ;;  %v609_v8 = vshra.s32 %v4254_v7, 16 }
 0xad4   :  { %v1366_v3 = vperm.slane %v1312_v42, %v2909_v55 }
 0xad6   :  { %v1373_v59 = vsel %vm429_vm13, %v1366_v3, %v1372_v1  ;;  %v4268_v3 = vcvt.s32.f32 %v609_v8  ;;  %v4798_v1 = vld [vmem:[#allocation24_spill] sm:$0xff] }
 0xad7   :  { %v1374_v30 = vsel %vm431_vm14, %v1367_v41, %v1373_v59  ;;  %v4211_v43 = vpop.xlane.xlu0 %905  ;;  %v4797_v41 = vld [vmem:[#allocation33_spill] sm:$0xff] }
 0xad8   :  { %1376 = vst.msk [vmem:[#allocation4 + $0x20] sm:$0xff] %vm117_vm5, %v1374_v30  ;;  %vm907_vm15 = vcmp.eq.f32.partialorder %v4137_v16, %v4211_v43  ;;  %v933_v16 = vcvt.s32.f32 %v931_v19 }
 0xad9   :  { %v908_v6 = vsel %vm907_vm15, %v903_v18, inf }
 0xadf   :  { %v2452_v29 = vld [vmem:[#allocation4 + $0x20] sm:$0xff]  ;;  %v4222_v51 = vpop.xlane.xlu0 %935 }
 0xae0   :  { %vm937_vm1 = vcmp.eq.f32.partialorder %v4147_v26, %v4222_v51  ;;  %v963_v26 = vcvt.s32.f32 %v961_v0 }
 0xae1   :  { %v938_v28 = vsel %vm937_vm1, %v933_v16, inf  ;;  %vm579_vm1 = vcmp.eq.f32.partialorder %v4796_v25, %v4795_v39  ;;  %v4804_v16 = vld [vmem:[#allocation30_spill] sm:$0xff] }
 0xae2   :  { %v587_v42 = vsel %vm579_vm1, %v2909_v55, 5  ;;  %vm2471_vm1 = vcmp.gt.s32.totalorder %v4325_v38, 3 }
 0xae3   :  { %v4273_v59 = vsel %vm236_vm7, %v587_v42, 2147483647 }
 0xae7   :  { %v4232_v63 = vpop.xlane.xlu0 %965 }
 0xaef   :  { %v4244_v14 = vpop.xlane.xlu0 %1010 }
 0xaf0   :  { %vm1012_vm15 = vcmp.eq.f32.partialorder %v4164_v22, %v4244_v14  ;;  %v993_v22 = vcvt.s32.f32 %v991_v12 }
 0xaf1   :  { %v1013_v56 = vsel %vm1012_vm15, %v1008_v61, inf  ;;  %v927_v61 = vcvt.f32.s32 %v4214_v23  ;;  %v942_v23 = vcvt.f32.s32 %v4222_v51  ;;  %v972_v51 = vcvt.f32.s32 %v4232_v63 }
 0xaf3   :  { %v928_v25 = vshll.u32 %v927_v61, 16 }
 0xb14   :  { %v2455_v46 = vpop.permute.xlu1 %2454 }
 0xb15   :  { %vm2456_vm3 = vcmp.eq.s32.totalorder %v2909_v55, %v2455_v46  ;;  %v4799_v46 = vld [vmem:[#allocation37_spill] sm:$0xff] }
 0xb16   :  { %v2457_v20 = vsel %vm2456_vm3, %v2452_v29, 0  ;;  %vm967_vm3 = vcmp.eq.f32.partialorder %v4157_v9, %v4232_v63  ;;  %v4793_v9 = vld [vmem:[#allocation31_spill] sm:$0xff]  ;;  %v4800_v29 = vld [vmem:[#allocation29_spill] sm:$0xff] }
 0xb17   :  { %v2458_v15 = vsel %vm117_vm5, %v2457_v20, 0  ;;  %v968_v54 = vsel %vm967_vm3, %v963_v26, inf  ;;  %vm576_vm0 = vcmp.eq.f32.partialorder %v4794_v45, %v4793_v9  ;;  %vm578_vm3 = vcmp.eq.f32.partialorder %v4798_v1, %v4797_v41 }
 0xb18   :  { %v2459_v2 = vand.u32 65535, %v2458_v15  ;;  %v2460_v50 = vshrl.u32 %v2458_v15, 16  ;;  %v584_v11 = vsel %vm576_vm0, %v2909_v55, 5  ;;  %vm581_vm4 = vcmp.eq.f32.partialorder %v4800_v29, %v4799_v46 }
 0xb19   :  { %v4266_v52 = vsel %vm236_vm7, %v584_v11, 2147483647  ;;  %v639_v20 = vshra.s32 %v4273_v59, 16  ;;  %v589_v15 = vsel %vm581_vm4, %v2909_v55, 5  ;;  %vm583_vm0 = vcmp.eq.f32.partialorder %v4804_v16, %v4803_v13 }
 0xb1a   :  { %v2462_v44 = vcvt.s32.f32 %v2460_v50  ;;  %v2461_v32 = vcvt.s32.f32 %v2459_v2  ;;  %v594_v30 = vshra.s32 %v4266_v52, 16  ;;  %v4293_v47 = vsel %vm236_vm7, %v589_v15, 2147483647 }
 0xb1b   :  { %v912_v9 = vcvt.f32.s32 %v4211_v43  ;;  %v957_v41 = vcvt.f32.s32 %v4224_v34 }
 0xb1c   :  { %2465 = vadd.xlane.f32.xlu2 %v2462_v44  ;;  %2463 = vadd.xlane.f32.xlu0 %v2461_v32  ;;  %v4282_v2 = vcvt.s32.f32 %v594_v30  ;;  %v4288_v44 = vcvt.s32.f32 %v639_v20  ;;  %v4801_v32 = vld [vmem:[#allocation35_spill] sm:$0xff]  ;;  %v943_v20 = vshll.u32 %v942_v23, 16 }
 0xb1d   :  { %vm580_vm15 = vcmp.eq.f32.partialorder %v4802_v5, %v4801_v32  ;;  %v913_v11 = vshll.u32 %v912_v9, 16  ;;  %v1017_v9 = vcvt.f32.s32 %v4244_v14  ;;  %v4806_v23 = vld [vmem:[#allocation27_spill] sm:$0xff] }
 0xb1e   :  { %v588_v18 = vsel %vm580_vm15, %v2909_v55, 5 }
 0xb1f   :  { %v4302_v40 = vsel %vm236_vm7, %v588_v18, 2147483647 }
 0xb24   :  { %924 = vmin.xlane.f32.xlu0 %v923_v33  ;;  %909 = vmin.xlane.f32.xlu2 %v908_v6  ;;  %v669_v33 = vshra.s32 %v4293_v47, 16 }
 0xb26   :  { %v4305_v19 = vcvt.s32.f32 %v669_v33 }
 0xb2c   :  { %954 = vmin.xlane.f32.xlu0 %v953_v49  ;;  %939 = vmin.xlane.f32.xlu2 %v938_v28  ;;  %v654_v49 = vshra.s32 %v4302_v40, 16  ;;  %v591_v28 = vsel %vm583_vm0, %v2909_v55, 5 }
 0xb2d   :  { %v4315_v0 = vsel %vm236_vm7, %v591_v28, 2147483647  ;;  %v973_v28 = vshll.u32 %v972_v51, 16 }
 0xb2e   :  { %v4312_v48 = vcvt.s32.f32 %v654_v49  ;;  %v699_v35 = vshra.s32 %v4315_v0, 16 }
 0xb30   :  { %v4319_v26 = vcvt.s32.f32 %v699_v35 }
 0xb34   :  { %984 = vmin.xlane.f32.xlu0 %v983_v53  ;;  %969 = vmin.xlane.f32.xlu2 %v968_v54 }
 0xb3c   :  { %1014 = vmin.xlane.f32.xlu0 %v1013_v56 }
 0xb3f   :  { %v4260_v57 = vpop.xlane.xlu1 %995 }
 0xb40   :  { %vm997_vm2 = vcmp.eq.f32.partialorder %v4198_v27, %v4260_v57  ;;  %v586_v27 = vsel %vm578_vm3, %v2909_v55, 5 }
 0xb41   :  { %v998_v4 = vsel %vm997_vm2, %v993_v22, inf  ;;  %v4285_v50 = vsel %vm236_vm7, %v586_v27, 2147483647  ;;  %v958_v27 = vshll.u32 %v957_v41, 16 }
 0xb42   :  { %999 = vmin.xlane.f32.xlu2 %v998_v4  ;;  %v624_v21 = vshra.s32 %v4285_v50, 16 }
 0xb44   :  { %612 = vmin.xlane.f32.xlu0 %v4268_v3  ;;  %v4299_v6 = vcvt.s32.f32 %v624_v21 }
 0xb4a   :  { %597 = vmin.xlane.f32.xlu2 %v4282_v2 }
 0xb4c   :  { %642 = vmin.xlane.f32.xlu0 %v4288_v44 }
 0xb52   :  { %627 = vmin.xlane.f32.xlu2 %v4299_v6 }
 0xb54   :  { %672 = vmin.xlane.f32.xlu0 %v4305_v19 }
 0xb5a   :  { %657 = vmin.xlane.f32.xlu2 %v4312_v48 }
 0xb62   :  { %702 = vmin.xlane.f32.xlu2 %v4319_v26 }
 0xb8f   :  { %v2466_v53 = vpop.xlane.xlu2 %2465  ;;  %v2464_v54 = vpop.xlane.xlu0 %2463 }
 0xb90   :  { %v2468_v17 = vcvt.f32.s32 %v2466_v53  ;;  %v2467_v37 = vcvt.f32.s32 %v2464_v54 }
 0xb92   :  { %v2469_v24 = vshll.u32 %v2468_v17, 16  ;;  %v987_v17 = vcvt.f32.s32 %v4234_v36  ;;  %v4805_v36 = vld [vmem:[#allocation36_spill] sm:$0xff] }
 0xb93   :  { %vm582_vm2 = vcmp.eq.f32.partialorder %v4806_v23, %v4805_v36  ;;  %v4811_v36 = vld [vmem:[#allocation17_spill] sm:$0xff]  ;;  %v4812_v23 = vld [vmem:[#allocation12_spill] sm:$0xff] }
 0xb94   :  { %v2470_v45 = vadd.s32 %v2469_v24, %v2467_v37  ;;  %v988_v61 = vshll.u32 %v987_v17, 16 }
 0xb96   :  { %v4331_v56 = vsel %vm2471_vm1, %v2470_v45, %v4180_v62  ;;  %v1002_v45 = vcvt.f32.s32 %v4260_v57 }
 0xb97   :  { %2473 = vst.msk [vmem:[#allocation5] sm:$0xff] %vm2327_vm6, %v4331_v56  ;;  %v910_v12 = vpop.xlane.xlu2 %909  ;;  %v925_v39 = vpop.xlane.xlu0 %924 }
 0xb98   :  { %v911_v8 = vcvt.f32.s32 %v910_v12  ;;  %v926_v22 = vcvt.f32.s32 %v925_v39 }
 0xb9a   :  { %v914_v42 = vadd.s32 %v913_v11, %v911_v8  ;;  %v929_v4 = vadd.s32 %v928_v25, %v926_v22  ;;  %v1018_v25 = vshll.u32 %v1017_v9, 16  ;;  %v1003_v8 = vshll.u32 %v1002_v45, 16 }
 0xb9c   :  { %v1052_v43 = vperm.slane %v914_v42, %v2909_v55  ;;  %v1053_v62 = vperm.slane %v929_v4, %v2909_v55 }
 0xb9e   :  { %v1060_v1 = vsel %vm419_vm8, %v1053_v62, %v1052_v43  ;;  %v4340_v30 = vld [vmem:[#allocation5] sm:$0xff] }
 0xb9f   :  { %v940_v46 = vpop.xlane.xlu2 %939  ;;  %v955_v29 = vpop.xlane.xlu0 %954  ;;  %2484 = vperm.xlu1 %2625, %v4340_v30  }
 0xba0   :  { %v941_v15 = vcvt.f32.s32 %v940_v46  ;;  %v956_v32 = vcvt.f32.s32 %v955_v29 }
 0xba2   :  { %v944_v5 = vadd.s32 %v943_v20, %v941_v15  ;;  %v959_v34 = vadd.s32 %v958_v27, %v956_v32 }
 0xba4   :  { %v1054_v21 = vperm.slane %v944_v5, %v2909_v55  ;;  %v1055_v18 = vperm.slane %v959_v34, %v2909_v55 }
 0xba6   :  { %v1061_v33 = vsel %vm421_vm9, %v1054_v21, %v1060_v1  ;;  %v590_v1 = vsel %vm582_vm2, %v2909_v55, 5 }
 0xba7   :  { %v1062_v13 = vsel %vm423_vm10, %v1055_v18, %v1061_v33  ;;  %v970_v16 = vpop.xlane.xlu2 %969  ;;  %v985_v49 = vpop.xlane.xlu0 %984  ;;  %v4364_v29 = vsel %vm236_vm7, %v590_v1, 2147483647 }
 0xba8   :  { %v971_v35 = vcvt.f32.s32 %v970_v16  ;;  %v986_v63 = vcvt.f32.s32 %v985_v49  ;;  %v684_v27 = vshra.s32 %v4364_v29, 16  ;;  %v608_v49 = vand.u32 65535, %v4254_v7 }
 0xba9   :  { %v638_v7 = vand.u32 65535, %v4273_v59  ;;  %v668_v59 = vand.u32 65535, %v4293_v47  ;;  %v698_v47 = vand.u32 65535, %v4315_v0 }
 0xbaa   :  { %v974_v53 = vadd.s32 %v973_v28, %v971_v35  ;;  %v989_v12 = vadd.s32 %v988_v61, %v986_v63  ;;  %v4367_v20 = vcvt.s32.f32 %v684_v27  ;;  %v593_v28 = vand.u32 65535, %v4266_v52  ;;  %v4814_v27 = vld [vmem:[#allocation10_spill] sm:$0xff] }
 0xbab   :  { %v623_v52 = vand.u32 65535, %v4285_v50  ;;  %v653_v50 = vand.u32 65535, %v4302_v40 }
 0xbac   :  { %v1056_v54 = vperm.slane %v974_v53, %v2909_v55  ;;  %v1057_v42 = vperm.slane %v989_v12, %v2909_v55  ;;  %v610_v53 = vcvt.s32.f32 %v608_v49 }
 0xbae   :  { %v1063_v24 = vsel %vm425_vm11, %v1056_v54, %v1062_v13  ;;  %v595_v54 = vcvt.s32.f32 %v593_v28  ;;  %v4817_v28 = vld [vmem:[#allocation19_spill] sm:$0xff] }
 0xbaf   :  { %v1015_v37 = vpop.xlane.xlu0 %1014  ;;  %v1064_v62 = vsel %vm427_vm12, %v1057_v42, %v1063_v24 }
 0xbb0   :  { %v1016_v39 = vcvt.f32.s32 %v1015_v37 }
 0xbb2   :  { %v1019_v4 = vadd.s32 %v1018_v25, %v1016_v39  ;;  %v4807_v25 = vld [vmem:[#allocation16_spill] sm:$0xff] }
 0xbb4   :  { %v1059_v14 = vperm.slane %v1019_v4, %v2909_v55  ;;  %v683_v4 = vand.u32 65535, %v4364_v29  ;;  %v4813_v29 = vld [vmem:[#allocation18_spill] sm:$0xff] }
 0xbb5   :  { %v1000_v11 = vpop.xlane.xlu2 %999 }
 0xbb6   :  { %v1001_v22 = vcvt.f32.s32 %v1000_v11  ;;  %v4808_v11 = vld [vmem:[#allocation8_spill] sm:$0xff] }
 0xbb7   :  { %v4374_v33 = vpop.xlane.xlu0 %612 }
 0xbb8   :  { %v1004_v41 = vadd.s32 %v1003_v8, %v1001_v22  ;;  %vm614_vm4 = vcmp.eq.f32.partialorder %v4268_v3, %v4374_v33  ;;  %v640_v3 = vcvt.s32.f32 %v638_v7  ;;  %v4810_v22 = vld [vmem:[#allocation7_spill] sm:$0xff] }
 0xbb9   :  { %v615_v24 = vsel %vm614_vm4, %v610_v53, inf  ;;  %vm262_vm4 = vcmp.eq.f32.partialorder %v4808_v11, %v4807_v25  ;;  %v4818_v53 = vld [vmem:[#allocation13_spill] sm:$0xff] }
 0xbba   :  { %v1058_v43 = vperm.slane %v1004_v41, %v2909_v55  ;;  %v270_v40 = vsel %vm262_vm4, %v2909_v55, 5 }
 0xbbb   :  { %v4414_v41 = vsel %vm236_vm7, %v270_v40, 2147483647 }
 0xbbc   :  { %v1065_v57 = vsel %vm429_vm13, %v1058_v43, %v1064_v62  ;;  %v294_v43 = vshra.s32 %v4414_v41, 16 }
 0xbbd   :  { %v1066_v46 = vsel %vm431_vm14, %v1059_v14, %v1065_v57  ;;  %v4371_v34 = vpop.xlane.xlu2 %597 }
 0xbbe   :  { %1068 = vst.msk [vmem:[#allocation4 + $0x18] sm:$0xff] %vm117_vm5, %v1066_v46  ;;  %vm599_vm15 = vcmp.eq.f32.partialorder %v4282_v2, %v4371_v34  ;;  %v625_v2 = vcvt.s32.f32 %v623_v52  ;;  %v4428_v46 = vcvt.s32.f32 %v294_v43 }
 0xbbf   :  { %v4384_v17 = vpop.xlane.xlu0 %642  ;;  %v600_v63 = vsel %vm599_vm15, %v595_v54, inf }
 0xbc0   :  { %vm644_vm0 = vcmp.eq.f32.partialorder %v4288_v44, %v4384_v17  ;;  %v670_v44 = vcvt.s32.f32 %v668_v59 }
 0xbc1   :  { %v645_v61 = vsel %vm644_vm0, %v640_v3, inf }
 0xbc5   :  { %v2482_v32 = vld [vmem:[#allocation4 + $0x18] sm:$0xff]  ;;  %v4382_v35 = vpop.xlane.xlu2 %627 }
 0xbc6   :  { %vm629_vm1 = vcmp.eq.f32.partialorder %v4299_v6, %v4382_v35  ;;  %v655_v6 = vcvt.s32.f32 %v653_v50 }
 0xbc7   :  { %v630_v9 = vsel %vm629_vm1, %v625_v2, inf  ;;  %v4394_v45 = vpop.xlane.xlu0 %672  ;;  %vm264_vm1 = vcmp.eq.f32.partialorder %v4812_v23, %v4811_v36 }
 0xbc8   :  { %vm674_vm2 = vcmp.eq.f32.partialorder %v4305_v19, %v4394_v45  ;;  %v700_v19 = vcvt.s32.f32 %v698_v47  ;;  %v272_v14 = vsel %vm264_vm1, %v2909_v55, 5  ;;  %vm2501_vm1 = vcmp.gt.s32.totalorder %v4325_v38, 2 }
 0xbc9   :  { %687 = vmin.xlane.f32.xlu1 %v4367_v20  ;;  %v675_v12 = vsel %vm674_vm2, %v670_v44, inf }
 0xbcd   :  { %v4392_v37 = vpop.xlane.xlu2 %657 }
 0xbd5   :  { %v4404_v8 = vpop.xlane.xlu2 %702 }
 0xbd6   :  { %vm704_vm15 = vcmp.eq.f32.partialorder %v4319_v26, %v4404_v8  ;;  %v685_v26 = vcvt.s32.f32 %v683_v4 }
 0xbd7   :  { %v705_v42 = vsel %vm704_vm15, %v700_v19, inf  ;;  %vm265_vm15 = vcmp.eq.f32.partialorder %v4818_v53, %v4817_v28 }
 0xc11   :  { %v2485_v15 = vpop.permute.xlu1 %2484 }
 0xc12   :  { %vm2486_vm3 = vcmp.eq.s32.totalorder %v2909_v55, %v2485_v15  ;;  %v4433_v15 = vsel %vm236_vm7, %v272_v14, 2147483647 }
 0xc13   :  { %v2487_v5 = vsel %vm2486_vm3, %v2482_v32, 0  ;;  %vm659_vm3 = vcmp.eq.f32.partialorder %v4312_v48, %v4392_v37  ;;  %v4809_v48 = vld [vmem:[#allocation15_spill] sm:$0xff] }
 0xc14   :  { %v2488_v51 = vsel %vm117_vm5, %v2487_v5, 0  ;;  %v660_v39 = vsel %vm659_vm3, %v655_v6, inf  ;;  %vm261_vm0 = vcmp.eq.f32.partialorder %v4810_v22, %v4809_v48  ;;  %vm263_vm3 = vcmp.eq.f32.partialorder %v4814_v27, %v4813_v29  ;;  %v4815_v5 = vld [vmem:[#allocation20_spill] sm:$0xff] }
 0xc15   :  { %v2489_v21 = vand.u32 65535, %v2488_v51  ;;  %v2490_v18 = vshrl.u32 %v2488_v51, 16  ;;  %v269_v0 = vsel %vm261_vm0, %v2909_v55, 5  ;;  %v4816_v51 = vld [vmem:[#allocation9_spill] sm:$0xff]  ;;  %v619_v48 = vcvt.f32.s32 %v4374_v33 }
 0xc16   :  { %v4426_v1 = vsel %vm236_vm7, %v269_v0, 2147483647  ;;  %vm266_vm4 = vcmp.eq.f32.partialorder %v4816_v51, %v4815_v5  ;;  %v604_v22 = vcvt.f32.s32 %v4371_v34  ;;  %v649_v27 = vcvt.f32.s32 %v4384_v17 }
 0xc17   :  { %v2492_v13 = vcvt.s32.f32 %v2490_v18  ;;  %v2491_v16 = vcvt.s32.f32 %v2489_v21  ;;  %v279_v32 = vshra.s32 %v4426_v1, 16  ;;  %v324_v21 = vshra.s32 %v4433_v15, 16 }
 0xc18   :  { %v274_v18 = vsel %vm266_vm4, %v2909_v55, 5  ;;  %v620_v0 = vshll.u32 %v619_v48, 16  ;;  %v605_v43 = vshll.u32 %v604_v22, 16  ;;  %v634_v33 = vcvt.f32.s32 %v4382_v35 }
 0xc19   :  { %2495 = vadd.xlane.f32.xlu0 %v2492_v13  ;;  %2493 = vadd.xlane.f32.xlu2 %v2491_v16  ;;  %v4442_v13 = vcvt.s32.f32 %v279_v32  ;;  %v4448_v49 = vcvt.s32.f32 %v324_v21  ;;  %v4453_v54 = vsel %vm236_vm7, %v274_v18, 2147483647  ;;  %v650_v21 = vshll.u32 %v649_v27, 16 }
 0xc1a   :  { %v354_v7 = vshra.s32 %v4453_v54, 16  ;;  %v635_v18 = vshll.u32 %v634_v33, 16  ;;  %v664_v35 = vcvt.f32.s32 %v4392_v37 }
 0xc1c   :  { %v4465_v2 = vcvt.s32.f32 %v354_v7 }
 0xc21   :  { %616 = vmin.xlane.f32.xlu2 %v615_v24  ;;  %601 = vmin.xlane.f32.xlu0 %v600_v63  ;;  %v273_v63 = vsel %vm265_vm15, %v2909_v55, 5 }
 0xc22   :  { %v4462_v3 = vsel %vm236_vm7, %v273_v63, 2147483647 }
 0xc23   :  { %v339_v59 = vshra.s32 %v4462_v3, 16 }
 0xc25   :  { %v4472_v44 = vcvt.s32.f32 %v339_v59 }
 0xc29   :  { %646 = vmin.xlane.f32.xlu2 %v645_v61  ;;  %631 = vmin.xlane.f32.xlu0 %v630_v9  ;;  %v4819_v61 = vld [vmem:[#allocation22_spill] sm:$0xff] }
 0xc2a   :  { %v4820_v9 = vld [vmem:[#allocation14_spill] sm:$0xff] }
 0xc2b   :  { %vm268_vm0 = vcmp.eq.f32.partialorder %v4820_v9, %v4819_v61 }
 0xc2c   :  { %v276_v50 = vsel %vm268_vm0, %v2909_v55, 5 }
 0xc2d   :  { %v4475_v6 = vsel %vm236_vm7, %v276_v50, 2147483647 }
 0xc31   :  { %676 = vmin.xlane.f32.xlu2 %v675_v12  ;;  %661 = vmin.xlane.f32.xlu0 %v660_v39  ;;  %v384_v12 = vshra.s32 %v4475_v6, 16 }
 0xc33   :  { %v4479_v39 = vcvt.s32.f32 %v384_v12  ;;  %v665_v12 = vshll.u32 %v664_v35, 16 }
 0xc39   :  { %706 = vmin.xlane.f32.xlu2 %v705_v42 }
 0xc3c   :  { %v4420_v62 = vpop.xlane.xlu1 %687 }
 0xc3d   :  { %vm689_vm2 = vcmp.eq.f32.partialorder %v4367_v20, %v4420_v62  ;;  %v271_v20 = vsel %vm263_vm3, %v2909_v55, 5 }
 0xc3e   :  { %v690_v57 = vsel %vm689_vm2, %v685_v26, inf  ;;  %v4445_v16 = vsel %vm236_vm7, %v271_v20, 2147483647 }
 0xc3f   :  { %691 = vmin.xlane.f32.xlu0 %v690_v57  ;;  %v309_v24 = vshra.s32 %v4445_v16, 16  ;;  %v308_v35 = vand.u32 65535, %v4445_v16  ;;  %v383_v16 = vand.u32 65535, %v4475_v6 }
 0xc41   :  { %297 = vmin.xlane.f32.xlu2 %v4428_v46  ;;  %v4459_v52 = vcvt.s32.f32 %v309_v24 }
 0xc47   :  { %282 = vmin.xlane.f32.xlu0 %v4442_v13 }
 0xc49   :  { %327 = vmin.xlane.f32.xlu2 %v4448_v49 }
 0xc4f   :  { %312 = vmin.xlane.f32.xlu0 %v4459_v52 }
 0xc51   :  { %357 = vmin.xlane.f32.xlu2 %v4465_v2 }
 0xc57   :  { %342 = vmin.xlane.f32.xlu0 %v4472_v44 }
 0xc5f   :  { %387 = vmin.xlane.f32.xlu0 %v4479_v39 }
 0xc8c   :  { %v2496_v25 = vpop.xlane.xlu0 %2495  ;;  %v2494_v11 = vpop.xlane.xlu2 %2493 }
 0xc8d   :  { %v2498_v47 = vcvt.f32.s32 %v2496_v25  ;;  %v2497_v19 = vcvt.f32.s32 %v2494_v11 }
 0xc8f   :  { %v2499_v40 = vshll.u32 %v2498_v47, 16 }
 0xc91   :  { %v2500_v42 = vadd.s32 %v2499_v40, %v2497_v19  ;;  %v679_v40 = vcvt.f32.s32 %v4394_v45 }
 0xc93   :  { %v4486_v4 = vsel %vm2501_vm1, %v2500_v42, %v4340_v30  ;;  %v680_v22 = vshll.u32 %v679_v40, 16  ;;  %v709_v42 = vcvt.f32.s32 %v4404_v8 }
 0xc94   :  { %2503 = vst.msk [vmem:[#allocation5] sm:$0xff] %vm2327_vm6, %v4486_v4  ;;  %v602_v36 = vpop.xlane.xlu0 %601  ;;  %v617_v23 = vpop.xlane.xlu2 %616 }
 0xc95   :  { %v603_v26 = vcvt.f32.s32 %v602_v36  ;;  %v618_v14 = vcvt.f32.s32 %v617_v23  ;;  %v694_v36 = vcvt.f32.s32 %v4420_v62  ;;  %v278_v62 = vand.u32 65535, %v4426_v1 }
 0xc97   :  { %v606_v57 = vadd.s32 %v605_v43, %v603_v26  ;;  %v621_v29 = vadd.s32 %v620_v0, %v618_v14  ;;  %v293_v43 = vand.u32 65535, %v4414_v41  ;;  %v710_v26 = vshll.u32 %v709_v42, 16 }
 0xc99   :  { %v744_v34 = vperm.slane %v606_v57, %v2909_v55  ;;  %v745_v30 = vperm.slane %v621_v29, %v2909_v55  ;;  %v695_v57 = vshll.u32 %v694_v36, 16 }
 0xc9b   :  { %v752_v32 = vsel %vm419_vm8, %v745_v30, %v744_v34  ;;  %v4495_v5 = vld [vmem:[#allocation5] sm:$0xff]  ;;  %v295_v34 = vcvt.s32.f32 %v293_v43 }
 0xc9c   :  { %v632_v51 = vpop.xlane.xlu0 %631  ;;  %2514 = vperm.xlu1 %2625, %v4495_v5   ;;  %v647_v20 = vpop.xlane.xlu2 %646 }
 0xc9d   :  { %v633_v28 = vcvt.f32.s32 %v632_v51  ;;  %v648_v53 = vcvt.f32.s32 %v647_v20  ;;  %v4822_v51 = vld [vmem:[#allocation11_spill] sm:$0xff] }
 0xc9f   :  { %v636_v24 = vadd.s32 %v635_v18, %v633_v28  ;;  %v651_v17 = vadd.s32 %v650_v21, %v648_v53 }
 0xca1   :  { %v746_v63 = vperm.slane %v636_v24, %v2909_v55  ;;  %v747_v7 = vperm.slane %v651_v17, %v2909_v55  ;;  %v280_v24 = vcvt.s32.f32 %v278_v62 }
 0xca3   :  { %v753_v61 = vsel %vm421_vm9, %v746_v63, %v752_v32  ;;  %v4821_v32 = vld [vmem:[#allocation21_spill] sm:$0xff] }
 0xca4   :  { %v754_v9 = vsel %vm423_vm10, %v747_v7, %v753_v61  ;;  %v662_v59 = vpop.xlane.xlu0 %661  ;;  %v677_v50 = vpop.xlane.xlu2 %676  ;;  %vm267_vm3 = vcmp.eq.f32.partialorder %v4822_v51, %v4821_v32  ;;  %v310_v61 = vcvt.s32.f32 %v308_v35 }
 0xca5   :  { %v663_v25 = vcvt.f32.s32 %v662_v59  ;;  %v678_v37 = vcvt.f32.s32 %v677_v50  ;;  %v275_v28 = vsel %vm267_vm3, %v2909_v55, 5  ;;  %v338_v50 = vand.u32 65535, %v4462_v3 }
 0xca6   :  { %v367_v17 = vsel %vm236_vm7, %v275_v28, 2147483647 }
 0xca7   :  { %v666_v11 = vadd.s32 %v665_v12, %v663_v25  ;;  %v681_v23 = vadd.s32 %v680_v22, %v678_v37  ;;  %v369_v63 = vshra.s32 %v367_v17, 16 }
 0xca9   :  { %v748_v47 = vperm.slane %v666_v11, %v2909_v55  ;;  %v749_v27 = vperm.slane %v681_v23, %v2909_v55  ;;  %v353_v23 = vand.u32 65535, %v4453_v54 }
 0xcab   :  { %v755_v19 = vsel %vm425_vm11, %v748_v47, %v754_v9  ;;  %v371_v9 = vcvt.s32.f32 %v369_v63  ;;  %v385_v47 = vcvt.s32.f32 %v383_v16 }
 0xcac   :  { %v707_v48 = vpop.xlane.xlu2 %706  ;;  %v756_v20 = vsel %vm427_vm12, %v749_v27, %v755_v19 }
 0xcad   :  { %v708_v0 = vcvt.f32.s32 %v707_v48 }
 0xcaf   :  { %v711_v45 = vadd.s32 %v710_v26, %v708_v0  ;;  %v355_v0 = vcvt.s32.f32 %v353_v23  ;;  %v368_v26 = vand.u32 65535, %v367_v17 }
 0xcb1   :  { %v751_v21 = vperm.slane %v711_v45, %v2909_v55 }
 0xcb2   :  { %v692_v14 = vpop.xlane.xlu0 %691 }
 0xcb3   :  { %v693_v29 = vcvt.f32.s32 %v692_v14 }
 0xcb4   :  { %v4510_v33 = vpop.xlane.xlu2 %297 }
 0xcb5   :  { %v696_v30 = vadd.s32 %v695_v57, %v693_v29  ;;  %vm299_vm2 = vcmp.eq.f32.partialorder %v4428_v46, %v4510_v33 }
 0xcb6   :  { %v300_v8 = vsel %vm299_vm2, %v295_v34, inf }
 0xcb7   :  { %v750_v41 = vperm.slane %v696_v30, %v2909_v55  ;;  %301 = vmin.xlane.f32.xlu0 %v300_v8 }
 0xcb9   :  { %v757_v18 = vsel %vm429_vm13, %v750_v41, %v756_v20 }
 0xcba   :  { %v758_v53 = vsel %vm431_vm14, %v751_v21, %v757_v18  ;;  %v4523_v46 = vpop.xlane.xlu0 %282  ;;  %v4823_v21 = vmov 0  }
 0xcbb   :  { %760 = vst.msk [vmem:[#allocation4 + $0x10] sm:$0xff] %vm117_vm5, %v758_v53  ;;  %vm284_vm4 = vcmp.eq.f32.partialorder %v4442_v13, %v4523_v46  ;;  %v340_v13 = vcvt.s32.f32 %v338_v50  ;;  %v289_v30 = vcvt.f32.s32 %v4523_v46 }
 0xcbc   :  { %v285_v1 = vsel %vm284_vm4, %v280_v24, inf  ;;  %v328_v42 = vpop.xlane.xlu2 %327 }
 0xcbd   :  { %vm329_vm2 = vcmp.eq.f32.partialorder %v4448_v49, %v328_v42  ;;  %v370_v49 = vcvt.s32.f32 %v368_v26  ;;  %v290_v41 = vshll.u32 %v289_v30, 16  ;;  %v334_v53 = vcvt.f32.s32 %v328_v42 }
 0xcbf   :  { %v335_v63 = vshll.u32 %v334_v53, 16 }
 0xcc2   :  { %v4530_v7 = vpop.xlane.xlu0 %312  ;;  %v2512_v40 = vld [vmem:[#allocation4 + $0x10] sm:$0xff] }
 0xcc3   :  { %vm314_vm15 = vcmp.eq.f32.partialorder %v4459_v52, %v4530_v7  ;;  %v319_v46 = vcvt.f32.s32 %v4530_v7 }
 0xcc4   :  { %v315_v59 = vsel %vm314_vm15, %v310_v61, inf  ;;  %v4550_v36 = vpop.xlane.xlu2 %357  ;;  %vm2531_vm15 = vcmp.gt.s32.totalorder %v4325_v38, 1 }
 0xcc5   :  { %vm359_vm3 = vcmp.eq.f32.partialorder %v4465_v2, %v4550_v36  ;;  %v304_v2 = vcvt.f32.s32 %v4510_v33 }
 0xcc6   :  { %372 = vmin.xlane.f32.xlu1 %v371_v9  ;;  %v360_v43 = vsel %vm359_vm3, %v355_v0, inf }
 0xcc7   :  { %v305_v32 = vshll.u32 %v304_v2, 16 }
 0xcca   :  { %v4535_v12 = vpop.xlane.xlu0 %342 }
 0xccb   :  { %vm344_vm7 = vcmp.eq.f32.partialorder %v4472_v44, %v4535_v12 }
 0xccc   :  { %v345_v25 = vsel %vm344_vm7, %v340_v13, inf  ;;  %vm2329_vm7 = vcmask 64512  }
 0xccd   :  { %2330 = vst.msk [vmem:[#allocation6] sm:$0xff] %vm2329_vm7, %v4823_v21 }
 0xcd2   :  { %v4540_v11 = vpop.xlane.xlu0 %387 }
 0xcd3   :  { %vm389_vm0 = vcmp.eq.f32.partialorder %v4479_v39, %v4540_v11  ;;  %v323_v39 = vand.u32 65535, %v4433_v15  ;;  %v394_v42 = vcvt.f32.s32 %v4540_v11 }
 0xcd4   :  { %v390_v52 = vsel %vm389_vm0, %v385_v47, inf  ;;  %vm2561_vm0 = vcmp.gt.s32.totalorder %v4325_v38, 0 }
 0xcd5   :  { %391 = vmin.xlane.f32.xlu1 %v390_v52  ;;  %v395_v23 = vshll.u32 %v394_v42, 16 }
 0xcee   :  { %2387 = vperm.xlu1 %2625, %v3859_v60   ;;  %v325_v60 = vcvt.s32.f32 %v323_v39 }
 0xcf6   :  { %2417 = vperm.xlu1 %2625, %v4016_v31   ;;  %v330_v31 = vsel %vm329_vm2, %v325_v60, inf }
 0xd0e   :  { %v2515_v3 = vpop.permute.xlu1 %2514 }
 0xd0f   :  { %vm2516_vm1 = vcmp.eq.s32.totalorder %v2909_v55, %v2515_v3 }
 0xd10   :  { %v2517_v44 = vsel %vm2516_vm1, %v2512_v40, 0  ;;  %vm2564_vm1 = vcmp.eq.s32.totalorder %v2909_v55, 0 }
 0xd11   :  { %v2518_v19 = vsel %vm117_vm5, %v2517_v44, 0 }
 0xd12   :  { %v2519_v6 = vand.u32 65535, %v2518_v19  ;;  %v2520_v37 = vshrl.u32 %v2518_v19, 16 }
 0xd14   :  { %v2522_v48 = vcvt.s32.f32 %v2520_v37  ;;  %v2521_v22 = vcvt.s32.f32 %v2519_v6 }
 0xd16   :  { %2525 = vadd.xlane.f32.xlu2 %v2522_v48  ;;  %2523 = vadd.xlane.f32.xlu0 %v2521_v22 }
 0xd1e   :  { %286 = vmin.xlane.f32.xlu2 %v285_v1  ;;  %331 = vmin.xlane.f32.xlu0 %v330_v31 }
 0xd26   :  { %316 = vmin.xlane.f32.xlu2 %v315_v59  ;;  %361 = vmin.xlane.f32.xlu0 %v360_v43 }
 0xd2a   :  { %v302_v57 = vpop.xlane.xlu0 %301 }
 0xd2b   :  { %v303_v8 = vcvt.f32.s32 %v302_v57 }
 0xd2d   :  { %v306_v20 = vadd.s32 %v305_v32, %v303_v8 }
 0xd2e   :  { %346 = vmin.xlane.f32.xlu2 %v345_v25  ;;  %v349_v25 = vcvt.f32.s32 %v4535_v12  ;;  %v364_v12 = vcvt.f32.s32 %v4550_v36 }
 0xd2f   :  { %v437_v24 = vperm.slane %v306_v20, %v2909_v55 }
 0xd30   :  { %v350_v40 = vshll.u32 %v349_v25, 16  ;;  %v365_v60 = vshll.u32 %v364_v12, 16 }
 0xd39   :  { %v4555_v15 = vpop.xlane.xlu1 %372 }
 0xd3a   :  { %vm374_vm4 = vcmp.eq.f32.partialorder %v371_v9, %v4555_v15  ;;  %v320_v9 = vshll.u32 %v319_v46, 16 }
 0xd3b   :  { %v375_v14 = vsel %vm374_vm4, %v370_v49, inf }
 0xd3c   :  { %376 = vmin.xlane.f32.xlu2 %v375_v14 }
 0xd48   :  { %v392_v22 = vpop.xlane.xlu1 %391 }
 0xd49   :  { %v393_v31 = vcvt.f32.s32 %v392_v22 }
 0xd4b   :  { %v396_v14 = vadd.s32 %v395_v23, %v393_v31 }
 0xd4d   :  { %v443_v11 = vperm.slane %v396_v14, %v2909_v55 }
 0xd54   :  { %2357 = vperm.xlu2 %2624, %v3729_v10  }
 0xd89   :  { %v2524_v54 = vpop.xlane.xlu0 %2523  ;;  %v2526_v29 = vpop.xlane.xlu2 %2525 }
 0xd8a   :  { %v2528_v27 = vcvt.f32.s32 %v2526_v29  ;;  %v2527_v45 = vcvt.f32.s32 %v2524_v54 }
 0xd8c   :  { %v2529_v34 = vshll.u32 %v2528_v27, 16 }
 0xd8e   :  { %v2530_v62 = vadd.s32 %v2529_v34, %v2527_v45  ;;  %v2388_v45 = vpop.permute.xlu1 %2387 }
 0xd90   :  { %v4563_v51 = vsel %vm2531_vm15, %v2530_v62, %v4495_v5 }
 0xd91   :  { %2533 = vst.msk [vmem:[#allocation5] sm:$0xff] %vm2327_vm6, %v4563_v51  ;;  %v287_v10 = vpop.xlane.xlu2 %286  ;;  %v332_v18 = vpop.xlane.xlu0 %331 }
 0xd92   :  { %v288_v33 = vcvt.f32.s32 %v287_v10  ;;  %v333_v1 = vcvt.f32.s32 %v332_v18 }
 0xd94   :  { %v291_v28 = vadd.s32 %v290_v41, %v288_v33  ;;  %v336_v50 = vadd.s32 %v335_v63, %v333_v1 }
 0xd96   :  { %v436_v5 = vperm.slane %v291_v28, %v2909_v55  ;;  %v439_v16 = vperm.slane %v336_v50, %v2909_v55  ;;  %v2418_v8 = vpop.permute.xlu1 %2417 }
 0xd98   :  { %v444_v17 = vsel %vm419_vm8, %v437_v24, %v436_v5  ;;  %v4573_v35 = vld [vmem:[#allocation5] sm:$0xff]  ;;  %vm2354_vm8 = vcmp.eq.s32.totalorder %v2909_v55, 7 }
 0xd99   :  { %2544 = vperm.xlu0 %2626, %v4573_v35   ;;  %v317_v61 = vpop.xlane.xlu2 %316  ;;  %v362_v37 = vpop.xlane.xlu0 %361 }
 0xd9a   :  { %v318_v59 = vcvt.f32.s32 %v317_v61  ;;  %v363_v39 = vcvt.f32.s32 %v362_v37 }
 0xd9c   :  { %v321_v13 = vadd.s32 %v320_v9, %v318_v59  ;;  %v366_v0 = vadd.s32 %v365_v60, %v363_v39 }
 0xd9e   :  { %v438_v7 = vperm.slane %v321_v13, %v2909_v55  ;;  %v441_v36 = vperm.slane %v366_v0, %v2909_v55 }
 0xda0   :  { %v445_v47 = vsel %vm421_vm9, %v438_v7, %v444_v17  ;;  %vm2384_vm9 = vcmp.eq.s32.totalorder %v2909_v55, 6 }
 0xda1   :  { %2447 = vperm.xlu0 %2626, %v4171_v58   ;;  %v446_v52 = vsel %vm423_vm10, %v439_v16, %v445_v47  ;;  %v347_v3 = vpop.xlane.xlu2 %346  ;;  %v379_v58 = vcvt.f32.s32 %v4555_v15  ;;  %v2355_v15 = vld [vmem:[#allocation6] sm:$0xff]  ;;  %vm2414_vm10 = vcmp.eq.s32.totalorder %v2909_v55, 5 }
 0xda2   :  { %v348_v44 = vcvt.f32.s32 %v347_v3 }
 0xda3   :  { %v380_v26 = vshll.u32 %v379_v58, 16 }
 0xda4   :  { %v351_v19 = vadd.s32 %v350_v40, %v348_v44 }
 0xda6   :  { %v440_v6 = vperm.slane %v351_v19, %v2909_v55 }
 0xda8   :  { %v447_v48 = vsel %vm425_vm11, %v440_v6, %v446_v52 }
 0xda9   :  { %2477 = vperm.xlu0 %2626, %v4331_v56   ;;  %v448_v54 = vsel %vm427_vm12, %v441_v36, %v447_v48  ;;  %vm2444_vm12 = vcmp.eq.s32.totalorder %v2909_v55, 4 }
 0xdaf   :  { %v377_v43 = vpop.xlane.xlu2 %376 }
 0xdb0   :  { %v378_v49 = vcvt.f32.s32 %v377_v43 }
 0xdb1   :  { %2507 = vperm.xlu0 %2626, %v4486_v4  }
 0xdb2   :  { %v381_v57 = vadd.s32 %v380_v26, %v378_v49 }
 0xdb4   :  { %v442_v56 = vperm.slane %v381_v57, %v2909_v55 }
 0xdb6   :  { %v449_v29 = vsel %vm429_vm13, %v442_v56, %v448_v54  ;;  %vm2474_vm13 = vcmp.eq.s32.totalorder %v2909_v55, 3 }
 0xdb7   :  { %v450_v27 = vsel %vm431_vm14, %v443_v11, %v449_v29  ;;  %v2358_v2 = vpop.permute.xlu2 %2357  ;;  %vm2534_vm14 = vcmp.eq.s32.totalorder %v2909_v55, 1 }
 0xdb8   :  { %452 = vst.msk [vmem:[#allocation4 + $0x8] sm:$0xff] %vm117_vm5, %v450_v27  ;;  %v2359_v4 = vsel %vm2354_vm8, %v2358_v2, %v2355_v15 }
 0xdb9   :  { %2360 = vst.msk [vmem:[#allocation6] sm:$0xff] %vm2329_vm7, %v2359_v4  ;;  %2537 = vperm.xlu0 %2626, %v4563_v51  }
 0xdbf   :  { %v2542_v41 = vld [vmem:[#allocation4 + $0x8] sm:$0xff] }
 0xdc0   :  { %v2385_v34 = vld [vmem:[#allocation6] sm:$0xff] }
 0xdc1   :  { %v2389_v30 = vsel %vm2384_vm9, %v2388_v45, %v2385_v34 }
 0xdc2   :  { %2390 = vst.msk [vmem:[#allocation6] sm:$0xff] %vm2329_vm7, %v2389_v30 }
 0xdc9   :  { %v2415_v62 = vld [vmem:[#allocation6] sm:$0xff] }
 0xdca   :  { %v2419_v32 = vsel %vm2414_vm10, %v2418_v8, %v2415_v62 }
 0xdcb   :  { %2420 = vst.msk [vmem:[#allocation6] sm:$0xff] %vm2329_vm7, %v2419_v32 }
 0xdd2   :  { %v2445_v46 = vld [vmem:[#allocation6] sm:$0xff] }
 0xe0b   :  { %v2545_v10 = vpop.permute.xlu0 %2544 }
 0xe0c   :  { %vm2546_vm11 = vcmp.eq.s32.totalorder %v2909_v55, %v2545_v10 }
 0xe0d   :  { %v2547_v20 = vsel %vm2546_vm11, %v2542_v41, 0 }
 0xe0e   :  { %v2548_v51 = vsel %vm117_vm5, %v2547_v20, 0  ;;  %vm2504_vm5 = vcmp.eq.s32.totalorder %v2909_v55, 2 }
 0xe0f   :  { %v2549_v33 = vand.u32 65535, %v2548_v51  ;;  %v2550_v21 = vshrl.u32 %v2548_v51, 16 }
 0xe11   :  { %v2552_v18 = vcvt.s32.f32 %v2550_v21  ;;  %v2551_v28 = vcvt.s32.f32 %v2549_v33 }
 0xe13   :  { %v2448_v53 = vpop.permute.xlu0 %2447  ;;  %2555 = vadd.xlane.f32.xlu2 %v2552_v18  ;;  %2553 = vadd.xlane.f32.xlu1 %v2551_v28 }
 0xe14   :  { %v2449_v24 = vsel %vm2444_vm12, %v2448_v53, %v2445_v46 }
 0xe15   :  { %2450 = vst.msk [vmem:[#allocation6] sm:$0xff] %vm2329_vm7, %v2449_v24 }
 0xe1b   :  { %v2478_v5 = vpop.permute.xlu0 %2477 }
 0xe1c   :  { %v2475_v1 = vld [vmem:[#allocation6] sm:$0xff] }
 0xe1d   :  { %v2479_v17 = vsel %vm2474_vm13, %v2478_v5, %v2475_v1 }
 0xe1e   :  { %2480 = vst.msk [vmem:[#allocation6] sm:$0xff] %vm2329_vm7, %v2479_v17 }
 0xe23   :  { %v2508_v63 = vpop.permute.xlu0 %2507 }
 0xe25   :  { %v2505_v61 = vld [vmem:[#allocation6] sm:$0xff] }
 0xe26   :  { %v2509_v9 = vsel %vm2504_vm5, %v2508_v63, %v2505_v61 }
 0xe27   :  { %2510 = vst.msk [vmem:[#allocation6] sm:$0xff] %vm2329_vm7, %v2509_v9 }
 0xe2b   :  { %v2538_v59 = vpop.permute.xlu0 %2537 }
 0xe2e   :  { %v2535_v50 = vld [vmem:[#allocation6] sm:$0xff] }
 0xe2f   :  { %v2539_v13 = vsel %vm2534_vm14, %v2538_v59, %v2535_v50 }
 0xe30   :  { %2540 = vst.msk [vmem:[#allocation6] sm:$0xff] %vm2329_vm7, %v2539_v13 }
 0xe37   :  { %v2565_v44 = vld [vmem:[#allocation6] sm:$0xff] }
 0xe86   :  { %v2554_v25 = vpop.xlane.xlu1 %2553  ;;  %v2556_v7 = vpop.xlane.xlu2 %2555 }
 0xe87   :  { %v2558_v16 = vcvt.f32.s32 %v2556_v7  ;;  %v2557_v47 = vcvt.f32.s32 %v2554_v25 }
 0xe89   :  { %v2559_v52 = vshll.u32 %v2558_v16, 16 }
 0xe8b   :  { %v2560_v3 = vadd.s32 %v2559_v52, %v2557_v47 }
 0xe8d   :  { %v2562_v40 = vsel %vm2561_vm0, %v2560_v3, %v4573_v35 }
 0xe8e   :  { %2567 = vperm.xlu2 %2624, %v2562_v40   ;;  %2563 = vst.msk [vmem:[#allocation5] sm:$0xff] %vm2327_vm6, %v2562_v40 }
 0xee8   :  { %v2568_v19 = vpop.permute.xlu2 %2567 }
 0xee9   :  { %v2569_v6 = vsel %vm2564_vm1, %v2568_v19, %v2565_v44 }
 0xeea   :  { %2570 = vst.msk [vmem:[#allocation6] sm:$0xff] %vm2329_vm7, %v2569_v6 }
 0xef1   :  { %v2571_v37 = vld [vmem:[#allocation6] sm:$0xff] }
 0xef2   :  { %2572 = vst.msk [vmem:[%s4629_s7] sm:$0xff] %vm2329_vm7, %v2571_v37 }

</bundles_post_ra>
